<compile_context>
chip_gen: v7x
topology: tpu7x:2x2x1
jax: 0.10.0
libtpu: 0.0.40
codegen_flags: <defaults>
</compile_context>

<pallas_src>
import jax
import jax.numpy as jnp
from jax.experimental import pallas as pl
from jax.experimental.pallas import tpu as pltpu

BN_EPS = 1e-3
MXU_DTYPE = jnp.bfloat16  # MXU operand dtype; accumulation is always f32.


# ----------------------------------------------------------------------------
# Fused inception-block kernel:
#   merged 1x1 conv (3 branches) -> per-branch 3x3 conv chains, all in VMEM.
# ----------------------------------------------------------------------------
def _inception_kernel(x_ref, ml_ref, mr_ref, w1_ref, s1_ref, b1_ref,
                      w3_ref, s3_ref, b3_ref, o_ref):
    # x_ref : (C_in, NL)      folded activations, NL = batch * length (lanes)
    # ml_ref: (1, NL)         0/1 mask: 0 where the left neighbour is out of
    #                         the batch segment (or slab), else 1
    # mr_ref: (1, NL)         same for the right neighbour
    # w1_ref: (300, C_in)     three 1x1 convs stacked along C_out   (bf16)
    # s1_ref/b1_ref: (300, 1) folded BN scale / bias for the 1x1 convs (f32)
    # w3_ref: (4, 100, 300)   four 3x3 convs in im2col layout (C_out, K*C_in)
    # s3_ref/b3_ref: (4, 100, 1)
    # o_ref : (300, NL)       concat([branch1, branch2, branch3], channel)
    nl = x_ref.shape[1]

    # ---- merged 1x1 conv + folded BN + ReLU (one matmul for all 3 branches)
    h = jnp.dot(w1_ref[...], x_ref[...].astype(w1_ref.dtype),
                preferred_element_type=jnp.float32)
    h = jnp.maximum(h * s1_ref[...] + b1_ref[...], 0.0)
    b1 = h[0:100, :]
    b2 = h[100:200, :]
    b3 = h[200:300, :]

    mask_l = ml_ref[...]
    mask_r = mr_ref[...]

    def conv3x3(t, j):
        # im2col: stack the three shifted taps along the contraction axis and
        # run ONE 300-deep MXU matmul (instead of 3 tap-offset matmuls).
        zero = jnp.zeros((t.shape[0], 1), jnp.float32)
        left = jnp.concatenate([zero, t[:, :nl - 1]], axis=1) * mask_l
        right = jnp.concatenate([t[:, 1:], zero], axis=1) * mask_r
        xcol = jnp.concatenate([left, t, right], axis=0)          # (300, NL)
        y = jnp.dot(w3_ref[j], xcol.astype(w3_ref.dtype),
                    preferred_element_type=jnp.float32)
        return jnp.maximum(y * s3_ref[j] + b3_ref[j], 0.0)

    b2 = conv3x3(b2, 0)
    b3 = conv3x3(b3, 1)
    b3 = conv3x3(b3, 2)
    b3 = conv3x3(b3, 3)

    o_ref[...] = jnp.concatenate([b1, b2, b3], axis=0)


def inception_forward(p, xf, mask_l, mask_r):
    """xf: (C_in, N*L) f32 -> (300, N*L) f32, one fused pallas_call."""
    c_in, nl = xf.shape
    return pl.pallas_call(
        _inception_kernel,
        out_shape=jax.ShapeDtypeStruct((300, nl), jnp.float32),
        grid=(1,),
        in_specs=[
            pl.BlockSpec((c_in, nl), lambda i: (0, 0)),
            pl.BlockSpec((1, nl), lambda i: (0, 0)),
            pl.BlockSpec((1, nl), lambda i: (0, 0)),
            pl.BlockSpec((300, c_in), lambda i: (0, 0)),
            pl.BlockSpec((300, 1), lambda i: (0, 0)),
            pl.BlockSpec((300, 1), lambda i: (0, 0)),
            pl.BlockSpec((4, 100, 300), lambda i: (0, 0, 0)),
            pl.BlockSpec((4, 100, 1), lambda i: (0, 0, 0)),
            pl.BlockSpec((4, 100, 1), lambda i: (0, 0, 0)),
        ],
        out_specs=pl.BlockSpec((300, nl), lambda i: (0, 0)),
        compiler_params=pltpu.CompilerParams(
            dimension_semantics=("arbitrary",)),
    )(xf, mask_l, mask_r, p["w1"], p["s1"], p["b1"], p["w3"], p["s3"], p["b3"])


# ----------------------------------------------------------------------------
# Deterministic parameter construction (mirrors the PyTorch module shapes),
# with BN folded and weights pre-packed into MXU-friendly layouts.
# ----------------------------------------------------------------------------
def init_basic_conv(key, c_in, c_out, k):
    k1, k2, k3 = jax.random.split(key, 3)
    fan_in = c_in * k
    w = jax.random.normal(k1, (c_out, c_in, k), jnp.float32) / jnp.sqrt(
        jnp.float32(fan_in))
    gamma = 1.0 + 0.1 * jax.random.normal(k2, (c_out,), jnp.float32)
    beta = 0.1 * jax.random.normal(k3, (c_out,), jnp.float32)
    running_mean = jnp.zeros((c_out,), jnp.float32)   # PyTorch BN defaults
    running_var = jnp.ones((c_out,), jnp.float32)
    scale = gamma / jnp.sqrt(running_var + BN_EPS)
    bias = beta - running_mean * scale
    return w, scale, bias


def init_inception(key, c_in):
    keys = jax.random.split(key, 7)
    # Three 1x1 convs merged along C_out: rows 0:100 -> branch1,
    # 100:200 -> branch2, 200:300 -> branch3.
    ws, ss, bs = [], [], []
    for i in range(3):
        w, s, b = init_basic_conv(keys[i], c_in, 100, 1)
        ws.append(w[:, :, 0])
        ss.append(s)
        bs.append(b)
    w1 = jnp.concatenate(ws, axis=0)                      # (300, c_in)
    s1 = jnp.concatenate(ss).reshape(300, 1)
    b1 = jnp.concatenate(bs).reshape(300, 1)
    # Four 3x3 convs packed in im2col layout (C_out, K*C_in),
    # column index = dk * 100 + c_in.
    w3s, s3s, b3s = [], [], []
    for i in range(4):
        w, s, b = init_basic_conv(keys[3 + i], 100, 100, 3)
        w3s.append(jnp.transpose(w, (0, 2, 1)).reshape(100, 300))
        s3s.append(s.reshape(100, 1))
        b3s.append(b.reshape(100, 1))
    return dict(
        w1=w1.astype(MXU_DTYPE), s1=s1, b1=b1,
        w3=jnp.stack(w3s).astype(MXU_DTYPE),
        s3=jnp.stack(s3s), b3=jnp.stack(b3s),
    )


def init_deep3i(key, in_channels):
    keys = jax.random.split(key, 7)
    input_layers = [init_inception(keys[i], in_channels) for i in range(3)]
    intermediate_layers = [init_inception(keys[3 + i], 300) for i in range(4)]
    return dict(input_layers=input_layers,
                intermediate_layers=intermediate_layers)


# ----------------------------------------------------------------------------
# Deep3I forward (inference semantics).
# ----------------------------------------------------------------------------
def deep3i_forward(params, x):
    N, c_in, L = x.shape                       # all static under jit
    nl = N * L
    # Fold batch into the lane axis: (N, C, L) -> (C, N*L).
    xf = jnp.transpose(x, (1, 0, 2)).reshape(c_in, nl).astype(jnp.float32)
    # 0/1 masks for the 3x3 'same'-padding halo at batch-segment boundaries.
    pos = jnp.arange(nl, dtype=jnp.int32) % L
    mask_l = (pos != 0).astype(jnp.float32).reshape(1, nl)
    mask_r = (pos != L - 1).astype(jnp.float32).reshape(1, nl)

    def inc(p, h):
        return inception_forward(p, h, mask_l, mask_r)

    branch1 = inc(params["input_layers"][0], xf)
    branch2 = inc(params["intermediate_layers"][0],
                  inc(params["input_layers"][1], xf))
    branch3 = inc(params["input_layers"][2], xf)
    for i in range(1, 4):
        branch3 = inc(params["intermediate_layers"][i], branch3)

    out = jnp.concatenate([branch1, branch2, branch3, xf], axis=0)  # (900+C, NL)
    out = out.reshape(-1, N, L).transpose(1, 0, 2)                  # (N, 900+C, L)
    # Dropout: identity in inference mode.
    return out


# ----------------------------------------------------------------------------
if __name__ == "__main__":
    key = jax.random.PRNGKey(0)
    k_params, k_x = jax.random.split(key)

    N, C_IN, L = 2, 4, 16
    params = init_deep3i(k_params, C_IN)
    x = jax.random.normal(k_x, (N, C_IN, L), jnp.float32)

    fwd = jax.jit(deep3i_forward)
    out = jax.block_until_ready(fwd(params, x))

    assert out.shape == (N, 900 + C_IN, L), out.shape
    assert out.dtype == jnp.float32
    assert bool(jnp.all(jnp.isfinite(out)))
    print("KERNEL_OK")
</pallas_src>

<mosaic_0001>
module attributes {stable_mosaic.version = 11 : i64} {
  func.func @_inception_kernel(%arg0: i32, %arg1: memref<4x32xf32, #tpu.memory_space<vmem>>, %arg2: memref<1x32xf32, #tpu.memory_space<vmem>>, %arg3: memref<1x32xf32, #tpu.memory_space<vmem>>, %arg4: memref<300x4xbf16, #tpu.memory_space<vmem>>, %arg5: memref<300x1xf32, #tpu.memory_space<vmem>>, %arg6: memref<300x1xf32, #tpu.memory_space<vmem>>, %arg7: memref<4x100x300xbf16, #tpu.memory_space<vmem>>, %arg8: memref<4x100x1xf32, #tpu.memory_space<vmem>>, %arg9: memref<4x100x1xf32, #tpu.memory_space<vmem>>, %arg10: memref<300x32xf32, #tpu.memory_space<vmem>>) attributes {dimension_semantics = [#tpu.dimension_semantics<arbitrary>], iteration_bounds = array<i64: 1>, scalar_prefetch = 0 : i64, scratch_operands = 0 : i64, tpu.core_type = #tpu.core_type<tc>, window_params = [{pipeline_mode = #tpu.pipeline_mode<synchronous>, transform_indices = @transform_0, window_bounds = array<i64: 4, 32>}, {pipeline_mode = #tpu.pipeline_mode<synchronous>, transform_indices = @transform_1, window_bounds = array<i64: 1, 32>}, {pipeline_mode = #tpu.pipeline_mode<synchronous>, transform_indices = @transform_2, window_bounds = array<i64: 1, 32>}, {pipeline_mode = #tpu.pipeline_mode<synchronous>, transform_indices = @transform_3, window_bounds = array<i64: 300, 4>}, {pipeline_mode = #tpu.pipeline_mode<synchronous>, transform_indices = @transform_4, window_bounds = array<i64: 300, 1>}, {pipeline_mode = #tpu.pipeline_mode<synchronous>, transform_indices = @transform_5, window_bounds = array<i64: 300, 1>}, {pipeline_mode = #tpu.pipeline_mode<synchronous>, transform_indices = @transform_6, window_bounds = array<i64: 4, 100, 300>}, {pipeline_mode = #tpu.pipeline_mode<synchronous>, transform_indices = @transform_7, window_bounds = array<i64: 4, 100, 1>}, {pipeline_mode = #tpu.pipeline_mode<synchronous>, transform_indices = @transform_8, window_bounds = array<i64: 4, 100, 1>}, {pipeline_mode = #tpu.pipeline_mode<synchronous>, transform_indices = @transform_9, window_bounds = array<i64: 300, 32>}]} {
    %c0 = arith.constant 0 : index
    %c0_0 = arith.constant 0 : index
    %0 = vector.load %arg4[%c0, %c0_0] : memref<300x4xbf16, #tpu.memory_space<vmem>>, vector<300x4xbf16>
    %c0_1 = arith.constant 0 : index
    %c0_2 = arith.constant 0 : index
    %1 = vector.load %arg1[%c0_1, %c0_2] : memref<4x32xf32, #tpu.memory_space<vmem>>, vector<4x32xf32>
    %2 = arith.truncf %1 : vector<4x32xf32> to vector<4x32xbf16>
    %cst = arith.constant dense<0.000000e+00> : vector<300x32xf32>
    %3 = tpu.matmul %0, %2, %cst {dimension_numbers = #tpu.dot_dimension_numbers<[1], [0], [0], [1], [0, 0, 1, 1], [], []>} : vector<300x4xbf16>, vector<4x32xbf16>, vector<300x32xf32> -> vector<300x32xf32>
    %c0_3 = arith.constant 0 : index
    %c0_4 = arith.constant 0 : index
    %4 = vector.load %arg5[%c0_3, %c0_4] : memref<300x1xf32, #tpu.memory_space<vmem>>, vector<300x1xf32>
    %5 = vector.broadcast %4 : vector<300x1xf32> to vector<300x32xf32>
    %6 = arith.mulf %3, %5 : vector<300x32xf32>
    %c0_5 = arith.constant 0 : index
    %c0_6 = arith.constant 0 : index
    %7 = vector.load %arg6[%c0_5, %c0_6] : memref<300x1xf32, #tpu.memory_space<vmem>>, vector<300x1xf32>
    %8 = vector.broadcast %7 : vector<300x1xf32> to vector<300x32xf32>
    %9 = arith.addf %6, %8 : vector<300x32xf32>
    %cst_7 = arith.constant 0.000000e+00 : f32
    %10 = vector.broadcast %cst_7 : f32 to vector<300x32xf32>
    %11 = arith.maximumf %9, %10 : vector<300x32xf32>
    %12 = vector.extract_strided_slice %11 {offsets = [0, 0], sizes = [100, 32], strides = [1, 1]} : vector<300x32xf32> to vector<100x32xf32>
    %13 = vector.extract_strided_slice %11 {offsets = [100, 0], sizes = [100, 32], strides = [1, 1]} : vector<300x32xf32> to vector<100x32xf32>
    %14 = vector.extract_strided_slice %11 {offsets = [200, 0], sizes = [100, 32], strides = [1, 1]} : vector<300x32xf32> to vector<100x32xf32>
    %c0_8 = arith.constant 0 : index
    %c0_9 = arith.constant 0 : index
    %15 = vector.load %arg2[%c0_8, %c0_9] : memref<1x32xf32, #tpu.memory_space<vmem>>, vector<1x32xf32>
    %c0_10 = arith.constant 0 : index
    %c0_11 = arith.constant 0 : index
    %16 = vector.load %arg3[%c0_10, %c0_11] : memref<1x32xf32, #tpu.memory_space<vmem>>, vector<1x32xf32>
    %cst_12 = arith.constant 0.000000e+00 : f32
    %17 = vector.broadcast %cst_12 : f32 to vector<100x1xf32>
    %18 = vector.extract_strided_slice %13 {offsets = [0, 0], sizes = [100, 31], strides = [1, 1]} : vector<100x32xf32> to vector<100x31xf32>
    %19 = tpu.concatenate %17, %18 in 1 : vector<100x1xf32>, vector<100x31xf32> -> vector<100x32xf32>
    %20 = vector.broadcast %15 : vector<1x32xf32> to vector<100x32xf32>
    %21 = arith.mulf %19, %20 : vector<100x32xf32>
    %22 = vector.extract_strided_slice %13 {offsets = [0, 1], sizes = [100, 31], strides = [1, 1]} : vector<100x32xf32> to vector<100x31xf32>
    %23 = tpu.concatenate %22, %17 in 1 : vector<100x31xf32>, vector<100x1xf32> -> vector<100x32xf32>
    %24 = vector.broadcast %16 : vector<1x32xf32> to vector<100x32xf32>
    %25 = arith.mulf %23, %24 : vector<100x32xf32>
    %26 = tpu.concatenate %21, %13, %25 in 0 : vector<100x32xf32>, vector<100x32xf32>, vector<100x32xf32> -> vector<300x32xf32>
    %c0_13 = arith.constant 0 : index
    %c0_14 = arith.constant 0 : index
    %c0_15 = arith.constant 0 : index
    %27 = vector.load %arg7[%c0_13, %c0_14, %c0_15] : memref<4x100x300xbf16, #tpu.memory_space<vmem>>, vector<1x100x300xbf16>
    %28 = vector.shape_cast %27 : vector<1x100x300xbf16> to vector<100x300xbf16>
    %29 = arith.truncf %26 : vector<300x32xf32> to vector<300x32xbf16>
    %cst_16 = arith.constant dense<0.000000e+00> : vector<100x32xf32>
    %30 = tpu.matmul %28, %29, %cst_16 {dimension_numbers = #tpu.dot_dimension_numbers<[1], [0], [0], [1], [0, 0, 1, 1], [], []>} : vector<100x300xbf16>, vector<300x32xbf16>, vector<100x32xf32> -> vector<100x32xf32>
    %c0_17 = arith.constant 0 : index
    %c0_18 = arith.constant 0 : index
    %c0_19 = arith.constant 0 : index
    %31 = vector.load %arg8[%c0_17, %c0_18, %c0_19] : memref<4x100x1xf32, #tpu.memory_space<vmem>>, vector<1x100x1xf32>
    %32 = vector.shape_cast %31 : vector<1x100x1xf32> to vector<100x1xf32>
    %33 = vector.broadcast %32 : vector<100x1xf32> to vector<100x32xf32>
    %34 = arith.mulf %30, %33 : vector<100x32xf32>
    %c0_20 = arith.constant 0 : index
    %c0_21 = arith.constant 0 : index
    %c0_22 = arith.constant 0 : index
    %35 = vector.load %arg9[%c0_20, %c0_21, %c0_22] : memref<4x100x1xf32, #tpu.memory_space<vmem>>, vector<1x100x1xf32>
    %36 = vector.shape_cast %35 : vector<1x100x1xf32> to vector<100x1xf32>
    %37 = vector.broadcast %36 : vector<100x1xf32> to vector<100x32xf32>
    %38 = arith.addf %34, %37 : vector<100x32xf32>
    %cst_23 = arith.constant 0.000000e+00 : f32
    %39 = vector.broadcast %cst_23 : f32 to vector<100x32xf32>
    %40 = arith.maximumf %38, %39 : vector<100x32xf32>
    %cst_24 = arith.constant 0.000000e+00 : f32
    %41 = vector.broadcast %cst_24 : f32 to vector<100x1xf32>
    %42 = vector.extract_strided_slice %14 {offsets = [0, 0], sizes = [100, 31], strides = [1, 1]} : vector<100x32xf32> to vector<100x31xf32>
    %43 = tpu.concatenate %41, %42 in 1 : vector<100x1xf32>, vector<100x31xf32> -> vector<100x32xf32>
    %44 = vector.broadcast %15 : vector<1x32xf32> to vector<100x32xf32>
    %45 = arith.mulf %43, %44 : vector<100x32xf32>
    %46 = vector.extract_strided_slice %14 {offsets = [0, 1], sizes = [100, 31], strides = [1, 1]} : vector<100x32xf32> to vector<100x31xf32>
    %47 = tpu.concatenate %46, %41 in 1 : vector<100x31xf32>, vector<100x1xf32> -> vector<100x32xf32>
    %48 = vector.broadcast %16 : vector<1x32xf32> to vector<100x32xf32>
    %49 = arith.mulf %47, %48 : vector<100x32xf32>
    %50 = tpu.concatenate %45, %14, %49 in 0 : vector<100x32xf32>, vector<100x32xf32>, vector<100x32xf32> -> vector<300x32xf32>
    %c1 = arith.constant 1 : index
    %c0_25 = arith.constant 0 : index
    %c0_26 = arith.constant 0 : index
    %51 = vector.load %arg7[%c1, %c0_25, %c0_26] : memref<4x100x300xbf16, #tpu.memory_space<vmem>>, vector<1x100x300xbf16>
    %52 = vector.shape_cast %51 : vector<1x100x300xbf16> to vector<100x300xbf16>
    %53 = arith.truncf %50 : vector<300x32xf32> to vector<300x32xbf16>
    %cst_27 = arith.constant dense<0.000000e+00> : vector<100x32xf32>
    %54 = tpu.matmul %52, %53, %cst_27 {dimension_numbers = #tpu.dot_dimension_numbers<[1], [0], [0], [1], [0, 0, 1, 1], [], []>} : vector<100x300xbf16>, vector<300x32xbf16>, vector<100x32xf32> -> vector<100x32xf32>
    %c1_28 = arith.constant 1 : index
    %c0_29 = arith.constant 0 : index
    %c0_30 = arith.constant 0 : index
    %55 = vector.load %arg8[%c1_28, %c0_29, %c0_30] : memref<4x100x1xf32, #tpu.memory_space<vmem>>, vector<1x100x1xf32>
    %56 = vector.shape_cast %55 : vector<1x100x1xf32> to vector<100x1xf32>
    %57 = vector.broadcast %56 : vector<100x1xf32> to vector<100x32xf32>
    %58 = arith.mulf %54, %57 : vector<100x32xf32>
    %c1_31 = arith.constant 1 : index
    %c0_32 = arith.constant 0 : index
    %c0_33 = arith.constant 0 : index
    %59 = vector.load %arg9[%c1_31, %c0_32, %c0_33] : memref<4x100x1xf32, #tpu.memory_space<vmem>>, vector<1x100x1xf32>
    %60 = vector.shape_cast %59 : vector<1x100x1xf32> to vector<100x1xf32>
    %61 = vector.broadcast %60 : vector<100x1xf32> to vector<100x32xf32>
    %62 = arith.addf %58, %61 : vector<100x32xf32>
    %cst_34 = arith.constant 0.000000e+00 : f32
    %63 = vector.broadcast %cst_34 : f32 to vector<100x32xf32>
    %64 = arith.maximumf %62, %63 : vector<100x32xf32>
    %cst_35 = arith.constant 0.000000e+00 : f32
    %65 = vector.broadcast %cst_35 : f32 to vector<100x1xf32>
    %66 = vector.extract_strided_slice %64 {offsets = [0, 0], sizes = [100, 31], strides = [1, 1]} : vector<100x32xf32> to vector<100x31xf32>
    %67 = tpu.concatenate %65, %66 in 1 : vector<100x1xf32>, vector<100x31xf32> -> vector<100x32xf32>
    %68 = vector.broadcast %15 : vector<1x32xf32> to vector<100x32xf32>
    %69 = arith.mulf %67, %68 : vector<100x32xf32>
    %70 = vector.extract_strided_slice %64 {offsets = [0, 1], sizes = [100, 31], strides = [1, 1]} : vector<100x32xf32> to vector<100x31xf32>
    %71 = tpu.concatenate %70, %65 in 1 : vector<100x31xf32>, vector<100x1xf32> -> vector<100x32xf32>
    %72 = vector.broadcast %16 : vector<1x32xf32> to vector<100x32xf32>
    %73 = arith.mulf %71, %72 : vector<100x32xf32>
    %74 = tpu.concatenate %69, %64, %73 in 0 : vector<100x32xf32>, vector<100x32xf32>, vector<100x32xf32> -> vector<300x32xf32>
    %c2 = arith.constant 2 : index
    %c0_36 = arith.constant 0 : index
    %c0_37 = arith.constant 0 : index
    %75 = vector.load %arg7[%c2, %c0_36, %c0_37] : memref<4x100x300xbf16, #tpu.memory_space<vmem>>, vector<1x100x300xbf16>
    %76 = vector.shape_cast %75 : vector<1x100x300xbf16> to vector<100x300xbf16>
    %77 = arith.truncf %74 : vector<300x32xf32> to vector<300x32xbf16>
    %cst_38 = arith.constant dense<0.000000e+00> : vector<100x32xf32>
    %78 = tpu.matmul %76, %77, %cst_38 {dimension_numbers = #tpu.dot_dimension_numbers<[1], [0], [0], [1], [0, 0, 1, 1], [], []>} : vector<100x300xbf16>, vector<300x32xbf16>, vector<100x32xf32> -> vector<100x32xf32>
    %c2_39 = arith.constant 2 : index
    %c0_40 = arith.constant 0 : index
    %c0_41 = arith.constant 0 : index
    %79 = vector.load %arg8[%c2_39, %c0_40, %c0_41] : memref<4x100x1xf32, #tpu.memory_space<vmem>>, vector<1x100x1xf32>
    %80 = vector.shape_cast %79 : vector<1x100x1xf32> to vector<100x1xf32>
    %81 = vector.broadcast %80 : vector<100x1xf32> to vector<100x32xf32>
    %82 = arith.mulf %78, %81 : vector<100x32xf32>
    %c2_42 = arith.constant 2 : index
    %c0_43 = arith.constant 0 : index
    %c0_44 = arith.constant 0 : index
    %83 = vector.load %arg9[%c2_42, %c0_43, %c0_44] : memref<4x100x1xf32, #tpu.memory_space<vmem>>, vector<1x100x1xf32>
    %84 = vector.shape_cast %83 : vector<1x100x1xf32> to vector<100x1xf32>
    %85 = vector.broadcast %84 : vector<100x1xf32> to vector<100x32xf32>
    %86 = arith.addf %82, %85 : vector<100x32xf32>
    %cst_45 = arith.constant 0.000000e+00 : f32
    %87 = vector.broadcast %cst_45 : f32 to vector<100x32xf32>
    %88 = arith.maximumf %86, %87 : vector<100x32xf32>
    %cst_46 = arith.constant 0.000000e+00 : f32
    %89 = vector.broadcast %cst_46 : f32 to vector<100x1xf32>
    %90 = vector.extract_strided_slice %88 {offsets = [0, 0], sizes = [100, 31], strides = [1, 1]} : vector<100x32xf32> to vector<100x31xf32>
    %91 = tpu.concatenate %89, %90 in 1 : vector<100x1xf32>, vector<100x31xf32> -> vector<100x32xf32>
    %92 = vector.broadcast %15 : vector<1x32xf32> to vector<100x32xf32>
    %93 = arith.mulf %91, %92 : vector<100x32xf32>
    %94 = vector.extract_strided_slice %88 {offsets = [0, 1], sizes = [100, 31], strides = [1, 1]} : vector<100x32xf32> to vector<100x31xf32>
    %95 = tpu.concatenate %94, %89 in 1 : vector<100x31xf32>, vector<100x1xf32> -> vector<100x32xf32>
    %96 = vector.broadcast %16 : vector<1x32xf32> to vector<100x32xf32>
    %97 = arith.mulf %95, %96 : vector<100x32xf32>
    %98 = tpu.concatenate %93, %88, %97 in 0 : vector<100x32xf32>, vector<100x32xf32>, vector<100x32xf32> -> vector<300x32xf32>
    %c3 = arith.constant 3 : index
    %c0_47 = arith.constant 0 : index
    %c0_48 = arith.constant 0 : index
    %99 = vector.load %arg7[%c3, %c0_47, %c0_48] : memref<4x100x300xbf16, #tpu.memory_space<vmem>>, vector<1x100x300xbf16>
    %100 = vector.shape_cast %99 : vector<1x100x300xbf16> to vector<100x300xbf16>
    %101 = arith.truncf %98 : vector<300x32xf32> to vector<300x32xbf16>
    %cst_49 = arith.constant dense<0.000000e+00> : vector<100x32xf32>
    %102 = tpu.matmul %100, %101, %cst_49 {dimension_numbers = #tpu.dot_dimension_numbers<[1], [0], [0], [1], [0, 0, 1, 1], [], []>} : vector<100x300xbf16>, vector<300x32xbf16>, vector<100x32xf32> -> vector<100x32xf32>
    %c3_50 = arith.constant 3 : index
    %c0_51 = arith.constant 0 : index
    %c0_52 = arith.constant 0 : index
    %103 = vector.load %arg8[%c3_50, %c0_51, %c0_52] : memref<4x100x1xf32, #tpu.memory_space<vmem>>, vector<1x100x1xf32>
    %104 = vector.shape_cast %103 : vector<1x100x1xf32> to vector<100x1xf32>
    %105 = vector.broadcast %104 : vector<100x1xf32> to vector<100x32xf32>
    %106 = arith.mulf %102, %105 : vector<100x32xf32>
    %c3_53 = arith.constant 3 : index
    %c0_54 = arith.constant 0 : index
    %c0_55 = arith.constant 0 : index
    %107 = vector.load %arg9[%c3_53, %c0_54, %c0_55] : memref<4x100x1xf32, #tpu.memory_space<vmem>>, vector<1x100x1xf32>
    %108 = vector.shape_cast %107 : vector<1x100x1xf32> to vector<100x1xf32>
    %109 = vector.broadcast %108 : vector<100x1xf32> to vector<100x32xf32>
    %110 = arith.addf %106, %109 : vector<100x32xf32>
    %cst_56 = arith.constant 0.000000e+00 : f32
    %111 = vector.broadcast %cst_56 : f32 to vector<100x32xf32>
    %112 = arith.maximumf %110, %111 : vector<100x32xf32>
    %113 = tpu.concatenate %12, %40, %112 in 0 : vector<100x32xf32>, vector<100x32xf32>, vector<100x32xf32> -> vector<300x32xf32>
    %c0_57 = arith.constant 0 : index
    %c0_58 = arith.constant 0 : index
    %114 = vector.load %arg10[%c0_57, %c0_58] : memref<300x32xf32, #tpu.memory_space<vmem>>, vector<300x32xf32>
    tpu.vector_store %arg10[%c0_57, %c0_58], %113 {strides = array<i32>} : memref<300x32xf32, #tpu.memory_space<vmem>>, vector<300x32xf32>,
    return
  }
  func.func @transform_0(%arg0: i32) -> (i32, i32) {
    %c0_i32 = arith.constant 0 : i32
    %c0_i32_0 = arith.constant 0 : i32
    %c0_i32_1 = arith.constant 0 : i32
    return %c0_i32, %c0_i32_0 : i32, i32
  }
  func.func @transform_1(%arg0: i32) -> (i32, i32) {
    %c0_i32 = arith.constant 0 : i32
    %c0_i32_0 = arith.constant 0 : i32
    %c0_i32_1 = arith.constant 0 : i32
    return %c0_i32, %c0_i32_0 : i32, i32
  }
  func.func @transform_2(%arg0: i32) -> (i32, i32) {
    %c0_i32 = arith.constant 0 : i32
    %c0_i32_0 = arith.constant 0 : i32
    %c0_i32_1 = arith.constant 0 : i32
    return %c0_i32, %c0_i32_0 : i32, i32
  }
  func.func @transform_3(%arg0: i32) -> (i32, i32) {
    %c0_i32 = arith.constant 0 : i32
    %c0_i32_0 = arith.constant 0 : i32
    %c0_i32_1 = arith.constant 0 : i32
    return %c0_i32, %c0_i32_0 : i32, i32
  }
  func.func @transform_4(%arg0: i32) -> (i32, i32) {
    %c0_i32 = arith.constant 0 : i32
    %c0_i32_0 = arith.constant 0 : i32
    %c0_i32_1 = arith.constant 0 : i32
    return %c0_i32, %c0_i32_0 : i32, i32
  }
  func.func @transform_5(%arg0: i32) -> (i32, i32) {
    %c0_i32 = arith.constant 0 : i32
    %c0_i32_0 = arith.constant 0 : i32
    %c0_i32_1 = arith.constant 0 : i32
    return %c0_i32, %c0_i32_0 : i32, i32
  }
  func.func @transform_6(%arg0: i32) -> (i32, i32, i32) {
    %c0_i32 = arith.constant 0 : i32
    %c0_i32_0 = arith.constant 0 : i32
    %c0_i32_1 = arith.constant 0 : i32
    %c0_i32_2 = arith.constant 0 : i32
    return %c0_i32, %c0_i32_0, %c0_i32_1 : i32, i32, i32
  }
  func.func @transform_7(%arg0: i32) -> (i32, i32, i32) {
    %c0_i32 = arith.constant 0 : i32
    %c0_i32_0 = arith.constant 0 : i32
    %c0_i32_1 = arith.constant 0 : i32
    %c0_i32_2 = arith.constant 0 : i32
    return %c0_i32, %c0_i32_0, %c0_i32_1 : i32, i32, i32
  }
  func.func @transform_8(%arg0: i32) -> (i32, i32, i32) {
    %c0_i32 = arith.constant 0 : i32
    %c0_i32_0 = arith.constant 0 : i32
    %c0_i32_1 = arith.constant 0 : i32
    %c0_i32_2 = arith.constant 0 : i32
    return %c0_i32, %c0_i32_0, %c0_i32_1 : i32, i32, i32
  }
  func.func @transform_9(%arg0: i32) -> (i32, i32) {
    %c0_i32 = arith.constant 0 : i32
    %c0_i32_0 = arith.constant 0 : i32
    %c0_i32_1 = arith.constant 0 : i32
    return %c0_i32, %c0_i32_0 : i32, i32
  }
}

module attributes {stable_mosaic.version = 11 : i64} {
  func.func @_inception_kernel(%arg0: i32, %arg1: memref<300x32xf32, #tpu.memory_space<vmem>>, %arg2: memref<1x32xf32, #tpu.memory_space<vmem>>, %arg3: memref<1x32xf32, #tpu.memory_space<vmem>>, %arg4: memref<300x300xbf16, #tpu.memory_space<vmem>>, %arg5: memref<300x1xf32, #tpu.memory_space<vmem>>, %arg6: memref<300x1xf32, #tpu.memory_space<vmem>>, %arg7: memref<4x100x300xbf16, #tpu.memory_space<vmem>>, %arg8: memref<4x100x1xf32, #tpu.memory_space<vmem>>, %arg9: memref<4x100x1xf32, #tpu.memory_space<vmem>>, %arg10: memref<300x32xf32, #tpu.memory_space<vmem>>) attributes {dimension_semantics = [#tpu.dimension_semantics<arbitrary>], iteration_bounds = array<i64: 1>, scalar_prefetch = 0 : i64, scratch_operands = 0 : i64, tpu.core_type = #tpu.core_type<tc>, window_params = [{pipeline_mode = #tpu.pipeline_mode<synchronous>, transform_indices = @transform_0, window_bounds = array<i64: 300, 32>}, {pipeline_mode = #tpu.pipeline_mode<synchronous>, transform_indices = @transform_1, window_bounds = array<i64: 1, 32>}, {pipeline_mode = #tpu.pipeline_mode<synchronous>, transform_indices = @transform_2, window_bounds = array<i64: 1, 32>}, {pipeline_mode = #tpu.pipeline_mode<synchronous>, transform_indices = @transform_3, window_bounds = array<i64: 300, 300>}, {pipeline_mode = #tpu.pipeline_mode<synchronous>, transform_indices = @transform_4, window_bounds = array<i64: 300, 1>}, {pipeline_mode = #tpu.pipeline_mode<synchronous>, transform_indices = @transform_5, window_bounds = array<i64: 300, 1>}, {pipeline_mode = #tpu.pipeline_mode<synchronous>, transform_indices = @transform_6, window_bounds = array<i64: 4, 100, 300>}, {pipeline_mode = #tpu.pipeline_mode<synchronous>, transform_indices = @transform_7, window_bounds = array<i64: 4, 100, 1>}, {pipeline_mode = #tpu.pipeline_mode<synchronous>, transform_indices = @transform_8, window_bounds = array<i64: 4, 100, 1>}, {pipeline_mode = #tpu.pipeline_mode<synchronous>, transform_indices = @transform_9, window_bounds = array<i64: 300, 32>}]} {
    %c0 = arith.constant 0 : index
    %c0_0 = arith.constant 0 : index
    %0 = vector.load %arg4[%c0, %c0_0] : memref<300x300xbf16, #tpu.memory_space<vmem>>, vector<300x300xbf16>
    %c0_1 = arith.constant 0 : index
    %c0_2 = arith.constant 0 : index
    %1 = vector.load %arg1[%c0_1, %c0_2] : memref<300x32xf32, #tpu.memory_space<vmem>>, vector<300x32xf32>
    %2 = arith.truncf %1 : vector<300x32xf32> to vector<300x32xbf16>
    %cst = arith.constant dense<0.000000e+00> : vector<300x32xf32>
    %3 = tpu.matmul %0, %2, %cst {dimension_numbers = #tpu.dot_dimension_numbers<[1], [0], [0], [1], [0, 0, 1, 1], [], []>} : vector<300x300xbf16>, vector<300x32xbf16>, vector<300x32xf32> -> vector<300x32xf32>
    %c0_3 = arith.constant 0 : index
    %c0_4 = arith.constant 0 : index
    %4 = vector.load %arg5[%c0_3, %c0_4] : memref<300x1xf32, #tpu.memory_space<vmem>>, vector<300x1xf32>
    %5 = vector.broadcast %4 : vector<300x1xf32> to vector<300x32xf32>
    %6 = arith.mulf %3, %5 : vector<300x32xf32>
    %c0_5 = arith.constant 0 : index
    %c0_6 = arith.constant 0 : index
    %7 = vector.load %arg6[%c0_5, %c0_6] : memref<300x1xf32, #tpu.memory_space<vmem>>, vector<300x1xf32>
    %8 = vector.broadcast %7 : vector<300x1xf32> to vector<300x32xf32>
    %9 = arith.addf %6, %8 : vector<300x32xf32>
    %cst_7 = arith.constant 0.000000e+00 : f32
    %10 = vector.broadcast %cst_7 : f32 to vector<300x32xf32>
    %11 = arith.maximumf %9, %10 : vector<300x32xf32>
    %12 = vector.extract_strided_slice %11 {offsets = [0, 0], sizes = [100, 32], strides = [1, 1]} : vector<300x32xf32> to vector<100x32xf32>
    %13 = vector.extract_strided_slice %11 {offsets = [100, 0], sizes = [100, 32], strides = [1, 1]} : vector<300x32xf32> to vector<100x32xf32>
    %14 = vector.extract_strided_slice %11 {offsets = [200, 0], sizes = [100, 32], strides = [1, 1]} : vector<300x32xf32> to vector<100x32xf32>
    %c0_8 = arith.constant 0 : index
    %c0_9 = arith.constant 0 : index
    %15 = vector.load %arg2[%c0_8, %c0_9] : memref<1x32xf32, #tpu.memory_space<vmem>>, vector<1x32xf32>
    %c0_10 = arith.constant 0 : index
    %c0_11 = arith.constant 0 : index
    %16 = vector.load %arg3[%c0_10, %c0_11] : memref<1x32xf32, #tpu.memory_space<vmem>>, vector<1x32xf32>
    %cst_12 = arith.constant 0.000000e+00 : f32
    %17 = vector.broadcast %cst_12 : f32 to vector<100x1xf32>
    %18 = vector.extract_strided_slice %13 {offsets = [0, 0], sizes = [100, 31], strides = [1, 1]} : vector<100x32xf32> to vector<100x31xf32>
    %19 = tpu.concatenate %17, %18 in 1 : vector<100x1xf32>, vector<100x31xf32> -> vector<100x32xf32>
    %20 = vector.broadcast %15 : vector<1x32xf32> to vector<100x32xf32>
    %21 = arith.mulf %19, %20 : vector<100x32xf32>
    %22 = vector.extract_strided_slice %13 {offsets = [0, 1], sizes = [100, 31], strides = [1, 1]} : vector<100x32xf32> to vector<100x31xf32>
    %23 = tpu.concatenate %22, %17 in 1 : vector<100x31xf32>, vector<100x1xf32> -> vector<100x32xf32>
    %24 = vector.broadcast %16 : vector<1x32xf32> to vector<100x32xf32>
    %25 = arith.mulf %23, %24 : vector<100x32xf32>
    %26 = tpu.concatenate %21, %13, %25 in 0 : vector<100x32xf32>, vector<100x32xf32>, vector<100x32xf32> -> vector<300x32xf32>
    %c0_13 = arith.constant 0 : index
    %c0_14 = arith.constant 0 : index
    %c0_15 = arith.constant 0 : index
    %27 = vector.load %arg7[%c0_13, %c0_14, %c0_15] : memref<4x100x300xbf16, #tpu.memory_space<vmem>>, vector<1x100x300xbf16>
    %28 = vector.shape_cast %27 : vector<1x100x300xbf16> to vector<100x300xbf16>
    %29 = arith.truncf %26 : vector<300x32xf32> to vector<300x32xbf16>
    %cst_16 = arith.constant dense<0.000000e+00> : vector<100x32xf32>
    %30 = tpu.matmul %28, %29, %cst_16 {dimension_numbers = #tpu.dot_dimension_numbers<[1], [0], [0], [1], [0, 0, 1, 1], [], []>} : vector<100x300xbf16>, vector<300x32xbf16>, vector<100x32xf32> -> vector<100x32xf32>
    %c0_17 = arith.constant 0 : index
    %c0_18 = arith.constant 0 : index
    %c0_19 = arith.constant 0 : index
    %31 = vector.load %arg8[%c0_17, %c0_18, %c0_19] : memref<4x100x1xf32, #tpu.memory_space<vmem>>, vector<1x100x1xf32>
    %32 = vector.shape_cast %31 : vector<1x100x1xf32> to vector<100x1xf32>
    %33 = vector.broadcast %32 : vector<100x1xf32> to vector<100x32xf32>
    %34 = arith.mulf %30, %33 : vector<100x32xf32>
    %c0_20 = arith.constant 0 : index
    %c0_21 = arith.constant 0 : index
    %c0_22 = arith.constant 0 : index
    %35 = vector.load %arg9[%c0_20, %c0_21, %c0_22] : memref<4x100x1xf32, #tpu.memory_space<vmem>>, vector<1x100x1xf32>
    %36 = vector.shape_cast %35 : vector<1x100x1xf32> to vector<100x1xf32>
    %37 = vector.broadcast %36 : vector<100x1xf32> to vector<100x32xf32>
    %38 = arith.addf %34, %37 : vector<100x32xf32>
    %cst_23 = arith.constant 0.000000e+00 : f32
    %39 = vector.broadcast %cst_23 : f32 to vector<100x32xf32>
    %40 = arith.maximumf %38, %39 : vector<100x32xf32>
    %cst_24 = arith.constant 0.000000e+00 : f32
    %41 = vector.broadcast %cst_24 : f32 to vector<100x1xf32>
    %42 = vector.extract_strided_slice %14 {offsets = [0, 0], sizes = [100, 31], strides = [1, 1]} : vector<100x32xf32> to vector<100x31xf32>
    %43 = tpu.concatenate %41, %42 in 1 : vector<100x1xf32>, vector<100x31xf32> -> vector<100x32xf32>
    %44 = vector.broadcast %15 : vector<1x32xf32> to vector<100x32xf32>
    %45 = arith.mulf %43, %44 : vector<100x32xf32>
    %46 = vector.extract_strided_slice %14 {offsets = [0, 1], sizes = [100, 31], strides = [1, 1]} : vector<100x32xf32> to vector<100x31xf32>
    %47 = tpu.concatenate %46, %41 in 1 : vector<100x31xf32>, vector<100x1xf32> -> vector<100x32xf32>
    %48 = vector.broadcast %16 : vector<1x32xf32> to vector<100x32xf32>
    %49 = arith.mulf %47, %48 : vector<100x32xf32>
    %50 = tpu.concatenate %45, %14, %49 in 0 : vector<100x32xf32>, vector<100x32xf32>, vector<100x32xf32> -> vector<300x32xf32>
    %c1 = arith.constant 1 : index
    %c0_25 = arith.constant 0 : index
    %c0_26 = arith.constant 0 : index
    %51 = vector.load %arg7[%c1, %c0_25, %c0_26] : memref<4x100x300xbf16, #tpu.memory_space<vmem>>, vector<1x100x300xbf16>
    %52 = vector.shape_cast %51 : vector<1x100x300xbf16> to vector<100x300xbf16>
    %53 = arith.truncf %50 : vector<300x32xf32> to vector<300x32xbf16>
    %cst_27 = arith.constant dense<0.000000e+00> : vector<100x32xf32>
    %54 = tpu.matmul %52, %53, %cst_27 {dimension_numbers = #tpu.dot_dimension_numbers<[1], [0], [0], [1], [0, 0, 1, 1], [], []>} : vector<100x300xbf16>, vector<300x32xbf16>, vector<100x32xf32> -> vector<100x32xf32>
    %c1_28 = arith.constant 1 : index
    %c0_29 = arith.constant 0 : index
    %c0_30 = arith.constant 0 : index
    %55 = vector.load %arg8[%c1_28, %c0_29, %c0_30] : memref<4x100x1xf32, #tpu.memory_space<vmem>>, vector<1x100x1xf32>
    %56 = vector.shape_cast %55 : vector<1x100x1xf32> to vector<100x1xf32>
    %57 = vector.broadcast %56 : vector<100x1xf32> to vector<100x32xf32>
    %58 = arith.mulf %54, %57 : vector<100x32xf32>
    %c1_31 = arith.constant 1 : index
    %c0_32 = arith.constant 0 : index
    %c0_33 = arith.constant 0 : index
    %59 = vector.load %arg9[%c1_31, %c0_32, %c0_33] : memref<4x100x1xf32, #tpu.memory_space<vmem>>, vector<1x100x1xf32>
    %60 = vector.shape_cast %59 : vector<1x100x1xf32> to vector<100x1xf32>
    %61 = vector.broadcast %60 : vector<100x1xf32> to vector<100x32xf32>
    %62 = arith.addf %58, %61 : vector<100x32xf32>
    %cst_34 = arith.constant 0.000000e+00 : f32
    %63 = vector.broadcast %cst_34 : f32 to vector<100x32xf32>
    %64 = arith.maximumf %62, %63 : vector<100x32xf32>
    %cst_35 = arith.constant 0.000000e+00 : f32
    %65 = vector.broadcast %cst_35 : f32 to vector<100x1xf32>
    %66 = vector.extract_strided_slice %64 {offsets = [0, 0], sizes = [100, 31], strides = [1, 1]} : vector<100x32xf32> to vector<100x31xf32>
    %67 = tpu.concatenate %65, %66 in 1 : vector<100x1xf32>, vector<100x31xf32> -> vector<100x32xf32>
    %68 = vector.broadcast %15 : vector<1x32xf32> to vector<100x32xf32>
    %69 = arith.mulf %67, %68 : vector<100x32xf32>
    %70 = vector.extract_strided_slice %64 {offsets = [0, 1], sizes = [100, 31], strides = [1, 1]} : vector<100x32xf32> to vector<100x31xf32>
    %71 = tpu.concatenate %70, %65 in 1 : vector<100x31xf32>, vector<100x1xf32> -> vector<100x32xf32>
    %72 = vector.broadcast %16 : vector<1x32xf32> to vector<100x32xf32>
    %73 = arith.mulf %71, %72 : vector<100x32xf32>
    %74 = tpu.concatenate %69, %64, %73 in 0 : vector<100x32xf32>, vector<100x32xf32>, vector<100x32xf32> -> vector<300x32xf32>
    %c2 = arith.constant 2 : index
    %c0_36 = arith.constant 0 : index
    %c0_37 = arith.constant 0 : index
    %75 = vector.load %arg7[%c2, %c0_36, %c0_37] : memref<4x100x300xbf16, #tpu.memory_space<vmem>>, vector<1x100x300xbf16>
    %76 = vector.shape_cast %75 : vector<1x100x300xbf16> to vector<100x300xbf16>
    %77 = arith.truncf %74 : vector<300x32xf32> to vector<300x32xbf16>
    %cst_38 = arith.constant dense<0.000000e+00> : vector<100x32xf32>
    %78 = tpu.matmul %76, %77, %cst_38 {dimension_numbers = #tpu.dot_dimension_numbers<[1], [0], [0], [1], [0, 0, 1, 1], [], []>} : vector<100x300xbf16>, vector<300x32xbf16>, vector<100x32xf32> -> vector<100x32xf32>
    %c2_39 = arith.constant 2 : index
    %c0_40 = arith.constant 0 : index
    %c0_41 = arith.constant 0 : index
    %79 = vector.load %arg8[%c2_39, %c0_40, %c0_41] : memref<4x100x1xf32, #tpu.memory_space<vmem>>, vector<1x100x1xf32>
    %80 = vector.shape_cast %79 : vector<1x100x1xf32> to vector<100x1xf32>
    %81 = vector.broadcast %80 : vector<100x1xf32> to vector<100x32xf32>
    %82 = arith.mulf %78, %81 : vector<100x32xf32>
    %c2_42 = arith.constant 2 : index
    %c0_43 = arith.constant 0 : index
    %c0_44 = arith.constant 0 : index
    %83 = vector.load %arg9[%c2_42, %c0_43, %c0_44] : memref<4x100x1xf32, #tpu.memory_space<vmem>>, vector<1x100x1xf32>
    %84 = vector.shape_cast %83 : vector<1x100x1xf32> to vector<100x1xf32>
    %85 = vector.broadcast %84 : vector<100x1xf32> to vector<100x32xf32>
    %86 = arith.addf %82, %85 : vector<100x32xf32>
    %cst_45 = arith.constant 0.000000e+00 : f32
    %87 = vector.broadcast %cst_45 : f32 to vector<100x32xf32>
    %88 = arith.maximumf %86, %87 : vector<100x32xf32>
    %cst_46 = arith.constant 0.000000e+00 : f32
    %89 = vector.broadcast %cst_46 : f32 to vector<100x1xf32>
    %90 = vector.extract_strided_slice %88 {offsets = [0, 0], sizes = [100, 31], strides = [1, 1]} : vector<100x32xf32> to vector<100x31xf32>
    %91 = tpu.concatenate %89, %90 in 1 : vector<100x1xf32>, vector<100x31xf32> -> vector<100x32xf32>
    %92 = vector.broadcast %15 : vector<1x32xf32> to vector<100x32xf32>
    %93 = arith.mulf %91, %92 : vector<100x32xf32>
    %94 = vector.extract_strided_slice %88 {offsets = [0, 1], sizes = [100, 31], strides = [1, 1]} : vector<100x32xf32> to vector<100x31xf32>
    %95 = tpu.concatenate %94, %89 in 1 : vector<100x31xf32>, vector<100x1xf32> -> vector<100x32xf32>
    %96 = vector.broadcast %16 : vector<1x32xf32> to vector<100x32xf32>
    %97 = arith.mulf %95, %96 : vector<100x32xf32>
    %98 = tpu.concatenate %93, %88, %97 in 0 : vector<100x32xf32>, vector<100x32xf32>, vector<100x32xf32> -> vector<300x32xf32>
    %c3 = arith.constant 3 : index
    %c0_47 = arith.constant 0 : index
    %c0_48 = arith.constant 0 : index
    %99 = vector.load %arg7[%c3, %c0_47, %c0_48] : memref<4x100x300xbf16, #tpu.memory_space<vmem>>, vector<1x100x300xbf16>
    %100 = vector.shape_cast %99 : vector<1x100x300xbf16> to vector<100x300xbf16>
    %101 = arith.truncf %98 : vector<300x32xf32> to vector<300x32xbf16>
    %cst_49 = arith.constant dense<0.000000e+00> : vector<100x32xf32>
    %102 = tpu.matmul %100, %101, %cst_49 {dimension_numbers = #tpu.dot_dimension_numbers<[1], [0], [0], [1], [0, 0, 1, 1], [], []>} : vector<100x300xbf16>, vector<300x32xbf16>, vector<100x32xf32> -> vector<100x32xf32>
    %c3_50 = arith.constant 3 : index
    %c0_51 = arith.constant 0 : index
    %c0_52 = arith.constant 0 : index
    %103 = vector.load %arg8[%c3_50, %c0_51, %c0_52] : memref<4x100x1xf32, #tpu.memory_space<vmem>>, vector<1x100x1xf32>
    %104 = vector.shape_cast %103 : vector<1x100x1xf32> to vector<100x1xf32>
    %105 = vector.broadcast %104 : vector<100x1xf32> to vector<100x32xf32>
    %106 = arith.mulf %102, %105 : vector<100x32xf32>
    %c3_53 = arith.constant 3 : index
    %c0_54 = arith.constant 0 : index
    %c0_55 = arith.constant 0 : index
    %107 = vector.load %arg9[%c3_53, %c0_54, %c0_55] : memref<4x100x1xf32, #tpu.memory_space<vmem>>, vector<1x100x1xf32>
    %108 = vector.shape_cast %107 : vector<1x100x1xf32> to vector<100x1xf32>
    %109 = vector.broadcast %108 : vector<100x1xf32> to vector<100x32xf32>
    %110 = arith.addf %106, %109 : vector<100x32xf32>
    %cst_56 = arith.constant 0.000000e+00 : f32
    %111 = vector.broadcast %cst_56 : f32 to vector<100x32xf32>
    %112 = arith.maximumf %110, %111 : vector<100x32xf32>
    %113 = tpu.concatenate %12, %40, %112 in 0 : vector<100x32xf32>, vector<100x32xf32>, vector<100x32xf32> -> vector<300x32xf32>
    %c0_57 = arith.constant 0 : index
    %c0_58 = arith.constant 0 : index
    %114 = vector.load %arg10[%c0_57, %c0_58] : memref<300x32xf32, #tpu.memory_space<vmem>>, vector<300x32xf32>
    tpu.vector_store %arg10[%c0_57, %c0_58], %113 {strides = array<i32>} : memref<300x32xf32, #tpu.memory_space<vmem>>, vector<300x32xf32>,
    return
  }
  func.func @transform_0(%arg0: i32) -> (i32, i32) {
    %c0_i32 = arith.constant 0 : i32
    %c0_i32_0 = arith.constant 0 : i32
    %c0_i32_1 = arith.constant 0 : i32
    return %c0_i32, %c0_i32_0 : i32, i32
  }
  func.func @transform_1(%arg0: i32) -> (i32, i32) {
    %c0_i32 = arith.constant 0 : i32
    %c0_i32_0 = arith.constant 0 : i32
    %c0_i32_1 = arith.constant 0 : i32
    return %c0_i32, %c0_i32_0 : i32, i32
  }
  func.func @transform_2(%arg0: i32) -> (i32, i32) {
    %c0_i32 = arith.constant 0 : i32
    %c0_i32_0 = arith.constant 0 : i32
    %c0_i32_1 = arith.constant 0 : i32
    return %c0_i32, %c0_i32_0 : i32, i32
  }
  func.func @transform_3(%arg0: i32) -> (i32, i32) {
    %c0_i32 = arith.constant 0 : i32
    %c0_i32_0 = arith.constant 0 : i32
    %c0_i32_1 = arith.constant 0 : i32
    return %c0_i32, %c0_i32_0 : i32, i32
  }
  func.func @transform_4(%arg0: i32) -> (i32, i32) {
    %c0_i32 = arith.constant 0 : i32
    %c0_i32_0 = arith.constant 0 : i32
    %c0_i32_1 = arith.constant 0 : i32
    return %c0_i32, %c0_i32_0 : i32, i32
  }
  func.func @transform_5(%arg0: i32) -> (i32, i32) {
    %c0_i32 = arith.constant 0 : i32
    %c0_i32_0 = arith.constant 0 : i32
    %c0_i32_1 = arith.constant 0 : i32
    return %c0_i32, %c0_i32_0 : i32, i32
  }
  func.func @transform_6(%arg0: i32) -> (i32, i32, i32) {
    %c0_i32 = arith.constant 0 : i32
    %c0_i32_0 = arith.constant 0 : i32
    %c0_i32_1 = arith.constant 0 : i32
    %c0_i32_2 = arith.constant 0 : i32
    return %c0_i32, %c0_i32_0, %c0_i32_1 : i32, i32, i32
  }
  func.func @transform_7(%arg0: i32) -> (i32, i32, i32) {
    %c0_i32 = arith.constant 0 : i32
    %c0_i32_0 = arith.constant 0 : i32
    %c0_i32_1 = arith.constant 0 : i32
    %c0_i32_2 = arith.constant 0 : i32
    return %c0_i32, %c0_i32_0, %c0_i32_1 : i32, i32, i32
  }
  func.func @transform_8(%arg0: i32) -> (i32, i32, i32) {
    %c0_i32 = arith.constant 0 : i32
    %c0_i32_0 = arith.constant 0 : i32
    %c0_i32_1 = arith.constant 0 : i32
    %c0_i32_2 = arith.constant 0 : i32
    return %c0_i32, %c0_i32_0, %c0_i32_1 : i32, i32, i32
  }
  func.func @transform_9(%arg0: i32) -> (i32, i32) {
    %c0_i32 = arith.constant 0 : i32
    %c0_i32_0 = arith.constant 0 : i32
    %c0_i32_1 = arith.constant 0 : i32
    return %c0_i32, %c0_i32_0 : i32, i32
  }
}

</mosaic_0001>

<bundles_post_ra>
// kernel: deep3i_forward.10
= control target key start
LH: loop header
LB: loop body
LE: loop exit
PB: predicated region body
PF: predicated region fallthrough
CT: control target
= control target key end

     0   :  { %vm226_vm0 = vcmask 1041408   ;;  %v7068_v0 = vmov 0.0   ;;  %vm4985_vm1 = vmmov 0   ;;  %v4986_v3 = vmov 0   ;;  %s4988_s20 = smov 1   ;;  %s7058_s0 = inlined_call_operand.vmem [shape: f32[4,32], index: 0, kind: input, shape index: {}]   ;;  %s7059_s3 = inlined_call_operand.vmem [shape: bf16[300,4], index: 3, kind: input, shape index: {}]   ;;  %s7060_s4 = inlined_call_operand.vmem [shape: f32[300,1], index: 4, kind: input, shape index: {}]   ;;  %s7061_s5 = inlined_call_operand.vmem [shape: f32[300,1], index: 5, kind: input, shape index: {}]   ;;  %s7062_s6 = inlined_call_operand.vmem [shape: bf16[4,100,300], index: 6, kind: input, shape index: {}]   ;;  %s7063_s1 = inlined_call_operand.vmem [shape: f32[1,32], index: 1, kind: input, shape index: {}]   ;;  %s7064_s2 = inlined_call_operand.vmem [shape: f32[1,32], index: 2, kind: input, shape index: {}]   ;;  %s7065_s7 = inlined_call_operand.vmem [shape: f32[4,100,1], index: 7, kind: input, shape index: {}]   ;;  %s7066_s8 = inlined_call_operand.vmem [shape: f32[4,100,1], index: 8, kind: input, shape index: {}]   ;;  %s7067_s9 = inlined_call_operand.vmem [shape: f32[300,32], index: 9, kind: output, shape index: {}]  }
   0x1   :  { %4635 = vmatprep.subr.bf16.mxu0 %v7068_v0  ;;  %v71_v1 = vld [vmem:[%s7058_s0] sm:$0xf]  ;;  %4637 = vmatprep.mubr.msk.bf16.mxu0 %vm4985_vm1, %v7068_v0  ;;  %vm168_vm2 = vcmask 31744   ;;  %v429_v6 = vld [vmem:[%s7060_s4 + $0x70] sm:$0xff]  ;;  %v4857_v8 = vld [vmem:[%s7059_s3 + $0x8] sm:$0xff]   ;;  %vm1000_vm3 = vcmask 1043456  }
   0x2   :  { %v72_v2 = vpack.c.bf16 %v71_v1, %v71_v1  ;;  %4855 = vset.pattern.permute.xlu1 %v4986_v3  ;;  %4854 = vset.pattern.permute.xlu0 %v4986_v3  ;;  %v4856_v5 = vld [vmem:[%s7059_s3] sm:$0xff]   ;;  %v428_v10 = vld [vmem:[%s7060_s4 + $0x68] sm:$0xff]  ;;  %v695_v11 = vld [vmem:[%s7061_s5 + $0x70] sm:$0xff]  ;;  %vm1065_vm4 = vcmask 7168   ;;  %vm1137_vm5 = vcmask 252928   ;;  %vm1389_vm6 = vcmask 1045504  }
   0x3   :  { %v427_v7 = vld [vmem:[%s7060_s4 + $0x60] sm:$0xff]  ;;  %525 = vperm.xlu1 %4855, %v429_v6   ;;  %v694_v12 = vld [vmem:[%s7061_s5 + $0x68] sm:$0xff]  ;;  %v4858_v13 = vld [vmem:[%s7059_s3 + $0x10] sm:$0xff]   ;;  %vm1367_vm7 = vcmask 359424   ;;  %vm3991_vm8 = vcmask 261120   ;;  %vm4029_vm9 = vcmask 257024  }
   0x4   :  { %v228_v4 = vsel %vm226_vm0, %v72_v2, 0  ;;  %515 = vperm.xlu0 %4854, %v427_v7   ;;  %v693_v9 = vld [vmem:[%s7061_s5 + $0x60] sm:$0xff]  ;;  %v430_v15 = vld [vmem:[%s7060_s4 + $0x78] sm:$0xff]  ;;  %v433_v19 = vld [vmem:[%s7060_s4 + $0x90] sm:$0xff] }
   0x5   :  { %4636 = vmatpush3.bf16.msra.mxu0 %v228_v4  ;;  %v431_v14 = vld [vmem:[%s7060_s4 + $0x80] sm:$0xff]  ;;  %v696_v17 = vld [vmem:[%s7061_s5 + $0x78] sm:$0xff]  ;;  %v432_v20 = vld [vmem:[%s7060_s4 + $0x88] sm:$0xff] }
   0x6   :  { %4747 = vmatprep.subr.bf16.mxu0 %v7068_v0  ;;  %v697_v16 = vld [vmem:[%s7061_s5 + $0x80] sm:$0xff]  ;;  %v4859_v18 = vld [vmem:[%s7059_s3 + $0x18] sm:$0xff]   ;;  %v699_v21 = vld [vmem:[%s7061_s5 + $0x90] sm:$0xff] }
   0x7   :  { %781 = vperm.xlu1 %4855, %v693_v9   ;;  %v698_v22 = vld [vmem:[%s7061_s5 + $0x88] sm:$0xff]  ;;  %v4860_v23 = vld [vmem:[%s7059_s3 + $0x20] sm:$0xff]   ;;  %v434_v25 = vld [vmem:[%s7060_s4 + $0x98] sm:$0xff] }
   0x8   :  { %4638 = vmatmul.mubr.msk.bf16.vlgmr.msra.gmra.mrb[0].mxu0 %vm168_vm2, %v4856_v5  ;;  %520 = vperm.xlu0 %4854, %v428_v10   ;;  %v435_v24 = vld [vmem:[%s7060_s4 + $0xa0] sm:$0xff]  ;;  %v700_v27 = vld [vmem:[%s7061_s5 + $0x98] sm:$0xff]  ;;  %v4861_v28 = vld [vmem:[%s7059_s3 + $0x28] sm:$0xff]  }
   0x9   :  { %4641 = vmatprep.mubr.msk.bf16.mxu0 %vm4985_vm1, %v7068_v0  ;;  %v701_v26 = vld [vmem:[%s7061_s5 + $0xa0] sm:$0xff]  ;;  %v437_v29 = vld [vmem:[%s7060_s4 + $0xb0] sm:$0xff]  ;;  %v436_v30 = vld [vmem:[%s7060_s4 + $0xa8] sm:$0xff] }
   0xa   :  { %v703_v31 = vld [vmem:[%s7061_s5 + $0xb0] sm:$0xff]  ;;  %v702_v32 = vld [vmem:[%s7061_s5 + $0xa8] sm:$0xff]  ;;  %v439_v34 = vld [vmem:[%s7060_s4 + $0xc0] sm:$0xff] }
   0xb   :  { %791 = vperm.xlu1 %4855, %v695_v11   ;;  %v4862_v33 = vld [vmem:[%s7059_s3 + $0x30] sm:$0xff]   ;;  %v438_v35 = vld [vmem:[%s7060_s4 + $0xb8] sm:$0xff]  ;;  %v705_v36 = vld [vmem:[%s7061_s5 + $0xc0] sm:$0xff] }
   0xc   :  { %786 = vperm.xlu0 %4854, %v694_v12   ;;  %v704_v37 = vld [vmem:[%s7061_s5 + $0xb8] sm:$0xff]  ;;  %v440_v39 = vld [vmem:[%s7060_s4 + $0xc8] sm:$0xff]  ;;  %v441_v40 = vld [vmem:[%s7060_s4 + $0xd0] sm:$0xff] }
   0xd   :  { %v4863_v38 = vld [vmem:[%s7059_s3 + $0x38] sm:$0xff]   ;;  %v706_v41 = vld [vmem:[%s7061_s5 + $0xc8] sm:$0xff]  ;;  %v707_v42 = vld [vmem:[%s7061_s5 + $0xd0] sm:$0xff] }
   0xe   :  { %v4864_v43 = vld [vmem:[%s7059_s3 + $0x40] sm:$0xff]   ;;  %v4865_v44 = vld [vmem:[%s7059_s3 + $0x48] sm:$0xff]   ;;  %v4866_v45 = vld [vmem:[%s7059_s3 + $0x50] sm:$0xff]  }
   0xf   :  { %535 = vperm.xlu1 %4855, %v431_v14   ;;  %v4867_v46 = vld [vmem:[%s7059_s3 + $0x58] sm:$0xff]   ;;  %v4868_v47 = vld [vmem:[%s7059_s3 + $0x60] sm:$0xff]   ;;  %v4869_v48 = vld [vmem:[%s7059_s3 + $0x68] sm:$0xff]  }
  0x10   :  { %4642 = vmatmul.mubr.msk.bf16.gmra.mrb[4].mxu0 %vm168_vm2, %v4857_v8  ;;  %530 = vperm.xlu0 %4854, %v430_v15   ;;  %v4870_v49 = vld [vmem:[%s7059_s3 + $0x70] sm:$0xff]   ;;  %v4871_v50 = vld [vmem:[%s7059_s3 + $0x78] sm:$0xff]   ;;  %v4872_v51 = vld [vmem:[%s7059_s3 + $0x80] sm:$0xff]  }
  0x11   :  { %4645 = vmatprep.mubr.msk.bf16.mxu0 %vm4985_vm1, %v7068_v0  ;;  %v4873_v52 = vld [vmem:[%s7059_s3 + $0x88] sm:$0xff]   ;;  %v4874_v53 = vld [vmem:[%s7059_s3 + $0x90] sm:$0x3f]   ;;  %s4987_s3 = smov 127  }
  0x13   :  { %801 = vperm.xlu1 %4855, %v697_v16  }
  0x14   :  { %796 = vperm.xlu0 %4854, %v696_v17  }
  0x17   :  { %545 = vperm.xlu1 %4855, %v433_v19  }
  0x18   :  { %4646 = vmatmul.mubr.msk.bf16.gmra.mrb[8].mxu0 %vm168_vm2, %v4858_v13  ;;  %540 = vperm.xlu0 %4854, %v432_v20  }
  0x19   :  { %4649 = vmatprep.mubr.msk.bf16.mxu0 %vm4985_vm1, %v7068_v0 }
  0x1b   :  { %811 = vperm.xlu1 %4855, %v699_v21  }
  0x1c   :  { %806 = vperm.xlu0 %4854, %v698_v22  }
  0x1f   :  { %555 = vperm.xlu1 %4855, %v435_v24  }
  0x20   :  { %4650 = vmatmul.mubr.msk.bf16.gmra.mrb[12].mxu0 %vm168_vm2, %v4859_v18  ;;  %550 = vperm.xlu0 %4854, %v434_v25  }
  0x21   :  { %4653 = vmatprep.mubr.msk.bf16.mxu0 %vm4985_vm1, %v7068_v0 }
  0x23   :  { %821 = vperm.xlu1 %4855, %v701_v26  }
  0x24   :  { %816 = vperm.xlu0 %4854, %v700_v27  }
  0x27   :  { %565 = vperm.xlu1 %4855, %v437_v29  }
  0x28   :  { %4654 = vmatmul.mubr.msk.bf16.gmra.mrb[16].mxu0 %vm168_vm2, %v4860_v23  ;;  %560 = vperm.xlu0 %4854, %v436_v30  }
  0x29   :  { %4657 = vmatprep.mubr.msk.bf16.mxu0 %vm4985_vm1, %v7068_v0 }
  0x2b   :  { %831 = vperm.xlu1 %4855, %v703_v31  }
  0x2c   :  { %826 = vperm.xlu0 %4854, %v702_v32  }
  0x2f   :  { %575 = vperm.xlu1 %4855, %v439_v34  }
  0x30   :  { %4658 = vmatmul.mubr.msk.bf16.gmra.mrb[20].mxu0 %vm168_vm2, %v4861_v28  ;;  %570 = vperm.xlu0 %4854, %v438_v35  }
  0x31   :  { %4661 = vmatprep.mubr.msk.bf16.mxu0 %vm4985_vm1, %v7068_v0 }
  0x33   :  { %841 = vperm.xlu1 %4855, %v705_v36  }
  0x34   :  { %836 = vperm.xlu0 %4854, %v704_v37  }
  0x37   :  { %580 = vperm.xlu1 %4855, %v440_v39  }
  0x38   :  { %4662 = vmatmul.mubr.msk.bf16.gmra.mrb[24].mxu0 %vm168_vm2, %v4862_v33  ;;  %585 = vperm.xlu0 %4854, %v441_v40  }
  0x39   :  { %4665 = vmatprep.mubr.msk.bf16.mxu0 %vm4985_vm1, %v7068_v0 }
  0x3b   :  { %846 = vperm.xlu1 %4855, %v706_v41  }
  0x3c   :  { %851 = vperm.xlu0 %4854, %v707_v42  }
  0x40   :  { %4666 = vmatmul.mubr.msk.bf16.gmra.mrb[28].mxu0 %vm168_vm2, %v4863_v38 }
  0x41   :  { %4669 = vmatprep.mubr.msk.bf16.mxu0 %vm4985_vm1, %v7068_v0 }
  0x48   :  { %4670 = vmatmul.mubr.msk.bf16.gmra.mrb[32].mxu0 %vm168_vm2, %v4864_v43 }
  0x49   :  { %4673 = vmatprep.mubr.msk.bf16.mxu0 %vm4985_vm1, %v7068_v0 }
  0x50   :  { %4674 = vmatmul.mubr.msk.bf16.gmra.mrb[36].mxu0 %vm168_vm2, %v4865_v44 }
  0x51   :  { %4677 = vmatprep.mubr.msk.bf16.mxu0 %vm4985_vm1, %v7068_v0 }
  0x58   :  { %4678 = vmatmul.mubr.msk.bf16.gmra.mrb[40].mxu0 %vm168_vm2, %v4866_v45 }
  0x59   :  { %4681 = vmatprep.mubr.msk.bf16.mxu0 %vm4985_vm1, %v7068_v0 }
  0x60   :  { %4682 = vmatmul.mubr.msk.bf16.gmra.mrb[44].mxu0 %vm168_vm2, %v4867_v46 }
  0x61   :  { %4685 = vmatprep.mubr.msk.bf16.mxu0 %vm4985_vm1, %v7068_v0 }
  0x68   :  { %4686 = vmatmul.mubr.msk.bf16.gmra.mrb[48].mxu0 %vm168_vm2, %v4868_v47 }
  0x69   :  { %4689 = vmatprep.mubr.msk.bf16.mxu0 %vm4985_vm1, %v7068_v0 }
  0x70   :  { %4690 = vmatmul.mubr.msk.bf16.gmra.mrb[52].mxu0 %vm168_vm2, %v4869_v48 }
  0x71   :  { %4693 = vmatprep.mubr.msk.bf16.mxu0 %vm4985_vm1, %v7068_v0 }
  0x78   :  { %4694 = vmatmul.mubr.msk.bf16.gmra.mrb[56].mxu0 %vm168_vm2, %v4870_v49 }
  0x79   :  { %4697 = vmatprep.mubr.msk.bf16.mxu0 %vm4985_vm1, %v7068_v0 }
  0x80   :  { %4698 = vmatmul.mubr.msk.bf16.gmra.mrb[60].mxu0 %vm168_vm2, %v4871_v50 }
  0x81   :  { %4701 = vmatprep.mubr.msk.bf16.mxu0 %vm4985_vm1, %v7068_v0 }
  0x82   :  { %v526_v1 = vpop.permute.xlu1 %525 }
  0x83   :  { %v516_v4 = vpop.permute.xlu0 %515 }
  0x86   :  { %v782_v5 = vpop.permute.xlu1 %781 }
  0x87   :  { %v521_v8 = vpop.permute.xlu0 %520 }
  0x88   :  { %4702 = vmatmul.mubr.msk.bf16.gmra.mrb[64].mxu0 %vm168_vm2, %v4872_v51 }
  0x89   :  { %4705 = vmatprep.mubr.msk.bf16.mxu0 %vm4985_vm1, %v7068_v0 }
  0x8a   :  { %v792_v11 = vpop.permute.xlu1 %791 }
  0x8b   :  { %v787_v12 = vpop.permute.xlu0 %786 }
  0x8e   :  { %v536_v17 = vpop.permute.xlu1 %535 }
  0x8f   :  { %v531_v18 = vpop.permute.xlu0 %530 }
  0x90   :  { %4706 = vmatmul.mubr.msk.bf16.gmra.mrb[68].mxu0 %vm168_vm2, %v4873_v52 }
  0x91   :  { %4709 = vmatprep.mubr.msk.bf16.mxu0 %vm4985_vm1, %v7068_v0 }
  0x92   :  { %v802_v21 = vpop.permute.xlu1 %801 }
  0x93   :  { %v797_v24 = vpop.permute.xlu0 %796 }
  0x96   :  { %v546_v25 = vpop.permute.xlu1 %545 }
  0x97   :  { %v541_v29 = vpop.permute.xlu0 %540 }
  0x98   :  { %4710 = vmatmul.mubr.msk.bf16.gmra.mrb[72].mxu0 %vm168_vm2, %v4874_v53 }
  0x99   :  { %4753 = vmatprep.mubr.msk.bf16.mxu0 %vm4985_vm1, %v7068_v0 }
  0x9a   :  { %v812_v36 = vpop.permute.xlu1 %811 }
  0x9b   :  { %v807_v38 = vpop.permute.xlu0 %806 }
  0x9e   :  { %v556_v49 = vpop.permute.xlu1 %555 }
  0x9f   :  { %v551_v52 = vpop.permute.xlu0 %550 }
  0xdb   :  { %v5250_v54 = vpop.f32.mrb[0].mxu0 }
  0xdc   :  { %v4639_v55 = vpop.f32.mrb[1].mxu0 }
  0xdd   :  { %v5252_v56 = vpop.f32.mrb[2].mxu0 }
  0xde   :  { %v4640_v57 = vpop.f32.mrb[3].mxu0 }
  0xe3   :  { %v5254_v58 = vpop.f32.mrb[4].mxu0 }
  0xe4   :  { %v4643_v59 = vpop.f32.mrb[5].mxu0 }
  0xe5   :  { %v5256_v60 = vpop.f32.mrb[6].mxu0 }
  0xe6   :  { %v4644_v61 = vpop.f32.mrb[7].mxu0 }
  0xeb   :  { %v5258_v62 = vpop.f32.mrb[8].mxu0 }
  0xec   :  { %v4647_v63 = vpop.f32.mrb[9].mxu0 }
  0xed   :  { %v5260_v2 = vpop.f32.mrb[10].mxu0 }
  0xee   :  { %v4648_v3 = vpop.f32.mrb[11].mxu0 }
  0xef   :  { %v822_v3 = vpop.permute.xlu1 %821 }
  0xf3   :  { %v5262_v6 = vpop.f32.mrb[12].mxu0 }
  0xf4   :  { %v4651_v7 = vpop.f32.mrb[13].mxu0 }
  0xf5   :  { %v5264_v9 = vpop.f32.mrb[14].mxu0 }
  0xf6   :  { %v4652_v10 = vpop.f32.mrb[15].mxu0 }
  0xfb   :  { %v5266_v13 = vpop.f32.mrb[16].mxu0 }
  0xfc   :  { %v4655_v14 = vpop.f32.mrb[17].mxu0 }
  0xfd   :  { %v5268_v15 = vpop.f32.mrb[18].mxu0 }
  0xfe   :  { %v4656_v16 = vpop.f32.mrb[19].mxu0 }
 0x103   :  { %v5270_v19 = vpop.f32.mrb[20].mxu0 }
 0x104   :  { %v4659_v20 = vpop.f32.mrb[21].mxu0 }
 0x105   :  { %v5272_v22 = vpop.f32.mrb[22].mxu0  ;;  %v566_v20 = vpop.permute.xlu1 %565 }
 0x106   :  { %v4660_v23 = vpop.f32.mrb[23].mxu0 }
 0x10b   :  { %v312_v26 = vpop.f32.mrb[24].mxu0 }
 0x10c   :  { %v655_v27 = vmul.f32 %v516_v4, %v312_v26  ;;  %v4663_v28 = vpop.f32.mrb[25].mxu0 }
 0x10d   :  { %v315_v30 = vpop.f32.mrb[26].mxu0 }
 0x10e   :  { %v921_v31 = vadd.f32 %v782_v5, %v655_v27  ;;  %v656_v32 = vmul.f32 %v521_v8, %v315_v30  ;;  %v4664_v33 = vpop.f32.mrb[27].mxu0 }
 0x110   :  { %v5274_v34 = vmax.f32 %v921_v31, 0.0  ;;  %v922_v35 = vadd.f32 %v787_v12, %v656_v32 }
 0x112   :  { %v5276_v37 = vmax.f32 %v922_v35, 0.0  ;;  %1098 = vrot.lane.b32.xlu0 %v5274_v34, %s4987_s3  ;;  %v1001_v42 = vrot.slane %v5274_v34, 4 }
 0x113   :  { %v320_v39 = vpop.f32.mrb[28].mxu0 }
 0x114   :  { %v657_v40 = vmul.f32 %v526_v1, %v320_v39  ;;  %1100 = vrot.lane.b32.xlu1 %v5276_v37, %s4987_s3  ;;  %v4667_v41 = vpop.f32.mrb[29].mxu0  ;;  %v1002_v43 = vrot.slane %v5276_v37, 4  ;;  %v832_v39 = vpop.permute.xlu1 %831 }
 0x115   :  { %v323_v44 = vpop.f32.mrb[30].mxu0 }
 0x116   :  { %v923_v45 = vadd.f32 %v792_v11, %v657_v40  ;;  %v658_v46 = vmul.f32 %v531_v18, %v323_v44  ;;  %v4668_v47 = vpop.f32.mrb[31].mxu0  ;;  %v1003_v48 = vsel %vm1000_vm3, %v1001_v42, %v1002_v43  ;;  %v817_v11 = vpop.permute.xlu0 %816 }
 0x117   :  { %1026 = vrot.lane.b32.xlu0 %v1003_v48, %s4988_s20 }
 0x118   :  { %v5286_v50 = vmax.f32 %v923_v45, 0.0  ;;  %v924_v51 = vadd.f32 %v797_v24, %v658_v46 }
 0x11a   :  { %v5288_v53 = vmax.f32 %v924_v51, 0.0  ;;  %v1004_v57 = vrot.slane %v5286_v50, 4 }
 0x11b   :  { %1102 = vrot.lane.b32.xlu0 %v5286_v50, %s4987_s3  ;;  %v328_v55 = vpop.f32.mrb[32].mxu0 }
 0x11c   :  { %v659_v59 = vmul.f32 %v536_v17, %v328_v55  ;;  %1104 = vrot.lane.b32.xlu1 %v5288_v53, %s4987_s3  ;;  %v4671_v61 = vpop.f32.mrb[33].mxu0  ;;  %v1006_v63 = vrot.slane %v5288_v53, 4  ;;  %v1255_v1 = vpack.c.bf16 %v5288_v53, %v5286_v50  ;;  %v1005_v12 = vsel %vm1000_vm3, %v1002_v43, %v1004_v57  ;;  %v4880_v50 = vld [vmem:[%s7062_s6 + $0x18] ss:$12 sps:$4 sm:$0xff]  }
 0x11d   :  { %v331_v4 = vpop.f32.mrb[34].mxu0 }
 0x11e   :  { %v925_v5 = vadd.f32 %v802_v21, %v659_v59  ;;  %v660_v7 = vmul.f32 %v541_v29, %v331_v4  ;;  %v4672_v8 = vpop.f32.mrb[35].mxu0  ;;  %v1007_v10 = vsel %vm1000_vm3, %v1004_v57, %v1006_v63  ;;  %v561_v29 = vpop.permute.xlu0 %560 }
 0x11f   :  { %1030 = vrot.lane.b32.xlu0 %v1007_v10, %s4988_s20  ;;  %v576_v57 = vpop.permute.xlu1 %575 }
 0x120   :  { %v963_v14 = vmax.f32 %v925_v5, 0.0  ;;  %v926_v16 = vadd.f32 %v807_v38, %v660_v7  ;;  %1028 = vrot.lane.b32.xlu1 %v1005_v12, %s4988_s20 }
 0x122   :  { %v964_v17 = vmax.f32 %v926_v16, 0.0  ;;  %v1008_v18 = vrot.slane %v963_v14, 4  ;;  %v827_v42 = vpop.permute.xlu0 %826 }
 0x123   :  { %1106 = vrot.lane.b32.xlu0 %v963_v14, %s4987_s3  ;;  %v336_v23 = vpop.f32.mrb[36].mxu0  ;;  %v842_v12 = vpop.permute.xlu1 %841 }
 0x124   :  { %v661_v21 = vmul.f32 %v546_v25, %v336_v23  ;;  %1108 = vrot.lane.b32.xlu1 %v964_v17, %s4987_s3  ;;  %v4675_v24 = vpop.f32.mrb[37].mxu0  ;;  %v1256_v26 = vpack.c.bf16 %v964_v17, %v963_v14  ;;  %v1010_v27 = vrot.slane %v964_v17, 4  ;;  %v1009_v28 = vsel %vm1000_vm3, %v1006_v63, %v1008_v18 }
 0x125   :  { %v339_v30 = vpop.f32.mrb[38].mxu0 }
 0x126   :  { %v927_v31 = vadd.f32 %v812_v36, %v661_v21  ;;  %v662_v32 = vmul.f32 %v551_v52, %v339_v30  ;;  %v4676_v33 = vpop.f32.mrb[39].mxu0  ;;  %4363 = vmatprep.subr.bf16.mxu1 %v1256_v26  ;;  %v1011_v35 = vsel %vm1000_vm3, %v1008_v18, %v1010_v27  ;;  %v571_v63 = vpop.permute.xlu0 %570 }
 0x127   :  { %1034 = vrot.lane.b32.xlu0 %v1011_v35, %s4988_s20 }
 0x128   :  { %v5307_v38 = vmax.f32 %v927_v31, 0.0  ;;  %v928_v25 = vadd.f32 %v817_v11, %v662_v32  ;;  %1032 = vrot.lane.b32.xlu1 %v1009_v28, %s4988_s20  ;;  %v581_v28 = vpop.permute.xlu1 %580 }
 0x12a   :  { %v5310_v40 = vmax.f32 %v928_v25, 0.0  ;;  %v1012_v41 = vrot.slane %v5307_v38, 4  ;;  %v837_v21 = vpop.permute.xlu0 %836 }
 0x12b   :  { %v344_v43 = vpop.f32.mrb[40].mxu0 }
 0x12c   :  { %v663_v36 = vmul.f32 %v556_v49, %v344_v43  ;;  %1110 = vrot.lane.b32.xlu1 %v5307_v38, %s4987_s3  ;;  %1112 = vrot.lane.b32.xlu0 %v5310_v40, %s4987_s3  ;;  %v4679_v44 = vpop.f32.mrb[41].mxu0  ;;  %v1013_v45 = vsel %vm1000_vm3, %v1010_v27, %v1012_v41  ;;  %v1014_v46 = vrot.slane %v5310_v40, 4  ;;  %v1257_v47 = vpack.c.bf16 %v5310_v40, %v5307_v38 }
 0x12d   :  { %v347_v48 = vpop.f32.mrb[42].mxu0 }
 0x12e   :  { %v929_v51 = vadd.f32 %v822_v3, %v663_v36  ;;  %v664_v52 = vmul.f32 %v561_v29, %v347_v48  ;;  %v4680_v55 = vpop.f32.mrb[43].mxu0  ;;  %v1015_v49 = vsel %vm1000_vm3, %v1012_v41, %v1014_v46  ;;  %v586_v36 = vpop.permute.xlu0 %585 }
 0x130   :  { %v5322_v59 = vmax.f32 %v929_v51, 0.0  ;;  %v930_v61 = vadd.f32 %v827_v42, %v664_v52  ;;  %1036 = vrot.lane.b32.xlu1 %v1013_v45, %s4988_s20  ;;  %1038 = vrot.lane.b32.xlu0 %v1015_v49, %s4988_s20  ;;  %v847_v45 = vpop.permute.xlu1 %846 }
 0x132   :  { %v5326_v4 = vmax.f32 %v930_v61, 0.0  ;;  %v1016_v5 = vrot.slane %v5322_v59, 4  ;;  %v443_v61 = vld [vmem:[%s7060_s4 + $0xe0] sm:$0xff] }
 0x133   :  { %v352_v7 = vpop.f32.mrb[44].mxu0 }
 0x134   :  { %v665_v8 = vmul.f32 %v566_v20, %v352_v7  ;;  %v4683_v3 = vpop.f32.mrb[45].mxu0  ;;  %v1017_v10 = vsel %vm1000_vm3, %v1014_v46, %v1016_v5  ;;  %v1018_v11 = vrot.slane %v5326_v4, 4 }
 0x135   :  { %1040 = vrot.lane.b32.xlu1 %v1017_v10, %s4988_s20  ;;  %v355_v14 = vpop.f32.mrb[46].mxu0 }
 0x136   :  { %v931_v16 = vadd.f32 %v832_v39, %v665_v8  ;;  %v666_v17 = vmul.f32 %v571_v63, %v355_v14  ;;  %v4684_v18 = vpop.f32.mrb[47].mxu0  ;;  %v1019_v23 = vsel %vm1000_vm3, %v1016_v5, %v1018_v11  ;;  %v442_v8 = vld [vmem:[%s7060_s4 + $0xd8] sm:$0xff] }
 0x137   :  { %1042 = vrot.lane.b32.xlu0 %v1019_v23, %s4988_s20 }
 0x138   :  { %v5334_v24 = vmax.f32 %v931_v16, 0.0  ;;  %v932_v20 = vadd.f32 %v837_v21, %v666_v17  ;;  %v708_v16 = vld [vmem:[%s7061_s5 + $0xd8] sm:$0xff]  ;;  %v445_v21 = vld [vmem:[%s7060_s4 + $0xf0] sm:$0xff] }
 0x13a   :  { %v5336_v26 = vmax.f32 %v932_v20, 0.0  ;;  %v1020_v27 = vrot.slane %v5334_v24, 4 }
 0x13b   :  { %v360_v29 = vpop.f32.mrb[48].mxu0 }
 0x13c   :  { %v667_v30 = vmul.f32 %v576_v57, %v360_v29  ;;  %v4687_v31 = vpop.f32.mrb[49].mxu0  ;;  %v1021_v32 = vsel %vm1000_vm3, %v1018_v11, %v1020_v27  ;;  %v1022_v33 = vrot.slane %v5336_v26, 4  ;;  %v1259_v35 = vpack.c.bf16 %v5336_v26, %v5334_v24  ;;  %v852_v57 = vpop.permute.xlu0 %851  ;;  %v709_v11 = vld [vmem:[%s7061_s5 + $0xe0] sm:$0xff]  ;;  %v711_v29 = vld [vmem:[%s7061_s5 + $0xf0] sm:$0xff] }
 0x13d   :  { %1044 = vrot.lane.b32.xlu1 %v1021_v32, %s4988_s20  ;;  %v363_v25 = vpop.f32.mrb[50].mxu0  ;;  %v710_v31 = vld [vmem:[%s7061_s5 + $0xe8] sm:$0xff]  ;;  %v447_v32 = vld [vmem:[%s7060_s4 + $0x100] sm:$0xff] }
 0x13e   :  { %v933_v39 = vadd.f32 %v842_v12, %v667_v30  ;;  %v668_v41 = vmul.f32 %v581_v28, %v363_v25  ;;  %v4688_v42 = vpop.f32.mrb[51].mxu0  ;;  %v1023_v43 = vsel %vm1000_vm3, %v1020_v27, %v1022_v33  ;;  %v444_v27 = vld [vmem:[%s7060_s4 + $0xe8] sm:$0xff]  ;;  %v4877_v30 = vld [vmem:[%s7062_s6 + $0x4] ss:$12 sps:$4 sm:$0xff]   ;;  %v446_v25 = vld [vmem:[%s7060_s4 + $0xf8] sm:$0xff] }
 0x13f   :  { %1046 = vrot.lane.b32.xlu0 %v1023_v43, %s4988_s20  ;;  %1425 = vmatprep.mubr.bf16.mxu1 %v4877_v30  ;;  %v713_v43 = vld [vmem:[%s7061_s5 + $0x100] sm:$0xff] }
 0x140   :  { %v5346_v44 = vmax.f32 %v933_v39, 0.0  ;;  %v934_v46 = vadd.f32 %v847_v45, %v668_v41  ;;  %v449_v45 = vld [vmem:[%s7060_s4 + $0x110] sm:$0xff] }
 0x142   :  { %v1024_v48 = vrot.slane %v5346_v44, 4  ;;  %v5357_v5 = vmax.f32 %v934_v46, 0.0 }
 0x143   :  { %v368_v51 = vpop.f32.mrb[52].mxu0 }
 0x144   :  { %v669_v52 = vmul.f32 %v586_v36, %v368_v51  ;;  %1050 = vrot.lane.b32.xlu0 %v1024_v48, %s4988_s20  ;;  %v1025_v55 = vsel %vm1000_vm3, %v1022_v33, %v1024_v48  ;;  %v4691_v49 = vpop.f32.mrb[53].mxu0  ;;  %v1907_v12 = vrot.slane %v5357_v5, 4  ;;  %v712_v36 = vld [vmem:[%s7061_s5 + $0xf8] sm:$0xff]  ;;  %v448_v48 = vld [vmem:[%s7060_s4 + $0x108] sm:$0xff] }
 0x145   :  { %1048 = vrot.lane.b32.xlu1 %v1025_v55, %s4988_s20  ;;  %v5355_v63 = vpop.f32.mrb[54].mxu0  ;;  %v715_v49 = vld [vmem:[%s7061_s5 + $0x110] sm:$0xff] }
 0x146   :  { %v935_v7 = vadd.f32 %v852_v57, %v669_v52  ;;  %v4692_v3 = vpop.f32.mrb[55].mxu0  ;;  %v714_v57 = vld [vmem:[%s7061_s5 + $0x108] sm:$0xff] }
 0x148   :  { %v5362_v10 = vmax.f32 %v935_v7, 0.0  ;;  %595 = vperm.xlu0 %4854, %v443_v61   ;;  %v451_v61 = vld [vmem:[%s7060_s4 + $0x120] sm:$0xff] }
 0x149   :  { %590 = vperm.xlu1 %4855, %v442_v8   ;;  %v450_v8 = vld [vmem:[%s7060_s4 + $0x118] sm:$0xff] }
 0x14a   :  { %v1908_v14 = vrot.slane %v5362_v10, 4 }
 0x14b   :  { %v5372_v17 = vpop.f32.mrb[56].mxu0 }
 0x14c   :  { %861 = vperm.xlu0 %4854, %v709_v11   ;;  %v4695_v18 = vpop.f32.mrb[57].mxu0  ;;  %v5379_v23 = vsel %vm1000_vm3, %v1907_v12, %v1908_v14 }
 0x14d   :  { %856 = vperm.xlu1 %4855, %v708_v16   ;;  %v5384_v20 = vpop.f32.mrb[58].mxu0  ;;  %v717_v18 = vld [vmem:[%s7061_s5 + $0x120] sm:$0xff] }
 0x14e   :  { %v4696_v28 = vpop.f32.mrb[59].mxu0 }
 0x150   :  { %605 = vperm.xlu0 %4854, %v445_v21   ;;  %v716_v21 = vld [vmem:[%s7061_s5 + $0x118] sm:$0xff] }
 0x151   :  { %600 = vperm.xlu1 %4855, %v444_v27   ;;  %v718_v27 = vld [vmem:[%s7061_s5 + $0x128] sm:$0xf] }
 0x153   :  { %v5401_v33 = vpop.f32.mrb[60].mxu0 }
 0x154   :  { %871 = vperm.xlu0 %4854, %v711_v29   ;;  %v4699_v39 = vpop.f32.mrb[61].mxu0  ;;  %v452_v29 = vld [vmem:[%s7060_s4 + $0x128] sm:$0xf] }
 0x155   :  { %866 = vperm.xlu1 %4855, %v710_v31   ;;  %v5406_v41 = vpop.f32.mrb[62].mxu0 }
 0x156   :  { %v4700_v42 = vpop.f32.mrb[63].mxu0 }
 0x158   :  { %615 = vperm.xlu0 %4854, %v447_v32  }
 0x159   :  { %610 = vperm.xlu1 %4855, %v446_v25  }
 0x15b   :  { %v5417_v46 = vpop.f32.mrb[64].mxu0 }
 0x15c   :  { %881 = vperm.xlu0 %4854, %v713_v43   ;;  %v4703_v51 = vpop.f32.mrb[65].mxu0 }
 0x15d   :  { %876 = vperm.xlu1 %4855, %v712_v36   ;;  %v5422_v52 = vpop.f32.mrb[66].mxu0 }
 0x15e   :  { %v4704_v55 = vpop.f32.mrb[67].mxu0 }
 0x160   :  { %625 = vperm.xlu0 %4854, %v449_v45   ;;  %v5477_v45 = vld [vmem:[%s7063_s1] ss:$0 sm:$0xff] }
 0x161   :  { %620 = vperm.xlu1 %4855, %v448_v48  }
 0x163   :  { %v5433_v7 = vpop.f32.mrb[68].mxu0 }
 0x164   :  { %891 = vperm.xlu0 %4854, %v715_v49   ;;  %v4707_v3 = vpop.f32.mrb[69].mxu0 }
 0x165   :  { %886 = vperm.xlu1 %4855, %v714_v57   ;;  %v5438_v11 = vpop.f32.mrb[70].mxu0 }
 0x166   :  { %v4708_v16 = vpop.f32.mrb[71].mxu0 }
 0x168   :  { %635 = vperm.xlu0 %4854, %v451_v61  }
 0x169   :  { %630 = vperm.xlu1 %4855, %v450_v8  }
 0x16b   :  { %v5449_v28 = vpop.f32.mrb[72].mxu0 }
 0x16c   :  { %901 = vperm.xlu0 %4854, %v717_v18   ;;  %v4711_v30 = vpop.f32.mrb[73].mxu0 }
 0x16d   :  { %896 = vperm.xlu1 %4855, %v716_v21   ;;  %v5454_v31 = vpop.f32.mrb[74].mxu0 }
 0x16e   :  { %v4712_v32 = vpop.f32.mrb[75].mxu0 }
 0x170   :  { %906 = vperm.xlu0 %4854, %v718_v27  }
 0x171   :  { %640 = vperm.xlu1 %4855, %v452_v29  }
 0x174   :  { %1116 = vrot.lane.b32.xlu0 %v5326_v4, %s4987_s3 }
 0x175   :  { %1114 = vrot.lane.b32.xlu1 %v5322_v59, %s4987_s3 }
 0x178   :  { %1120 = vrot.lane.b32.xlu0 %v5336_v26, %s4987_s3 }
 0x179   :  { %1118 = vrot.lane.b32.xlu1 %v5334_v24, %s4987_s3 }
 0x17c   :  { %1777 = vrot.lane.b32.xlu0 %v5357_v5, %s4988_s20 }
 0x17d   :  { %1122 = vrot.lane.b32.xlu1 %v5346_v44, %s4987_s3 }
 0x180   :  { %1842 = vrot.lane.b32.xlu0 %v5357_v5, %s4987_s3 }
 0x181   :  { %1779 = vrot.lane.b32.xlu1 %v5362_v10, %s4988_s20 }
 0x184   :  { %v1099_v25 = vpop.permute.xlu0 %1098 }
 0x185   :  { %1844 = vrot.lane.b32.xlu1 %v5362_v10, %s4987_s3  ;;  %v4884_v10 = vld [vmem:[%s7062_s6 + $0x4c] ss:$12 sps:$4 sm:$0xff]  }
 0x186   :  { %v1101_v42 = vpop.permute.xlu1 %1100 }
 0x189   :  { %v1027_v39 = vpop.permute.xlu0 %1026 }
 0x18a   :  { %v1066_v48 = vsel %vm1065_vm4, 0.0, %v1027_v39  ;;  %v1139_v39 = vsel %vm1137_vm5, %v1101_v42, 0.0 }
 0x18b   :  { %v1085_v57 = vmul.f32 %v5477_v45, %v1066_v48  ;;  %v5494_v48 = vld [vmem:[%s7064_s2] ss:$0 sm:$0xff] }
 0x18d   :  { %v1103_v43 = vpop.permute.xlu0 %1102 }
 0x18e   :  { %v1105_v36 = vpop.permute.xlu1 %1104 }
 0x191   :  { %v1031_v51 = vpop.permute.xlu0 %1030 }
 0x192   :  { %v1029_v55 = vpop.permute.xlu1 %1028  ;;  %v1068_v18 = vsel %vm1065_vm4, 0.0, %v1031_v51  ;;  %v1138_v51 = vsel %vm1137_vm5, %v1099_v25, 0.0 }
 0x193   :  { %v1067_v49 = vsel %vm1065_vm4, 0.0, %v1029_v55  ;;  %v1087_v30 = vmul.f32 %v5477_v45, %v1068_v18 }
 0x194   :  { %v1086_v61 = vmul.f32 %v5477_v45, %v1067_v49  ;;  %v1158_v49 = vmul.f32 %v5494_v48, %v1139_v39 }
 0x195   :  { %v1107_v8 = vpop.permute.xlu0 %1106 }
 0x196   :  { %v1109_v3 = vpop.permute.xlu1 %1108  ;;  %v1248_v16 = vpack.c.bf16 %v1086_v61, %v1085_v57  ;;  %v1157_v57 = vmul.f32 %v5494_v48, %v1138_v51 }
 0x198   :  { %4364 = vmatpush3.bf16.msra.mxu1 %v1248_v16 }
 0x199   :  { %v1035_v21 = vpop.permute.xlu0 %1034  ;;  %4365 = vmatprep.subr.bf16.mxu1 %v1257_v47  ;;  %v1258_v47 = vpack.c.bf16 %v5326_v4, %v5322_v59  ;;  %v1140_v59 = vsel %vm1137_vm5, %v1103_v43, 0.0  ;;  %v1141_v4 = vsel %vm1137_vm5, %v1105_v36, 0.0 }
 0x19a   :  { %v1033_v27 = vpop.permute.xlu1 %1032  ;;  %v1070_v42 = vsel %vm1065_vm4, 0.0, %v1035_v21 }
 0x19b   :  { %v1069_v29 = vsel %vm1065_vm4, 0.0, %v1033_v27  ;;  %v1184_v27 = vrot.slane %v1158_v49, 4  ;;  %v1089_v25 = vmul.f32 %v5477_v45, %v1070_v42  ;;  %v1160_v49 = vmul.f32 %v5494_v48, %v1141_v4 }
 0x19c   :  { %v1088_v32 = vmul.f32 %v5477_v45, %v1069_v29 }
 0x19e   :  { %v1111_v55 = vpop.permute.xlu1 %1110  ;;  %v1113_v38 = vpop.permute.xlu0 %1112  ;;  %v1249_v40 = vpack.c.bf16 %v1088_v32, %v1087_v30  ;;  %v1183_v30 = vrot.slane %v1157_v57, 4 }
 0x1a0   :  { %4366 = vmatpush3.bf16.msra.mxu1 %v1249_v40  ;;  %v1185_v40 = vsel %vm1000_vm3, %v1183_v30, %v1184_v27 }
 0x1a1   :  { %4367 = vmatprep.subr.bf16.mxu1 %v1258_v47  ;;  %v1159_v47 = vmul.f32 %v5494_v48, %v1140_v59 }
 0x1a2   :  { %v1037_v61 = vpop.permute.xlu1 %1036  ;;  %v1039_v18 = vpop.permute.xlu0 %1038 }
 0x1a3   :  { %v1071_v16 = vsel %vm1065_vm4, 0.0, %v1037_v61  ;;  %v1072_v32 = vsel %vm1065_vm4, 0.0, %v1039_v18  ;;  %v1260_v61 = vpack.c.bf16 %v1185_v40, %v5346_v44  ;;  %v1188_v18 = vrot.slane %v1160_v49, 4 }
 0x1a4   :  { %v1090_v29 = vmul.f32 %v5477_v45, %v1071_v16  ;;  %v1091_v42 = vmul.f32 %v5477_v45, %v1072_v32  ;;  %v1186_v16 = vrot.slane %v1159_v47, 4 }
 0x1a6   :  { %v1250_v39 = vpack.c.bf16 %v1090_v29, %v1089_v25  ;;  %v1142_v25 = vsel %vm1137_vm5, %v1107_v8, 0.0  ;;  %v1143_v29 = vsel %vm1137_vm5, %v1109_v3, 0.0  ;;  %v1187_v8 = vsel %vm1000_vm3, %v1184_v27, %v1186_v16 }
 0x1a7   :  { %v1041_v51 = vpop.permute.xlu1 %1040  ;;  %v1161_v4 = vmul.f32 %v5494_v48, %v1142_v25  ;;  %v1162_v24 = vmul.f32 %v5494_v48, %v1143_v29  ;;  %v1189_v3 = vsel %vm1000_vm3, %v1186_v16, %v1188_v18 }
 0x1a8   :  { %v1073_v21 = vsel %vm1065_vm4, 0.0, %v1041_v51  ;;  %4368 = vmatpush3.bf16.msra.mxu1 %v1250_v39  ;;  %v1144_v39 = vsel %vm1137_vm5, %v1111_v55, 0.0  ;;  %v1145_v51 = vsel %vm1137_vm5, %v1113_v38, 0.0  ;;  %v1261_v49 = vpack.c.bf16 %v1189_v3, %v1187_v8  ;;  %v4875_v3 = vld [vmem:[%s7062_s6] ss:$12 sps:$4 sm:$0xff]  }
 0x1a9   :  { %v1092_v57 = vmul.f32 %v5477_v45, %v1073_v21  ;;  %4369 = vmatprep.subr.bf16.mxu1 %v1259_v35  ;;  %v1043_v43 = vpop.permute.xlu0 %1042  ;;  %v1190_v40 = vrot.slane %v1161_v4, 4  ;;  %v1192_v47 = vrot.slane %v1162_v24, 4 }
 0x1aa   :  { %v1074_v30 = vsel %vm1065_vm4, 0.0, %v1043_v43 }
 0x1ab   :  { %v1251_v36 = vpack.c.bf16 %v1092_v57, %v1091_v42  ;;  %v1093_v35 = vmul.f32 %v5477_v45, %v1074_v30  ;;  %v1163_v42 = vmul.f32 %v5494_v48, %v1144_v39  ;;  %v5532_v57 = vmul.f32 %v5494_v48, %v1145_v51  ;;  %v4878_v39 = vld [vmem:[%s7062_s6 + $0x1c] ss:$12 sps:$4 sm:$0xff]  }
 0x1ac   :  { %v1191_v16 = vsel %vm1000_vm3, %v1188_v18, %v1190_v40  ;;  %v1193_v25 = vsel %vm1000_vm3, %v1190_v40, %v1192_v47 }
 0x1ad   :  { %4370 = vmatpush3.bf16.msra.mxu1 %v1251_v36  ;;  %v1194_v29 = vrot.slane %v1163_v42, 4  ;;  %v1196_v30 = vrot.slane %v5532_v57, 4  ;;  %v4157_v57 = vld [vmem:[%s7065_s7 + $0x68] sm:$0xff] }
 0x1ae   :  { %4371 = vmatprep.subr.bf16.mxu1 %v1260_v61 }
 0x1af   :  { %v1045_v59 = vpop.permute.xlu1 %1044  ;;  %v1197_v18 = vsel %vm1000_vm3, %v1194_v29, %v1196_v30 }
 0x1b0   :  { %v1075_v26 = vsel %vm1065_vm4, 0.0, %v1045_v59 }
 0x1b1   :  { %v1094_v44 = vmul.f32 %v5477_v45, %v1075_v26  ;;  %v1047_v32 = vpop.permute.xlu0 %1046  ;;  %v1262_v26 = vpack.c.bf16 %v1193_v25, %v1191_v16 }
 0x1b2   :  { %v1076_v43 = vsel %vm1065_vm4, 0.0, %v1047_v32 }
 0x1b3   :  { %v1252_v21 = vpack.c.bf16 %v1094_v44, %v1093_v35  ;;  %v1095_v59 = vmul.f32 %v5477_v45, %v1076_v43  ;;  %v1195_v44 = vsel %vm1000_vm3, %v1192_v47, %v1194_v29 }
 0x1b4   :  { %v1263_v8 = vpack.c.bf16 %v1197_v18, %v1195_v44 }
 0x1b5   :  { %4372 = vmatpush3.bf16.msra.mxu1 %v1252_v21 }
 0x1b6   :  { %4373 = vmatprep.subr.bf16.mxu1 %v1261_v49  ;;  %v1051_v27 = vpop.permute.xlu0 %1050 }
 0x1b7   :  { %v1078_v36 = vsel %vm1065_vm4, 0.0, %v1051_v27  ;;  %v1049_v61 = vpop.permute.xlu1 %1048 }
 0x1b8   :  { %v1097_v55 = vmul.f32 %v5477_v45, %v1078_v36  ;;  %v1077_v38 = vsel %vm1065_vm4, 0.0, %v1049_v61 }
 0x1b9   :  { %v1096_v4 = vmul.f32 %v5477_v45, %v1077_v38 }
 0x1ba   :  { %v1221_v35 = vsel %vm1000_vm3, %v1097_v55, %v5274_v34 }
 0x1bb   :  { %v1253_v24 = vpack.c.bf16 %v1096_v4, %v1095_v59  ;;  %v1254_v32 = vpack.c.bf16 %v5276_v37, %v1221_v35 }
 0x1bd   :  { %4374 = vmatpush3.bf16.msra.mxu1 %v1253_v24  ;;  %v4883_v24 = vld [vmem:[%s7062_s6 + $0x30] ss:$12 sps:$4 sm:$0xff]  }
 0x1be   :  { %4375 = vmatprep.subr.bf16.mxu1 %v1262_v26 }
 0x1c1   :  { %4376 = vmatpush3.bf16.msra.mxu1 %v1254_v32 }
 0x1c2   :  { %4377 = vmatprep.subr.bf16.mxu1 %v1263_v8 }
 0x1c5   :  { %4378 = vmatpush3.bf16.msra.mxu1 %v1255_v1  ;;  %v4881_v1 = vld [vmem:[%s7062_s6 + $0x34] ss:$12 sps:$4 sm:$0xff]  }
 0x1c6   :  { %4713 = vmatprep.subr.bf16.mxu1 %v7068_v0 }
 0x1c7   :  { %v596_v51 = vpop.permute.xlu0 %595 }
 0x1c8   :  { %v591_v21 = vpop.permute.xlu1 %590  ;;  %1426 = vmatmul.mubr.bf16.vlgmr.msra.gmra.mrb[0].mxu1 %v4875_v3  ;;  %v671_v37 = vmul.f32 %v596_v51, %v5372_v17 }
 0x1c9   :  { %1433 = vmatprep.mubr.bf16.mxu1 %v4878_v39  ;;  %v670_v40 = vmul.f32 %v591_v21, %v5355_v63 }
 0x1cb   :  { %v862_v47 = vpop.permute.xlu0 %861 }
 0x1cc   :  { %v937_v49 = vadd.f32 %v862_v47, %v671_v37  ;;  %v857_v42 = vpop.permute.xlu1 %856  ;;  %v4886_v47 = vld [vmem:[%s7062_s6 + $0x48] ss:$12 sps:$4 sm:$0xff]  }
 0x1cd   :  { %v936_v53 = vadd.f32 %v857_v42, %v670_v40  ;;  %v4887_v42 = vld [vmem:[%s7062_s6 + $0x64] ss:$12 sps:$4 sm:$0xff]  }
 0x1ce   :  { %v975_v43 = vmax.f32 %v937_v49, 0.0 }
 0x1cf   :  { %v974_v27 = vmax.f32 %v936_v53, 0.0  ;;  %v606_v36 = vpop.permute.xlu0 %605 }
 0x1d0   :  { %v1912_v61 = vrot.slane %v975_v43, 4  ;;  %v601_v55 = vpop.permute.xlu1 %600  ;;  %1783 = vrot.lane.b32.xlu1 %v975_v43, %s4988_s20  ;;  %1434 = vmatmul.mubr.bf16.gmra.mrb[4].mxu1 %v4880_v50  ;;  %v673_v17 = vmul.f32 %v606_v36, %v5401_v33 }
 0x1d1   :  { %v1910_v63 = vrot.slane %v974_v27, 4  ;;  %1781 = vrot.lane.b32.xlu0 %v974_v27, %s4988_s20  ;;  %1441 = vmatprep.mubr.bf16.mxu1 %v4881_v1  ;;  %v672_v38 = vmul.f32 %v601_v55, %v5384_v20 }
 0x1d3   :  { %v872_v16 = vpop.permute.xlu0 %871  ;;  %v5575_v25 = vsel %vm1000_vm3, %v1908_v14, %v1910_v63  ;;  %v5578_v29 = vsel %vm1000_vm3, %v1910_v63, %v1912_v61 }
 0x1d4   :  { %v939_v59 = vadd.f32 %v872_v16, %v673_v17  ;;  %v867_v4 = vpop.permute.xlu1 %866  ;;  %v1980_v33 = vpack.c.bf16 %v5578_v29, %v5575_v25  ;;  %v4908_v25 = vld [vmem:[%s7062_s6 + $0xb4] ss:$12 sps:$4 sm:$0xff]   ;;  %v4910_v29 = vld [vmem:[%s7062_s6 + $0xd0] ss:$12 sps:$4 sm:$0xff]  }
 0x1d5   :  { %v938_v26 = vadd.f32 %v867_v4, %v672_v38  ;;  %1846 = vrot.lane.b32.xlu0 %v974_v27, %s4987_s3 }
 0x1d6   :  { %v5586_v20 = vmax.f32 %v939_v59, 0.0  ;;  %v4889_v59 = vld [vmem:[%s7062_s6 + $0x60] ss:$12 sps:$4 sm:$0xff]  }
 0x1d7   :  { %v976_v14 = vmax.f32 %v938_v26, 0.0  ;;  %v616_v35 = vpop.permute.xlu0 %615 }
 0x1d8   :  { %v1916_v44 = vrot.slane %v5586_v20, 4  ;;  %v611_v18 = vpop.permute.xlu1 %610  ;;  %1442 = vmatmul.mubr.bf16.gmra.mrb[8].mxu1 %v4883_v24  ;;  %v675_v8 = vmul.f32 %v616_v35, %v5417_v46  ;;  %v4890_v24 = vld [vmem:[%s7062_s6 + $0x7c] ss:$12 sps:$4 sm:$0xff]  }
 0x1d9   :  { %v1914_v32 = vrot.slane %v976_v14, 4  ;;  %1848 = vrot.lane.b32.xlu0 %v975_v43, %s4987_s3  ;;  %1850 = vrot.lane.b32.xlu1 %v976_v14, %s4987_s3  ;;  %v674_v3 = vmul.f32 %v611_v18, %v5406_v41 }
 0x1da   :  { %1449 = vmatprep.mubr.bf16.mxu1 %v4884_v10 }
 0x1db   :  { %v882_v39 = vpop.permute.xlu0 %881  ;;  %v5597_v51 = vsel %vm1000_vm3, %v1912_v61, %v1914_v32  ;;  %v5600_v21 = vsel %vm1000_vm3, %v1914_v32, %v1916_v44  ;;  %v1246_v32 = vld [vmem:[%s7062_s6 + $0x90] sm:$0x33] }
 0x1dc   :  { %v941_v37 = vadd.f32 %v882_v39, %v675_v8  ;;  %v877_v40 = vpop.permute.xlu1 %876  ;;  %v1981_v49 = vpack.c.bf16 %v5600_v21, %v5597_v51  ;;  %v4161_v51 = vld [vmem:[%s7065_s7 + $0x88] sm:$0xff] }
 0x1dd   :  { %v940_v46 = vadd.f32 %v877_v40, %v674_v3  ;;  %1785 = vrot.lane.b32.xlu0 %v976_v14, %s4988_s20  ;;  %1787 = vrot.lane.b32.xlu1 %v5586_v20, %s4988_s20  ;;  %v4896_v21 = vld [vmem:[%s7062_s6 + $0x20] ss:$12 sps:$4 sm:$0xff]  }
 0x1de   :  { %v979_v41 = vmax.f32 %v941_v37, 0.0 }
 0x1df   :  { %v5613_v50 = vmax.f32 %v940_v46, 0.0  ;;  %v626_v53 = vpop.permute.xlu0 %625 }
 0x1e0   :  { %v1920_v1 = vrot.slane %v979_v41, 4  ;;  %v621_v43 = vpop.permute.xlu1 %620  ;;  %1450 = vmatmul.mubr.bf16.gmra.mrb[12].mxu1 %v4886_v47  ;;  %v677_v36 = vmul.f32 %v626_v53, %v5433_v7 }
 0x1e1   :  { %v1918_v27 = vrot.slane %v5613_v50, 4  ;;  %1789 = vrot.lane.b32.xlu0 %v5613_v50, %s4988_s20  ;;  %1791 = vrot.lane.b32.xlu1 %v979_v41, %s4988_s20  ;;  %v676_v61 = vmul.f32 %v621_v43, %v5422_v52 }
 0x1e2   :  { %1457 = vmatprep.mubr.bf16.mxu1 %v4887_v42 }
 0x1e3   :  { %v892_v55 = vpop.permute.xlu0 %891  ;;  %v5622_v63 = vsel %vm1000_vm3, %v1916_v44, %v1918_v27  ;;  %v5625_v17 = vsel %vm1000_vm3, %v1918_v27, %v1920_v1 }
 0x1e4   :  { %v943_v38 = vadd.f32 %v892_v55, %v677_v36  ;;  %v887_v16 = vpop.permute.xlu1 %886  ;;  %v1982_v4 = vpack.c.bf16 %v5625_v17, %v5622_v63  ;;  %v4174_v63 = vld [vmem:[%s7066_s8 + $0x88] sm:$0xff]  ;;  %v4162_v17 = vld [vmem:[%s7065_s7 + $0x90] sm:$0xff] }
 0x1e5   :  { %v942_v7 = vadd.f32 %v887_v16, %v676_v61  ;;  %1856 = vrot.lane.b32.xlu0 %v979_v41, %s4987_s3 }
 0x1e6   :  { %v981_v52 = vmax.f32 %v943_v38, 0.0 }
 0x1e7   :  { %v980_v26 = vmax.f32 %v942_v7, 0.0  ;;  %v636_v10 = vpop.permute.xlu0 %635 }
 0x1e8   :  { %v1924_v14 = vrot.slane %v981_v52, 4  ;;  %v631_v35 = vpop.permute.xlu1 %630  ;;  %1458 = vmatmul.mubr.bf16.gmra.mrb[16].mxu1 %v4889_v59  ;;  %v679_v18 = vmul.f32 %v636_v10, %v5449_v28  ;;  %v4892_v28 = vld [vmem:[%s7062_s6 + $0x78] ss:$12 sps:$4 sm:$0xff]  }
 0x1e9   :  { %v1922_v44 = vrot.slane %v980_v26, 4  ;;  %1793 = vrot.lane.b32.xlu1 %v980_v26, %s4988_s20  ;;  %1795 = vrot.lane.b32.xlu0 %v981_v52, %s4988_s20  ;;  %v678_v8 = vmul.f32 %v631_v35, %v5438_v11  ;;  %v4094_v11 = vcombine.high %v1246_v32, %v1246_v32 }
 0x1ea   :  { %1465 = vmatprep.mubr.bf16.mxu1 %v4890_v24 }
 0x1eb   :  { %v902_v3 = vpop.permute.xlu0 %901  ;;  %v5644_v39 = vsel %vm1000_vm3, %v1920_v1, %v1922_v44  ;;  %v5647_v37 = vsel %vm1000_vm3, %v1922_v44, %v1924_v14 }
 0x1ec   :  { %v945_v40 = vadd.f32 %v902_v3, %v679_v18  ;;  %v897_v47 = vpop.permute.xlu1 %896  ;;  %v1983_v46 = vpack.c.bf16 %v5647_v37, %v5644_v39 }
 0x1ed   :  { %v944_v41 = vadd.f32 %v897_v47, %v678_v8  ;;  %1858 = vrot.lane.b32.xlu1 %v980_v26, %s4987_s3  ;;  %v4093_v26 = vcombine.low %v1246_v32, %v1246_v32 }
 0x1ee   :  { %v983_v42 = vmax.f32 %v945_v40, 0.0 }
 0x1ef   :  { %v982_v53 = vmax.f32 %v944_v41, 0.0  ;;  %v907_v1 = vpop.permute.xlu0 %906 }
 0x1f0   :  { %v1928_v43 = vrot.slane %v983_v42, 4  ;;  %v641_v27 = vpop.permute.xlu1 %640  ;;  %1799 = vrot.lane.b32.xlu0 %v983_v42, %s4988_s20  ;;  %1466 = vmatmul.mubr.bf16.gmra.mrb[20].mxu1 %v4892_v28 }
 0x1f1   :  { %v1926_v36 = vrot.slane %v982_v53, 4  ;;  %v680_v61 = vmul.f32 %v641_v27, %v5454_v31  ;;  %1797 = vrot.lane.b32.xlu1 %v982_v53, %s4988_s20  ;;  %1473 = vmatprep.mubr.bf16.mxu1 %v4094_v11 }
 0x1f3   :  { %v946_v55 = vadd.f32 %v907_v1, %v680_v61  ;;  %v1117_v38 = vpop.permute.xlu0 %1116  ;;  %v5659_v16 = vsel %vm1000_vm3, %v1924_v14, %v1926_v36  ;;  %v5662_v59 = vsel %vm1000_vm3, %v1926_v36, %v1928_v43 }
 0x1f4   :  { %v1147_v7 = vsel %vm1137_vm5, %v1117_v38, 0.0  ;;  %v1115_v24 = vpop.permute.xlu1 %1114  ;;  %1852 = vrot.lane.b32.xlu0 %v5586_v20, %s4987_s3  ;;  %v1984_v31 = vpack.c.bf16 %v5662_v59, %v5659_v16 }
 0x1f5   :  { %v984_v10 = vmax.f32 %v946_v55, 0.0  ;;  %v1166_v35 = vmul.f32 %v5494_v48, %v1147_v7  ;;  %v1146_v44 = vsel %vm1137_vm5, %v1115_v24, 0.0  ;;  %1854 = vrot.lane.b32.xlu1 %v5613_v50, %s4987_s3 }
 0x1f6   :  { %v1165_v14 = vmul.f32 %v5494_v48, %v1146_v44 }
 0x1f7   :  { %v1930_v18 = vrot.slane %v984_v10, 4  ;;  %v1200_v8 = vrot.slane %v1166_v35, 4  ;;  %v1121_v3 = vpop.permute.xlu0 %1120 }
 0x1f8   :  { %v1198_v40 = vrot.slane %v1165_v14, 4  ;;  %v1149_v20 = vsel %vm1137_vm5, %v1121_v3, 0.0  ;;  %v1119_v32 = vpop.permute.xlu1 %1118  ;;  %1860 = vrot.lane.b32.xlu0 %v981_v52, %s4987_s3  ;;  %1474 = vmatmul.mubr.bf16.gmra.mrb[24].mxu1 %v4093_v26  ;;  %v4158_v14 = vld [vmem:[%s7065_s7 + $0x70] sm:$0xff] }
 0x1f9   :  { %v1168_v47 = vmul.f32 %v5494_v48, %v1149_v20  ;;  %v1148_v28 = vsel %vm1137_vm5, %v1119_v32, 0.0  ;;  %1801 = vrot.lane.b32.xlu1 %v984_v10, %s4988_s20  ;;  %4719 = vmatprep.mubr.msk.bf16.mxu1 %vm4985_vm1, %v7068_v0  ;;  %v5682_v50 = vsel %vm1000_vm3, %v1928_v43, %v1930_v18  ;;  %v4895_v20 = vld [vmem:[%s7062_s6 + $0x8] ss:$12 sps:$4 sm:$0xff]  }
 0x1fa   :  { %v1199_v41 = vsel %vm1000_vm3, %v1196_v30, %v1198_v40  ;;  %v1201_v11 = vsel %vm1000_vm3, %v1198_v40, %v1200_v8  ;;  %v1167_v52 = vmul.f32 %v5494_v48, %v1148_v28  ;;  %v4159_v40 = vld [vmem:[%s7065_s7 + $0x78] sm:$0xff] }
 0x1fb   :  { %v1204_v1 = vrot.slane %v1168_v47, 4  ;;  %v1264_v27 = vpack.c.bf16 %v1201_v11, %v1199_v41  ;;  %v1778_v24 = vpop.permute.xlu0 %1777  ;;  %v4171_v47 = vld [vmem:[%s7066_s8 + $0x70] sm:$0xff]  ;;  %v4172_v41 = vld [vmem:[%s7066_s8 + $0x78] sm:$0xff]  ;;  %v4160_v11 = vld [vmem:[%s7065_s7 + $0x80] sm:$0xff] }
 0x1fc   :  { %v1202_v36 = vrot.slane %v1167_v52, 4  ;;  %v1123_v61 = vpop.permute.xlu1 %1122  ;;  %1864 = vrot.lane.b32.xlu0 %v983_v42, %s4987_s3  ;;  %v1816_v18 = vsel %vm1065_vm4, 0.0, %v1778_v24  ;;  %v4897_v52 = vld [vmem:[%s7062_s6 + $0x38] ss:$12 sps:$4 sm:$0xff]   ;;  %v4179_v24 = vld [vmem:[%s7066_s8 + $0xb0] sm:$0xff] }
 0x1fd   :  { %v1150_v55 = vsel %vm1137_vm5, %v1123_v61, 0.0  ;;  %4714 = vmatpush3.bf16.msra.mxu1 %v1264_v27  ;;  %1862 = vrot.lane.b32.xlu1 %v982_v53, %s4987_s3  ;;  %v4170_v53 = vld [vmem:[%s7066_s8 + $0x68] sm:$0xff]  ;;  %v1829_v32 = vmul.f32 %v5477_v45, %v1816_v18  ;;  %v4176_v27 = vld [vmem:[%s7066_s8 + $0x98] sm:$0xff] }
 0x1fe   :  { %v1203_v30 = vsel %vm1000_vm3, %v1200_v8, %v1202_v36  ;;  %v1205_v43 = vsel %vm1000_vm3, %v1202_v36, %v1204_v1  ;;  %v1169_v38 = vmul.f32 %v5494_v48, %v1150_v55  ;;  %4715 = vmatprep.subr.bf16.mxu1 %v7068_v0  ;;  %v4164_v36 = vld [vmem:[%s7065_s7 + $0xa0] sm:$0xff]  ;;  %v4165_v61 = vld [vmem:[%s7065_s7 + $0xa8] sm:$0xff]  ;;  %v4898_v55 = vld [vmem:[%s7062_s6 + $0x50] ss:$12 sps:$4 sm:$0xff]  }
 0x1ff   :  { %v1265_v7 = vpack.c.bf16 %v1205_v43, %v1203_v30  ;;  %v4178_v30 = vld [vmem:[%s7066_s8 + $0xa8] sm:$0xff]  ;;  %v4166_v43 = vld [vmem:[%s7065_s7 + $0xb0] sm:$0xff]  ;;  %v4901_v18 = vld [vmem:[%s7062_s6 + $0x98] ss:$0 sps:$4 sm:$0x33]  }
 0x200   :  { %v1206_v42 = vrot.slane %v1169_v38, 4  ;;  %v1780_v26 = vpop.permute.xlu1 %1779  ;;  %2308 = vperm.xlu0 %4854, %v4157_v57   ;;  %v4177_v57 = vld [vmem:[%s7066_s8 + $0xa0] sm:$0xff]  ;;  %v4167_v38 = vld [vmem:[%s7065_s7 + $0xb8] sm:$0xff] }
 0x201   :  { %v1817_v35 = vsel %vm1065_vm4, 0.0, %v1780_v26  ;;  %4716 = vmatpush3.bf16.msra.mxu1 %v1265_v7  ;;  %1866 = vrot.lane.b32.xlu1 %v984_v10, %s4987_s3  ;;  %v4899_v7 = vld [vmem:[%s7062_s6 + $0x68] ss:$12 sps:$4 sm:$0xff]   ;;  %v4168_v26 = vld [vmem:[%s7065_s7 + $0xc0] sm:$0xff] }
 0x202   :  { %v1207_v44 = vsel %vm1000_vm3, %v1204_v1, %v1206_v42  ;;  %4717 = vmatprep.subr.bf16.mxu1 %v7068_v0  ;;  %v1830_v3 = vmul.f32 %v5477_v45, %v1817_v35  ;;  %v4175_v1 = vld [vmem:[%s7066_s8 + $0x90] sm:$0xff]  ;;  %v4169_v35 = vld [vmem:[%s7065_s7 + $0xc8] sm:$0xf] }
 0x203   :  { %v1266_v8 = vpack.c.bf16 %v1206_v42, %v1207_v44  ;;  %v4180_v42 = vld [vmem:[%s7066_s8 + $0xb8] sm:$0xff]  ;;  %v4181_v44 = vld [vmem:[%s7066_s8 + $0xc0] sm:$0xff] }
 0x204   :  { %2400 = vperm.xlu0 %4854, %v4170_v53   ;;  %v1973_v28 = vpack.c.bf16 %v1830_v3, %v1829_v32  ;;  %v4900_v53 = vld [vmem:[%s7062_s6 + $0x80] ss:$12 sps:$4 sm:$0xff]   ;;  %v1845_v3 = vpop.permute.xlu1 %1844 }
 0x205   :  { %2313 = vperm.xlu1 %4855, %v4158_v14   ;;  %v1391_v10 = vsel %vm1389_vm6, %v1266_v8, 0  ;;  %v4182_v14 = vld [vmem:[%s7066_s8 + $0xc8] sm:$0xf]  ;;  %v4904_v8 = vld [vmem:[%s7062_s6 + $0xa0] ss:$12 sps:$4 sm:$0xff]  }
 0x206   :  { %4718 = vmatpush3.bf16.msra.mxu1 %v1391_v10  ;;  %v1843_v10 = vpop.permute.xlu0 %1842 }
 0x207   :  { %4431 = vmatprep.subr.bf16.mxu1 %v1981_v49  ;;  %v4173_v49 = vld [vmem:[%s7066_s8 + $0x80] sm:$0xff] }
 0x208   :  { %2318 = vperm.xlu0 %4854, %v4159_v40  }
 0x209   :  { %2405 = vperm.xlu1 %4855, %v4171_v47   ;;  %4720 = vmatmul.mubr.msk.bf16.vlgmr.msra.gmra.mrb[28].mxu1 %vm1367_vm7, %v4895_v20 }
 0x20a   :  { %4432 = vmatpush3.bf16.msra.mxu1 %v1973_v28  ;;  %4723 = vmatprep.mubr.msk.bf16.mxu1 %vm4985_vm1, %v7068_v0 }
 0x20b   :  { %4433 = vmatprep.subr.bf16.mxu1 %v1982_v4  ;;  %v4163_v4 = vld [vmem:[%s7065_s7 + $0x98] sm:$0xff] }
 0x20c   :  { %2410 = vperm.xlu0 %4854, %v4172_v41  }
 0x20d   :  { %2323 = vperm.xlu1 %4855, %v4160_v11  }
 0x210   :  { %2328 = vperm.xlu0 %4854, %v4161_v51  }
 0x211   :  { %2415 = vperm.xlu1 %4855, %v4173_v49   ;;  %4724 = vmatmul.mubr.msk.bf16.gmra.mrb[32].mxu1 %vm1367_vm7, %v4896_v21 }
 0x212   :  { %4727 = vmatprep.mubr.msk.bf16.mxu1 %vm4985_vm1, %v7068_v0 }
 0x214   :  { %2420 = vperm.xlu0 %4854, %v4174_v63  }
 0x215   :  { %2333 = vperm.xlu1 %4855, %v4162_v17  }
 0x218   :  { %2338 = vperm.xlu0 %4854, %v4163_v4  }
 0x219   :  { %2425 = vperm.xlu1 %4855, %v4175_v1   ;;  %4728 = vmatmul.mubr.msk.bf16.gmra.mrb[36].mxu1 %vm1367_vm7, %v4897_v52  ;;  %v1881_v1 = vsel %vm1137_vm5, %v1843_v10, 0.0 }
 0x21a   :  { %4731 = vmatprep.mubr.msk.bf16.mxu1 %vm4985_vm1, %v7068_v0  ;;  %v1894_v39 = vmul.f32 %v5494_v48, %v1881_v1 }
 0x21c   :  { %2430 = vperm.xlu0 %4854, %v4176_v27  }
 0x21d   :  { %2343 = vperm.xlu1 %4855, %v4164_v36  }
 0x220   :  { %2348 = vperm.xlu0 %4854, %v4165_v61  }
 0x221   :  { %2435 = vperm.xlu1 %4855, %v4177_v57   ;;  %4732 = vmatmul.mubr.msk.bf16.gmra.mrb[40].mxu1 %vm1367_vm7, %v4898_v55 }
 0x222   :  { %4735 = vmatprep.mubr.msk.bf16.mxu1 %vm4985_vm1, %v7068_v0 }
 0x224   :  { %2440 = vperm.xlu0 %4854, %v4178_v30  }
 0x225   :  { %2353 = vperm.xlu1 %4855, %v4166_v43  }
 0x228   :  { %2358 = vperm.xlu0 %4854, %v4167_v38  }
 0x229   :  { %2445 = vperm.xlu1 %4855, %v4179_v24   ;;  %4736 = vmatmul.mubr.msk.bf16.gmra.mrb[44].mxu1 %vm1367_vm7, %v4899_v7  ;;  %v1985_v24 = vpack.c.bf16 %v1894_v39, %v5682_v50 }
 0x22a   :  { %4739 = vmatprep.mubr.msk.bf16.mxu1 %vm4985_vm1, %v7068_v0 }
 0x22c   :  { %2450 = vperm.xlu0 %4854, %v4180_v42  }
 0x22d   :  { %2363 = vperm.xlu1 %4855, %v4168_v26   ;;  %v1882_v26 = vsel %vm1137_vm5, %v1845_v3, 0.0 }
 0x230   :  { %2368 = vperm.xlu0 %4854, %v4169_v35  }
 0x231   :  { %2455 = vperm.xlu1 %4855, %v4181_v44   ;;  %4740 = vmatmul.mubr.msk.bf16.gmra.mrb[48].mxu1 %vm1367_vm7, %v4900_v53 }
 0x232   :  { %4743 = vmatprep.mubr.msk.bf16.mxu1 %vm4985_vm1, %v7068_v0 }
 0x235   :  { %2460 = vperm.xlu1 %4855, %v4182_v14  }
 0x239   :  { %4744 = vmatmul.mubr.msk.bf16.gmra.mrb[52].mxu1 %vm1367_vm7, %v4901_v18 }
 0x23a   :  { %2148 = vmatprep.mubr.bf16.mxu1 %v4904_v8 }
 0x242   :  { %v1784_v40 = vpop.permute.xlu1 %1783 }
 0x243   :  { %v1819_v20 = vsel %vm1065_vm4, 0.0, %v1784_v40  ;;  %v1782_v32 = vpop.permute.xlu0 %1781 }
 0x244   :  { %v1832_v47 = vmul.f32 %v5477_v45, %v1819_v20  ;;  %v1818_v28 = vsel %vm1065_vm4, 0.0, %v1782_v32 }
 0x245   :  { %v1831_v41 = vmul.f32 %v5477_v45, %v1818_v28 }
 0x247   :  { %v1974_v11 = vpack.c.bf16 %v1832_v47, %v1831_v41  ;;  %v1847_v51 = vpop.permute.xlu0 %1846 }
 0x248   :  { %v1883_v42 = vsel %vm1137_vm5, %v1847_v51, 0.0 }
 0x249   :  { %4434 = vmatpush3.bf16.msra.mxu1 %v1974_v11  ;;  %v1896_v44 = vmul.f32 %v5494_v48, %v1883_v42 }
 0x24a   :  { %4435 = vmatprep.subr.bf16.mxu1 %v1983_v46 }
 0x24b   :  { %v1849_v21 = vpop.permute.xlu0 %1848  ;;  %v1851_v49 = vpop.permute.xlu1 %1850 }
 0x24c   :  { %v1884_v20 = vsel %vm1137_vm5, %v1849_v21, 0.0  ;;  %v1885_v32 = vsel %vm1137_vm5, %v1851_v49, 0.0 }
 0x24f   :  { %v1786_v63 = vpop.permute.xlu0 %1785  ;;  %v1788_v17 = vpop.permute.xlu1 %1787 }
 0x250   :  { %v1820_v4 = vsel %vm1065_vm4, 0.0, %v1786_v63  ;;  %v1821_v52 = vsel %vm1065_vm4, 0.0, %v1788_v17  ;;  %v1897_v17 = vmul.f32 %v5494_v48, %v1884_v20  ;;  %v4913_v20 = vld [vmem:[%s7062_s6 + $0xd4] ss:$12 sps:$4 sm:$0xff]  }
 0x251   :  { %v1833_v27 = vmul.f32 %v5477_v45, %v1820_v4  ;;  %v1834_v36 = vmul.f32 %v5477_v45, %v1821_v52  ;;  %v1898_v4 = vmul.f32 %v5494_v48, %v1885_v32  ;;  %v4916_v32 = vld [vmem:[%s7062_s6 + $0xe4] ss:$12 sps:$4 sm:$0xff]  }
 0x253   :  { %v1975_v61 = vpack.c.bf16 %v1834_v36, %v1833_v27  ;;  %v1790_v55 = vpop.permute.xlu0 %1789  ;;  %v1792_v57 = vpop.permute.xlu1 %1791 }
 0x254   :  { %v1822_v37 = vsel %vm1065_vm4, 0.0, %v1790_v55  ;;  %v1823_v46 = vsel %vm1065_vm4, 0.0, %v1792_v57 }
 0x255   :  { %v1835_v30 = vmul.f32 %v5477_v45, %v1822_v37  ;;  %v1836_v43 = vmul.f32 %v5477_v45, %v1823_v46  ;;  %4436 = vmatpush3.bf16.msra.mxu1 %v1975_v61  ;;  %v1987_v61 = vpack.c.bf16 %v1898_v4, %v1897_v17 }
 0x256   :  { %4437 = vmatprep.subr.bf16.mxu1 %v1984_v31  ;;  %v1895_v31 = vmul.f32 %v5494_v48, %v1882_v26 }
 0x257   :  { %v1976_v38 = vpack.c.bf16 %v1836_v43, %v1835_v30  ;;  %v1857_v7 = vpop.permute.xlu0 %1856 }
 0x258   :  { %v1888_v50 = vsel %vm1137_vm5, %v1857_v7, 0.0  ;;  %v1986_v40 = vpack.c.bf16 %v1896_v44, %v1895_v31 }
 0x259   :  { %4438 = vmatpush3.bf16.msra.mxu1 %v1976_v38  ;;  %v1901_v47 = vmul.f32 %v5494_v48, %v1888_v50  ;;  %v4906_v50 = vld [vmem:[%s7062_s6 + $0xb8] ss:$12 sps:$4 sm:$0xff]  }
 0x25a   :  { %4439 = vmatprep.subr.bf16.mxu1 %v1985_v24 }
 0x25b   :  { %v1794_v35 = vpop.permute.xlu1 %1793  ;;  %v1796_v53 = vpop.permute.xlu0 %1795 }
 0x25c   :  { %v1824_v14 = vsel %vm1065_vm4, 0.0, %v1794_v35  ;;  %v1825_v18 = vsel %vm1065_vm4, 0.0, %v1796_v53 }
 0x25d   :  { %v1837_v16 = vmul.f32 %v5477_v45, %v1824_v14  ;;  %v1838_v59 = vmul.f32 %v5477_v45, %v1825_v18 }
 0x25f   :  { %v1977_v8 = vpack.c.bf16 %v1838_v59, %v1837_v16  ;;  %v1859_v10 = vpop.permute.xlu1 %1858 }
 0x260   :  { %v1889_v3 = vsel %vm1137_vm5, %v1859_v10, 0.0 }
 0x261   :  { %v1902_v28 = vmul.f32 %v5494_v48, %v1889_v3  ;;  %4440 = vmatpush3.bf16.msra.mxu1 %v1977_v8  ;;  %v4912_v3 = vld [vmem:[%s7062_s6 + $0xcc] ss:$12 sps:$4 sm:$0xff]  }
 0x262   :  { %v1800_v41 = vpop.permute.xlu0 %1799  ;;  %4441 = vmatprep.subr.bf16.mxu1 %v1986_v40  ;;  %v4914_v40 = vld [vmem:[%s7062_s6 + $0xe8] ss:$12 sps:$4 sm:$0xff]  }
 0x263   :  { %v1989_v11 = vpack.c.bf16 %v1902_v28, %v1901_v47  ;;  %v1827_v51 = vsel %vm1065_vm4, 0.0, %v1800_v41  ;;  %v1798_v63 = vpop.permute.xlu1 %1797  ;;  %v4918_v47 = vld [vmem:[%s7062_s6 + $0x100] ss:$12 sps:$4 sm:$0xff]   ;;  %v4920_v41 = vld [vmem:[%s7062_s6 + $0xfc] ss:$12 sps:$4 sm:$0xff]  }
 0x264   :  { %v1840_v52 = vmul.f32 %v5477_v45, %v1827_v51  ;;  %v1826_v21 = vsel %vm1065_vm4, 0.0, %v1798_v63  ;;  %v4917_v28 = vld [vmem:[%s7062_s6 + $0xec] ss:$12 sps:$4 sm:$0xff]   ;;  %v4921_v51 = vld [vmem:[%s7062_s6 + $0x104] ss:$12 sps:$4 sm:$0xff]  }
 0x265   :  { %v1839_v49 = vmul.f32 %v5477_v45, %v1826_v21  ;;  %4748 = vmatpush3.bf16.msra.mxu0 %v1989_v11  ;;  %v4922_v11 = vld [vmem:[%s7062_s6 + $0x118] ss:$12 sps:$4 sm:$0xff]   ;;  %v4127_v63 = vld [vmem:[%s7062_s6 + $0x12c] sm:$0x33] }
 0x266   :  { %v1853_v1 = vpop.permute.xlu0 %1852  ;;  %4749 = vmatprep.subr.bf16.mxu0 %v7068_v0 }
 0x267   :  { %v1978_v27 = vpack.c.bf16 %v1840_v52, %v1839_v49  ;;  %v1855_v36 = vpop.permute.xlu1 %1854  ;;  %v1886_v55 = vsel %vm1137_vm5, %v1853_v1, 0.0  ;;  %v4924_v52 = vld [vmem:[%s7062_s6 + $0x114] ss:$12 sps:$4 sm:$0xff]   ;;  %v4148_v1 = vcombine.high %v4127_v63, %v4127_v63 }
 0x268   :  { %v1887_v57 = vsel %vm1137_vm5, %v1855_v36, 0.0  ;;  %v1899_v30 = vmul.f32 %v5494_v48, %v1886_v55 }
 0x269   :  { %4442 = vmatpush3.bf16.msra.mxu1 %v1978_v27  ;;  %v1900_v43 = vmul.f32 %v5494_v48, %v1887_v57 }
 0x26a   :  { %v1861_v39 = vpop.permute.xlu0 %1860  ;;  %4443 = vmatprep.subr.bf16.mxu1 %v1987_v61  ;;  %v4925_v61 = vld [vmem:[%s7062_s6 + $0x11c] ss:$12 sps:$4 sm:$0xff]  }
 0x26b   :  { %v1802_v37 = vpop.permute.xlu1 %1801  ;;  %v1890_v7 = vsel %vm1137_vm5, %v1861_v39, 0.0  ;;  %v1988_v18 = vpack.c.bf16 %v1900_v43, %v1899_v30  ;;  %v4147_v39 = vcombine.low %v4127_v63, %v4127_v63 }
 0x26c   :  { %v1828_v46 = vsel %vm1065_vm4, 0.0, %v1802_v37  ;;  %v1903_v44 = vmul.f32 %v5494_v48, %v1890_v7 }
 0x26d   :  { %v1841_v38 = vmul.f32 %v5477_v45, %v1828_v46 }
 0x26e   :  { %v1865_v42 = vpop.permute.xlu0 %1864 }
 0x26f   :  { %v1945_v24 = vsel %vm1000_vm3, %v1841_v38, %v1907_v12  ;;  %v1863_v26 = vpop.permute.xlu1 %1862  ;;  %v1892_v16 = vsel %vm1137_vm5, %v1865_v42, 0.0  ;;  %v4928_v38 = vld [vmem:[%s7062_s6 + $0x134] ss:$0 sps:$4 sm:$0x33]  }
 0x270   :  { %v1891_v35 = vsel %vm1137_vm5, %v1863_v26, 0.0  ;;  %v1979_v53 = vpack.c.bf16 %v5379_v23, %v1945_v24  ;;  %v1905_v12 = vmul.f32 %v5494_v48, %v1892_v16  ;;  %v4902_v23 = vld [vmem:[%s7062_s6 + $0x9c] ss:$12 sps:$4 sm:$0xff]  }
 0x271   :  { %v1904_v14 = vmul.f32 %v5494_v48, %v1891_v35 }
 0x272   :  { %4444 = vmatpush3.bf16.msra.mxu1 %v1979_v53 }
 0x273   :  { %v1990_v45 = vpack.c.bf16 %v1904_v14, %v1903_v44  ;;  %v1867_v59 = vpop.permute.xlu1 %1866  ;;  %4445 = vmatprep.subr.bf16.mxu1 %v1988_v18 }
 0x274   :  { %v1893_v5 = vsel %vm1137_vm5, %v1867_v59, 0.0 }
 0x275   :  { %v1906_v31 = vmul.f32 %v5494_v48, %v1893_v5  ;;  %4750 = vmatpush3.bf16.msra.mxu0 %v1990_v45  ;;  %v4905_v48 = vld [vmem:[%s7062_s6 + $0xa4] ss:$12 sps:$4 sm:$0xff]  }
 0x276   :  { %4446 = vmatpush3.bf16.msra.mxu1 %v1980_v33  ;;  %4751 = vmatprep.subr.bf16.mxu0 %v7068_v0  ;;  %v4909_v33 = vld [vmem:[%s7062_s6 + $0xbc] ss:$12 sps:$4 sm:$0xff]  }
 0x277   :  { %v1991_v8 = vpack.c.bf16 %v1906_v31, %v1905_v12 }
 0x279   :  { %2149 = vmatmul.mubr.bf16.vlgmr.msra.gmra.mrb[56].mxu1 %v4902_v23  ;;  %v2114_v10 = vsel %vm1389_vm6, %v1991_v8, 0 }
 0x27a   :  { %4752 = vmatpush3.bf16.msra.mxu0 %v2114_v10  ;;  %2156 = vmatprep.mubr.bf16.mxu1 %v4906_v50 }
 0x27b   :  { %4781 = vmatprep.subr.bf16.mxu0 %v7068_v0 }
 0x27d   :  { %4754 = vmatmul.mubr.msk.bf16.vlgmr.msra.gmra.mrb[76].mxu0 %vm1367_vm7, %v4905_v48 }
 0x27e   :  { %4757 = vmatprep.mubr.msk.bf16.mxu0 %vm4985_vm1, %v7068_v0 }
 0x281   :  { %2157 = vmatmul.mubr.bf16.gmra.mrb[60].mxu1 %v4908_v25 }
 0x282   :  { %2164 = vmatprep.mubr.bf16.mxu1 %v4910_v29 }
 0x285   :  { %4758 = vmatmul.mubr.msk.bf16.gmra.mrb[80].mxu0 %vm1367_vm7, %v4909_v33 }
 0x286   :  { %4761 = vmatprep.mubr.msk.bf16.mxu0 %vm4985_vm1, %v7068_v0 }
 0x289   :  { %2165 = vmatmul.mubr.bf16.gmra.mrb[64].mxu1 %v4912_v3 }
 0x28a   :  { %2172 = vmatprep.mubr.bf16.mxu1 %v4914_v40 }
 0x28d   :  { %4762 = vmatmul.mubr.msk.bf16.gmra.mrb[84].mxu0 %vm1367_vm7, %v4913_v20 }
 0x28e   :  { %4765 = vmatprep.mubr.msk.bf16.mxu0 %vm4985_vm1, %v7068_v0 }
 0x291   :  { %2173 = vmatmul.mubr.bf16.gmra.mrb[68].mxu1 %v4916_v32 }
 0x292   :  { %2180 = vmatprep.mubr.bf16.mxu1 %v4918_v47 }
 0x295   :  { %4766 = vmatmul.mubr.msk.bf16.gmra.mrb[88].mxu0 %vm1367_vm7, %v4917_v28 }
 0x296   :  { %4769 = vmatprep.mubr.msk.bf16.mxu0 %vm4985_vm1, %v7068_v0 }
 0x299   :  { %2181 = vmatmul.mubr.bf16.gmra.mrb[72].mxu1 %v4920_v41 }
 0x29a   :  { %2188 = vmatprep.mubr.bf16.mxu1 %v4922_v11 }
 0x29b   :  { %v4379_v17 = vpop.f32.mrb[0].mxu1 }
 0x29c   :  { %v4380_v4 = vpop.f32.mrb[1].mxu1 }
 0x29d   :  { %4770 = vmatmul.mubr.msk.bf16.gmra.mrb[92].mxu0 %vm1367_vm7, %v4921_v51  ;;  %v4381_v21 = vadd.f32 %v4380_v4, %v4379_v17  ;;  %v4382_v49 = vpop.f32.mrb[2].mxu1 }
 0x29e   :  { %4773 = vmatprep.mubr.msk.bf16.mxu0 %vm4985_vm1, %v7068_v0  ;;  %v4383_v27 = vpop.f32.mrb[3].mxu1 }
 0x29f   :  { %v4384_v36 = vadd.f32 %v4383_v27, %v4382_v49 }
 0x2a1   :  { %2189 = vmatmul.mubr.bf16.gmra.mrb[76].mxu1 %v4924_v52 }
 0x2a2   :  { %2196 = vmatprep.mubr.bf16.mxu1 %v4148_v1 }
 0x2a3   :  { %v4385_v55 = vpop.f32.mrb[4].mxu1 }
 0x2a4   :  { %v4386_v57 = vpop.f32.mrb[5].mxu1 }
 0x2a5   :  { %4774 = vmatmul.mubr.msk.bf16.gmra.mrb[96].mxu0 %vm1367_vm7, %v4925_v61  ;;  %v4387_v37 = vadd.f32 %v4386_v57, %v4385_v55  ;;  %v4388_v46 = vpop.f32.mrb[6].mxu1 }
 0x2a6   :  { %4777 = vmatprep.mubr.msk.bf16.mxu0 %vm4985_vm1, %v7068_v0  ;;  %v4389_v30 = vpop.f32.mrb[7].mxu1 }
 0x2a7   :  { %v4390_v43 = vadd.f32 %v4389_v30, %v4388_v46 }
 0x2a9   :  { %2197 = vmatmul.mubr.bf16.gmra.mrb[80].mxu1 %v4147_v39 }
 0x2ab   :  { %v4391_v7 = vpop.f32.mrb[8].mxu1 }
 0x2ac   :  { %v4392_v24 = vpop.f32.mrb[9].mxu1 }
 0x2ad   :  { %4778 = vmatmul.mubr.msk.bf16.gmra.mrb[100].mxu0 %vm1367_vm7, %v4928_v38  ;;  %v4393_v42 = vadd.f32 %v4392_v24, %v4391_v7  ;;  %v4394_v26 = vpop.f32.mrb[10].mxu1 }
 0x2ae   :  { %v4395_v35 = vpop.f32.mrb[11].mxu1  ;;  %4787 = vmatprep.mubr.msk.bf16.mxu0 %vm4985_vm1, %v7068_v0 }
 0x2af   :  { %v4396_v53 = vadd.f32 %v4395_v35, %v4394_v26 }
 0x2b3   :  { %v4397_v44 = vpop.f32.mrb[12].mxu1 }
 0x2b4   :  { %v4398_v14 = vpop.f32.mrb[13].mxu1 }
 0x2b5   :  { %v4399_v18 = vadd.f32 %v4398_v14, %v4397_v44  ;;  %v4400_v16 = vpop.f32.mrb[14].mxu1 }
 0x2b6   :  { %v4401_v45 = vpop.f32.mrb[15].mxu1 }
 0x2b7   :  { %v4402_v59 = vadd.f32 %v4401_v45, %v4400_v16 }
 0x2bb   :  { %v4403_v5 = vpop.f32.mrb[16].mxu1 }
 0x2bc   :  { %v4404_v12 = vpop.f32.mrb[17].mxu1 }
 0x2bd   :  { %v4405_v31 = vadd.f32 %v4404_v12, %v4403_v5  ;;  %v4406_v23 = vpop.f32.mrb[18].mxu1 }
 0x2be   :  { %v4407_v50 = vpop.f32.mrb[19].mxu1 }
 0x2bf   :  { %v4408_v8 = vadd.f32 %v4407_v50, %v4406_v23 }
 0x2c3   :  { %v4409_v10 = vpop.f32.mrb[20].mxu1 }
 0x2c4   :  { %v4410_v48 = vpop.f32.mrb[21].mxu1 }
 0x2c5   :  { %v4411_v25 = vadd.f32 %v4410_v48, %v4409_v10  ;;  %v4412_v29 = vpop.f32.mrb[22].mxu1 }
 0x2c6   :  { %v4413_v33 = vpop.f32.mrb[23].mxu1 }
 0x2c7   :  { %v4414_v3 = vadd.f32 %v4413_v33, %v4412_v29  ;;  %v2309_v33 = vpop.permute.xlu0 %2308 }
 0x2cb   :  { %v4415_v40 = vpop.f32.mrb[24].mxu1 }
 0x2cc   :  { %v4416_v20 = vpop.f32.mrb[25].mxu1 }
 0x2cd   :  { %v4417_v32 = vadd.f32 %v4416_v20, %v4415_v40  ;;  %v4418_v47 = vpop.f32.mrb[26].mxu1  ;;  %v2314_v40 = vpop.permute.xlu1 %2313 }
 0x2ce   :  { %v4419_v28 = vpop.f32.mrb[27].mxu1  ;;  %v2401_v20 = vpop.permute.xlu0 %2400 }
 0x2d2   :  { %v2319_v47 = vpop.permute.xlu0 %2318 }
 0x2dc   :  { %v1515_v41 = vpop.f32.mrb[28].mxu1 }
 0x2dd   :  { %v5975_v11 = vadd.f32 %v4381_v21, %v1515_v41  ;;  %v4721_v51 = vpop.f32.mrb[29].mxu1  ;;  %v2411_v41 = vpop.permute.xlu0 %2410 }
 0x2de   :  { %v1518_v63 = vpop.f32.mrb[30].mxu1 }
 0x2df   :  { %v5977_v17 = vadd.f32 %v4384_v36, %v1518_v63  ;;  %v4722_v4 = vpop.f32.mrb[31].mxu1 }
 0x2e4   :  { %v1523_v52 = vpop.f32.mrb[32].mxu1 }
 0x2e5   :  { %v5979_v49 = vadd.f32 %v4387_v37, %v1523_v52  ;;  %v4725_v1 = vpop.f32.mrb[33].mxu1 }
 0x2e6   :  { %v1526_v27 = vpop.f32.mrb[34].mxu1 }
 0x2e7   :  { %v5981_v61 = vadd.f32 %v4390_v43, %v1526_v27  ;;  %v4726_v55 = vpop.f32.mrb[35].mxu1 }
 0x2ec   :  { %v1531_v57 = vpop.f32.mrb[36].mxu1 }
 0x2ed   :  { %v5983_v39 = vadd.f32 %v4393_v42, %v1531_v57  ;;  %v4729_v46 = vpop.f32.mrb[37].mxu1  ;;  %v2329_v57 = vpop.permute.xlu0 %2328 }
 0x2ee   :  { %v1534_v30 = vpop.f32.mrb[38].mxu1 }
 0x2ef   :  { %v5985_v21 = vadd.f32 %v4396_v53, %v1534_v30  ;;  %v4730_v38 = vpop.f32.mrb[39].mxu1 }
 0x2f4   :  { %v1539_v7 = vpop.f32.mrb[40].mxu1 }
 0x2f5   :  { %v5987_v36 = vadd.f32 %v4399_v18, %v1539_v7  ;;  %v4733_v24 = vpop.f32.mrb[41].mxu1 }
 0x2f6   :  { %v1542_v26 = vpop.f32.mrb[42].mxu1 }
 0x2f7   :  { %v5989_v37 = vadd.f32 %v4402_v59, %v1542_v26  ;;  %v4734_v35 = vpop.f32.mrb[43].mxu1 }
 0x2fc   :  { %v1547_v44 = vpop.f32.mrb[44].mxu1 }
 0x2fd   :  { %v5991_v43 = vadd.f32 %v4405_v31, %v1547_v44  ;;  %v4737_v14 = vpop.f32.mrb[45].mxu1 }
 0x2fe   :  { %v1550_v16 = vpop.f32.mrb[46].mxu1 }
 0x2ff   :  { %v5993_v42 = vadd.f32 %v4408_v8, %v1550_v16  ;;  %v4738_v45 = vpop.f32.mrb[47].mxu1  ;;  %v2406_v8 = vpop.permute.xlu1 %2405 }
 0x303   :  { %v2324_v28 = vpop.permute.xlu1 %2323 }
 0x304   :  { %v1555_v5 = vpop.f32.mrb[48].mxu1 }
 0x305   :  { %v5995_v53 = vadd.f32 %v4411_v25, %v1555_v5  ;;  %v4741_v12 = vpop.f32.mrb[49].mxu1 }
 0x306   :  { %v1558_v23 = vpop.f32.mrb[50].mxu1 }
 0x307   :  { %v5997_v18 = vadd.f32 %v4414_v3, %v1558_v23  ;;  %v4742_v50 = vpop.f32.mrb[51].mxu1  ;;  %v2416_v63 = vpop.permute.xlu1 %2415 }
 0x308   :  { %v2421_v50 = vpop.permute.xlu0 %2420 }
 0x309   :  { %7071 = vst [vmem:[#allocation2_spill] sm:$0xff] %v5997_v18 }
 0x30b   :  { %v2334_v24 = vpop.permute.xlu1 %2333 }
 0x30c   :  { %v1563_v10 = vpop.f32.mrb[52].mxu1 }
 0x30d   :  { %v5999_v59 = vadd.f32 %v4417_v32, %v1563_v10  ;;  %v4745_v48 = vpop.f32.mrb[53].mxu1 }
 0x30e   :  { %v1566_v29 = vpop.f32.mrb[54].mxu1 }
 0x30f   :  { %7072 = vst [vmem:[#allocation3_spill] sm:$0xff] %v5999_v59  ;;  %v4746_v31 = vpop.f32.mrb[55].mxu1 }
 0x34c   :  { %v4447_v25 = vpop.f32.mrb[56].mxu1 }
 0x34d   :  { %v4448_v51 = vpop.f32.mrb[57].mxu1 }
 0x34e   :  { %v4449_v4 = vadd.f32 %v4448_v51, %v4447_v25  ;;  %v4450_v3 = vpop.f32.mrb[58].mxu1  ;;  %v2426_v25 = vpop.permute.xlu1 %2425 }
 0x34f   :  { %v4451_v52 = vpop.f32.mrb[59].mxu1 }
 0x350   :  { %v4452_v1 = vadd.f32 %v4451_v52, %v4450_v3  ;;  %v2238_v27 = vpop.f32.mrb[76].mxu0 }
 0x351   :  { %v2239_v32 = vadd.f32 %v4449_v4, %v2238_v27  ;;  %v4755_v55 = vpop.f32.mrb[77].mxu0 }
 0x352   :  { %v2241_v46 = vpop.f32.mrb[78].mxu0 }
 0x353   :  { %v2371_v30 = vmul.f32 %v2309_v33, %v2239_v32  ;;  %v2242_v38 = vadd.f32 %v4452_v1, %v2241_v46  ;;  %v4756_v7 = vpop.f32.mrb[79].mxu0  ;;  %v2339_v46 = vpop.permute.xlu0 %2338 }
 0x354   :  { %v4453_v26 = vpop.f32.mrb[60].mxu1 }
 0x355   :  { %v2463_v35 = vadd.f32 %v2401_v20, %v2371_v30  ;;  %v2372_v44 = vmul.f32 %v2314_v40, %v2242_v38  ;;  %v4454_v14 = vpop.f32.mrb[61].mxu1 }
 0x356   :  { %v4455_v16 = vadd.f32 %v4454_v14, %v4453_v26  ;;  %v4456_v45 = vpop.f32.mrb[62].mxu1 }
 0x357   :  { %v6001_v5 = vmax.f32 %v2463_v35, 0.0  ;;  %v2464_v12 = vadd.f32 %v2406_v8, %v2372_v44  ;;  %v4457_v23 = vpop.f32.mrb[63].mxu1  ;;  %v2344_v35 = vpop.permute.xlu1 %2343 }
 0x358   :  { %v4458_v10 = vadd.f32 %v4457_v23, %v4456_v45  ;;  %v2246_v48 = vpop.f32.mrb[80].mxu0 }
 0x359   :  { %v2477_v29 = vmax.f32 %v2464_v12, 0.0  ;;  %v2247_v31 = vadd.f32 %v4455_v16, %v2246_v48  ;;  %2502 = vrot.lane.b32.xlu0 %v6001_v5, %s4988_s20  ;;  %v4759_v33 = vpop.f32.mrb[81].mxu0  ;;  %v2632_v40 = vrot.slane %v6001_v5, 4 }
 0x35a   :  { %v2249_v51 = vpop.f32.mrb[82].mxu0 }
 0x35b   :  { %v2633_v20 = vrot.slane %v2477_v29, 4  ;;  %v2373_v4 = vmul.f32 %v2319_v47, %v2247_v31  ;;  %v2250_v3 = vadd.f32 %v4458_v10, %v2249_v51  ;;  %2504 = vrot.lane.b32.xlu1 %v2477_v29, %s4988_s20  ;;  %v4760_v8 = vpop.f32.mrb[83].mxu0 }
 0x35c   :  { %v4459_v52 = vpop.f32.mrb[64].mxu1 }
 0x35d   :  { %v2465_v1 = vadd.f32 %v2411_v41, %v2373_v4  ;;  %v2374_v27 = vmul.f32 %v2324_v28, %v2250_v3  ;;  %2567 = vrot.lane.b32.xlu0 %v6001_v5, %s4987_s3  ;;  %v4460_v32 = vpop.f32.mrb[65].mxu1  ;;  %v6012_v55 = vsel %vm1000_vm3, %v2632_v40, %v2633_v20 }
 0x35e   :  { %v4461_v30 = vadd.f32 %v4460_v32, %v4459_v52  ;;  %v4462_v38 = vpop.f32.mrb[66].mxu1  ;;  %v2436_v52 = vpop.permute.xlu1 %2435 }
 0x35f   :  { %v2478_v47 = vmax.f32 %v2465_v1, 0.0  ;;  %v2466_v7 = vadd.f32 %v2416_v63, %v2374_v27  ;;  %2569 = vrot.lane.b32.xlu1 %v2477_v29, %s4987_s3  ;;  %v4463_v26 = vpop.f32.mrb[67].mxu1  ;;  %v2431_v29 = vpop.permute.xlu0 %2430 }
 0x360   :  { %v4464_v41 = vadd.f32 %v4463_v26, %v4462_v38  ;;  %v2254_v28 = vpop.f32.mrb[84].mxu0 }
 0x361   :  { %v2635_v44 = vrot.slane %v2478_v47, 4  ;;  %v2479_v14 = vmax.f32 %v2466_v7, 0.0  ;;  %v2255_v16 = vadd.f32 %v4461_v30, %v2254_v28  ;;  %2506 = vrot.lane.b32.xlu0 %v2478_v47, %s4988_s20  ;;  %v4763_v45 = vpop.f32.mrb[85].mxu0 }
 0x362   :  { %v2257_v12 = vpop.f32.mrb[86].mxu0 }
 0x363   :  { %v2375_v23 = vmul.f32 %v2329_v57, %v2255_v16  ;;  %v2258_v10 = vadd.f32 %v4464_v41, %v2257_v12  ;;  %2508 = vrot.lane.b32.xlu1 %v2479_v14, %s4988_s20  ;;  %v4764_v48 = vpop.f32.mrb[87].mxu0  ;;  %v2637_v31 = vrot.slane %v2479_v14, 4  ;;  %v6018_v63 = vsel %vm1000_vm3, %v2633_v20, %v2635_v44  ;;  %v2349_v41 = vpop.permute.xlu0 %2348 }
 0x364   :  { %v4465_v33 = vpop.f32.mrb[68].mxu1 }
 0x365   :  { %v2467_v51 = vadd.f32 %v2421_v50, %v2375_v23  ;;  %v2376_v4 = vmul.f32 %v2334_v24, %v2258_v10  ;;  %2571 = vrot.lane.b32.xlu0 %v2478_v47, %s4987_s3  ;;  %v4466_v3 = vpop.f32.mrb[69].mxu1  ;;  %v6022_v8 = vsel %vm1000_vm3, %v2635_v44, %v2637_v31  ;;  %v2354_v23 = vpop.permute.xlu1 %2353 }
 0x366   :  { %v4467_v57 = vadd.f32 %v4466_v3, %v4465_v33  ;;  %v4468_v1 = vpop.f32.mrb[70].mxu1  ;;  %v2705_v27 = vpack.c.bf16 %v6022_v8, %v6018_v63  ;;  %v4935_v63 = vld [vmem:[%s7062_s6 + $0x150] ss:$12 sps:$4 sm:$0xff]   ;;  %v4937_v8 = vld [vmem:[%s7062_s6 + $0x16c] ss:$12 sps:$4 sm:$0xff]  }
 0x367   :  { %v2480_v32 = vmax.f32 %v2467_v51, 0.0  ;;  %v2468_v30 = vadd.f32 %v2426_v25, %v2376_v4  ;;  %v4469_v20 = vpop.f32.mrb[71].mxu1 }
 0x368   :  { %v4470_v38 = vadd.f32 %v4469_v20, %v4468_v1  ;;  %v2262_v7 = vpop.f32.mrb[88].mxu0 }
 0x369   :  { %v6026_v26 = vmax.f32 %v2468_v30, 0.0  ;;  %v2263_v24 = vadd.f32 %v4467_v57, %v2262_v7  ;;  %2573 = vrot.lane.b32.xlu0 %v2479_v14, %s4987_s3  ;;  %2575 = vrot.lane.b32.xlu1 %v2480_v32, %s4987_s3  ;;  %v4767_v50 = vpop.f32.mrb[89].mxu0  ;;  %v2639_v47 = vrot.slane %v2480_v32, 4  ;;  %v2441_v30 = vpop.permute.xlu0 %2440 }
 0x36a   :  { %v2265_v28 = vpop.f32.mrb[90].mxu0 }
 0x36b   :  { %v2377_v44 = vmul.f32 %v2339_v46, %v2263_v24  ;;  %v2266_v16 = vadd.f32 %v4470_v38, %v2265_v28  ;;  %v4768_v45 = vpop.f32.mrb[91].mxu0  ;;  %v2640_v12 = vsel %vm1000_vm3, %v2637_v31, %v2639_v47  ;;  %v2641_v25 = vrot.slane %v6026_v26, 4  ;;  %v2446_v24 = vpop.permute.xlu1 %2445 }
 0x36c   :  { %v4471_v10 = vpop.f32.mrb[72].mxu1 }
 0x36d   :  { %v2469_v48 = vadd.f32 %v2431_v29, %v2377_v44  ;;  %v2378_v33 = vmul.f32 %v2344_v35, %v2266_v16  ;;  %2510 = vrot.lane.b32.xlu0 %v2480_v32, %s4988_s20  ;;  %2512 = vrot.lane.b32.xlu1 %v6026_v26, %s4988_s20  ;;  %v4472_v14 = vpop.f32.mrb[73].mxu1  ;;  %v2642_v51 = vsel %vm1000_vm3, %v2639_v47, %v2641_v25 }
 0x36e   :  { %v4473_v4 = vadd.f32 %v4472_v14, %v4471_v10  ;;  %v4474_v46 = vpop.f32.mrb[74].mxu1  ;;  %v2706_v3 = vpack.c.bf16 %v2642_v51, %v2640_v12  ;;  %v2359_v14 = vpop.permute.xlu0 %2358 }
 0x36f   :  { %v6036_v57 = vmax.f32 %v2469_v48, 0.0  ;;  %v2470_v31 = vadd.f32 %v2436_v52, %v2378_v33  ;;  %v4475_v1 = vpop.f32.mrb[75].mxu1 }
 0x370   :  { %v4476_v20 = vadd.f32 %v4475_v1, %v4474_v46  ;;  %v2270_v38 = vpop.f32.mrb[92].mxu0  ;;  %4499 = vmatprep.subr.bf16.mxu1 %v2706_v3 }
 0x371   :  { %v2483_v35 = vmax.f32 %v2470_v31, 0.0  ;;  %v2271_v29 = vadd.f32 %v4473_v4, %v2270_v38  ;;  %2514 = vrot.lane.b32.xlu0 %v6036_v57, %s4988_s20  ;;  %v4771_v32 = vpop.f32.mrb[93].mxu0  ;;  %v2643_v7 = vrot.slane %v6036_v57, 4  ;;  %v2364_v31 = vpop.permute.xlu1 %2363 }
 0x372   :  { %v2273_v50 = vpop.f32.mrb[94].mxu0 }
 0x373   :  { %v2379_v47 = vmul.f32 %v2349_v41, %v2271_v29  ;;  %v2274_v28 = vadd.f32 %v4476_v20, %v2273_v50  ;;  %2516 = vrot.lane.b32.xlu1 %v2483_v35, %s4988_s20  ;;  %v4772_v52 = vpop.f32.mrb[95].mxu0  ;;  %v6043_v44 = vsel %vm1000_vm3, %v2641_v25, %v2643_v7  ;;  %v2645_v16 = vrot.slane %v2483_v35, 4 }
 0x374   :  { %v4477_v45 = vpop.f32.mrb[76].mxu1 }
 0x375   :  { %v2471_v12 = vadd.f32 %v2441_v30, %v2379_v47  ;;  %v2380_v10 = vmul.f32 %v2354_v23, %v2274_v28  ;;  %2581 = vrot.lane.b32.xlu0 %v2483_v35, %s4987_s3  ;;  %v4478_v48 = vpop.f32.mrb[77].mxu1  ;;  %v6047_v33 = vsel %vm1000_vm3, %v2643_v7, %v2645_v16  ;;  %v2451_v28 = vpop.permute.xlu0 %2450 }
 0x376   :  { %v4479_v51 = vadd.f32 %v4478_v48, %v4477_v45  ;;  %v4480_v41 = vpop.f32.mrb[78].mxu1  ;;  %v2707_v4 = vpack.c.bf16 %v6047_v33, %v6043_v44 }
 0x377   :  { %v2484_v46 = vmax.f32 %v2471_v12, 0.0  ;;  %v2472_v3 = vadd.f32 %v2446_v24, %v2380_v10  ;;  %v4481_v25 = vpop.f32.mrb[79].mxu1 }
 0x378   :  { %v4482_v1 = vadd.f32 %v4481_v25, %v4480_v41  ;;  %v2278_v20 = vpop.f32.mrb[96].mxu0 }
 0x379   :  { %v2485_v30 = vmax.f32 %v2472_v3, 0.0  ;;  %v2279_v23 = vadd.f32 %v4479_v51, %v2278_v20  ;;  %2518 = vrot.lane.b32.xlu1 %v2484_v46, %s4988_s20  ;;  %v4775_v38 = vpop.f32.mrb[97].mxu0  ;;  %v2647_v35 = vrot.slane %v2484_v46, 4  ;;  %v2456_v51 = vpop.permute.xlu1 %2455 }
 0x37a   :  { %v2281_v29 = vpop.f32.mrb[98].mxu0 }
 0x37b   :  { %v2381_v32 = vmul.f32 %v2359_v14, %v2279_v23  ;;  %v2282_v7 = vadd.f32 %v4482_v1, %v2281_v29  ;;  %2520 = vrot.lane.b32.xlu0 %v2485_v30, %s4988_s20  ;;  %v4776_v50 = vpop.f32.mrb[99].mxu0  ;;  %v6054_v47 = vsel %vm1000_vm3, %v2645_v16, %v2647_v35  ;;  %v2649_v24 = vrot.slane %v2485_v30, 4  ;;  %v2369_v29 = vpop.permute.xlu0 %2368 }
 0x37c   :  { %v4483_v52 = vpop.f32.mrb[80].mxu1 }
 0x37d   :  { %v2473_v45 = vadd.f32 %v2451_v28, %v2381_v32  ;;  %v2382_v12 = vmul.f32 %v2364_v31, %v2282_v7  ;;  %2583 = vrot.lane.b32.xlu1 %v2484_v46, %s4987_s3  ;;  %v4484_v10 = vpop.f32.mrb[81].mxu1  ;;  %v6058_v48 = vsel %vm1000_vm3, %v2647_v35, %v2649_v24 }
 0x37e   :  { %v4485_v14 = vadd.f32 %v4484_v10, %v4483_v52  ;;  %v4486_v41 = vpop.f32.mrb[82].mxu1  ;;  %v2708_v3 = vpack.c.bf16 %v6058_v48, %v6054_v47  ;;  %v2461_v52 = vpop.permute.xlu1 %2460  ;;  %v6211_v47 = vld [vmem:[%s7064_s2] ss:$0 sm:$0xff] }
 0x37f   :  { %v2486_v25 = vmax.f32 %v2473_v45, 0.0  ;;  %v2474_v16 = vadd.f32 %v2456_v51, %v2382_v12  ;;  %v4487_v1 = vpop.f32.mrb[83].mxu1  ;;  %v4931_v51 = vld [vmem:[%s7062_s6 + $0x13c] ss:$12 sps:$4 sm:$0xff]   ;;  %v415_v41 = vld [vmem:[%s7060_s4] sm:$0xff] }
 0x380   :  { %v2286_v20 = vpop.f32.mrb[100].mxu0  ;;  %2873 = vmatprep.mubr.bf16.mxu1 %v4931_v51  ;;  %v420_v1 = vld [vmem:[%s7060_s4 + $0x28] sm:$0xff]  ;;  %v4243_v51 = vld [vmem:[%s7065_s7 + $0x100] sm:$0xff] }
 0x381   :  { %v2487_v23 = vmax.f32 %v2474_v16, 0.0  ;;  %v2287_v38 = vadd.f32 %v4485_v14, %v2286_v20  ;;  %2522 = vrot.lane.b32.xlu1 %v2486_v25, %s4988_s20  ;;  %v4779_v31 = vpop.f32.mrb[101].mxu0  ;;  %v2651_v46 = vrot.slane %v2486_v25, 4  ;;  %v419_v16 = vld [vmem:[%s7060_s4 + $0x20] sm:$0xff]  ;;  %v4237_v20 = vld [vmem:[%s7065_s7 + $0xd0] sm:$0xff] }
 0x382   :  { %v2289_v32 = vpop.f32.mrb[102].mxu0  ;;  %v4251_v31 = vld [vmem:[%s7066_s8 + $0xd8] sm:$0xff] }
 0x383   :  { %v2383_v35 = vmul.f32 %v2369_v29, %v2287_v38  ;;  %2524 = vrot.lane.b32.xlu0 %v2487_v23, %s4988_s20  ;;  %v4780_v7 = vpop.f32.mrb[103].mxu0  ;;  %v6065_v50 = vsel %vm1000_vm3, %v2649_v24, %v2651_v46  ;;  %v2653_v28 = vrot.slane %v2487_v23, 4  ;;  %v4250_v38 = vld [vmem:[%s7066_s8 + $0xd0] sm:$0xff]  ;;  %v4240_v29 = vld [vmem:[%s7065_s7 + $0xe8] sm:$0xff]  ;;  %v4252_v32 = vld [vmem:[%s7066_s8 + $0xe0] sm:$0xff] }
 0x384   :  { %v4241_v7 = vld [vmem:[%s7065_s7 + $0xf0] sm:$0xff] }
 0x385   :  { %v2475_v45 = vadd.f32 %v2461_v52, %v2383_v35  ;;  %2579 = vrot.lane.b32.xlu1 %v6036_v57, %s4987_s3  ;;  %v6070_v12 = vsel %vm1000_vm3, %v2651_v46, %v2653_v28  ;;  %v4239_v46 = vld [vmem:[%s7065_s7 + $0xe0] sm:$0xff]  ;;  %v4253_v35 = vld [vmem:[%s7066_s8 + $0xe8] sm:$0xff]  ;;  %v4254_v52 = vld [vmem:[%s7066_s8 + $0xf0] sm:$0xff] }
 0x386   :  { %v2709_v10 = vpack.c.bf16 %v6070_v12, %v6065_v50 }
 0x387   :  { %v2488_v14 = vmax.f32 %v2475_v45, 0.0  ;;  %2577 = vrot.lane.b32.xlu0 %v6026_v26, %s4987_s3  ;;  %v416_v26 = vld [vmem:[%s7060_s4 + $0x8] sm:$0xff]  ;;  %v4255_v45 = vld [vmem:[%s7066_s8 + $0xf8] sm:$0xff] }
 0x389   :  { %2526 = vrot.lane.b32.xlu1 %v2488_v14, %s4988_s20  ;;  %v2655_v24 = vrot.slane %v2488_v14, 4 }
 0x38b   :  { %2585 = vrot.lane.b32.xlu0 %v2485_v30, %s4987_s3  ;;  %v6082_v57 = vsel %vm1000_vm3, %v2653_v28, %v2655_v24  ;;  %v417_v30 = vld [vmem:[%s7060_s4 + $0x10] sm:$0xff]  ;;  %v4242_v28 = vld [vmem:[%s7065_s7 + $0xf8] sm:$0xff]  ;;  %v4256_v24 = vld [vmem:[%s7066_s8 + $0x100] sm:$0xff] }
 0x38d   :  { %2587 = vrot.lane.b32.xlu1 %v2486_v25, %s4987_s3  ;;  %v418_v25 = vld [vmem:[%s7060_s4 + $0x18] sm:$0xff] }
 0x38f   :  { %2589 = vrot.lane.b32.xlu0 %v2487_v23, %s4987_s3  ;;  %v4238_v23 = vld [vmem:[%s7065_s7 + $0xd8] sm:$0xff] }
 0x391   :  { %2591 = vrot.lane.b32.xlu1 %v2488_v14, %s4987_s3  ;;  %v4244_v14 = vld [vmem:[%s7065_s7 + $0x108] sm:$0xff] }
 0x393   :  { %455 = vperm.xlu0 %4854, %v415_v41   ;;  %v4257_v41 = vld [vmem:[%s7066_s8 + $0x108] sm:$0xff] }
 0x395   :  { %460 = vperm.xlu1 %4855, %v416_v26   ;;  %v4245_v26 = vld [vmem:[%s7065_s7 + $0x110] sm:$0xff] }
 0x397   :  { %465 = vperm.xlu0 %4854, %v417_v30   ;;  %v4246_v30 = vld [vmem:[%s7065_s7 + $0x118] sm:$0xff] }
 0x399   :  { %470 = vperm.xlu1 %4855, %v418_v25   ;;  %v4258_v25 = vld [vmem:[%s7066_s8 + $0x110] sm:$0xff] }
 0x39b   :  { %475 = vperm.xlu0 %4854, %v419_v16   ;;  %v4259_v16 = vld [vmem:[%s7066_s8 + $0x118] sm:$0xff] }
 0x39d   :  { %480 = vperm.xlu1 %4855, %v420_v1   ;;  %v4247_v1 = vld [vmem:[%s7065_s7 + $0x120] sm:$0xff] }
 0x39f   :  { %3033 = vperm.xlu0 %4854, %v4237_v20   ;;  %v4248_v20 = vld [vmem:[%s7065_s7 + $0x128] sm:$0xff] }
 0x3a1   :  { %3038 = vperm.xlu1 %4855, %v4238_v23   ;;  %v4260_v23 = vld [vmem:[%s7066_s8 + $0x120] sm:$0xff] }
 0x3a3   :  { %3125 = vperm.xlu0 %4854, %v4250_v38   ;;  %v4261_v38 = vld [vmem:[%s7066_s8 + $0x128] sm:$0xff] }
 0x3a5   :  { %3130 = vperm.xlu1 %4855, %v4251_v31  }
 0x3a7   :  { %3043 = vperm.xlu0 %4854, %v4239_v46  }
 0x3a9   :  { %3048 = vperm.xlu1 %4855, %v4240_v29   ;;  %v4249_v29 = vld [vmem:[%s7065_s7 + $0x130] sm:$0xf] }
 0x3ab   :  { %3135 = vperm.xlu0 %4854, %v4252_v32  }
 0x3ad   :  { %3140 = vperm.xlu1 %4855, %v4253_v35  }
 0x3af   :  { %3053 = vperm.xlu0 %4854, %v4241_v7   ;;  %v4262_v7 = vld [vmem:[%s7066_s8 + $0x130] sm:$0xf] }
 0x3b1   :  { %3058 = vperm.xlu1 %4855, %v4242_v28   ;;  %v6188_v28 = vld [vmem:[%s7063_s1] ss:$0 sm:$0xff] }
 0x3b3   :  { %3145 = vperm.xlu0 %4854, %v4254_v52  }
 0x3b5   :  { %3150 = vperm.xlu1 %4855, %v4255_v45  }
 0x3b7   :  { %3063 = vperm.xlu0 %4854, %v4243_v51  }
 0x3b9   :  { %3068 = vperm.xlu1 %4855, %v4244_v14  }
 0x3bb   :  { %3155 = vperm.xlu0 %4854, %v4256_v24  }
 0x3bd   :  { %3160 = vperm.xlu1 %4855, %v4257_v41  }
 0x3bf   :  { %3073 = vperm.xlu0 %4854, %v4245_v26  }
 0x3c1   :  { %3078 = vperm.xlu1 %4855, %v4246_v30  }
 0x3c3   :  { %3165 = vperm.xlu0 %4854, %v4258_v25  }
 0x3c5   :  { %3170 = vperm.xlu1 %4855, %v4259_v16  }
 0x3c7   :  { %3083 = vperm.xlu0 %4854, %v4247_v1  }
 0x3c9   :  { %3088 = vperm.xlu1 %4855, %v4248_v20  }
 0x3cb   :  { %v2503_v31 = vpop.permute.xlu0 %2502  ;;  %3175 = vperm.xlu0 %4854, %v4260_v23  }
 0x3cc   :  { %v2541_v46 = vsel %vm1065_vm4, 0.0, %v2503_v31 }
 0x3cd   :  { %v2505_v32 = vpop.permute.xlu1 %2504  ;;  %3180 = vperm.xlu1 %4855, %v4261_v38   ;;  %v2554_v52 = vmul.f32 %v6188_v28, %v2541_v46 }
 0x3ce   :  { %v2542_v35 = vsel %vm1065_vm4, 0.0, %v2505_v32 }
 0x3cf   :  { %v2555_v45 = vmul.f32 %v6188_v28, %v2542_v35  ;;  %v2568_v51 = vpop.permute.xlu0 %2567  ;;  %3093 = vperm.xlu0 %4854, %v4249_v29  }
 0x3d0   :  { %v2606_v35 = vsel %vm1137_vm5, %v2568_v51, 0.0 }
 0x3d1   :  { %v2698_v14 = vpack.c.bf16 %v2555_v45, %v2554_v52  ;;  %v2570_v24 = vpop.permute.xlu1 %2569  ;;  %3185 = vperm.xlu1 %4855, %v4262_v7   ;;  %v2619_v48 = vmul.f32 %v6211_v47, %v2606_v35 }
 0x3d3   :  { %v2507_v41 = vpop.permute.xlu0 %2506  ;;  %4500 = vmatpush3.bf16.msra.mxu1 %v2698_v14 }
 0x3d4   :  { %v2543_v26 = vsel %vm1065_vm4, 0.0, %v2507_v41  ;;  %4501 = vmatprep.subr.bf16.mxu1 %v2707_v4 }
 0x3d5   :  { %v2509_v30 = vpop.permute.xlu1 %2508  ;;  %v2556_v16 = vmul.f32 %v6188_v28, %v2543_v26 }
 0x3d6   :  { %v2544_v25 = vsel %vm1065_vm4, 0.0, %v2509_v30 }
 0x3d7   :  { %v2557_v1 = vmul.f32 %v6188_v28, %v2544_v25  ;;  %v2572_v20 = vpop.permute.xlu0 %2571  ;;  %v2710_v25 = vpack.c.bf16 %v2619_v48, %v6082_v57 }
 0x3d9   :  { %v2699_v23 = vpack.c.bf16 %v2557_v1, %v2556_v16  ;;  %v2608_v16 = vsel %vm1137_vm5, %v2572_v20, 0.0 }
 0x3da   :  { %v2621_v50 = vmul.f32 %v6211_v47, %v2608_v16 }
 0x3db   :  { %v2574_v38 = vpop.permute.xlu0 %2573  ;;  %v2576_v31 = vpop.permute.xlu1 %2575  ;;  %4502 = vmatpush3.bf16.msra.mxu1 %v2699_v23 }
 0x3dc   :  { %4503 = vmatprep.subr.bf16.mxu1 %v2708_v3 }
 0x3df   :  { %v2511_v46 = vpop.permute.xlu0 %2510  ;;  %v2513_v29 = vpop.permute.xlu1 %2512 }
 0x3e0   :  { %v2545_v44 = vsel %vm1065_vm4, 0.0, %v2511_v46  ;;  %v2546_v33 = vsel %vm1065_vm4, 0.0, %v2513_v29  ;;  %v2607_v46 = vsel %vm1137_vm5, %v2570_v24, 0.0 }
 0x3e1   :  { %v2558_v4 = vmul.f32 %v6188_v28, %v2545_v44  ;;  %v2559_v32 = vmul.f32 %v6188_v28, %v2546_v33  ;;  %v2620_v20 = vmul.f32 %v6211_v47, %v2607_v46 }
 0x3e3   :  { %v2700_v7 = vpack.c.bf16 %v2559_v32, %v2558_v4  ;;  %v2515_v52 = vpop.permute.xlu0 %2514 }
 0x3e4   :  { %v2547_v45 = vsel %vm1065_vm4, 0.0, %v2515_v52  ;;  %v2609_v52 = vsel %vm1137_vm5, %v2574_v38, 0.0 }
 0x3e5   :  { %v2517_v14 = vpop.permute.xlu1 %2516  ;;  %4504 = vmatpush3.bf16.msra.mxu1 %v2700_v7  ;;  %v2560_v51 = vmul.f32 %v6188_v28, %v2547_v45  ;;  %v2711_v7 = vpack.c.bf16 %v2621_v50, %v2620_v20  ;;  %v2610_v45 = vsel %vm1137_vm5, %v2576_v31, 0.0 }
 0x3e6   :  { %v2548_v3 = vsel %vm1065_vm4, 0.0, %v2517_v14  ;;  %4505 = vmatprep.subr.bf16.mxu1 %v2709_v10 }
 0x3e7   :  { %v2561_v41 = vmul.f32 %v6188_v28, %v2548_v3  ;;  %v2582_v30 = vpop.permute.xlu0 %2581 }
 0x3e8   :  { %v2613_v12 = vsel %vm1137_vm5, %v2582_v30, 0.0 }
 0x3e9   :  { %v2701_v26 = vpack.c.bf16 %v2561_v41, %v2560_v51  ;;  %v2626_v32 = vmul.f32 %v6211_v47, %v2613_v12  ;;  %v2622_v41 = vmul.f32 %v6211_v47, %v2609_v52 }
 0x3eb   :  { %v2519_v1 = vpop.permute.xlu1 %2518  ;;  %4506 = vmatpush3.bf16.msra.mxu1 %v2701_v26  ;;  %v2623_v26 = vmul.f32 %v6211_v47, %v2610_v45 }
 0x3ec   :  { %v2549_v23 = vsel %vm1065_vm4, 0.0, %v2519_v1  ;;  %4507 = vmatprep.subr.bf16.mxu1 %v2710_v25 }
 0x3ed   :  { %v2521_v29 = vpop.permute.xlu0 %2520  ;;  %v2562_v44 = vmul.f32 %v6188_v28, %v2549_v23  ;;  %v2712_v46 = vpack.c.bf16 %v2623_v26, %v2622_v41  ;;  %v4933_v26 = vld [vmem:[%s7062_s6 + $0x154] ss:$12 sps:$4 sm:$0xff]  }
 0x3ee   :  { %v2550_v10 = vsel %vm1065_vm4, 0.0, %v2521_v29 }
 0x3ef   :  { %v2563_v57 = vmul.f32 %v6188_v28, %v2550_v10  ;;  %v2584_v33 = vpop.permute.xlu1 %2583 }
 0x3f0   :  { %v2614_v4 = vsel %vm1137_vm5, %v2584_v33, 0.0 }
 0x3f1   :  { %v2702_v35 = vpack.c.bf16 %v2563_v57, %v2562_v44  ;;  %v2627_v24 = vmul.f32 %v6211_v47, %v2614_v4 }
 0x3f3   :  { %v2714_v14 = vpack.c.bf16 %v2627_v24, %v2626_v32  ;;  %v2523_v48 = vpop.permute.xlu1 %2522  ;;  %4508 = vmatpush3.bf16.msra.mxu1 %v2702_v35 }
 0x3f4   :  { %v2551_v3 = vsel %vm1065_vm4, 0.0, %v2523_v48  ;;  %4509 = vmatprep.subr.bf16.mxu1 %v2711_v7 }
 0x3f5   :  { %4782 = vmatpush3.bf16.msra.mxu0 %v2714_v14  ;;  %v2525_v51 = vpop.permute.xlu0 %2524  ;;  %v2564_v38 = vmul.f32 %v6188_v28, %v2551_v3 }
 0x3f6   :  { %v2552_v30 = vsel %vm1065_vm4, 0.0, %v2525_v51  ;;  %4783 = vmatprep.subr.bf16.mxu0 %v7068_v0 }
 0x3f7   :  { %v2565_v31 = vmul.f32 %v6188_v28, %v2552_v30  ;;  %v2580_v25 = vpop.permute.xlu1 %2579 }
 0x3f8   :  { %v2612_v50 = vsel %vm1137_vm5, %v2580_v25, 0.0  ;;  %v4939_v25 = vld [vmem:[%s7062_s6 + $0x168] ss:$12 sps:$4 sm:$0xff]  }
 0x3f9   :  { %v2703_v16 = vpack.c.bf16 %v2565_v31, %v2564_v38  ;;  %v2578_v1 = vpop.permute.xlu0 %2577  ;;  %v2625_v20 = vmul.f32 %v6211_v47, %v2612_v50  ;;  %v4932_v31 = vld [vmem:[%s7062_s6 + $0x140] ss:$12 sps:$4 sm:$0xff]   ;;  %v4947_v50 = vld [vmem:[%s7062_s6 + $0x198] ss:$12 sps:$4 sm:$0xff]  }
 0x3fa   :  { %v2611_v23 = vsel %vm1137_vm5, %v2578_v1, 0.0  ;;  %v4940_v1 = vld [vmem:[%s7062_s6 + $0x170] ss:$12 sps:$4 sm:$0xff]  }
 0x3fb   :  { %v2527_v29 = vpop.permute.xlu1 %2526  ;;  %4510 = vmatpush3.bf16.msra.mxu1 %v2703_v16  ;;  %v2624_v10 = vmul.f32 %v6211_v47, %v2611_v23  ;;  %v4941_v16 = vld [vmem:[%s7062_s6 + $0x184] ss:$12 sps:$4 sm:$0xff]   ;;  %v4943_v23 = vld [vmem:[%s7062_s6 + $0x180] ss:$12 sps:$4 sm:$0xff]  }
 0x3fc   :  { %v2553_v12 = vsel %vm1065_vm4, 0.0, %v2527_v29  ;;  %4511 = vmatprep.subr.bf16.mxu1 %v2712_v46  ;;  %v4945_v46 = vld [vmem:[%s7062_s6 + $0x19c] ss:$12 sps:$4 sm:$0xff]  }
 0x3fd   :  { %v2566_v44 = vmul.f32 %v6188_v28, %v2553_v12  ;;  %v2586_v57 = vpop.permute.xlu0 %2585  ;;  %v2713_v14 = vpack.c.bf16 %v2625_v20, %v2624_v10  ;;  %v4944_v29 = vld [vmem:[%s7062_s6 + $0x188] ss:$12 sps:$4 sm:$0xff]   ;;  %v4948_v10 = vld [vmem:[%s7062_s6 + $0x1a0] ss:$12 sps:$4 sm:$0xff]   ;;  %v4952_v20 = vld [vmem:[%s7062_s6 + $0x1b8] ss:$12 sps:$4 sm:$0xff]  }
 0x3fe   :  { %v2615_v33 = vsel %vm1137_vm5, %v2586_v57, 0.0  ;;  %v4949_v12 = vld [vmem:[%s7062_s6 + $0x1b4] ss:$12 sps:$4 sm:$0xff]   ;;  %v4951_v57 = vld [vmem:[%s7062_s6 + $0x1b0] ss:$12 sps:$4 sm:$0xff]  }
 0x3ff   :  { %v2670_v4 = vsel %vm1000_vm3, %v2566_v44, %v2632_v40  ;;  %v2588_v32 = vpop.permute.xlu1 %2587  ;;  %v2628_v7 = vmul.f32 %v6211_v47, %v2615_v33  ;;  %v4207_v44 = vld [vmem:[%s7062_s6 + $0x1c8] sm:$0x33] }
 0x400   :  { %v2616_v35 = vsel %vm1137_vm5, %v2588_v32, 0.0  ;;  %v2704_v24 = vpack.c.bf16 %v6012_v55, %v2670_v4  ;;  %v4929_v55 = vld [vmem:[%s7062_s6 + $0x138] ss:$12 sps:$4 sm:$0xff]   ;;  %v4228_v33 = vcombine.high %v4207_v44, %v4207_v44  ;;  %v4227_v4 = vcombine.low %v4207_v44, %v4207_v44  ;;  %v4955_v32 = vld [vmem:[%s7062_s6 + $0x1d0] ss:$0 sps:$4 sm:$0x33]  }
 0x401   :  { %v2629_v52 = vmul.f32 %v6211_v47, %v2616_v35  ;;  %v2590_v45 = vpop.permute.xlu0 %2589 }
 0x402   :  { %v2617_v48 = vsel %vm1137_vm5, %v2590_v45, 0.0  ;;  %4512 = vmatpush3.bf16.msra.mxu1 %v2704_v24 }
 0x403   :  { %v2715_v3 = vpack.c.bf16 %v2629_v52, %v2628_v7  ;;  %v2592_v51 = vpop.permute.xlu1 %2591  ;;  %4513 = vmatprep.subr.bf16.mxu1 %v2713_v14  ;;  %v2630_v40 = vmul.f32 %v6211_v47, %v2617_v48 }
 0x404   :  { %v2618_v5 = vsel %vm1137_vm5, %v2592_v51, 0.0 }
 0x405   :  { %v2631_v41 = vmul.f32 %v6211_v47, %v2618_v5  ;;  %4784 = vmatpush3.bf16.msra.mxu0 %v2715_v3 }
 0x406   :  { %4514 = vmatpush3.bf16.msra.mxu1 %v2705_v27  ;;  %4785 = vmatprep.subr.bf16.mxu0 %v7068_v0  ;;  %v4936_v27 = vld [vmem:[%s7062_s6 + $0x158] ss:$12 sps:$4 sm:$0xff]  }
 0x407   :  { %v2716_v30 = vpack.c.bf16 %v2631_v41, %v2630_v40 }
 0x409   :  { %2874 = vmatmul.mubr.bf16.vlgmr.msra.gmra.mrb[84].mxu1 %v4929_v55  ;;  %v2839_v38 = vsel %vm1389_vm6, %v2716_v30, 0 }
 0x40a   :  { %4786 = vmatpush3.bf16.msra.mxu0 %v2839_v38  ;;  %2881 = vmatprep.mubr.bf16.mxu1 %v4933_v26 }
 0x40b   :  { %4815 = vmatprep.subr.bf16.mxu0 %v7068_v0 }
 0x40d   :  { %4788 = vmatmul.mubr.msk.bf16.vlgmr.msra.gmra.mrb[104].mxu0 %vm1367_vm7, %v4932_v31 }
 0x40e   :  { %4791 = vmatprep.mubr.msk.bf16.mxu0 %vm4985_vm1, %v7068_v0 }
 0x411   :  { %2882 = vmatmul.mubr.bf16.gmra.mrb[88].mxu1 %v4935_v63 }
 0x412   :  { %2889 = vmatprep.mubr.bf16.mxu1 %v4937_v8  ;;  %v6344_v35 = vpop.permute.xlu0 %455 }
 0x414   :  { %v6346_v24 = vpop.permute.xlu1 %460 }
 0x415   :  { %4792 = vmatmul.mubr.msk.bf16.gmra.mrb[108].mxu0 %vm1367_vm7, %v4936_v27 }
 0x416   :  { %4795 = vmatprep.mubr.msk.bf16.mxu0 %vm4985_vm1, %v7068_v0  ;;  %v6348_v7 = vpop.permute.xlu0 %465 }
 0x418   :  { %v6350_v52 = vpop.permute.xlu1 %470 }
 0x419   :  { %2890 = vmatmul.mubr.bf16.gmra.mrb[92].mxu1 %v4939_v25 }
 0x41a   :  { %2897 = vmatprep.mubr.bf16.mxu1 %v4941_v16  ;;  %v6352_v45 = vpop.permute.xlu0 %475 }
 0x41c   :  { %v6354_v14 = vpop.permute.xlu1 %480 }
 0x41d   :  { %4796 = vmatmul.mubr.msk.bf16.gmra.mrb[112].mxu0 %vm1367_vm7, %v4940_v1 }
 0x41e   :  { %4799 = vmatprep.mubr.msk.bf16.mxu0 %vm4985_vm1, %v7068_v0  ;;  %v3034_v48 = vpop.permute.xlu0 %3033 }
 0x420   :  { %v3039_v3 = vpop.permute.xlu1 %3038 }
 0x421   :  { %2898 = vmatmul.mubr.bf16.gmra.mrb[96].mxu1 %v4943_v23 }
 0x422   :  { %2905 = vmatprep.mubr.bf16.mxu1 %v4945_v46  ;;  %v3126_v51 = vpop.permute.xlu0 %3125 }
 0x424   :  { %v3131_v5 = vpop.permute.xlu1 %3130 }
 0x425   :  { %4800 = vmatmul.mubr.msk.bf16.gmra.mrb[116].mxu0 %vm1367_vm7, %v4944_v29 }
 0x426   :  { %4803 = vmatprep.mubr.msk.bf16.mxu0 %vm4985_vm1, %v7068_v0  ;;  %v3044_v40 = vpop.permute.xlu0 %3043 }
 0x428   :  { %v3049_v41 = vpop.permute.xlu1 %3048 }
 0x429   :  { %2906 = vmatmul.mubr.bf16.gmra.mrb[100].mxu1 %v4947_v50 }
 0x42a   :  { %2913 = vmatprep.mubr.bf16.mxu1 %v4949_v12  ;;  %v3136_v55 = vpop.permute.xlu0 %3135 }
 0x42c   :  { %v3141_v38 = vpop.permute.xlu1 %3140 }
 0x42d   :  { %4804 = vmatmul.mubr.msk.bf16.gmra.mrb[120].mxu0 %vm1367_vm7, %v4948_v10 }
 0x42e   :  { %4807 = vmatprep.mubr.msk.bf16.mxu0 %vm4985_vm1, %v7068_v0  ;;  %v3054_v23 = vpop.permute.xlu0 %3053 }
 0x430   :  { %v3059_v10 = vpop.permute.xlu1 %3058 }
 0x431   :  { %2914 = vmatmul.mubr.bf16.gmra.mrb[104].mxu1 %v4951_v57 }
 0x432   :  { %2921 = vmatprep.mubr.bf16.mxu1 %v4228_v33 }
 0x435   :  { %4808 = vmatmul.mubr.msk.bf16.gmra.mrb[124].mxu0 %vm1367_vm7, %v4952_v20 }
 0x436   :  { %4811 = vmatprep.mubr.msk.bf16.mxu0 %vm4985_vm1, %v7068_v0 }
 0x439   :  { %2922 = vmatmul.mubr.bf16.gmra.mrb[108].mxu1 %v4227_v4 }
 0x43d   :  { %4812 = vmatmul.mubr.msk.bf16.gmra.mrb[128].mxu0 %vm1367_vm7, %v4955_v32 }
 0x43e   :  { %4821 = vmatprep.mubr.msk.bf16.mxu0 %vm4985_vm1, %v7068_v0 }
 0x4dc   :  { %v4515_v26 = vpop.f32.mrb[84].mxu1 }
 0x4dd   :  { %v4516_v30 = vpop.f32.mrb[85].mxu1 }
 0x4de   :  { %v4517_v31 = vadd.f32 %v4516_v30, %v4515_v26  ;;  %v4518_v63 = vpop.f32.mrb[86].mxu1 }
 0x4df   :  { %v4519_v8 = vpop.f32.mrb[87].mxu1 }
 0x4e0   :  { %v4520_v27 = vadd.f32 %v4519_v8, %v4518_v63  ;;  %v2963_v25 = vpop.f32.mrb[104].mxu0  ;;  %v3146_v63 = vpop.permute.xlu0 %3145 }
 0x4e1   :  { %v2964_v16 = vadd.f32 %v4517_v31, %v2963_v25  ;;  %v4789_v1 = vpop.f32.mrb[105].mxu0 }
 0x4e2   :  { %v2966_v46 = vpop.f32.mrb[106].mxu0 }
 0x4e3   :  { %v3096_v29 = vmul.f32 %v3034_v48, %v2964_v16  ;;  %v2967_v50 = vadd.f32 %v4520_v27, %v2966_v46  ;;  %v4790_v12 = vpop.f32.mrb[107].mxu0  ;;  %v3151_v27 = vpop.permute.xlu1 %3150 }
 0x4e4   :  { %v4521_v44 = vpop.f32.mrb[88].mxu1 }
 0x4e5   :  { %v3188_v57 = vadd.f32 %v3126_v51, %v3096_v29  ;;  %v3097_v33 = vmul.f32 %v3039_v3, %v2967_v50  ;;  %v4522_v20 = vpop.f32.mrb[89].mxu1 }
 0x4e6   :  { %v4523_v4 = vadd.f32 %v4522_v20, %v4521_v44  ;;  %v4524_v32 = vpop.f32.mrb[90].mxu1  ;;  %v3064_v20 = vpop.permute.xlu0 %3063 }
 0x4e7   :  { %v6356_v0 = vmax.f32 %v3188_v57, 0.0  ;;  %v3189_v26 = vadd.f32 %v3131_v5, %v3097_v33  ;;  %v4525_v30 = vpop.f32.mrb[91].mxu1 }
 0x4e8   :  { %v4526_v8 = vadd.f32 %v4525_v30, %v4524_v32  ;;  %v2971_v31 = vpop.f32.mrb[108].mxu0 }
 0x4e9   :  { %v3202_v25 = vmax.f32 %v3189_v26, 0.0  ;;  %v2972_v1 = vadd.f32 %v4523_v4, %v2971_v31  ;;  %3227 = vrot.lane.b32.xlu0 %v6356_v0, %s4988_s20  ;;  %v4793_v48 = vpop.f32.mrb[109].mxu0  ;;  %v7070_v3 = vrot.slane %v6356_v0, 4 }
 0x4ea   :  { %v2974_v16 = vpop.f32.mrb[110].mxu0 }
 0x4eb   :  { %v3358_v51 = vrot.slane %v3202_v25, 4  ;;  %v3098_v46 = vmul.f32 %v3044_v40, %v2972_v1  ;;  %v2975_v29 = vadd.f32 %v4526_v8, %v2974_v16  ;;  %3229 = vrot.lane.b32.xlu1 %v3202_v25, %s4988_s20  ;;  %v4794_v5 = vpop.f32.mrb[111].mxu0  ;;  %v3069_v8 = vpop.permute.xlu1 %3068 }
 0x4ec   :  { %v4527_v50 = vpop.f32.mrb[92].mxu1 }
 0x4ed   :  { %v3190_v12 = vadd.f32 %v3136_v55, %v3098_v46  ;;  %v3099_v44 = vmul.f32 %v3049_v41, %v2975_v29  ;;  %3292 = vrot.lane.b32.xlu0 %v6356_v0, %s4987_s3  ;;  %v4528_v57 = vpop.f32.mrb[93].mxu1  ;;  %v6367_v33 = vsel %vm1000_vm3, %v7070_v3, %v3358_v51 }
 0x4ee   :  { %v4529_v4 = vadd.f32 %v4528_v57, %v4527_v50  ;;  %v4530_v32 = vpop.f32.mrb[94].mxu1 }
 0x4ef   :  { %v3203_v40 = vmax.f32 %v3190_v12, 0.0  ;;  %v3191_v26 = vadd.f32 %v3141_v38, %v3099_v44  ;;  %3294 = vrot.lane.b32.xlu1 %v3202_v25, %s4987_s3  ;;  %v4531_v30 = vpop.f32.mrb[95].mxu1  ;;  %v3156_v25 = vpop.permute.xlu0 %3155 }
 0x4f0   :  { %v4532_v55 = vadd.f32 %v4531_v30, %v4530_v32  ;;  %v2979_v41 = vpop.f32.mrb[112].mxu0  ;;  %v3161_v30 = vpop.permute.xlu1 %3160 }
 0x4f1   :  { %v3360_v31 = vrot.slane %v3203_v40, 4  ;;  %v3204_v1 = vmax.f32 %v3191_v26, 0.0  ;;  %v2980_v48 = vadd.f32 %v4529_v4, %v2979_v41  ;;  %3231 = vrot.lane.b32.xlu0 %v3203_v40, %s4988_s20  ;;  %v4797_v16 = vpop.f32.mrb[113].mxu0 }
 0x4f2   :  { %v2982_v46 = vpop.f32.mrb[114].mxu0 }
 0x4f3   :  { %v3100_v29 = vmul.f32 %v3054_v23, %v2980_v48  ;;  %v2983_v5 = vadd.f32 %v4532_v55, %v2982_v46  ;;  %3233 = vrot.lane.b32.xlu1 %v3204_v1, %s4988_s20  ;;  %v4798_v50 = vpop.f32.mrb[115].mxu0  ;;  %v3362_v12 = vrot.slane %v3204_v1, 4  ;;  %v6373_v38 = vsel %vm1000_vm3, %v3358_v51, %v3360_v31 }
 0x4f4   :  { %v4533_v44 = vpop.f32.mrb[96].mxu1 }
 0x4f5   :  { %v3192_v57 = vadd.f32 %v3146_v63, %v3100_v29  ;;  %v3101_v32 = vmul.f32 %v3059_v10, %v2983_v5  ;;  %3296 = vrot.lane.b32.xlu0 %v3203_v40, %s4987_s3  ;;  %v4534_v4 = vpop.f32.mrb[97].mxu1  ;;  %v6377_v26 = vsel %vm1000_vm3, %v3360_v31, %v3362_v12  ;;  %v3074_v31 = vpop.permute.xlu0 %3073 }
 0x4f6   :  { %v4535_v23 = vadd.f32 %v4534_v4, %v4533_v44  ;;  %v4536_v55 = vpop.f32.mrb[98].mxu1 }
 0x4f7   :  { %v3205_v48 = vmax.f32 %v3192_v57, 0.0  ;;  %v3193_v16 = vadd.f32 %v3151_v27, %v3101_v32  ;;  %v4537_v51 = vpop.f32.mrb[99].mxu1  ;;  %v3079_v32 = vpop.permute.xlu1 %3078 }
 0x4f8   :  { %v4538_v46 = vadd.f32 %v4537_v51, %v4536_v55  ;;  %v2987_v50 = vpop.f32.mrb[116].mxu0 }
 0x4f9   :  { %v6381_v3 = vmax.f32 %v3193_v16, 0.0  ;;  %v2988_v10 = vadd.f32 %v4535_v23, %v2987_v50  ;;  %3298 = vrot.lane.b32.xlu0 %v3204_v1, %s4987_s3  ;;  %3300 = vrot.lane.b32.xlu1 %v3205_v48, %s4987_s3  ;;  %v4801_v63 = vpop.f32.mrb[117].mxu0  ;;  %v3364_v40 = vrot.slane %v3205_v48, 4 }
 0x4fa   :  { %v2990_v29 = vpop.f32.mrb[118].mxu0 }
 0x4fb   :  { %v3102_v5 = vmul.f32 %v3064_v20, %v2988_v10  ;;  %v2991_v44 = vadd.f32 %v4538_v46, %v2990_v29  ;;  %v4802_v4 = vpop.f32.mrb[119].mxu0  ;;  %v3365_v57 = vsel %vm1000_vm3, %v3362_v12, %v3364_v40  ;;  %v3366_v27 = vrot.slane %v6381_v3, 4  ;;  %v3166_v29 = vpop.permute.xlu0 %3165 }
 0x4fc   :  { %v4539_v55 = vpop.f32.mrb[100].mxu1 }
 0x4fd   :  { %v3194_v16 = vadd.f32 %v3156_v25, %v3102_v5  ;;  %v3103_v51 = vmul.f32 %v3069_v8, %v2991_v44  ;;  %3235 = vrot.lane.b32.xlu0 %v3205_v48, %s4988_s20  ;;  %3237 = vrot.lane.b32.xlu1 %v6381_v3, %s4988_s20  ;;  %v4540_v1 = vpop.f32.mrb[101].mxu1  ;;  %v3367_v23 = vsel %vm1000_vm3, %v3364_v40, %v3366_v27  ;;  %v3171_v40 = vpop.permute.xlu1 %3170 }
 0x4fe   :  { %v4541_v50 = vadd.f32 %v4540_v1, %v4539_v55  ;;  %v4542_v20 = vpop.f32.mrb[102].mxu1  ;;  %v3431_v46 = vpack.c.bf16 %v3367_v23, %v3365_v57 }
 0x4ff   :  { %v6391_v10 = vmax.f32 %v3194_v16, 0.0  ;;  %v3195_v12 = vadd.f32 %v3161_v30, %v3103_v51  ;;  %v4543_v63 = vpop.f32.mrb[103].mxu1 }
 0x500   :  { %v4544_v4 = vadd.f32 %v4543_v63, %v4542_v20  ;;  %v2995_v41 = vpop.f32.mrb[120].mxu0  ;;  %4567 = vmatprep.subr.bf16.mxu1 %v3431_v46  ;;  %v3084_v46 = vpop.permute.xlu0 %3083 }
 0x501   :  { %v3208_v8 = vmax.f32 %v3195_v12, 0.0  ;;  %v2996_v25 = vadd.f32 %v4541_v50, %v2995_v41  ;;  %3239 = vrot.lane.b32.xlu0 %v6391_v10, %s4988_s20  ;;  %v4805_v48 = vpop.f32.mrb[121].mxu0  ;;  %v3368_v5 = vrot.slane %v6391_v10, 4 }
 0x502   :  { %v2998_v44 = vpop.f32.mrb[122].mxu0  ;;  %v3089_v48 = vpop.permute.xlu1 %3088 }
 0x503   :  { %v3104_v55 = vmul.f32 %v3074_v31, %v2996_v25  ;;  %v2999_v57 = vadd.f32 %v4544_v4, %v2998_v44  ;;  %3241 = vrot.lane.b32.xlu1 %v3208_v8, %s4988_s20  ;;  %v4806_v30 = vpop.f32.mrb[123].mxu0  ;;  %v6398_v16 = vsel %vm1000_vm3, %v3366_v27, %v3368_v5  ;;  %v3370_v51 = vrot.slane %v3208_v8, 4 }
 0x504   :  { %v4545_v1 = vpop.f32.mrb[104].mxu1 }
 0x505   :  { %v3196_v23 = vadd.f32 %v3166_v29, %v3104_v55  ;;  %v3105_v41 = vmul.f32 %v3079_v32, %v2999_v57  ;;  %3306 = vrot.lane.b32.xlu0 %v3208_v8, %s4987_s3  ;;  %v4546_v50 = vpop.f32.mrb[105].mxu1  ;;  %v6402_v20 = vsel %vm1000_vm3, %v3368_v5, %v3370_v51 }
 0x506   :  { %v4547_v12 = vadd.f32 %v4546_v50, %v4545_v1  ;;  %v4548_v31 = vpop.f32.mrb[106].mxu1 }
 0x507   :  { %v3209_v4 = vmax.f32 %v3196_v23, 0.0  ;;  %v3197_v25 = vadd.f32 %v3171_v40, %v3105_v41  ;;  %v4549_v27 = vpop.f32.mrb[107].mxu1  ;;  %v3176_v23 = vpop.permute.xlu0 %3175 }
 0x508   :  { %v4550_v44 = vadd.f32 %v4549_v27, %v4548_v31  ;;  %v3003_v30 = vpop.f32.mrb[124].mxu0 }
 0x509   :  { %v3210_v29 = vmax.f32 %v3197_v25, 0.0  ;;  %v3004_v32 = vadd.f32 %v4547_v12, %v3003_v30  ;;  %3243 = vrot.lane.b32.xlu1 %v3209_v4, %s4988_s20  ;;  %v4809_v8 = vpop.f32.mrb[125].mxu0  ;;  %v3372_v55 = vrot.slane %v3209_v4, 4  ;;  %v3181_v30 = vpop.permute.xlu1 %3180 }
 0x50a   :  { %v3006_v5 = vpop.f32.mrb[126].mxu0 }
 0x50b   :  { %v3106_v57 = vmul.f32 %v3084_v46, %v3004_v32  ;;  %v3007_v59 = vadd.f32 %v4550_v44, %v3006_v5  ;;  %3245 = vrot.lane.b32.xlu0 %v3210_v29, %s4988_s20  ;;  %v4810_v1 = vpop.f32.mrb[127].mxu0  ;;  %v6409_v50 = vsel %vm1000_vm3, %v3370_v51, %v3372_v55  ;;  %v3374_v40 = vrot.slane %v3210_v29, 4 }
 0x50c   :  { %v4551_v41 = vpop.f32.mrb[108].mxu1 }
 0x50d   :  { %v3198_v31 = vadd.f32 %v3176_v23, %v3106_v57  ;;  %v3107_v27 = vmul.f32 %v3089_v48, %v3007_v59  ;;  %3308 = vrot.lane.b32.xlu1 %v3209_v4, %s4987_s3  ;;  %v4552_v12 = vpop.f32.mrb[109].mxu1  ;;  %v6413_v25 = vsel %vm1000_vm3, %v3372_v55, %v3374_v40  ;;  %v3094_v48 = vpop.permute.xlu0 %3093 }
 0x50e   :  { %v4553_v46 = vadd.f32 %v4552_v12, %v4551_v41  ;;  %v3433_v44 = vpack.c.bf16 %v6413_v25, %v6409_v50  ;;  %v4554_v32 = vpop.f32.mrb[110].mxu1  ;;  %v1669_v50 = vld [vmem:[%s7066_s8 + $0x48] sm:$0xff] }
 0x50f   :  { %v3211_v8 = vmax.f32 %v3198_v31, 0.0  ;;  %v3199_v51 = vadd.f32 %v3181_v30, %v3107_v27  ;;  %v4555_v5 = vpop.f32.mrb[111].mxu1  ;;  %v3186_v31 = vpop.permute.xlu1 %3185 }
 0x510   :  { %v3011_v1 = vpop.f32.mrb[128].mxu0  ;;  %v426_v5 = vld [vmem:[%s7060_s4 + $0x58] sm:$0xff] }
 0x511   :  { %v3212_v63 = vmax.f32 %v3199_v51, 0.0  ;;  %v3012_v18 = vadd.f32 %v4553_v46, %v3011_v1  ;;  %3247 = vrot.lane.b32.xlu1 %v3211_v8, %s4988_s20  ;;  %v4813_v59 = vpop.f32.mrb[129].mxu0  ;;  %v3376_v4 = vrot.slane %v3211_v8, 4  ;;  %v421_v51 = vld [vmem:[%s7060_s4 + $0x30] sm:$0xff]  ;;  %v681_v1 = vld [vmem:[%s7061_s5] sm:$0xff] }
 0x512   :  { %v3014_v57 = vpop.f32.mrb[130].mxu0  ;;  %v682_v59 = vld [vmem:[%s7061_s5 + $0x8] sm:$0xff] }
 0x513   :  { %v3108_v55 = vmul.f32 %v3094_v48, %v3012_v18  ;;  %3249 = vrot.lane.b32.xlu0 %v3212_v63, %s4988_s20  ;;  %v3378_v23 = vrot.slane %v3212_v63, 4  ;;  %v4814_v41 = vpop.f32.mrb[131].mxu0  ;;  %v6420_v12 = vsel %vm1000_vm3, %v3374_v40, %v3376_v4  ;;  %v4958_v18 = vld [vmem:[%s7062_s6 + $0x1d8] ss:$12 sps:$4 sm:$0xff]  }
 0x514   :  { %3598 = vmatprep.mubr.bf16.mxu1 %v4958_v18  ;;  %v684_v48 = vld [vmem:[%s7061_s5 + $0x18] sm:$0xff]  ;;  %v685_v57 = vld [vmem:[%s7061_s5 + $0x20] sm:$0xff]  ;;  %v691_v18 = vld [vmem:[%s7061_s5 + $0x50] sm:$0xff] }
 0x515   :  { %v3200_v27 = vadd.f32 %v3186_v31, %v3108_v55  ;;  %3304 = vrot.lane.b32.xlu1 %v6391_v10, %s4987_s3  ;;  %v6425_v30 = vsel %vm1000_vm3, %v3376_v4, %v3378_v23  ;;  %v683_v4 = vld [vmem:[%s7061_s5 + $0x10] sm:$0xff]  ;;  %v686_v55 = vld [vmem:[%s7061_s5 + $0x28] sm:$0xff]  ;;  %v688_v41 = vld [vmem:[%s7061_s5 + $0x38] sm:$0xff] }
 0x516   :  { %v3434_v46 = vpack.c.bf16 %v6425_v30, %v6420_v12  ;;  %v689_v31 = vld [vmem:[%s7061_s5 + $0x40] sm:$0xff] }
 0x517   :  { %v3213_v32 = vmax.f32 %v3200_v27, 0.0  ;;  %3302 = vrot.lane.b32.xlu0 %v6381_v3, %s4987_s3  ;;  %v422_v3 = vld [vmem:[%s7060_s4 + $0x38] sm:$0xff]  ;;  %v690_v27 = vld [vmem:[%s7061_s5 + $0x48] sm:$0xff]  ;;  %v4318_v12 = vld [vmem:[%s7065_s7 + $0x140] sm:$0xff] }
 0x519   :  { %3251 = vrot.lane.b32.xlu1 %v3213_v32, %s4988_s20  ;;  %v3380_v40 = vrot.slane %v3213_v32, 4 }
 0x51b   :  { %3310 = vrot.lane.b32.xlu0 %v3210_v29, %s4987_s3  ;;  %v6437_v10 = vsel %vm1000_vm3, %v3378_v23, %v3380_v40  ;;  %v423_v29 = vld [vmem:[%s7060_s4 + $0x40] sm:$0xff]  ;;  %v687_v23 = vld [vmem:[%s7061_s5 + $0x30] sm:$0xff] }
 0x51c   :  { %v1569_v40 = vld [vmem:[%s7065_s7] sm:$0xff] }
 0x51d   :  { %3312 = vrot.lane.b32.xlu1 %v3211_v8, %s4987_s3  ;;  %v425_v8 = vld [vmem:[%s7060_s4 + $0x50] sm:$0xff] }
 0x51f   :  { %3314 = vrot.lane.b32.xlu0 %v3212_v63, %s4987_s3  ;;  %v424_v63 = vld [vmem:[%s7060_s4 + $0x48] sm:$0xff] }
 0x521   :  { %3316 = vrot.lane.b32.xlu1 %v3213_v32, %s4987_s3  ;;  %v692_v32 = vld [vmem:[%s7061_s5 + $0x58] sm:$0xff] }
 0x523   :  { %485 = vperm.xlu0 %4854, %v421_v51   ;;  %v1570_v51 = vld [vmem:[%s7065_s7 + $0x8] sm:$0xff] }
 0x525   :  { %490 = vperm.xlu1 %4855, %v422_v3   ;;  %v1571_v3 = vld [vmem:[%s7065_s7 + $0x10] sm:$0xff] }
 0x527   :  { %495 = vperm.xlu0 %4854, %v423_v29   ;;  %v1572_v29 = vld [vmem:[%s7065_s7 + $0x18] sm:$0xff] }
 0x529   :  { %500 = vperm.xlu1 %4855, %v424_v63   ;;  %v1573_v63 = vld [vmem:[%s7065_s7 + $0x20] sm:$0xff] }
 0x52b   :  { %505 = vperm.xlu0 %4854, %v425_v8   ;;  %v1574_v8 = vld [vmem:[%s7065_s7 + $0x28] sm:$0xff] }
 0x52d   :  { %510 = vperm.xlu1 %4855, %v426_v5   ;;  %v1575_v5 = vld [vmem:[%s7065_s7 + $0x30] sm:$0xff] }
 0x52f   :  { %721 = vperm.xlu0 %4854, %v681_v1   ;;  %v1576_v1 = vld [vmem:[%s7065_s7 + $0x38] sm:$0xff] }
 0x531   :  { %726 = vperm.xlu1 %4855, %v682_v59   ;;  %v1577_v59 = vld [vmem:[%s7065_s7 + $0x40] sm:$0xff] }
 0x533   :  { %731 = vperm.xlu0 %4854, %v683_v4   ;;  %v1578_v4 = vld [vmem:[%s7065_s7 + $0x48] sm:$0xff] }
 0x535   :  { %736 = vperm.xlu1 %4855, %v684_v48   ;;  %v1579_v48 = vld [vmem:[%s7065_s7 + $0x50] sm:$0xff] }
 0x537   :  { %741 = vperm.xlu0 %4854, %v685_v57   ;;  %v1580_v57 = vld [vmem:[%s7065_s7 + $0x58] sm:$0xff] }
 0x539   :  { %746 = vperm.xlu1 %4855, %v686_v55  }
 0x53b   :  { %751 = vperm.xlu0 %4854, %v687_v23  }
 0x53d   :  { %756 = vperm.xlu1 %4855, %v688_v41   ;;  %v1581_v41 = vld [vmem:[%s7065_s7 + $0x60] sm:$0xf] }
 0x53f   :  { %761 = vperm.xlu0 %4854, %v689_v31  }
 0x541   :  { %766 = vperm.xlu1 %4855, %v690_v27  }
 0x543   :  { %771 = vperm.xlu0 %4854, %v691_v18   ;;  %v1660_v18 = vld [vmem:[%s7066_s8] sm:$0xff] }
 0x545   :  { %776 = vperm.xlu1 %4855, %v692_v32  }
 0x547   :  { %1584 = vperm.xlu0 %4854, %v1569_v40  }
 0x549   :  { %1589 = vperm.xlu1 %4855, %v1570_v51  }
 0x54b   :  { %1594 = vperm.xlu0 %4854, %v1571_v3   ;;  %v1661_v3 = vld [vmem:[%s7066_s8 + $0x8] sm:$0xff] }
 0x54d   :  { %1599 = vperm.xlu1 %4855, %v1572_v29  }
 0x54f   :  { %1604 = vperm.xlu0 %4854, %v1573_v63  }
 0x551   :  { %1609 = vperm.xlu1 %4855, %v1574_v8   ;;  %v1662_v8 = vld [vmem:[%s7066_s8 + $0x10] sm:$0xff] }
 0x553   :  { %1614 = vperm.xlu0 %4854, %v1575_v5  }
 0x555   :  { %1619 = vperm.xlu1 %4855, %v1576_v1  }
 0x557   :  { %1624 = vperm.xlu0 %4854, %v1577_v59   ;;  %v7073_v59 = vpack.c.bf16 %v6402_v20, %v6398_v16  ;;  %v1665_v16 = vld [vmem:[%s7066_s8 + $0x28] sm:$0xff] }
 0x559   :  { %1629 = vperm.xlu1 %4855, %v1578_v4   ;;  %v1663_v4 = vld [vmem:[%s7066_s8 + $0x18] sm:$0xff] }
 0x55b   :  { %v3228_v55 = vpop.permute.xlu0 %3227  ;;  %1634 = vperm.xlu0 %4854, %v1579_v48  }
 0x55c   :  { %v3266_v23 = vsel %vm1065_vm4, 0.0, %v3228_v55  ;;  %v1664_v55 = vld [vmem:[%s7066_s8 + $0x20] sm:$0xff] }
 0x55d   :  { %v3230_v31 = vpop.permute.xlu1 %3229  ;;  %1639 = vperm.xlu1 %4855, %v1580_v57   ;;  %v3279_v32 = vmul.f32 %v6188_v28, %v3266_v23 }
 0x55e   :  { %v3267_v27 = vsel %vm1065_vm4, 0.0, %v3230_v31 }
 0x55f   :  { %v3280_v40 = vmul.f32 %v6188_v28, %v3267_v27  ;;  %v3293_v51 = vpop.permute.xlu0 %3292  ;;  %1644 = vperm.xlu0 %4854, %v1581_v41   ;;  %v1666_v27 = vld [vmem:[%s7066_s8 + $0x30] sm:$0xff] }
 0x561   :  { %v3423_v29 = vpack.c.bf16 %v3280_v40, %v3279_v32  ;;  %v6545_v63 = vpop.permute.xlu1 %3294  ;;  %1675 = vperm.xlu1 %4855, %v1660_v18   ;;  %v1667_v40 = vld [vmem:[%s7066_s8 + $0x38] sm:$0xff] }
 0x563   :  { %v3232_v5 = vpop.permute.xlu0 %3231  ;;  %4568 = vmatpush3.bf16.msra.mxu1 %v3423_v29  ;;  %1680 = vperm.xlu0 %4854, %v1661_v3   ;;  %v1668_v3 = vld [vmem:[%s7066_s8 + $0x40] sm:$0xff] }
 0x564   :  { %v3268_v1 = vsel %vm1065_vm4, 0.0, %v3232_v5  ;;  %4569 = vmatprep.subr.bf16.mxu1 %v7073_v59  ;;  %v1670_v59 = vld [vmem:[%s7066_s8 + $0x50] sm:$0xff] }
 0x565   :  { %v3234_v48 = vpop.permute.xlu1 %3233  ;;  %1685 = vperm.xlu1 %4855, %v1662_v8   ;;  %v3281_v23 = vmul.f32 %v6188_v28, %v3268_v1 }
 0x566   :  { %v3269_v57 = vsel %vm1065_vm4, 0.0, %v3234_v48 }
 0x567   :  { %v3282_v41 = vmul.f32 %v6188_v28, %v3269_v57  ;;  %v3297_v31 = vpop.permute.xlu0 %3296  ;;  %1690 = vperm.xlu0 %4854, %v1663_v4   ;;  %v3331_v4 = vsel %vm1137_vm5, %v3293_v51, 0.0  ;;  %v1672_v51 = vld [vmem:[%s7066_s8 + $0x60] sm:$0xf] }
 0x568   :  { %v3333_v30 = vsel %vm1137_vm5, %v3297_v31, 0.0 }
 0x569   :  { %v3424_v20 = vpack.c.bf16 %v3282_v41, %v3281_v23  ;;  %1695 = vperm.xlu1 %4855, %v1664_v55   ;;  %v1671_v23 = vld [vmem:[%s7066_s8 + $0x58] sm:$0xff] }
 0x56b   :  { %v6569_v18 = vpop.permute.xlu0 %3298  ;;  %v6571_v32 = vpop.permute.xlu1 %3300  ;;  %4570 = vmatpush3.bf16.msra.mxu1 %v3424_v20  ;;  %1700 = vperm.xlu0 %4854, %v1665_v16   ;;  %v3344_v16 = vmul.f32 %v6211_v47, %v3331_v4  ;;  %v4982_v4 = vld [vmem:[%s7063_s1] ss:$0 sm:$0xff] }
 0x56c   :  { %4571 = vmatprep.subr.bf16.mxu1 %v3433_v44 }
 0x56d   :  { %1705 = vperm.xlu1 %4855, %v1666_v27  }
 0x56f   :  { %v3236_v29 = vpop.permute.xlu0 %3235  ;;  %v3238_v8 = vpop.permute.xlu1 %3237  ;;  %1710 = vperm.xlu0 %4854, %v1667_v40  }
 0x570   :  { %v3270_v5 = vsel %vm1065_vm4, 0.0, %v3236_v29  ;;  %v3271_v1 = vsel %vm1065_vm4, 0.0, %v3238_v8 }
 0x571   :  { %v3283_v25 = vmul.f32 %v6188_v28, %v3270_v5  ;;  %v3284_v44 = vmul.f32 %v6188_v28, %v3271_v1  ;;  %1715 = vperm.xlu1 %4855, %v1668_v3   ;;  %v4317_v3 = vld [vmem:[%s7065_s7 + $0x138] sm:$0xff]  ;;  %v3435_v5 = vpack.c.bf16 %v3344_v16, %v6437_v10  ;;  %v4319_v1 = vld [vmem:[%s7065_s7 + $0x148] sm:$0xff] }
 0x573   :  { %v3425_v48 = vpack.c.bf16 %v3284_v44, %v3283_v25  ;;  %v3240_v57 = vpop.permute.xlu0 %3239  ;;  %1720 = vperm.xlu0 %4854, %v1669_v50   ;;  %v3332_v50 = vsel %vm1137_vm5, %v6545_v63, 0.0  ;;  %v3346_v25 = vmul.f32 %v6211_v47, %v3333_v30 }
 0x574   :  { %v3272_v55 = vsel %vm1065_vm4, 0.0, %v3240_v57  ;;  %v3345_v63 = vmul.f32 %v6211_v47, %v3332_v50  ;;  %v7074_v50 = vmov 0.0  }
 0x575   :  { %v3242_v41 = vpop.permute.xlu1 %3241  ;;  %4572 = vmatpush3.bf16.msra.mxu1 %v3425_v48  ;;  %1725 = vperm.xlu1 %4855, %v1670_v59   ;;  %v3285_v27 = vmul.f32 %v6188_v28, %v3272_v55  ;;  %v4320_v59 = vld [vmem:[%s7065_s7 + $0x150] sm:$0xff] }
 0x576   :  { %v3273_v20 = vsel %vm1065_vm4, 0.0, %v3242_v41  ;;  %4573 = vmatprep.subr.bf16.mxu1 %v3434_v46  ;;  %v4321_v41 = vld [vmem:[%s7065_s7 + $0x158] sm:$0xff] }
 0x577   :  { %v3286_v40 = vmul.f32 %v6188_v28, %v3273_v20  ;;  %1730 = vperm.xlu0 %4854, %v1671_v23   ;;  %v3307_v8 = vpop.permute.xlu0 %3306 }
 0x578   :  { %v3338_v44 = vsel %vm1137_vm5, %v3307_v8, 0.0 }
 0x579   :  { %v3426_v29 = vpack.c.bf16 %v3286_v40, %v3285_v27  ;;  %1735 = vperm.xlu1 %4855, %v1672_v51   ;;  %v3351_v16 = vmul.f32 %v6211_v47, %v3338_v44  ;;  %v3436_v27 = vpack.c.bf16 %v3346_v25, %v3345_v63  ;;  %v4322_v40 = vld [vmem:[%s7065_s7 + $0x160] sm:$0xff] }
 0x57a   :  { %v4326_v63 = vld [vmem:[%s7065_s7 + $0x180] sm:$0xff] }
 0x57b   :  { %v3244_v46 = vpop.permute.xlu1 %3243  ;;  %3758 = vperm.xlu0 %4854, %v4317_v3   ;;  %4574 = vmatpush3.bf16.msra.mxu1 %v3426_v29  ;;  %v3334_v3 = vsel %vm1137_vm5, %v6569_v18, 0.0  ;;  %v3335_v29 = vsel %vm1137_vm5, %v6571_v32, 0.0  ;;  %v4983_v18 = vld [vmem:[%s7064_s2] ss:$0 sm:$0xff] }
 0x57c   :  { %v3274_v28 = vsel %vm1065_vm4, 0.0, %v3244_v46  ;;  %4575 = vmatprep.subr.bf16.mxu1 %v3435_v5  ;;  %v3347_v46 = vmul.f32 %v4983_v18, %v3334_v3  ;;  %v3348_v32 = vmul.f32 %v4983_v18, %v3335_v29  ;;  %v4328_v29 = vld [vmem:[%s7065_s7 + $0x190] sm:$0xff] }
 0x57d   :  { %v3246_v10 = vpop.permute.xlu0 %3245  ;;  %3763 = vperm.xlu1 %4855, %v4318_v12   ;;  %v3287_v48 = vmul.f32 %v4982_v4, %v3274_v28 }
 0x57e   :  { %v3275_v31 = vsel %vm1065_vm4, 0.0, %v3246_v10 }
 0x57f   :  { %v3288_v57 = vmul.f32 %v4982_v4, %v3275_v31  ;;  %v3309_v55 = vpop.permute.xlu1 %3308  ;;  %3768 = vperm.xlu0 %4854, %v4319_v1   ;;  %v4324_v1 = vld [vmem:[%s7065_s7 + $0x170] sm:$0xff]  ;;  %v4325_v31 = vld [vmem:[%s7065_s7 + $0x178] sm:$0xff] }
 0x580   :  { %v3339_v23 = vsel %vm1137_vm5, %v3309_v55, 0.0 }
 0x581   :  { %v3427_v20 = vpack.c.bf16 %v3288_v57, %v3287_v48  ;;  %v3352_v51 = vmul.f32 %v6211_v47, %v3339_v23  ;;  %3773 = vperm.xlu1 %4855, %v4320_v59   ;;  %v4323_v47 = vld [vmem:[%s7065_s7 + $0x168] sm:$0xff]  ;;  %v3437_v57 = vpack.c.bf16 %v3348_v32, %v3347_v46 }
 0x583   :  { %v3439_v8 = vpack.c.bf16 %v3352_v51, %v3351_v16  ;;  %v3248_v5 = vpop.permute.xlu1 %3247  ;;  %3778 = vperm.xlu0 %4854, %v4321_v41   ;;  %4576 = vmatpush3.bf16.msra.mxu1 %v3427_v20  ;;  %v4327_v20 = vld [vmem:[%s7065_s7 + $0x188] sm:$0xff] }
 0x584   :  { %v3276_v12 = vsel %vm1065_vm4, 0.0, %v3248_v5  ;;  %4577 = vmatprep.subr.bf16.mxu1 %v3436_v27  ;;  %v7075_v5 = vrot.slane %v6356_v0, 4  ;;  %v4330_v0 = vld [vmem:[%s7066_s8 + $0x138] sm:$0xff] }
 0x585   :  { %4816 = vmatpush3.bf16.msra.mxu0 %v3439_v8  ;;  %v3250_v30 = vpop.permute.xlu0 %3249  ;;  %3783 = vperm.xlu1 %4855, %v4322_v40   ;;  %v3289_v10 = vmul.f32 %v4982_v4, %v3276_v12 }
 0x586   :  { %v3277_v28 = vsel %vm1065_vm4, 0.0, %v3250_v30  ;;  %4817 = vmatprep.subr.bf16.mxu0 %v7074_v50 }
 0x587   :  { %v3290_v25 = vmul.f32 %v4982_v4, %v3277_v28  ;;  %v3305_v44 = vpop.permute.xlu1 %3304  ;;  %3788 = vperm.xlu0 %4854, %v4323_v47  }
 0x588   :  { %v3337_v41 = vsel %vm1137_vm5, %v3305_v44, 0.0 }
 0x589   :  { %v3428_v59 = vpack.c.bf16 %v3290_v25, %v3289_v10  ;;  %v3303_v48 = vpop.permute.xlu0 %3302  ;;  %3793 = vperm.xlu1 %4855, %v4324_v1   ;;  %v3350_v8 = vmul.f32 %v4983_v18, %v3337_v41 }
 0x58a   :  { %v3336_v55 = vsel %vm1137_vm5, %v3303_v48, 0.0 }
 0x58b   :  { %3798 = vperm.xlu0 %4854, %v4325_v31   ;;  %v3252_v23 = vpop.permute.xlu1 %3251  ;;  %4578 = vmatpush3.bf16.msra.mxu1 %v3428_v59  ;;  %v3349_v51 = vmul.f32 %v4983_v18, %v3336_v55  ;;  %v4331_v59 = vld [vmem:[%s7066_s8 + $0x140] sm:$0xff] }
 0x58c   :  { %v3278_v16 = vsel %vm1065_vm4, 0.0, %v3252_v23  ;;  %4579 = vmatprep.subr.bf16.mxu1 %v3437_v57  ;;  %v4956_v55 = vld [vmem:[%s7062_s6 + $0x1d4] ss:$12 sps:$4 sm:$0xff]   ;;  %v4332_v23 = vld [vmem:[%s7066_s8 + $0x148] sm:$0xff] }
 0x58d   :  { %v3291_v27 = vmul.f32 %v4982_v4, %v3278_v16  ;;  %v3311_v40 = vpop.permute.xlu0 %3310  ;;  %3803 = vperm.xlu1 %4855, %v4326_v63   ;;  %v4329_v4 = vld [vmem:[%s7065_s7 + $0x198] sm:$0xf]  ;;  %v3438_v32 = vpack.c.bf16 %v3350_v8, %v3349_v51  ;;  %v7076_v63 = vpack.c.bf16 %v6377_v26, %v6373_v38  ;;  %v4333_v16 = vld [vmem:[%s7066_s8 + $0x150] sm:$0xff]  ;;  %v4959_v26 = vld [vmem:[%s7062_s6 + $0x1dc] ss:$12 sps:$4 sm:$0xff]  }
 0x58e   :  { %v3340_v3 = vsel %vm1137_vm5, %v3311_v40, 0.0  ;;  %v4335_v51 = vld [vmem:[%s7066_s8 + $0x160] sm:$0xff]  ;;  %v4336_v40 = vld [vmem:[%s7066_s8 + $0x168] sm:$0xff] }
 0x58f   :  { %v3395_v12 = vsel %vm1000_vm3, %v3291_v27, %v7075_v5  ;;  %3808 = vperm.xlu0 %4854, %v4327_v20   ;;  %v3313_v47 = vpop.permute.xlu1 %3312  ;;  %v3353_v28 = vmul.f32 %v4983_v18, %v3340_v3  ;;  %v4334_v20 = vld [vmem:[%s7066_s8 + $0x158] sm:$0xff]  ;;  %v4964_v3 = vld [vmem:[%s7062_s6 + $0x208] ss:$12 sps:$4 sm:$0xff]  }
 0x590   :  { %v3429_v30 = vpack.c.bf16 %v6367_v33, %v3395_v12  ;;  %v3341_v46 = vsel %vm1137_vm5, %v3313_v47, 0.0  ;;  %v4962_v27 = vld [vmem:[%s7062_s6 + $0x1ec] ss:$12 sps:$4 sm:$0xff]   ;;  %v4963_v8 = vld [vmem:[%s7062_s6 + $0x1f4] ss:$12 sps:$4 sm:$0xff]  }
 0x591   :  { %v3354_v1 = vmul.f32 %v4983_v18, %v3341_v46  ;;  %v3315_v10 = vpop.permute.xlu0 %3314  ;;  %3813 = vperm.xlu1 %4855, %v4328_v29   ;;  %v4337_v29 = vld [vmem:[%s7066_s8 + $0x170] sm:$0xff]  ;;  %v4338_v12 = vld [vmem:[%s7066_s8 + $0x178] sm:$0xff] }
 0x592   :  { %v3342_v25 = vsel %vm1137_vm5, %v3315_v10, 0.0  ;;  %4580 = vmatpush3.bf16.msra.mxu1 %v3429_v30  ;;  %v4339_v30 = vld [vmem:[%s7066_s8 + $0x180] sm:$0xff]  ;;  %v4341_v10 = vld [vmem:[%s7066_s8 + $0x190] sm:$0xff] }
 0x593   :  { %v3440_v44 = vpack.c.bf16 %v3354_v1, %v3353_v28  ;;  %3818 = vperm.xlu0 %4854, %v4329_v4   ;;  %v3317_v33 = vpop.permute.xlu1 %3316  ;;  %4581 = vmatprep.subr.bf16.mxu1 %v3438_v32  ;;  %v3355_v48 = vmul.f32 %v4983_v18, %v3342_v25  ;;  %v4966_v46 = vld [vmem:[%s7062_s6 + $0x204] ss:$12 sps:$4 sm:$0xff]   ;;  %v4340_v32 = vld [vmem:[%s7066_s8 + $0x188] sm:$0xff] }
 0x594   :  { %v3343_v31 = vsel %vm1137_vm5, %v3317_v33, 0.0  ;;  %v4968_v28 = vld [vmem:[%s7062_s6 + $0x220] ss:$12 sps:$4 sm:$0xff]  }
 0x595   :  { %v3356_v57 = vmul.f32 %v4983_v18, %v3343_v31  ;;  %3850 = vperm.xlu1 %4855, %v4330_v0   ;;  %4818 = vmatpush3.bf16.msra.mxu0 %v3440_v44  ;;  %v4960_v18 = vld [vmem:[%s7062_s6 + $0x1f0] ss:$12 sps:$4 sm:$0xff]   ;;  %v4967_v25 = vld [vmem:[%s7062_s6 + $0x20c] ss:$12 sps:$4 sm:$0xff]  }
 0x596   :  { %4582 = vmatpush3.bf16.msra.mxu1 %v7076_v63  ;;  %4819 = vmatprep.subr.bf16.mxu0 %v7074_v50  ;;  %v4342_v44 = vld [vmem:[%s7066_s8 + $0x198] sm:$0xf]  ;;  %v4275_v33 = vld [vmem:[%s7062_s6 + $0x21c] sm:$0xff]  ;;  %v4277_v31 = vld [vmem:[%s7062_s6 + $0x228] sm:$0xff] }
 0x597   :  { %v3441_v41 = vpack.c.bf16 %v3356_v57, %v3355_v48  ;;  %3855 = vperm.xlu0 %4854, %v4331_v59   ;;  %v643_v48 = vmul.f32 %v6344_v35, %v5250_v54  ;;  %v4298_v57 = vcombine.low %v4275_v33, %v4277_v31  ;;  %v4971_v63 = vld [vmem:[%s7062_s6 + $0x238] ss:$12 sps:$4 sm:$0xff]   ;;  %v645_v54 = vmul.f32 %v6348_v7, %v5254_v58 }
 0x598   :  { %v646_v58 = vmul.f32 %v6350_v52, %v5256_v60 }
 0x599   :  { %3860 = vperm.xlu1 %4855, %v4332_v23   ;;  %3599 = vmatmul.mubr.bf16.vlgmr.msra.gmra.mrb[112].mxu1 %v4956_v55  ;;  %v3564_v38 = vsel %vm1389_vm6, %v3441_v41, 0  ;;  %v644_v23 = vmul.f32 %v6346_v24, %v5252_v56  ;;  %v4281_v56 = vld [vmem:[%s7062_s6 + $0x240] sm:$0xff] }
 0x59a   :  { %4820 = vmatpush3.bf16.msra.mxu0 %v3564_v38  ;;  %3606 = vmatprep.mubr.bf16.mxu1 %v4960_v18  ;;  %v4970_v38 = vld [vmem:[%s7062_s6 + $0x224] ss:$12 sps:$4 sm:$0xff]  }
 0x59b   :  { %3865 = vperm.xlu0 %4854, %v4333_v16  }
 0x59d   :  { %3870 = vperm.xlu1 %4855, %v4334_v20   ;;  %4822 = vmatmul.mubr.msk.bf16.vlgmr.msra.gmra.mrb[132].mxu0 %vm1367_vm7, %v4959_v26  ;;  %v4279_v20 = vld [vmem:[%s7062_s6 + $0x234] sm:$0xff] }
 0x59e   :  { %4825 = vmatprep.mubr.msk.bf16.mxu0 %vm4985_vm1, %v7074_v50  ;;  %v4301_v60 = vcombine.low %v4279_v20, %v4281_v56 }
 0x59f   :  { %3875 = vperm.xlu0 %4854, %v4335_v51  }
 0x5a1   :  { %3880 = vperm.xlu1 %4855, %v4336_v40   ;;  %3607 = vmatmul.mubr.bf16.gmra.mrb[116].mxu1 %v4962_v27  ;;  %v647_v27 = vmul.f32 %v6352_v45, %v5258_v62  ;;  %v648_v62 = vmul.f32 %v6354_v14, %v5260_v2  ;;  %v4973_v2 = vld [vmem:[%s7062_s6 + $0x23c] ss:$12 sps:$4 sm:$0xff]  }
 0x5a2   :  { %v6732_v5 = vpop.permute.xlu0 %485  ;;  %3614 = vmatprep.mubr.bf16.mxu1 %v4964_v3 }
 0x5a3   :  { %3885 = vperm.xlu0 %4854, %v4337_v29   ;;  %v4974_v29 = vld [vmem:[%s7062_s6 + $0x250] ss:$12 sps:$4 sm:$0xff]  }
 0x5a4   :  { %v6737_v47 = vpop.permute.xlu1 %490 }
 0x5a5   :  { %3890 = vperm.xlu1 %4855, %v4338_v12   ;;  %4826 = vmatmul.mubr.msk.bf16.gmra.mrb[136].mxu0 %vm1367_vm7, %v4963_v8 }
 0x5a6   :  { %v6746_v4 = vpop.permute.xlu0 %495  ;;  %4829 = vmatprep.mubr.msk.bf16.mxu0 %vm4985_vm1, %v7074_v50 }
 0x5a7   :  { %3895 = vperm.xlu0 %4854, %v4339_v30   ;;  %v649_v30 = vmul.f32 %v6732_v5, %v5262_v6  ;;  %v4285_v6 = vld [vmem:[%s7062_s6 + $0x258] sm:$0xff]  ;;  %v650_v5 = vmul.f32 %v6737_v47, %v5264_v9  ;;  %v651_v31 = vmul.f32 %v6746_v4, %v5266_v13 }
 0x5a8   :  { %v6756_v1 = vpop.permute.xlu1 %500 }
 0x5a9   :  { %3900 = vperm.xlu1 %4855, %v4340_v32   ;;  %3615 = vmatmul.mubr.bf16.gmra.mrb[120].mxu1 %v4966_v46 }
 0x5aa   :  { %v6764_v0 = vpop.permute.xlu0 %505  ;;  %3622 = vmatprep.mubr.bf16.mxu1 %v4968_v28  ;;  %v4283_v28 = vld [vmem:[%s7062_s6 + $0x24c] sm:$0xff] }
 0x5ab   :  { %3905 = vperm.xlu0 %4854, %v4341_v10  }
 0x5ac   :  { %v6775_v59 = vpop.permute.xlu1 %510 }
 0x5ad   :  { %3910 = vperm.xlu1 %4855, %v4342_v44   ;;  %4830 = vmatmul.mubr.msk.bf16.gmra.mrb[140].mxu0 %vm1367_vm7, %v4967_v25  ;;  %v4287_v44 = vld [vmem:[%s7062_s6 + $0x264] sm:$0x33] }
 0x5ae   :  { %v722_v55 = vpop.permute.xlu0 %721  ;;  %4833 = vmatprep.mubr.msk.bf16.mxu0 %vm4985_vm1, %v7074_v50  ;;  %v4307_v20 = vcombine.low %v4287_v44, %v4287_v44 }
 0x5af   :  { %v909_v18 = vadd.f32 %v722_v55, %v643_v48  ;;  %v4304_v48 = vcombine.low %v4283_v28, %v4285_v6  ;;  %v4308_v55 = vcombine.high %v4287_v44, %v4287_v44 }
 0x5b0   :  { %v727_v41 = vpop.permute.xlu1 %726 }
 0x5b1   :  { %v947_v35 = vmax.f32 %v909_v18, 0.0  ;;  %v910_v16 = vadd.f32 %v727_v41, %v644_v23  ;;  %3623 = vmatmul.mubr.bf16.gmra.mrb[124].mxu1 %v4298_v57  ;;  %v653_v18 = vmul.f32 %v6764_v0, %v5270_v19 }
 0x5b2   :  { %v732_v26 = vpop.permute.xlu0 %731  ;;  %3630 = vmatprep.mubr.bf16.mxu1 %v4971_v63  ;;  %v652_v63 = vmul.f32 %v6756_v1, %v5268_v15  ;;  %v4976_v15 = vld [vmem:[%s7062_s6 + $0x254] ss:$12 sps:$4 sm:$0xff]  }
 0x5b3   :  { %3992 = vst.msk [vmem:[%s7067_s9] sm:$0xff] %vm3991_vm8, %v947_v35  ;;  %v948_v24 = vmax.f32 %v910_v16, 0.0  ;;  %v911_v7 = vadd.f32 %v732_v26, %v645_v54  ;;  %v654_v35 = vmul.f32 %v6775_v59, %v5272_v22 }
 0x5b4   :  { %v737_v51 = vpop.permute.xlu1 %736 }
 0x5b5   :  { %3993 = vst.msk [vmem:[%s7067_s9 + $0x8] sm:$0xff] %vm3991_vm8, %v948_v24  ;;  %v949_v40 = vmax.f32 %v911_v7, 0.0  ;;  %v912_v3 = vadd.f32 %v737_v51, %v646_v58  ;;  %4834 = vmatmul.mubr.msk.bf16.gmra.mrb[144].mxu0 %vm1367_vm7, %v4970_v38  ;;  %v4979_v58 = vld [vmem:[%s7062_s6 + $0x26c] ss:$0 sps:$4 sm:$0x33]  }
 0x5b6   :  { %v742_v52 = vpop.permute.xlu0 %741  ;;  %4837 = vmatprep.mubr.msk.bf16.mxu0 %vm4985_vm1, %v7074_v50 }
 0x5b7   :  { %3994 = vst.msk [vmem:[%s7067_s9 + $0x10] sm:$0xff] %vm3991_vm8, %v949_v40  ;;  %v950_v45 = vmax.f32 %v912_v3, 0.0  ;;  %v913_v8 = vadd.f32 %v742_v52, %v647_v27 }
 0x5b8   :  { %v747_v12 = vpop.permute.xlu1 %746 }
 0x5b9   :  { %3995 = vst.msk [vmem:[%s7067_s9 + $0x18] sm:$0xff] %vm3991_vm8, %v950_v45  ;;  %v951_v46 = vmax.f32 %v913_v8, 0.0  ;;  %v914_v32 = vadd.f32 %v747_v12, %v648_v62  ;;  %3631 = vmatmul.mubr.bf16.gmra.mrb[128].mxu1 %v4301_v60 }
 0x5ba   :  { %v752_v14 = vpop.permute.xlu0 %751  ;;  %3638 = vmatprep.mubr.bf16.mxu1 %v4974_v29 }
 0x5bb   :  { %3996 = vst.msk [vmem:[%s7067_s9 + $0x20] sm:$0xff] %vm3991_vm8, %v951_v46  ;;  %v952_v10 = vmax.f32 %v914_v32, 0.0  ;;  %v915_v25 = vadd.f32 %v752_v14, %v649_v30 }
 0x5bc   :  { %v757_v33 = vpop.permute.xlu1 %756 }
 0x5bd   :  { %3997 = vst.msk [vmem:[%s7067_s9 + $0x28] sm:$0xff] %vm3991_vm8, %v952_v10  ;;  %v953_v9 = vmax.f32 %v915_v25, 0.0  ;;  %v916_v47 = vadd.f32 %v757_v33, %v650_v5  ;;  %4838 = vmatmul.mubr.msk.bf16.gmra.mrb[148].mxu0 %vm1367_vm7, %v4973_v2 }
 0x5be   :  { %v762_v57 = vpop.permute.xlu0 %761  ;;  %4841 = vmatprep.mubr.msk.bf16.mxu0 %vm4985_vm1, %v7074_v50 }
 0x5bf   :  { %3998 = vst.msk [vmem:[%s7067_s9 + $0x30] sm:$0xff] %vm3991_vm8, %v953_v9  ;;  %v954_v13 = vmax.f32 %v916_v47, 0.0  ;;  %v917_v4 = vadd.f32 %v762_v57, %v651_v31 }
 0x5c0   :  { %v767_v23 = vpop.permute.xlu1 %766 }
 0x5c1   :  { %3999 = vst.msk [vmem:[%s7067_s9 + $0x38] sm:$0xff] %vm3991_vm8, %v954_v13  ;;  %v955_v41 = vmax.f32 %v917_v4, 0.0  ;;  %v918_v54 = vadd.f32 %v767_v23, %v652_v63  ;;  %3639 = vmatmul.mubr.bf16.gmra.mrb[132].mxu1 %v4304_v48 }
 0x5c2   :  { %v772_v1 = vpop.permute.xlu0 %771  ;;  %3646 = vmatprep.mubr.bf16.mxu1 %v4308_v55 }
 0x5c3   :  { %4000 = vst.msk [vmem:[%s7067_s9 + $0x40] sm:$0xff] %vm3991_vm8, %v955_v41  ;;  %v956_v19 = vmax.f32 %v918_v54, 0.0  ;;  %v919_v0 = vadd.f32 %v772_v1, %v653_v18 }
 0x5c4   :  { %v777_v16 = vpop.permute.xlu1 %776 }
 0x5c5   :  { %4001 = vst.msk [vmem:[%s7067_s9 + $0x48] sm:$0xff] %vm3991_vm8, %v956_v19  ;;  %v957_v38 = vmax.f32 %v919_v0, 0.0  ;;  %v920_v26 = vadd.f32 %v777_v16, %v654_v35  ;;  %4842 = vmatmul.mubr.msk.bf16.gmra.mrb[152].mxu0 %vm1367_vm7, %v4976_v15 }
 0x5c6   :  { %v1585_v56 = vpop.permute.xlu0 %1584  ;;  %4845 = vmatprep.mubr.msk.bf16.mxu0 %vm4985_vm1, %v7074_v50 }
 0x5c7   :  { %4002 = vst.msk [vmem:[%s7067_s9 + $0x50] sm:$0xff] %vm3991_vm8, %v957_v38  ;;  %v958_v22 = vmax.f32 %v920_v26, 0.0  ;;  %v1647_v45 = vmul.f32 %v1585_v56, %v5975_v11 }
 0x5c8   :  { %v1590_v59 = vpop.permute.xlu1 %1589 }
 0x5c9   :  { %4003 = vst.msk [vmem:[%s7067_s9 + $0x58] sm:$0xff] %vm3991_vm8, %v958_v22  ;;  %3647 = vmatmul.mubr.bf16.gmra.mrb[136].mxu1 %v4307_v20  ;;  %v1648_v12 = vmul.f32 %v1590_v59, %v5977_v17 }
 0x5ca   :  { %v1595_v24 = vpop.permute.xlu0 %1594 }
 0x5cb   :  { %v1649_v32 = vmul.f32 %v1595_v24, %v5979_v49 }
 0x5cc   :  { %v1600_v7 = vpop.permute.xlu1 %1599 }
 0x5cd   :  { %4846 = vmatmul.mubr.msk.bf16.gmra.mrb[156].mxu0 %vm1367_vm7, %v4979_v58  ;;  %v1650_v6 = vmul.f32 %v1600_v7, %v5981_v61 }
 0x5ce   :  { %v1605_v50 = vpop.permute.xlu0 %1604 }
 0x5cf   :  { %v1651_v44 = vmul.f32 %v1605_v50, %v5983_v39 }
 0x5d0   :  { %v1610_v51 = vpop.permute.xlu1 %1609 }
 0x5d1   :  { %v1652_v47 = vmul.f32 %v1610_v51, %v5985_v21  ;;  %v7077_v51 = vld [vmem:[#allocation2_spill] sm:$0xff] }
 0x5d2   :  { %v1615_v27 = vpop.permute.xlu0 %1614 }
 0x5d3   :  { %v1653_v55 = vmul.f32 %v1615_v27, %v5987_v36 }
 0x5d4   :  { %v1620_v40 = vpop.permute.xlu1 %1619 }
 0x5d5   :  { %v1654_v23 = vmul.f32 %v1620_v40, %v5989_v37 }
 0x5d6   :  { %v1625_v3 = vpop.permute.xlu0 %1624 }
 0x5d7   :  { %v1655_v1 = vmul.f32 %v1625_v3, %v5991_v43 }
 0x5d8   :  { %v1630_v60 = vpop.permute.xlu1 %1629 }
 0x5d9   :  { %v1656_v38 = vmul.f32 %v1630_v60, %v5993_v42 }
 0x5da   :  { %v1635_v52 = vpop.permute.xlu0 %1634 }
 0x5db   :  { %v1657_v59 = vmul.f32 %v1635_v52, %v5995_v53 }
 0x5dc   :  { %v6895_v29 = vpop.permute.xlu1 %1639 }
 0x5dd   :  { %v1658_v27 = vmul.f32 %v6895_v29, %v7077_v51 }
 0x5de   :  { %v6897_v62 = vpop.permute.xlu0 %1644 }
 0x5e0   :  { %v1676_v8 = vpop.permute.xlu1 %1675 }
 0x5e1   :  { %v1738_v30 = vadd.f32 %v1676_v8, %v1647_v45  ;;  %v7078_v45 = vld [vmem:[#allocation3_spill] sm:$0xff] }
 0x5e2   :  { %v1681_v46 = vpop.permute.xlu0 %1680  ;;  %v1659_v8 = vmul.f32 %v6897_v62, %v7078_v45 }
 0x5e3   :  { %v1751_v2 = vmax.f32 %v1738_v30, 0.0  ;;  %v1739_v14 = vadd.f32 %v1681_v46, %v1648_v12 }
 0x5e4   :  { %v1686_v28 = vpop.permute.xlu1 %1685 }
 0x5e5   :  { %v3952_v5 = vrot.slane %v1751_v2, 4  ;;  %v1752_v10 = vmax.f32 %v1739_v14, 0.0  ;;  %v1740_v25 = vadd.f32 %v1686_v28, %v1649_v32 }
 0x5e6   :  { %v1691_v33 = vpop.permute.xlu0 %1690 }
 0x5e7   :  { %v3990_v11 = vsel %vm1000_vm3, %v5274_v34, %v3952_v5  ;;  %v3953_v31 = vrot.slane %v1752_v10, 4  ;;  %v1753_v17 = vmax.f32 %v1740_v25, 0.0  ;;  %v1741_v9 = vadd.f32 %v1691_v33, %v1650_v6 }
 0x5e8   :  { %4004 = vst.msk [vmem:[%s7067_s9 + $0x60] sm:$0xff] %vm3991_vm8, %v3990_v11  ;;  %v1696_v49 = vpop.permute.xlu1 %1695 }
 0x5e9   :  { %v3954_v61 = vsel %vm1000_vm3, %v3952_v5, %v3953_v31  ;;  %v3955_v48 = vrot.slane %v1753_v17, 4  ;;  %v1754_v57 = vmax.f32 %v1741_v9, 0.0  ;;  %v1742_v39 = vadd.f32 %v1696_v49, %v1651_v44 }
 0x5ea   :  { %4005 = vst.msk [vmem:[%s7067_s9 + $0x68] sm:$0xff] %vm3991_vm8, %v3954_v61  ;;  %v1701_v34 = vpop.permute.xlu0 %1700 }
 0x5eb   :  { %v3956_v21 = vsel %vm1000_vm3, %v3953_v31, %v3955_v48  ;;  %v3957_v63 = vrot.slane %v1754_v57, 4  ;;  %v1755_v13 = vmax.f32 %v1742_v39, 0.0  ;;  %v1743_v4 = vadd.f32 %v1701_v34, %v1652_v47 }
 0x5ec   :  { %4006 = vst.msk [vmem:[%s7067_s9 + $0x70] sm:$0xff] %vm3991_vm8, %v3956_v21  ;;  %v1706_v18 = vpop.permute.xlu1 %1705 }
 0x5ed   :  { %v3958_v36 = vsel %vm1000_vm3, %v3955_v48, %v3957_v63  ;;  %v3959_v41 = vrot.slane %v1755_v13, 4  ;;  %v1756_v54 = vmax.f32 %v1743_v4, 0.0  ;;  %v1744_v15 = vadd.f32 %v1706_v18, %v1653_v55 }
 0x5ee   :  { %4007 = vst.msk [vmem:[%s7067_s9 + $0x78] sm:$0xff] %vm3991_vm8, %v3958_v36  ;;  %v1711_v35 = vpop.permute.xlu0 %1710 }
 0x5ef   :  { %v3960_v37 = vsel %vm1000_vm3, %v3957_v63, %v3959_v41  ;;  %v3961_v19 = vrot.slane %v1756_v54, 4  ;;  %v1757_v0 = vmax.f32 %v1744_v15, 0.0  ;;  %v1745_v16 = vadd.f32 %v1711_v35, %v1654_v23 }
 0x5f0   :  { %4008 = vst.msk [vmem:[%s7067_s9 + $0x80] sm:$0xff] %vm3991_vm8, %v3960_v37  ;;  %v1716_v26 = vpop.permute.xlu1 %1715 }
 0x5f1   :  { %v3962_v43 = vsel %vm1000_vm3, %v3959_v41, %v3961_v19  ;;  %v3963_v20 = vrot.slane %v1757_v0, 4  ;;  %v1758_v56 = vmax.f32 %v1745_v16, 0.0  ;;  %v1746_v22 = vadd.f32 %v1716_v26, %v1655_v1 }
 0x5f2   :  { %4009 = vst.msk [vmem:[%s7067_s9 + $0x88] sm:$0xff] %vm3991_vm8, %v3962_v43  ;;  %v1721_v58 = vpop.permute.xlu0 %1720 }
 0x5f3   :  { %v3964_v42 = vsel %vm1000_vm3, %v3961_v19, %v3963_v20  ;;  %v3965_v24 = vrot.slane %v1758_v56, 4  ;;  %v1759_v7 = vmax.f32 %v1746_v22, 0.0  ;;  %v1747_v50 = vadd.f32 %v1721_v58, %v1656_v38 }
 0x5f4   :  { %4010 = vst.msk [vmem:[%s7067_s9 + $0x90] sm:$0xff] %vm3991_vm8, %v3964_v42  ;;  %v1726_v53 = vpop.permute.xlu1 %1725 }
 0x5f5   :  { %v3966_v40 = vsel %vm1000_vm3, %v3963_v20, %v3965_v24  ;;  %v3967_v3 = vrot.slane %v1759_v7, 4  ;;  %v1760_v60 = vmax.f32 %v1747_v50, 0.0  ;;  %v1748_v52 = vadd.f32 %v1726_v53, %v1657_v59 }
 0x5f6   :  { %4011 = vst.msk [vmem:[%s7067_s9 + $0x98] sm:$0xff] %vm3991_vm8, %v3966_v40  ;;  %v1731_v29 = vpop.permute.xlu0 %1730 }
 0x5f7   :  { %v3968_v12 = vsel %vm1000_vm3, %v3965_v24, %v3967_v3  ;;  %v3969_v30 = vrot.slane %v1760_v60, 4  ;;  %v1761_v46 = vmax.f32 %v1748_v52, 0.0  ;;  %v1749_v32 = vadd.f32 %v1731_v29, %v1658_v27 }
 0x5f8   :  { %4012 = vst.msk [vmem:[%s7067_s9 + $0xa0] sm:$0xff] %vm3991_vm8, %v3968_v12  ;;  %v1736_v2 = vpop.permute.xlu1 %1735 }
 0x5f9   :  { %v3970_v14 = vsel %vm1000_vm3, %v3967_v3, %v3969_v30  ;;  %v3971_v62 = vrot.slane %v1761_v46, 4  ;;  %v1762_v28 = vmax.f32 %v1749_v32, 0.0  ;;  %v1750_v6 = vadd.f32 %v1736_v2, %v1659_v8 }
 0x5fa   :  { %4013 = vst.msk [vmem:[%s7067_s9 + $0xa8] sm:$0xff] %vm3991_vm8, %v3970_v14  ;;  %v3759_v31 = vpop.permute.xlu0 %3758 }
 0x5fb   :  { %v3972_v5 = vsel %vm1000_vm3, %v3969_v30, %v3971_v62  ;;  %v3973_v10 = vrot.slane %v1762_v28, 4  ;;  %v1763_v25 = vmax.f32 %v1750_v6, 0.0 }
 0x5fc   :  { %4014 = vst.msk [vmem:[%s7067_s9 + $0xb0] sm:$0xff] %vm3991_vm8, %v3972_v5  ;;  %v3764_v17 = vpop.permute.xlu1 %3763 }
 0x5fd   :  { %v3974_v44 = vsel %vm1000_vm3, %v3971_v62, %v3973_v10  ;;  %v3975_v33 = vrot.slane %v1763_v25, 4 }
 0x5fe   :  { %4015 = vst.msk [vmem:[%s7067_s9 + $0xb8] sm:$0xff] %vm3991_vm8, %v3974_v44  ;;  %v3769_v9 = vpop.permute.xlu0 %3768 }
 0x5ff   :  { %v3976_v11 = vsel %vm1000_vm3, %v3973_v10, %v3975_v33 }
 0x600   :  { %4016 = vst.msk [vmem:[%s7067_s9 + $0xc0] sm:$0xff] %vm3991_vm8, %v3976_v11  ;;  %v3774_v47 = vpop.permute.xlu1 %3773 }
 0x602   :  { %v6980_v49 = vpop.permute.xlu0 %3778 }
 0x604   :  { %v6982_v61 = vpop.permute.xlu1 %3783 }
 0x606   :  { %v6984_v48 = vpop.permute.xlu0 %3788 }
 0x608   :  { %v6986_v57 = vpop.permute.xlu1 %3793 }
 0x60a   :  { %v6988_v39 = vpop.permute.xlu0 %3798 }
 0x60c   :  { %v6990_v55 = vpop.permute.xlu1 %3803 }
 0x60e   :  { %v6992_v34 = vpop.permute.xlu0 %3808 }
 0x610   :  { %v6994_v13 = vpop.permute.xlu1 %3813 }
 0x612   :  { %v6996_v36 = vpop.permute.xlu0 %3818 }
 0x614   :  { %v3851_v16 = vpop.permute.xlu1 %3850 }
 0x616   :  { %v3856_v56 = vpop.permute.xlu0 %3855 }
 0x618   :  { %v3861_v45 = vpop.permute.xlu1 %3860 }
 0x61a   :  { %v3866_v46 = vpop.permute.xlu0 %3865 }
 0x66c   :  { %v4583_v21 = vpop.f32.mrb[112].mxu1 }
 0x66d   :  { %v4584_v63 = vpop.f32.mrb[113].mxu1 }
 0x66e   :  { %v4585_v4 = vadd.f32 %v4584_v63, %v4583_v21  ;;  %v4586_v23 = vpop.f32.mrb[114].mxu1 }
 0x66f   :  { %v4587_v18 = vpop.f32.mrb[115].mxu1 }
 0x670   :  { %v4588_v41 = vadd.f32 %v4587_v18, %v4586_v23  ;;  %v3688_v54 = vpop.f32.mrb[132].mxu0  ;;  %v3876_v23 = vpop.permute.xlu0 %3875 }
 0x671   :  { %v3689_v15 = vadd.f32 %v4585_v4, %v3688_v54  ;;  %v4823_v1 = vpop.f32.mrb[133].mxu0 }
 0x672   :  { %v3691_v35 = vpop.f32.mrb[134].mxu0 }
 0x673   :  { %v3821_v37 = vmul.f32 %v3759_v31, %v3689_v15  ;;  %v3692_v19 = vadd.f32 %v4588_v41, %v3691_v35  ;;  %v4824_v0 = vpop.f32.mrb[135].mxu0 }
 0x674   :  { %v4589_v38 = vpop.f32.mrb[116].mxu1 }
 0x675   :  { %v3913_v26 = vadd.f32 %v3851_v16, %v3821_v37  ;;  %v3822_v43 = vmul.f32 %v3764_v17, %v3692_v19  ;;  %v4590_v20 = vpop.f32.mrb[117].mxu1 }
 0x676   :  { %v4591_v22 = vadd.f32 %v4590_v20, %v4589_v38  ;;  %v4592_v59 = vpop.f32.mrb[118].mxu1 }
 0x677   :  { %v3926_v58 = vmax.f32 %v3913_v26, 0.0  ;;  %v3914_v42 = vadd.f32 %v3856_v56, %v3822_v43  ;;  %v4593_v24 = vpop.f32.mrb[119].mxu1 }
 0x678   :  { %v4594_v7 = vadd.f32 %v4593_v24, %v4592_v59  ;;  %v3696_v50 = vpop.f32.mrb[136].mxu0 }
 0x679   :  { %4017 = vst.msk [vmem:[%s7067_s9 + $0xc8] sm:$0xff] %vm3991_vm8, %v3926_v58  ;;  %v3927_v51 = vmax.f32 %v3914_v42, 0.0  ;;  %v3697_v27 = vadd.f32 %v4591_v22, %v3696_v50  ;;  %v4827_v53 = vpop.f32.mrb[137].mxu0  ;;  %v3886_v58 = vpop.permute.xlu0 %3885 }
 0x67a   :  { %v3699_v40 = vpop.f32.mrb[138].mxu0 }
 0x67b   :  { %4018 = vst.msk [vmem:[%s7067_s9 + $0xd0] sm:$0xff] %vm3991_vm8, %v3927_v51  ;;  %v3823_v3 = vmul.f32 %v3769_v9, %v3697_v27  ;;  %v3700_v60 = vadd.f32 %v4594_v7, %v3699_v40  ;;  %v4828_v52 = vpop.f32.mrb[139].mxu0  ;;  %v3871_v9 = vpop.permute.xlu1 %3870 }
 0x67c   :  { %v4595_v8 = vpop.f32.mrb[120].mxu1 }
 0x67d   :  { %v3915_v29 = vadd.f32 %v3861_v45, %v3823_v3  ;;  %v3824_v12 = vmul.f32 %v3774_v47, %v3700_v60  ;;  %v4596_v30 = vpop.f32.mrb[121].mxu1 }
 0x67e   :  { %v4597_v32 = vadd.f32 %v4596_v30, %v4595_v8  ;;  %v4598_v2 = vpop.f32.mrb[122].mxu1 }
 0x67f   :  { %v3928_v14 = vmax.f32 %v3915_v29, 0.0  ;;  %v3916_v62 = vadd.f32 %v3866_v46, %v3824_v12  ;;  %v4599_v28 = vpop.f32.mrb[123].mxu1  ;;  %v3881_v43 = vpop.permute.xlu1 %3880 }
 0x680   :  { %v4600_v6 = vadd.f32 %v4599_v28, %v4598_v2  ;;  %v3704_v5 = vpop.f32.mrb[140].mxu0 }
 0x681   :  { %4019 = vst.msk [vmem:[%s7067_s9 + $0xd8] sm:$0xff] %vm3991_vm8, %v3928_v14  ;;  %v3929_v10 = vmax.f32 %v3916_v62, 0.0  ;;  %v3705_v25 = vadd.f32 %v4597_v32, %v3704_v5  ;;  %v4831_v44 = vpop.f32.mrb[141].mxu0  ;;  %v3896_v32 = vpop.permute.xlu0 %3895 }
 0x682   :  { %v3707_v33 = vpop.f32.mrb[142].mxu0 }
 0x683   :  { %4020 = vst.msk [vmem:[%s7067_s9 + $0xe0] sm:$0xff] %vm3991_vm8, %v3929_v10  ;;  %v3825_v11 = vmul.f32 %v6980_v49, %v3705_v25  ;;  %v3708_v31 = vadd.f32 %v4600_v6, %v3707_v33  ;;  %v4832_v17 = vpop.f32.mrb[143].mxu0  ;;  %v3891_v8 = vpop.permute.xlu1 %3890 }
 0x684   :  { %v4601_v47 = vpop.f32.mrb[124].mxu1 }
 0x685   :  { %v3917_v21 = vadd.f32 %v3871_v9, %v3825_v11  ;;  %v3826_v63 = vmul.f32 %v6982_v61, %v3708_v31  ;;  %v4602_v4 = vpop.f32.mrb[125].mxu1 }
 0x686   :  { %v4603_v18 = vadd.f32 %v4602_v4, %v4601_v47  ;;  %v4604_v41 = vpop.f32.mrb[126].mxu1  ;;  %v3906_v4 = vpop.permute.xlu0 %3905 }
 0x687   :  { %v3930_v54 = vmax.f32 %v3917_v21, 0.0  ;;  %v3918_v15 = vadd.f32 %v3876_v23, %v3826_v63  ;;  %v4605_v1 = vpop.f32.mrb[127].mxu1  ;;  %v3901_v17 = vpop.permute.xlu1 %3900 }
 0x688   :  { %v4606_v35 = vadd.f32 %v4605_v1, %v4604_v41  ;;  %v3712_v37 = vpop.f32.mrb[144].mxu0 }
 0x689   :  { %4021 = vst.msk [vmem:[%s7067_s9 + $0xe8] sm:$0xff] %vm3991_vm8, %v3930_v54  ;;  %v3931_v49 = vmax.f32 %v3918_v15, 0.0  ;;  %v3713_v19 = vadd.f32 %v4603_v18, %v3712_v37  ;;  %v4835_v0 = vpop.f32.mrb[145].mxu0 }
 0x68a   :  { %v3715_v16 = vpop.f32.mrb[146].mxu0 }
 0x68b   :  { %4022 = vst.msk [vmem:[%s7067_s9 + $0xf0] sm:$0xff] %vm3991_vm8, %v3931_v49  ;;  %v3827_v61 = vmul.f32 %v6984_v48, %v3713_v19  ;;  %v3716_v38 = vadd.f32 %v4606_v35, %v3715_v16  ;;  %v4836_v26 = vpop.f32.mrb[147].mxu0  ;;  %v3911_v0 = vpop.permute.xlu1 %3910 }
 0x68c   :  { %v4607_v20 = vpop.f32.mrb[128].mxu1 }
 0x68d   :  { %v3919_v56 = vadd.f32 %v3881_v43, %v3827_v61  ;;  %v3828_v22 = vmul.f32 %v6986_v57, %v3716_v38  ;;  %v4608_v59 = vpop.f32.mrb[129].mxu1 }
 0x68e   :  { %v4609_v42 = vadd.f32 %v4608_v59, %v4607_v20  ;;  %v4610_v24 = vpop.f32.mrb[130].mxu1 }
 0x68f   :  { %v3932_v7 = vmax.f32 %v3919_v56, 0.0  ;;  %v3920_v50 = vadd.f32 %v3886_v58, %v3828_v22  ;;  %v4611_v51 = vpop.f32.mrb[131].mxu1 }
 0x690   :  { %v4612_v27 = vadd.f32 %v4611_v51, %v4610_v24  ;;  %v3720_v53 = vpop.f32.mrb[148].mxu0 }
 0x691   :  { %4023 = vst.msk [vmem:[%s7067_s9 + $0xf8] sm:$0xff] %vm3991_vm8, %v3932_v7  ;;  %v3933_v48 = vmax.f32 %v3920_v50, 0.0  ;;  %v3721_v40 = vadd.f32 %v4609_v42, %v3720_v53  ;;  %v4839_v3 = vpop.f32.mrb[149].mxu0 }
 0x692   :  { %v3723_v60 = vpop.f32.mrb[150].mxu0 }
 0x693   :  { %4024 = vst.msk [vmem:[%s7067_s9 + $0x100] sm:$0xff] %vm3991_vm8, %v3933_v48  ;;  %v3829_v57 = vmul.f32 %v6988_v39, %v3721_v40  ;;  %v3724_v52 = vadd.f32 %v4612_v27, %v3723_v60  ;;  %v4840_v45 = vpop.f32.mrb[151].mxu0 }
 0x694   :  { %v4613_v29 = vpop.f32.mrb[132].mxu1 }
 0x695   :  { %v3921_v12 = vadd.f32 %v3891_v8, %v3829_v57  ;;  %v3830_v30 = vmul.f32 %v6990_v55, %v3724_v52  ;;  %v4614_v46 = vpop.f32.mrb[133].mxu1 }
 0x696   :  { %v4615_v2 = vadd.f32 %v4614_v46, %v4613_v29  ;;  %v4616_v14 = vpop.f32.mrb[134].mxu1 }
 0x697   :  { %v3934_v62 = vmax.f32 %v3921_v12, 0.0  ;;  %v3922_v28 = vadd.f32 %v3896_v32, %v3830_v30  ;;  %v4617_v6 = vpop.f32.mrb[135].mxu1 }
 0x698   :  { %v4618_v5 = vadd.f32 %v4617_v6, %v4616_v14  ;;  %v3728_v10 = vpop.f32.mrb[152].mxu0 }
 0x699   :  { %4025 = vst.msk [vmem:[%s7067_s9 + $0x108] sm:$0xff] %vm3991_vm8, %v3934_v62  ;;  %v3935_v39 = vmax.f32 %v3922_v28, 0.0  ;;  %v3729_v25 = vadd.f32 %v4615_v2, %v3728_v10  ;;  %v4843_v44 = vpop.f32.mrb[153].mxu0 }
 0x69a   :  { %v3731_v33 = vpop.f32.mrb[154].mxu0 }
 0x69b   :  { %4026 = vst.msk [vmem:[%s7067_s9 + $0x110] sm:$0xff] %vm3991_vm8, %v3935_v39  ;;  %v3831_v55 = vmul.f32 %v6992_v34, %v3729_v25  ;;  %v3732_v11 = vadd.f32 %v4618_v5, %v3731_v33  ;;  %v4844_v31 = vpop.f32.mrb[155].mxu0 }
 0x69c   :  { %v4619_v9 = vpop.f32.mrb[136].mxu1 }
 0x69d   :  { %v3923_v47 = vadd.f32 %v3901_v17, %v3831_v55  ;;  %v3832_v21 = vmul.f32 %v6994_v13, %v3732_v11  ;;  %v4620_v63 = vpop.f32.mrb[137].mxu1 }
 0x69e   :  { %v4621_v23 = vadd.f32 %v4620_v63, %v4619_v9  ;;  %v4622_v18 = vpop.f32.mrb[138].mxu1 }
 0x69f   :  { %v3936_v41 = vmax.f32 %v3923_v47, 0.0  ;;  %v3924_v54 = vadd.f32 %v3906_v4, %v3832_v21  ;;  %v4623_v15 = vpop.f32.mrb[139].mxu1 }
 0x6a0   :  { %v3736_v1 = vpop.f32.mrb[156].mxu0 }
 0x6a1   :  { %4027 = vst.msk [vmem:[%s7067_s9 + $0x118] sm:$0xff] %vm3991_vm8, %v3936_v41  ;;  %v3937_v34 = vmax.f32 %v3924_v54, 0.0  ;;  %v3737_v35 = vadd.f32 %v4621_v23, %v3736_v1  ;;  %v4847_v37 = vpop.f32.mrb[157].mxu0 }
 0x6a2   :  { %v3739_v49 = vpop.f32.mrb[158].mxu0 }
 0x6a3   :  { %4028 = vst.msk [vmem:[%s7067_s9 + $0x120] sm:$0xff] %vm3991_vm8, %v3937_v34  ;;  %v3833_v13 = vmul.f32 %v6996_v36, %v3737_v35  ;;  %v4848_v19 = vpop.f32.mrb[159].mxu0 }
 0x6a5   :  { %v3925_v16 = vadd.f32 %v3911_v0, %v3833_v13 }
 0x6a7   :  { %v3938_v61 = vmax.f32 %v3925_v16, 0.0 }
 0x6a9   :  { %4030 = vst.msk [vmem:[%s7067_s9 + $0x128] sm:$0xf] %vm4029_vm9, %v3938_v61 }

// kernel: deep3i_forward.11
= control target key start
LH: loop header
LB: loop body
LE: loop exit
PB: predicated region body
PF: predicated region fallthrough
CT: control target
= control target key end

     0   :  { %v5627_v0 = vmov 0   ;;  %v8073_v55 = vmov 0.0   ;;  %vm509_vm0 = vcmask 1045504   ;;  %vm5629_vm1 = vmmov 0   ;;  %s5631_s20 = smov 1   ;;  %s8063_s0 = inlined_call_operand.vmem [shape: f32[300,32], index: 0, kind: input, shape index: {}]   ;;  %s8064_s3 = inlined_call_operand.vmem [shape: bf16[300,300], index: 3, kind: input, shape index: {}]   ;;  %s8065_s4 = inlined_call_operand.vmem [shape: f32[300,1], index: 4, kind: input, shape index: {}]   ;;  %s8066_s5 = inlined_call_operand.vmem [shape: f32[300,1], index: 5, kind: input, shape index: {}]   ;;  %s8067_s6 = inlined_call_operand.vmem [shape: bf16[4,100,300], index: 6, kind: input, shape index: {}]   ;;  %s8068_s1 = inlined_call_operand.vmem [shape: f32[1,32], index: 1, kind: input, shape index: {}]   ;;  %s8069_s2 = inlined_call_operand.vmem [shape: f32[1,32], index: 2, kind: input, shape index: {}]   ;;  %s8070_s7 = inlined_call_operand.vmem [shape: f32[4,100,1], index: 7, kind: input, shape index: {}]   ;;  %s8071_s8 = inlined_call_operand.vmem [shape: f32[4,100,1], index: 8, kind: input, shape index: {}]   ;;  %s8072_s9 = inlined_call_operand.vmem [shape: f32[300,32], index: 9, kind: output, shape index: {}]  }
   0x1   :  { %513 = vmatprep.subr.bf16.mxu0 %v5627_v0  ;;  %v109_v1 = vld [vmem:[%s8063_s0] sm:$0xff]  ;;  %v110_v2 = vld [vmem:[%s8063_s0 + $0x8] sm:$0xff]  ;;  %v111_v3 = vld [vmem:[%s8063_s0 + $0x10] sm:$0xff]  ;;  %5441 = vset.pattern.permute.xlu1 %v5627_v0  ;;  %vm451_vm2 = vcmask 359424   ;;  %vm1468_vm3 = vcmask 1043456   ;;  %vm1533_vm4 = vcmask 7168  }
   0x2   :  { %v147_v4 = vpack.c.bf16 %v110_v2, %v109_v1  ;;  %v112_v5 = vld [vmem:[%s8063_s0 + $0x18] sm:$0xff]  ;;  %5440 = vset.pattern.permute.xlu0 %v5627_v0  ;;  %v113_v7 = vld [vmem:[%s8063_s0 + $0x20] sm:$0xff]  ;;  %v114_v8 = vld [vmem:[%s8063_s0 + $0x28] sm:$0xff]  ;;  %vm1605_vm5 = vcmask 252928   ;;  %vm4457_vm6 = vcmask 261120   ;;  %vm4495_vm7 = vcmask 257024  }
   0x3   :  { %v148_v6 = vpack.c.bf16 %v112_v5, %v111_v3  ;;  %v149_v9 = vpack.c.bf16 %v114_v8, %v113_v7  ;;  %v115_v10 = vld [vmem:[%s8063_s0 + $0x30] sm:$0xff]  ;;  %v116_v11 = vld [vmem:[%s8063_s0 + $0x38] sm:$0xff]  ;;  %v117_v13 = vld [vmem:[%s8063_s0 + $0x40] sm:$0xff] }
   0x4   :  { %514 = vmatpush1.bf16.msra.mxu0 %v147_v4  ;;  %v150_v12 = vpack.c.bf16 %v116_v11, %v115_v10  ;;  %v5444_v14 = vld [vmem:[%s8064_s3 + $0x4] ss:$12 sps:$4 sm:$0xff]   ;;  %v118_v15 = vld [vmem:[%s8063_s0 + $0x48] sm:$0xff]  ;;  %v120_v18 = vld [vmem:[%s8063_s0 + $0x58] sm:$0xff] }
   0x5   :  { %515 = vmatprep.subr.bf16.mxu0 %v5627_v0  ;;  %545 = vmatprep.mubr.bf16.mxu0 %v5444_v14  ;;  %v151_v16 = vpack.c.bf16 %v118_v15, %v117_v13  ;;  %v119_v17 = vld [vmem:[%s8063_s0 + $0x50] sm:$0xff]  ;;  %v121_v20 = vld [vmem:[%s8063_s0 + $0x60] sm:$0xff]  ;;  %v122_v21 = vld [vmem:[%s8063_s0 + $0x68] sm:$0xff] }
   0x6   :  { %v152_v19 = vpack.c.bf16 %v120_v18, %v119_v17  ;;  %v153_v22 = vpack.c.bf16 %v122_v21, %v121_v20  ;;  %v123_v23 = vld [vmem:[%s8063_s0 + $0x70] sm:$0xff]  ;;  %v124_v24 = vld [vmem:[%s8063_s0 + $0x78] sm:$0xff]  ;;  %v125_v26 = vld [vmem:[%s8063_s0 + $0x80] sm:$0xff] }
   0x7   :  { %v154_v25 = vpack.c.bf16 %v124_v24, %v123_v23  ;;  %v126_v27 = vld [vmem:[%s8063_s0 + $0x88] sm:$0xff]  ;;  %v127_v28 = vld [vmem:[%s8063_s0 + $0x90] sm:$0xff]  ;;  %v128_v29 = vld [vmem:[%s8063_s0 + $0x98] sm:$0xff] }
   0x8   :  { %516 = vmatpush1.bf16.msra.mxu0 %v148_v6  ;;  %v155_v30 = vpack.c.bf16 %v126_v27, %v125_v26  ;;  %v129_v31 = vld [vmem:[%s8063_s0 + $0xa0] sm:$0xff]  ;;  %v156_v32 = vpack.c.bf16 %v128_v29, %v127_v28  ;;  %v130_v33 = vld [vmem:[%s8063_s0 + $0xa8] sm:$0xff]  ;;  %v131_v34 = vld [vmem:[%s8063_s0 + $0xb0] sm:$0xff] }
   0x9   :  { %517 = vmatprep.subr.bf16.mxu0 %v5627_v0  ;;  %v132_v35 = vld [vmem:[%s8063_s0 + $0xb8] sm:$0xff]  ;;  %v157_v36 = vpack.c.bf16 %v130_v33, %v129_v31  ;;  %v133_v37 = vld [vmem:[%s8063_s0 + $0xc0] sm:$0xff]  ;;  %v134_v39 = vld [vmem:[%s8063_s0 + $0xc8] sm:$0xff] }
   0xa   :  { %v158_v38 = vpack.c.bf16 %v132_v35, %v131_v34  ;;  %v159_v40 = vpack.c.bf16 %v134_v39, %v133_v37  ;;  %v135_v41 = vld [vmem:[%s8063_s0 + $0xd0] sm:$0xff]  ;;  %v136_v42 = vld [vmem:[%s8063_s0 + $0xd8] sm:$0xff]  ;;  %v137_v44 = vld [vmem:[%s8063_s0 + $0xe0] sm:$0xff] }
   0xb   :  { %v160_v43 = vpack.c.bf16 %v136_v42, %v135_v41  ;;  %v138_v45 = vld [vmem:[%s8063_s0 + $0xe8] sm:$0xff]  ;;  %v139_v47 = vld [vmem:[%s8063_s0 + $0xf0] sm:$0xff]  ;;  %v140_v48 = vld [vmem:[%s8063_s0 + $0xf8] sm:$0xff] }
   0xc   :  { %518 = vmatpush1.bf16.msra.mxu0 %v149_v9  ;;  %v161_v46 = vpack.c.bf16 %v138_v45, %v137_v44  ;;  %v162_v49 = vpack.c.bf16 %v140_v48, %v139_v47  ;;  %v141_v50 = vld [vmem:[%s8063_s0 + $0x100] sm:$0xff]  ;;  %v142_v51 = vld [vmem:[%s8063_s0 + $0x108] sm:$0xff]  ;;  %v5450_v58 = vld [vmem:[%s8064_s3 + $0x30] ss:$12 sps:$4 sm:$0xff]  }
   0xd   :  { %519 = vmatprep.subr.bf16.mxu0 %v5627_v0  ;;  %v5442_v52 = vld [vmem:[%s8064_s3] ss:$12 sps:$4 sm:$0xff]   ;;  %v5445_v53 = vld [vmem:[%s8064_s3 + $0x1c] ss:$12 sps:$4 sm:$0xff]   ;;  %v163_v54 = vpack.c.bf16 %v142_v51, %v141_v50  ;;  %v5447_v56 = vld [vmem:[%s8064_s3 + $0x18] ss:$12 sps:$4 sm:$0xff]  }
   0xe   :  { %v5448_v57 = vld [vmem:[%s8064_s3 + $0x34] ss:$12 sps:$4 sm:$0xff]   ;;  %v5451_v59 = vld [vmem:[%s8064_s3 + $0x4c] ss:$12 sps:$4 sm:$0xff]   ;;  %v5454_v4 = vld [vmem:[%s8064_s3 + $0x64] ss:$12 sps:$4 sm:$0xff]  }
   0xf   :  { %v143_v60 = vld [vmem:[%s8063_s0 + $0x110] sm:$0xff]  ;;  %v144_v61 = vld [vmem:[%s8063_s0 + $0x118] sm:$0xff]  ;;  %v145_v63 = vld [vmem:[%s8063_s0 + $0x120] sm:$0xff] }
  0x10   :  { %520 = vmatpush1.bf16.msra.mxu0 %v150_v12  ;;  %v164_v62 = vpack.c.bf16 %v144_v61, %v143_v60  ;;  %v5453_v3 = vld [vmem:[%s8064_s3 + $0x48] ss:$12 sps:$4 sm:$0xff]   ;;  %v5456_v5 = vld [vmem:[%s8064_s3 + $0x60] ss:$12 sps:$4 sm:$0xff]   ;;  %v5459_v7 = vld [vmem:[%s8064_s3 + $0x78] ss:$12 sps:$4 sm:$0xff]  }
  0x11   :  { %521 = vmatprep.subr.bf16.mxu0 %v5627_v0  ;;  %v5457_v6 = vld [vmem:[%s8064_s3 + $0x7c] ss:$12 sps:$4 sm:$0xff]   ;;  %v5460_v8 = vld [vmem:[%s8064_s3 + $0x94] ss:$12 sps:$4 sm:$0xff]   ;;  %v5463_v10 = vld [vmem:[%s8064_s3 + $0xac] ss:$12 sps:$4 sm:$0xff]  }
  0x12   :  { %v5462_v9 = vld [vmem:[%s8064_s3 + $0x90] ss:$12 sps:$4 sm:$0xff]   ;;  %v5465_v11 = vld [vmem:[%s8064_s3 + $0xa8] ss:$12 sps:$4 sm:$0xff]   ;;  %v5468_v13 = vld [vmem:[%s8064_s3 + $0xc0] ss:$12 sps:$4 sm:$0xff]  }
  0x13   :  { %v5466_v12 = vld [vmem:[%s8064_s3 + $0xc4] ss:$12 sps:$4 sm:$0xff]   ;;  %v5469_v14 = vld [vmem:[%s8064_s3 + $0xdc] ss:$12 sps:$4 sm:$0xff]   ;;  %v5475_v18 = vld [vmem:[%s8064_s3 + $0x10c] ss:$12 sps:$4 sm:$0xff]  }
  0x14   :  { %522 = vmatpush1.bf16.msra.mxu0 %v151_v16  ;;  %v5471_v15 = vld [vmem:[%s8064_s3 + $0xd8] ss:$12 sps:$4 sm:$0xff]   ;;  %v5472_v16 = vld [vmem:[%s8064_s3 + $0xf4] ss:$12 sps:$4 sm:$0xff]   ;;  %v5474_v17 = vld [vmem:[%s8064_s3 + $0xf0] ss:$12 sps:$4 sm:$0xff]  }
  0x15   :  { %523 = vmatprep.subr.bf16.mxu0 %v5627_v0  ;;  %v5478_v20 = vld [vmem:[%s8064_s3 + $0x124] ss:$12 sps:$4 sm:$0xff]   ;;  %v5480_v21 = vld [vmem:[%s8064_s3 + $0x120] ss:$12 sps:$4 sm:$0xff]   ;;  %v898_v34 = vld [vmem:[%s8065_s4 + $0x78] sm:$0xff] }
  0x16   :  { %v897_v23 = vld [vmem:[%s8065_s4 + $0x70] sm:$0xff]  ;;  %v895_v24 = vld [vmem:[%s8065_s4 + $0x60] sm:$0xff]  ;;  %v896_v27 = vld [vmem:[%s8065_s4 + $0x68] sm:$0xff] }
  0x17   :  { %993 = vperm.xlu1 %5441, %v897_v23   ;;  %983 = vperm.xlu0 %5440, %v895_v24   ;;  %v5484_v26 = vld [vmem:[%s8064_s3 + $0x154] ss:$12 sps:$4 sm:$0xff]   ;;  %v1162_v29 = vld [vmem:[%s8066_s5 + $0x68] sm:$0xff]  ;;  %v5486_v31 = vld [vmem:[%s8064_s3 + $0x150] ss:$12 sps:$4 sm:$0xff]  }
  0x18   :  { %524 = vmatpush1.bf16.msra.mxu0 %v152_v19  ;;  %v5477_v19 = vld [vmem:[%s8064_s3 + $0x108] ss:$12 sps:$4 sm:$0xff]   ;;  %v1161_v28 = vld [vmem:[%s8066_s5 + $0x60] sm:$0xff]  ;;  %v1164_v35 = vld [vmem:[%s8066_s5 + $0x78] sm:$0xff] }
  0x19   :  { %525 = vmatprep.subr.bf16.mxu0 %v5627_v0  ;;  %v899_v33 = vld [vmem:[%s8065_s4 + $0x80] sm:$0xff]  ;;  %v5489_v37 = vld [vmem:[%s8064_s3 + $0x168] ss:$12 sps:$4 sm:$0xff]   ;;  %v1168_v47 = vld [vmem:[%s8066_s5 + $0x98] sm:$0xff] }
  0x1a   :  { %v901_v39 = vld [vmem:[%s8065_s4 + $0x90] sm:$0xff]  ;;  %v1166_v41 = vld [vmem:[%s8066_s5 + $0x88] sm:$0xff]  ;;  %v903_v45 = vld [vmem:[%s8065_s4 + $0xa0] sm:$0xff] }
  0x1b   :  { %988 = vperm.xlu0 %5440, %v896_v27   ;;  %1249 = vperm.xlu1 %5441, %v1161_v28   ;;  %v1167_v42 = vld [vmem:[%s8066_s5 + $0x90] sm:$0xff]  ;;  %v5493_v44 = vld [vmem:[%s8064_s3 + $0x19c] ss:$12 sps:$4 sm:$0xff]   ;;  %v1169_v48 = vld [vmem:[%s8066_s5 + $0xa0] sm:$0xff] }
  0x1c   :  { %526 = vmatpush1.bf16.msra.mxu0 %v153_v22  ;;  %v5481_v22 = vld [vmem:[%s8064_s3 + $0x13c] ss:$12 sps:$4 sm:$0xff]   ;;  %v5496_v50 = vld [vmem:[%s8064_s3 + $0x1b4] ss:$12 sps:$4 sm:$0x3f]  }
  0x1d   :  { %527 = vmatprep.subr.bf16.mxu0 %v5627_v0  ;;  %v905_v51 = vld [vmem:[%s8065_s4 + $0xb0] sm:$0xff]  ;;  %v1173_v60 = vld [vmem:[%s8066_s5 + $0xc0] sm:$0xff] }
  0x1e   :  { %v5499_v61 = vld [vmem:[%s8064_s3 + $0x8] ss:$12 sps:$4 sm:$0xff]  }
  0x1f   :  { %1254 = vperm.xlu0 %5440, %v1162_v29  }
  0x20   :  { %528 = vmatpush1.bf16.msra.mxu0 %v154_v25  ;;  %v5483_v25 = vld [vmem:[%s8064_s3 + $0x138] ss:$12 sps:$4 sm:$0xff]  }
  0x21   :  { %529 = vmatprep.subr.bf16.mxu0 %v5627_v0 }
  0x23   :  { %998 = vperm.xlu0 %5440, %v898_v34  }
  0x24   :  { %530 = vmatpush1.bf16.msra.mxu0 %v155_v30  ;;  %v1163_v30 = vld [vmem:[%s8066_s5 + $0x70] sm:$0xff] }
  0x25   :  { %531 = vmatprep.subr.bf16.mxu0 %v5627_v0  ;;  %1259 = vperm.xlu1 %5441, %v1163_v30  }
  0x27   :  { %1264 = vperm.xlu0 %5440, %v1164_v35  }
  0x28   :  { %532 = vmatpush1.bf16.msra.mxu0 %v156_v32  ;;  %v5487_v32 = vld [vmem:[%s8064_s3 + $0x16c] ss:$12 sps:$4 sm:$0xff]  }
  0x29   :  { %533 = vmatprep.subr.bf16.mxu0 %v5627_v0  ;;  %1003 = vperm.xlu1 %5441, %v899_v33  }
  0x2c   :  { %534 = vmatpush1.bf16.msra.mxu0 %v157_v36  ;;  %v1165_v36 = vld [vmem:[%s8066_s5 + $0x80] sm:$0xff] }
  0x2d   :  { %535 = vmatprep.subr.bf16.mxu0 %v5627_v0  ;;  %1269 = vperm.xlu1 %5441, %v1165_v36  }
  0x30   :  { %536 = vmatpush1.bf16.msra.mxu0 %v158_v38  ;;  %v5490_v38 = vld [vmem:[%s8064_s3 + $0x184] ss:$12 sps:$4 sm:$0xff]  }
  0x31   :  { %537 = vmatprep.subr.bf16.mxu0 %v5627_v0  ;;  %1013 = vperm.xlu1 %5441, %v901_v39  }
  0x34   :  { %538 = vmatpush1.bf16.msra.mxu0 %v159_v40  ;;  %v900_v40 = vld [vmem:[%s8065_s4 + $0x88] sm:$0xff] }
  0x35   :  { %539 = vmatprep.subr.bf16.mxu0 %v5627_v0  ;;  %1008 = vperm.xlu0 %5440, %v900_v40  }
  0x36   :  { %1279 = vperm.xlu1 %5441, %v1167_v42  }
  0x38   :  { %540 = vmatpush1.bf16.msra.mxu0 %v160_v43  ;;  %v5492_v43 = vld [vmem:[%s8064_s3 + $0x180] ss:$12 sps:$4 sm:$0xff]  }
  0x39   :  { %541 = vmatprep.subr.bf16.mxu0 %v5627_v0  ;;  %1274 = vperm.xlu0 %5440, %v1166_v41  }
  0x3a   :  { %1023 = vperm.xlu1 %5441, %v903_v45  }
  0x3c   :  { %542 = vmatpush1.bf16.msra.mxu0 %v161_v46  ;;  %v902_v46 = vld [vmem:[%s8065_s4 + $0x98] sm:$0xff] }
  0x3d   :  { %543 = vmatprep.subr.bf16.mxu0 %v5627_v0  ;;  %v146_v0 = vld [vmem:[%s8063_s0 + $0x128] sm:$0xf]  ;;  %1018 = vperm.xlu0 %5440, %v902_v46  }
  0x3e   :  { %v165_v1 = vpack.c.bf16 %v146_v0, %v145_v63  ;;  %1289 = vperm.xlu1 %5441, %v1169_v48   ;;  %v909_v63 = vld [vmem:[%s8065_s4 + $0xd0] sm:$0xff] }
  0x3f   :  { %v1175_v0 = vld [vmem:[%s8066_s5 + $0xd0] sm:$0xff] }
  0x40   :  { %544 = vmatpush1.bf16.msra.mxu0 %v162_v49  ;;  %v511_v2 = vsel %vm509_vm0, %v165_v1, 0  ;;  %v5495_v49 = vld [vmem:[%s8064_s3 + $0x198] ss:$12 sps:$4 sm:$0xff]   ;;  %v1174_v1 = vld [vmem:[%s8066_s5 + $0xc8] sm:$0xff] }
  0x41   :  { %5141 = vmatprep.subr.bf16.mxu0 %v8073_v55  ;;  %1284 = vperm.xlu0 %5440, %v1168_v47  }
  0x42   :  { %1033 = vperm.xlu1 %5441, %v905_v51  }
  0x43   :  { %546 = vmatmul.mubr.bf16.vlgmr.msra.gmra.mrb[0].mxu0 %v5442_v52  ;;  %v904_v52 = vld [vmem:[%s8065_s4 + $0xa8] sm:$0xff] }
  0x44   :  { %553 = vmatprep.mubr.bf16.mxu0 %v5445_v53  ;;  %5142 = vmatpush3.bf16.msra.mxu0 %v163_v54  ;;  %v1170_v53 = vld [vmem:[%s8066_s5 + $0xa8] sm:$0xff]  ;;  %v1171_v54 = vld [vmem:[%s8066_s5 + $0xb0] sm:$0xff] }
  0x45   :  { %5143 = vmatprep.subr.bf16.mxu0 %v8073_v55  ;;  %1028 = vperm.xlu0 %5440, %v904_v52  }
  0x46   :  { %1299 = vperm.xlu1 %5441, %v1171_v54  }
  0x48   :  { %5144 = vmatpush3.bf16.msra.mxu0 %v164_v62  ;;  %v908_v62 = vld [vmem:[%s8065_s4 + $0xc8] sm:$0xff] }
  0x49   :  { %5145 = vmatprep.subr.bf16.mxu0 %v8073_v55  ;;  %1294 = vperm.xlu0 %5440, %v1170_v53  }
  0x4b   :  { %554 = vmatmul.mubr.bf16.gmra.mrb[4].mxu0 %v5447_v56  ;;  %v5498_v56 = vld [vmem:[%s8064_s3 + $0x1b0] ss:$12 sps:$4 sm:$0x3f]  }
  0x4c   :  { %561 = vmatprep.mubr.bf16.mxu0 %v5448_v57  ;;  %5146 = vmatpush3.bf16.msra.mxu0 %v511_v2  ;;  %v907_v57 = vld [vmem:[%s8065_s4 + $0xc0] sm:$0xff] }
  0x4d   :  { %1043 = vperm.xlu1 %5441, %v907_v57   ;;  %v5500_v2 = vld [vmem:[%s8064_s3 + $0x20] ss:$12 sps:$4 sm:$0xff]  }
  0x51   :  { %1309 = vperm.xlu1 %5441, %v1173_v60  }
  0x53   :  { %562 = vmatmul.mubr.bf16.gmra.mrb[8].mxu0 %v5450_v58  ;;  %v906_v58 = vld [vmem:[%s8065_s4 + $0xb8] sm:$0xff] }
  0x54   :  { %569 = vmatprep.mubr.bf16.mxu0 %v5451_v59  ;;  %1038 = vperm.xlu0 %5440, %v906_v58   ;;  %v1172_v59 = vld [vmem:[%s8066_s5 + $0xb8] sm:$0xff] }
  0x55   :  { %1048 = vperm.xlu1 %5441, %v908_v62  }
  0x58   :  { %1304 = vperm.xlu0 %5440, %v1172_v59  }
  0x59   :  { %1314 = vperm.xlu1 %5441, %v1174_v1  }
  0x5b   :  { %570 = vmatmul.mubr.bf16.gmra.mrb[12].mxu0 %v5453_v3  ;;  %v5501_v3 = vld [vmem:[%s8064_s3 + $0x38] ss:$12 sps:$4 sm:$0xff]  }
  0x5c   :  { %577 = vmatprep.mubr.bf16.mxu0 %v5454_v4  ;;  %1053 = vperm.xlu0 %5440, %v909_v63   ;;  %v5502_v4 = vld [vmem:[%s8064_s3 + $0x50] ss:$12 sps:$4 sm:$0xff]  }
  0x60   :  { %1319 = vperm.xlu0 %5440, %v1175_v0  }
  0x63   :  { %578 = vmatmul.mubr.bf16.gmra.mrb[16].mxu0 %v5456_v5  ;;  %v5503_v5 = vld [vmem:[%s8064_s3 + $0x68] ss:$12 sps:$4 sm:$0xff]  }
  0x64   :  { %585 = vmatprep.mubr.bf16.mxu0 %v5457_v6  ;;  %v5504_v6 = vld [vmem:[%s8064_s3 + $0x80] ss:$12 sps:$4 sm:$0xff]  }
  0x6b   :  { %586 = vmatmul.mubr.bf16.gmra.mrb[20].mxu0 %v5459_v7  ;;  %v5505_v7 = vld [vmem:[%s8064_s3 + $0x98] ss:$12 sps:$4 sm:$0xff]  }
  0x6c   :  { %593 = vmatprep.mubr.bf16.mxu0 %v5460_v8  ;;  %v5506_v8 = vld [vmem:[%s8064_s3 + $0xb0] ss:$12 sps:$4 sm:$0xff]  }
  0x73   :  { %594 = vmatmul.mubr.bf16.gmra.mrb[24].mxu0 %v5462_v9  ;;  %v5507_v9 = vld [vmem:[%s8064_s3 + $0xc8] ss:$12 sps:$4 sm:$0xff]  }
  0x74   :  { %601 = vmatprep.mubr.bf16.mxu0 %v5463_v10  ;;  %v5508_v10 = vld [vmem:[%s8064_s3 + $0xe0] ss:$12 sps:$4 sm:$0xff]  }
  0x7b   :  { %602 = vmatmul.mubr.bf16.gmra.mrb[28].mxu0 %v5465_v11  ;;  %v5509_v11 = vld [vmem:[%s8064_s3 + $0xf8] ss:$12 sps:$4 sm:$0xff]  }
  0x7c   :  { %609 = vmatprep.mubr.bf16.mxu0 %v5466_v12  ;;  %v5510_v12 = vld [vmem:[%s8064_s3 + $0x110] ss:$12 sps:$4 sm:$0xff]  }
  0x83   :  { %610 = vmatmul.mubr.bf16.gmra.mrb[32].mxu0 %v5468_v13  ;;  %v5511_v13 = vld [vmem:[%s8064_s3 + $0x128] ss:$12 sps:$4 sm:$0xff]  }
  0x84   :  { %617 = vmatprep.mubr.bf16.mxu0 %v5469_v14  ;;  %v5512_v14 = vld [vmem:[%s8064_s3 + $0x140] ss:$12 sps:$4 sm:$0xff]  }
  0x8b   :  { %618 = vmatmul.mubr.bf16.gmra.mrb[36].mxu0 %v5471_v15  ;;  %v5513_v15 = vld [vmem:[%s8064_s3 + $0x158] ss:$12 sps:$4 sm:$0xff]  }
  0x8c   :  { %625 = vmatprep.mubr.bf16.mxu0 %v5472_v16  ;;  %v5514_v16 = vld [vmem:[%s8064_s3 + $0x170] ss:$12 sps:$4 sm:$0xff]  }
  0x93   :  { %626 = vmatmul.mubr.bf16.gmra.mrb[40].mxu0 %v5474_v17  ;;  %v5515_v17 = vld [vmem:[%s8064_s3 + $0x188] ss:$12 sps:$4 sm:$0xff]  }
  0x94   :  { %633 = vmatprep.mubr.bf16.mxu0 %v5475_v18  ;;  %v5516_v18 = vld [vmem:[%s8064_s3 + $0x1a0] ss:$12 sps:$4 sm:$0xff]  }
  0x96   :  { %v994_v30 = vpop.permute.xlu1 %993  ;;  %v984_v33 = vpop.permute.xlu0 %983 }
  0x9a   :  { %v1250_v34 = vpop.permute.xlu1 %1249 }
  0x9b   :  { %634 = vmatmul.mubr.bf16.gmra.mrb[44].mxu0 %v5477_v19  ;;  %v5517_v19 = vld [vmem:[%s8064_s3 + $0x1b8] ss:$12 sps:$4 sm:$0x3f]   ;;  %s5630_s3 = smov 127  }
  0x9c   :  { %641 = vmatprep.mubr.bf16.mxu0 %v5478_v20 }
  0xa3   :  { %642 = vmatmul.mubr.bf16.gmra.mrb[48].mxu0 %v5480_v21 }
  0xa4   :  { %649 = vmatprep.mubr.bf16.mxu0 %v5481_v22  ;;  %v1260_v40 = vpop.permute.xlu1 %1259 }
  0xa8   :  { %v1004_v46 = vpop.permute.xlu1 %1003 }
  0xab   :  { %650 = vmatmul.mubr.bf16.gmra.mrb[52].mxu0 %v5483_v25 }
  0xac   :  { %657 = vmatprep.mubr.bf16.mxu0 %v5484_v26 }
  0xb3   :  { %658 = vmatmul.mubr.bf16.gmra.mrb[56].mxu0 %v5486_v31 }
  0xb4   :  { %665 = vmatprep.mubr.bf16.mxu0 %v5487_v32 }
  0xbb   :  { %666 = vmatmul.mubr.bf16.gmra.mrb[60].mxu0 %v5489_v37  ;;  %v989_v37 = vpop.permute.xlu0 %988 }
  0xbc   :  { %673 = vmatprep.mubr.bf16.mxu0 %v5490_v38 }
  0xbf   :  { %v1255_v41 = vpop.permute.xlu0 %1254 }
  0xc3   :  { %674 = vmatmul.mubr.bf16.gmra.mrb[64].mxu0 %v5492_v43  ;;  %v999_v47 = vpop.permute.xlu0 %998 }
  0xc4   :  { %681 = vmatprep.mubr.bf16.mxu0 %v5493_v44 }
  0xc7   :  { %v1265_v53 = vpop.permute.xlu0 %1264 }
  0xcb   :  { %682 = vmatmul.mubr.bf16.gmra.mrb[68].mxu0 %v5495_v49  ;;  %v1009_v59 = vpop.permute.xlu0 %1008 }
  0xcc   :  { %689 = vmatprep.mubr.bf16.mxu0 %v5496_v50  ;;  %v1270_v50 = vpop.permute.xlu1 %1269 }
  0xd0   :  { %v1014_v54 = vpop.permute.xlu1 %1013 }
  0xd3   :  { %690 = vmatmul.mubr.bf16.gmra.mrb[72].mxu0 %v5498_v56 }
  0xd4   :  { %5147 = vmatprep.mubr.msk.bf16.mxu0 %vm5629_vm1, %v8073_v55 }
  0xdb   :  { %5148 = vmatmul.mubr.msk.bf16.vlgmr.msra.gmra.mrb[0].mxu0 %vm451_vm2, %v5499_v61 }
  0xdc   :  { %5151 = vmatprep.mubr.msk.bf16.mxu0 %vm5629_vm1, %v8073_v55 }
  0xe3   :  { %5152 = vmatmul.mubr.msk.bf16.gmra.mrb[4].mxu0 %vm451_vm2, %v5500_v2  ;;  %v1280_v2 = vpop.permute.xlu1 %1279 }
  0xe4   :  { %5155 = vmatprep.mubr.msk.bf16.mxu0 %vm5629_vm1, %v8073_v55 }
  0xeb   :  { %5156 = vmatmul.mubr.msk.bf16.gmra.mrb[8].mxu0 %vm451_vm2, %v5501_v3 }
  0xec   :  { %5159 = vmatprep.mubr.msk.bf16.mxu0 %vm5629_vm1, %v8073_v55 }
  0xf3   :  { %5160 = vmatmul.mubr.msk.bf16.gmra.mrb[12].mxu0 %vm451_vm2, %v5502_v4  ;;  %v1275_v4 = vpop.permute.xlu0 %1274 }
  0xf4   :  { %5163 = vmatprep.mubr.msk.bf16.mxu0 %vm5629_vm1, %v8073_v55 }
  0xfb   :  { %5164 = vmatmul.mubr.msk.bf16.gmra.mrb[16].mxu0 %vm451_vm2, %v5503_v5 }
  0xfc   :  { %5167 = vmatprep.mubr.msk.bf16.mxu0 %vm5629_vm1, %v8073_v55 }
 0x103   :  { %5168 = vmatmul.mubr.msk.bf16.gmra.mrb[20].mxu0 %vm451_vm2, %v5504_v6 }
 0x104   :  { %5171 = vmatprep.mubr.msk.bf16.mxu0 %vm5629_vm1, %v8073_v55 }
 0x10b   :  { %5172 = vmatmul.mubr.msk.bf16.gmra.mrb[24].mxu0 %vm451_vm2, %v5505_v7 }
 0x10c   :  { %5175 = vmatprep.mubr.msk.bf16.mxu0 %vm5629_vm1, %v8073_v55 }
 0x113   :  { %5176 = vmatmul.mubr.msk.bf16.gmra.mrb[28].mxu0 %vm451_vm2, %v5506_v8 }
 0x114   :  { %5179 = vmatprep.mubr.msk.bf16.mxu0 %vm5629_vm1, %v8073_v55 }
 0x11b   :  { %5180 = vmatmul.mubr.msk.bf16.gmra.mrb[32].mxu0 %vm451_vm2, %v5507_v9 }
 0x11c   :  { %5183 = vmatprep.mubr.msk.bf16.mxu0 %vm5629_vm1, %v8073_v55 }
 0x123   :  { %5184 = vmatmul.mubr.msk.bf16.gmra.mrb[36].mxu0 %vm451_vm2, %v5508_v10 }
 0x124   :  { %5187 = vmatprep.mubr.msk.bf16.mxu0 %vm5629_vm1, %v8073_v55 }
 0x12b   :  { %5188 = vmatmul.mubr.msk.bf16.gmra.mrb[40].mxu0 %vm451_vm2, %v5509_v11 }
 0x12c   :  { %5191 = vmatprep.mubr.msk.bf16.mxu0 %vm5629_vm1, %v8073_v55 }
 0x133   :  { %5192 = vmatmul.mubr.msk.bf16.gmra.mrb[44].mxu0 %vm451_vm2, %v5510_v12 }
 0x134   :  { %5195 = vmatprep.mubr.msk.bf16.mxu0 %vm5629_vm1, %v8073_v55 }
 0x13b   :  { %5196 = vmatmul.mubr.msk.bf16.gmra.mrb[48].mxu0 %vm451_vm2, %v5511_v13 }
 0x13c   :  { %5199 = vmatprep.mubr.msk.bf16.mxu0 %vm5629_vm1, %v8073_v55 }
 0x143   :  { %5200 = vmatmul.mubr.msk.bf16.gmra.mrb[52].mxu0 %vm451_vm2, %v5512_v14 }
 0x144   :  { %5203 = vmatprep.mubr.msk.bf16.mxu0 %vm5629_vm1, %v8073_v55 }
 0x14b   :  { %5204 = vmatmul.mubr.msk.bf16.gmra.mrb[56].mxu0 %vm451_vm2, %v5513_v15  ;;  %v1024_v15 = vpop.permute.xlu1 %1023 }
 0x14c   :  { %5207 = vmatprep.mubr.msk.bf16.mxu0 %vm5629_vm1, %v8073_v55 }
 0x153   :  { %5208 = vmatmul.mubr.msk.bf16.gmra.mrb[60].mxu0 %vm451_vm2, %v5514_v16 }
 0x154   :  { %5211 = vmatprep.mubr.msk.bf16.mxu0 %vm5629_vm1, %v8073_v55 }
 0x15b   :  { %5212 = vmatmul.mubr.msk.bf16.gmra.mrb[64].mxu0 %vm451_vm2, %v5515_v17 }
 0x15c   :  { %5215 = vmatprep.mubr.msk.bf16.mxu0 %vm5629_vm1, %v8073_v55 }
 0x163   :  { %5216 = vmatmul.mubr.msk.bf16.gmra.mrb[68].mxu0 %vm451_vm2, %v5516_v18  ;;  %v1019_v18 = vpop.permute.xlu0 %1018 }
 0x164   :  { %5219 = vmatprep.mubr.msk.bf16.mxu0 %vm5629_vm1, %v8073_v55 }
 0x16b   :  { %5220 = vmatmul.mubr.msk.bf16.gmra.mrb[72].mxu0 %vm451_vm2, %v5517_v19 }
 0x1ae   :  { %v6136_v20 = vpop.f32.mrb[0].mxu0 }
 0x1af   :  { %v5149_v21 = vpop.f32.mrb[1].mxu0 }
 0x1b0   :  { %v6138_v22 = vpop.f32.mrb[2].mxu0 }
 0x1b1   :  { %v5150_v23 = vpop.f32.mrb[3].mxu0 }
 0x1b6   :  { %v6140_v24 = vpop.f32.mrb[4].mxu0 }
 0x1b7   :  { %v5153_v25 = vpop.f32.mrb[5].mxu0 }
 0x1b8   :  { %v6142_v26 = vpop.f32.mrb[6].mxu0 }
 0x1b9   :  { %v5154_v27 = vpop.f32.mrb[7].mxu0 }
 0x1be   :  { %v6144_v28 = vpop.f32.mrb[8].mxu0 }
 0x1bf   :  { %v5157_v29 = vpop.f32.mrb[9].mxu0 }
 0x1c0   :  { %v6146_v31 = vpop.f32.mrb[10].mxu0 }
 0x1c1   :  { %v5158_v32 = vpop.f32.mrb[11].mxu0 }
 0x1c2   :  { %v1290_v32 = vpop.permute.xlu1 %1289 }
 0x1c6   :  { %v6148_v35 = vpop.f32.mrb[12].mxu0 }
 0x1c7   :  { %v5161_v36 = vpop.f32.mrb[13].mxu0 }
 0x1c8   :  { %v6150_v38 = vpop.f32.mrb[14].mxu0 }
 0x1c9   :  { %v5162_v39 = vpop.f32.mrb[15].mxu0 }
 0x1ce   :  { %v6152_v42 = vpop.f32.mrb[16].mxu0 }
 0x1cf   :  { %v5165_v43 = vpop.f32.mrb[17].mxu0 }
 0x1d0   :  { %v6154_v44 = vpop.f32.mrb[18].mxu0 }
 0x1d1   :  { %v5166_v45 = vpop.f32.mrb[19].mxu0 }
 0x1d6   :  { %v6156_v48 = vpop.f32.mrb[20].mxu0 }
 0x1d7   :  { %v5169_v49 = vpop.f32.mrb[21].mxu0 }
 0x1d8   :  { %v6158_v51 = vpop.f32.mrb[22].mxu0  ;;  %v1034_v49 = vpop.permute.xlu1 %1033 }
 0x1d9   :  { %v5170_v52 = vpop.f32.mrb[23].mxu0 }
 0x1de   :  { %v780_v56 = vpop.f32.mrb[24].mxu0 }
 0x1df   :  { %v1123_v57 = vmul.f32 %v984_v33, %v780_v56  ;;  %v5173_v58 = vpop.f32.mrb[25].mxu0 }
 0x1e0   :  { %v783_v60 = vpop.f32.mrb[26].mxu0 }
 0x1e1   :  { %v1389_v61 = vadd.f32 %v1250_v34, %v1123_v57  ;;  %v1124_v62 = vmul.f32 %v989_v37, %v783_v60  ;;  %v5174_v63 = vpop.f32.mrb[27].mxu0 }
 0x1e3   :  { %v6160_v0 = vmax.f32 %v1389_v61, 0.0  ;;  %v1390_v1 = vadd.f32 %v1255_v41, %v1124_v62 }
 0x1e5   :  { %8076 = vst [vmem:[#allocation2_spill] sm:$0xff] %v6160_v0  ;;  %v6162_v3 = vmax.f32 %v1390_v1, 0.0  ;;  %1566 = vrot.lane.b32.xlu0 %v6160_v0, %s5630_s3  ;;  %v1469_v8 = vrot.slane %v6160_v0, 4 }
 0x1e6   :  { %v788_v5 = vpop.f32.mrb[28].mxu0 }
 0x1e7   :  { %v1125_v6 = vmul.f32 %v994_v30, %v788_v5  ;;  %1568 = vrot.lane.b32.xlu1 %v6162_v3, %s5630_s3  ;;  %v5177_v7 = vpop.f32.mrb[29].mxu0  ;;  %v1470_v9 = vrot.slane %v6162_v3, 4  ;;  %v1300_v5 = vpop.permute.xlu1 %1299 }
 0x1e8   :  { %v791_v10 = vpop.f32.mrb[30].mxu0 }
 0x1e9   :  { %v1391_v11 = vadd.f32 %v1260_v40, %v1125_v6  ;;  %v1126_v12 = vmul.f32 %v999_v47, %v791_v10  ;;  %v5178_v13 = vpop.f32.mrb[31].mxu0  ;;  %v1471_v14 = vsel %vm1468_vm3, %v1469_v8, %v1470_v9  ;;  %v1285_v40 = vpop.permute.xlu0 %1284 }
 0x1ea   :  { %1494 = vrot.lane.b32.xlu0 %v1471_v14, %s5631_s20 }
 0x1eb   :  { %v6172_v16 = vmax.f32 %v1391_v11, 0.0  ;;  %v1392_v17 = vadd.f32 %v1265_v53, %v1126_v12 }
 0x1ed   :  { %v6174_v19 = vmax.f32 %v1392_v17, 0.0  ;;  %v1472_v23 = vrot.slane %v6172_v16, 4 }
 0x1ee   :  { %1570 = vrot.lane.b32.xlu0 %v6172_v16, %s5630_s3  ;;  %v796_v21 = vpop.f32.mrb[32].mxu0 }
 0x1ef   :  { %v1127_v25 = vmul.f32 %v1004_v46, %v796_v21  ;;  %1572 = vrot.lane.b32.xlu1 %v6174_v19, %s5630_s3  ;;  %v5181_v27 = vpop.f32.mrb[33].mxu0  ;;  %v1474_v29 = vrot.slane %v6174_v19, 4  ;;  %v1723_v30 = vpack.c.bf16 %v6174_v19, %v6172_v16  ;;  %v1473_v41 = vsel %vm1468_vm3, %v1470_v9, %v1472_v23  ;;  %v5523_v16 = vld [vmem:[%s8067_s6 + $0x18] ss:$12 sps:$4 sm:$0xff]  }
 0x1f0   :  { %v799_v33 = vpop.f32.mrb[34].mxu0 }
 0x1f1   :  { %v1393_v34 = vadd.f32 %v1270_v50, %v1127_v25  ;;  %v1128_v36 = vmul.f32 %v1009_v59, %v799_v33  ;;  %v5182_v37 = vpop.f32.mrb[35].mxu0  ;;  %v1475_v39 = vsel %vm1468_vm3, %v1472_v23, %v1474_v29  ;;  %v1029_v59 = vpop.permute.xlu0 %1028 }
 0x1f2   :  { %1498 = vrot.lane.b32.xlu0 %v1475_v39, %s5631_s20  ;;  %v1044_v23 = vpop.permute.xlu1 %1043 }
 0x1f3   :  { %v1431_v43 = vmax.f32 %v1393_v34, 0.0  ;;  %v1394_v45 = vadd.f32 %v1275_v4, %v1128_v36  ;;  %1496 = vrot.lane.b32.xlu1 %v1473_v41, %s5631_s20 }
 0x1f5   :  { %v1432_v46 = vmax.f32 %v1394_v45, 0.0  ;;  %v1476_v47 = vrot.slane %v1431_v43, 4  ;;  %v1295_v8 = vpop.permute.xlu0 %1294 }
 0x1f6   :  { %1574 = vrot.lane.b32.xlu0 %v1431_v43, %s5630_s3  ;;  %v804_v52 = vpop.f32.mrb[36].mxu0  ;;  %v1310_v41 = vpop.permute.xlu1 %1309 }
 0x1f7   :  { %v1129_v50 = vmul.f32 %v1014_v54, %v804_v52  ;;  %1576 = vrot.lane.b32.xlu1 %v1432_v46, %s5630_s3  ;;  %v5185_v53 = vpop.f32.mrb[37].mxu0  ;;  %v1724_v56 = vpack.c.bf16 %v1432_v46, %v1431_v43  ;;  %v1478_v57 = vrot.slane %v1432_v46, 4  ;;  %v1477_v58 = vsel %vm1468_vm3, %v1474_v29, %v1476_v47 }
 0x1f8   :  { %v807_v60 = vpop.f32.mrb[38].mxu0 }
 0x1f9   :  { %v1395_v61 = vadd.f32 %v1280_v2, %v1129_v50  ;;  %v1130_v62 = vmul.f32 %v1019_v18, %v807_v60  ;;  %v5186_v63 = vpop.f32.mrb[39].mxu0  ;;  %4869 = vmatprep.subr.bf16.mxu1 %v1724_v56  ;;  %v1479_v1 = vsel %vm1468_vm3, %v1476_v47, %v1478_v57  ;;  %v1039_v29 = vpop.permute.xlu0 %1038 }
 0x1fa   :  { %1502 = vrot.lane.b32.xlu0 %v1479_v1, %s5631_s20 }
 0x1fb   :  { %v6193_v4 = vmax.f32 %v1395_v61, 0.0  ;;  %v1396_v54 = vadd.f32 %v1285_v40, %v1130_v62  ;;  %1500 = vrot.lane.b32.xlu1 %v1477_v58, %s5631_s20  ;;  %v1049_v58 = vpop.permute.xlu1 %1048 }
 0x1fd   :  { %v6196_v6 = vmax.f32 %v1396_v54, 0.0  ;;  %v1480_v7 = vrot.slane %v6193_v4, 4  ;;  %v1305_v50 = vpop.permute.xlu0 %1304 }
 0x1fe   :  { %v812_v9 = vpop.f32.mrb[40].mxu0 }
 0x1ff   :  { %v1131_v2 = vmul.f32 %v1024_v15, %v812_v9  ;;  %1578 = vrot.lane.b32.xlu1 %v6193_v4, %s5630_s3  ;;  %1580 = vrot.lane.b32.xlu0 %v6196_v6, %s5630_s3  ;;  %v5189_v10 = vpop.f32.mrb[41].mxu0  ;;  %v1481_v11 = vsel %vm1468_vm3, %v1478_v57, %v1480_v7  ;;  %v1482_v12 = vrot.slane %v6196_v6, 4  ;;  %v1725_v13 = vpack.c.bf16 %v6196_v6, %v6193_v4 }
 0x200   :  { %v815_v14 = vpop.f32.mrb[42].mxu0 }
 0x201   :  { %v1397_v17 = vadd.f32 %v1290_v32, %v1131_v2  ;;  %v1132_v18 = vmul.f32 %v1029_v59, %v815_v14  ;;  %v5190_v21 = vpop.f32.mrb[43].mxu0  ;;  %v1483_v15 = vsel %vm1468_vm3, %v1480_v7, %v1482_v12  ;;  %v1054_v2 = vpop.permute.xlu0 %1053 }
 0x203   :  { %v6208_v25 = vmax.f32 %v1397_v17, 0.0  ;;  %v1398_v27 = vadd.f32 %v1295_v8, %v1132_v18  ;;  %1504 = vrot.lane.b32.xlu1 %v1481_v11, %s5631_s20  ;;  %1506 = vrot.lane.b32.xlu0 %v1483_v15, %s5631_s20  ;;  %v1315_v11 = vpop.permute.xlu1 %1314 }
 0x205   :  { %v6212_v33 = vmax.f32 %v1398_v27, 0.0  ;;  %v1484_v34 = vrot.slane %v6208_v25, 4 }
 0x206   :  { %v820_v36 = vpop.f32.mrb[44].mxu0 }
 0x207   :  { %v1133_v37 = vmul.f32 %v1034_v49, %v820_v36  ;;  %v5193_v32 = vpop.f32.mrb[45].mxu0  ;;  %v1485_v39 = vsel %vm1468_vm3, %v1482_v12, %v1484_v34  ;;  %v1486_v40 = vrot.slane %v6212_v33, 4 }
 0x208   :  { %1508 = vrot.lane.b32.xlu1 %v1485_v39, %s5631_s20  ;;  %v823_v43 = vpop.f32.mrb[46].mxu0  ;;  %v910_v32 = vld [vmem:[%s8065_s4 + $0xd8] sm:$0xff] }
 0x209   :  { %v1399_v45 = vadd.f32 %v1300_v5, %v1133_v37  ;;  %v1134_v46 = vmul.f32 %v1039_v29, %v823_v43  ;;  %v5194_v47 = vpop.f32.mrb[47].mxu0  ;;  %v1487_v52 = vsel %vm1468_vm3, %v1484_v34, %v1486_v40  ;;  %v911_v29 = vld [vmem:[%s8065_s4 + $0xe0] sm:$0xff] }
 0x20a   :  { %1510 = vrot.lane.b32.xlu0 %v1487_v52, %s5631_s20 }
 0x20b   :  { %v6220_v53 = vmax.f32 %v1399_v45, 0.0  ;;  %v1400_v49 = vadd.f32 %v1305_v50, %v1134_v46  ;;  %v1176_v45 = vld [vmem:[%s8066_s5 + $0xd8] sm:$0xff] }
 0x20d   :  { %v6222_v56 = vmax.f32 %v1400_v49, 0.0  ;;  %v1488_v57 = vrot.slane %v6220_v53, 4  ;;  %v913_v49 = vld [vmem:[%s8065_s4 + $0xf0] sm:$0xff] }
 0x20e   :  { %v828_v59 = vpop.f32.mrb[48].mxu0 }
 0x20f   :  { %v1135_v60 = vmul.f32 %v1044_v23, %v828_v59  ;;  %v5197_v61 = vpop.f32.mrb[49].mxu0  ;;  %v1489_v62 = vsel %vm1468_vm3, %v1486_v40, %v1488_v57  ;;  %v1490_v63 = vrot.slane %v6222_v56, 4  ;;  %v1727_v1 = vpack.c.bf16 %v6222_v56, %v6220_v53  ;;  %v1320_v23 = vpop.permute.xlu0 %1319  ;;  %v1177_v40 = vld [vmem:[%s8066_s5 + $0xe0] sm:$0xff] }
 0x210   :  { %1512 = vrot.lane.b32.xlu1 %v1489_v62, %s5631_s20  ;;  %v831_v54 = vpop.f32.mrb[50].mxu0  ;;  %v5520_v59 = vld [vmem:[%s8067_s6 + $0x4] ss:$12 sps:$4 sm:$0xff]   ;;  %v1178_v61 = vld [vmem:[%s8066_s5 + $0xe8] sm:$0xff] }
 0x211   :  { %v1401_v5 = vadd.f32 %v1310_v41, %v1135_v60  ;;  %v1136_v7 = vmul.f32 %v1049_v58, %v831_v54  ;;  %v5198_v8 = vpop.f32.mrb[51].mxu0  ;;  %v1491_v9 = vsel %vm1468_vm3, %v1488_v57, %v1490_v63  ;;  %v912_v57 = vld [vmem:[%s8065_s4 + $0xe8] sm:$0xff]  ;;  %v1179_v60 = vld [vmem:[%s8066_s5 + $0xf0] sm:$0xff]  ;;  %1891 = vmatprep.mubr.bf16.mxu1 %v5520_v59 }
 0x212   :  { %1514 = vrot.lane.b32.xlu0 %v1491_v9, %s5631_s20  ;;  %v914_v8 = vld [vmem:[%s8065_s4 + $0xf8] sm:$0xff]  ;;  %v1181_v9 = vld [vmem:[%s8066_s5 + $0x100] sm:$0xff] }
 0x213   :  { %v6232_v10 = vmax.f32 %v1401_v5, 0.0  ;;  %v1402_v12 = vadd.f32 %v1315_v11, %v1136_v7 }
 0x215   :  { %v1492_v14 = vrot.slane %v6232_v10, 4  ;;  %v6243_v34 = vmax.f32 %v1402_v12, 0.0  ;;  %v917_v12 = vld [vmem:[%s8065_s4 + $0x110] sm:$0xff] }
 0x216   :  { %v836_v17 = vpop.f32.mrb[52].mxu0 }
 0x217   :  { %v1137_v18 = vmul.f32 %v1054_v2, %v836_v17  ;;  %1518 = vrot.lane.b32.xlu0 %v1492_v14, %s5631_s20  ;;  %v5201_v21 = vpop.f32.mrb[53].mxu0  ;;  %v1493_v15 = vsel %vm1468_vm3, %v1490_v63, %v1492_v14  ;;  %v2373_v41 = vrot.slane %v6243_v34, 4  ;;  %v915_v63 = vld [vmem:[%s8065_s4 + $0x100] sm:$0xff]  ;;  %v1180_v2 = vld [vmem:[%s8066_s5 + $0xf8] sm:$0xff] }
 0x218   :  { %1516 = vrot.lane.b32.xlu1 %v1493_v15, %s5631_s20  ;;  %v6238_v27 = vpop.f32.mrb[54].mxu0  ;;  %v916_v21 = vld [vmem:[%s8065_s4 + $0x108] sm:$0xff]  ;;  %v1183_v15 = vld [vmem:[%s8066_s5 + $0x110] sm:$0xff] }
 0x219   :  { %v1403_v36 = vadd.f32 %v1320_v23, %v1137_v18  ;;  %v5202_v37 = vpop.f32.mrb[55].mxu0  ;;  %v1182_v23 = vld [vmem:[%s8066_s5 + $0x108] sm:$0xff] }
 0x21b   :  { %v6248_v39 = vmax.f32 %v1403_v36, 0.0  ;;  %1063 = vperm.xlu0 %5440, %v911_v29   ;;  %v919_v36 = vld [vmem:[%s8065_s4 + $0x120] sm:$0xff] }
 0x21c   :  { %1058 = vperm.xlu1 %5441, %v910_v32  }
 0x21d   :  { %v2374_v43 = vrot.slane %v6248_v39, 4 }
 0x21e   :  { %v6258_v46 = vpop.f32.mrb[56].mxu0 }
 0x21f   :  { %1329 = vperm.xlu0 %5440, %v1177_v40   ;;  %v5205_v47 = vpop.f32.mrb[57].mxu0  ;;  %v6265_v52 = vsel %vm1468_vm3, %v2373_v41, %v2374_v43 }
 0x220   :  { %1324 = vperm.xlu1 %5441, %v1176_v45   ;;  %v6267_v50 = vpop.f32.mrb[58].mxu0  ;;  %v918_v45 = vld [vmem:[%s8065_s4 + $0x118] sm:$0xff]  ;;  %v1185_v47 = vld [vmem:[%s8066_s5 + $0x120] sm:$0xff] }
 0x221   :  { %v5206_v58 = vpop.f32.mrb[59].mxu0 }
 0x222   :  { %v1186_v58 = vld [vmem:[%s8066_s5 + $0x128] sm:$0xf] }
 0x223   :  { %1073 = vperm.xlu0 %5440, %v913_v49   ;;  %v1184_v49 = vld [vmem:[%s8066_s5 + $0x118] sm:$0xff] }
 0x224   :  { %1068 = vperm.xlu1 %5441, %v912_v57  }
 0x226   :  { %v6284_v62 = vpop.f32.mrb[60].mxu0 }
 0x227   :  { %1339 = vperm.xlu0 %5440, %v1179_v60   ;;  %v5209_v54 = vpop.f32.mrb[61].mxu0 }
 0x228   :  { %1334 = vperm.xlu1 %5441, %v1178_v61   ;;  %v6289_v5 = vpop.f32.mrb[62].mxu0 }
 0x229   :  { %v5210_v7 = vpop.f32.mrb[63].mxu0 }
 0x22b   :  { %1083 = vperm.xlu0 %5440, %v915_v63   ;;  %v920_v63 = vld [vmem:[%s8065_s4 + $0x128] sm:$0xf] }
 0x22c   :  { %1078 = vperm.xlu1 %5441, %v914_v8  }
 0x22e   :  { %v6300_v11 = vpop.f32.mrb[64].mxu0 }
 0x22f   :  { %1349 = vperm.xlu0 %5440, %v1181_v9   ;;  %v5213_v14 = vpop.f32.mrb[65].mxu0 }
 0x230   :  { %1344 = vperm.xlu1 %5441, %v1180_v2   ;;  %v6305_v17 = vpop.f32.mrb[66].mxu0 }
 0x231   :  { %v5214_v18 = vpop.f32.mrb[67].mxu0 }
 0x233   :  { %1093 = vperm.xlu0 %5440, %v917_v12   ;;  %v6363_v12 = vld [vmem:[%s8068_s1] ss:$0 sm:$0xff] }
 0x234   :  { %1088 = vperm.xlu1 %5441, %v916_v21  }
 0x236   :  { %v6316_v29 = vpop.f32.mrb[68].mxu0 }
 0x237   :  { %1359 = vperm.xlu0 %5440, %v1183_v15   ;;  %v5217_v37 = vpop.f32.mrb[69].mxu0 }
 0x238   :  { %1354 = vperm.xlu1 %5441, %v1182_v23   ;;  %v6321_v32 = vpop.f32.mrb[70].mxu0 }
 0x239   :  { %v5218_v40 = vpop.f32.mrb[71].mxu0 }
 0x23b   :  { %1103 = vperm.xlu0 %5440, %v919_v36  }
 0x23c   :  { %1098 = vperm.xlu1 %5441, %v918_v45  }
 0x23e   :  { %v6332_v57 = vpop.f32.mrb[72].mxu0 }
 0x23f   :  { %1369 = vperm.xlu0 %5440, %v1185_v47   ;;  %v5221_v59 = vpop.f32.mrb[73].mxu0 }
 0x240   :  { %1364 = vperm.xlu1 %5441, %v1184_v49   ;;  %v6337_v60 = vpop.f32.mrb[74].mxu0 }
 0x241   :  { %v5222_v61 = vpop.f32.mrb[75].mxu0 }
 0x243   :  { %1374 = vperm.xlu0 %5440, %v1186_v58  }
 0x244   :  { %1108 = vperm.xlu1 %5441, %v920_v63  }
 0x247   :  { %1584 = vrot.lane.b32.xlu0 %v6212_v33, %s5630_s3 }
 0x248   :  { %1582 = vrot.lane.b32.xlu1 %v6208_v25, %s5630_s3 }
 0x24b   :  { %1588 = vrot.lane.b32.xlu0 %v6222_v56, %s5630_s3 }
 0x24c   :  { %1586 = vrot.lane.b32.xlu1 %v6220_v53, %s5630_s3 }
 0x24f   :  { %2243 = vrot.lane.b32.xlu0 %v6243_v34, %s5631_s20 }
 0x250   :  { %1590 = vrot.lane.b32.xlu1 %v6232_v10, %s5630_s3 }
 0x253   :  { %2308 = vrot.lane.b32.xlu0 %v6243_v34, %s5630_s3 }
 0x254   :  { %2245 = vrot.lane.b32.xlu1 %v6248_v39, %s5631_s20 }
 0x257   :  { %v1567_v54 = vpop.permute.xlu0 %1566 }
 0x258   :  { %2310 = vrot.lane.b32.xlu1 %v6248_v39, %s5630_s3  ;;  %v5527_v39 = vld [vmem:[%s8067_s6 + $0x4c] ss:$12 sps:$4 sm:$0xff]  }
 0x259   :  { %v1569_v8 = vpop.permute.xlu1 %1568 }
 0x25c   :  { %v1495_v7 = vpop.permute.xlu0 %1494 }
 0x25d   :  { %v1534_v14 = vsel %vm1533_vm4, 0.0, %v1495_v7  ;;  %v1607_v7 = vsel %vm1605_vm5, %v1569_v8, 0.0 }
 0x25e   :  { %v1553_v23 = vmul.f32 %v6363_v12, %v1534_v14  ;;  %v6380_v14 = vld [vmem:[%s8069_s2] ss:$0 sm:$0xff] }
 0x260   :  { %v1571_v9 = vpop.permute.xlu0 %1570 }
 0x261   :  { %v1573_v2 = vpop.permute.xlu1 %1572 }
 0x264   :  { %v1499_v18 = vpop.permute.xlu0 %1498 }
 0x265   :  { %v1497_v21 = vpop.permute.xlu1 %1496  ;;  %v1536_v47 = vsel %vm1533_vm4, 0.0, %v1499_v18  ;;  %v1606_v18 = vsel %vm1605_vm5, %v1567_v54, 0.0 }
 0x266   :  { %v1535_v15 = vsel %vm1533_vm4, 0.0, %v1497_v21  ;;  %v1555_v61 = vmul.f32 %v6363_v12, %v1536_v47 }
 0x267   :  { %v1554_v36 = vmul.f32 %v6363_v12, %v1535_v15  ;;  %v1626_v15 = vmul.f32 %v6380_v14, %v1607_v7 }
 0x268   :  { %v1575_v37 = vpop.permute.xlu0 %1574 }
 0x269   :  { %v1577_v40 = vpop.permute.xlu1 %1576  ;;  %v1716_v45 = vpack.c.bf16 %v1554_v36, %v1553_v23  ;;  %v1625_v23 = vmul.f32 %v6380_v14, %v1606_v18 }
 0x26b   :  { %4870 = vmatpush3.bf16.msra.mxu1 %v1716_v45 }
 0x26c   :  { %v1503_v49 = vpop.permute.xlu0 %1502  ;;  %4871 = vmatprep.subr.bf16.mxu1 %v1725_v13  ;;  %v1726_v13 = vpack.c.bf16 %v6212_v33, %v6208_v25  ;;  %v1608_v25 = vsel %vm1605_vm5, %v1571_v9, 0.0  ;;  %v1609_v33 = vsel %vm1605_vm5, %v1573_v2, 0.0 }
 0x26d   :  { %v1501_v58 = vpop.permute.xlu1 %1500  ;;  %v1538_v8 = vsel %vm1533_vm4, 0.0, %v1503_v49 }
 0x26e   :  { %v1537_v59 = vsel %vm1533_vm4, 0.0, %v1501_v58  ;;  %v1652_v58 = vrot.slane %v1626_v15, 4  ;;  %v1557_v54 = vmul.f32 %v6363_v12, %v1538_v8  ;;  %v1628_v15 = vmul.f32 %v6380_v14, %v1609_v33 }
 0x26f   :  { %v1556_v63 = vmul.f32 %v6363_v12, %v1537_v59 }
 0x271   :  { %v1579_v21 = vpop.permute.xlu1 %1578  ;;  %v1581_v4 = vpop.permute.xlu0 %1580  ;;  %v1717_v6 = vpack.c.bf16 %v1556_v63, %v1555_v61  ;;  %v1651_v61 = vrot.slane %v1625_v23, 4 }
 0x273   :  { %4872 = vmatpush3.bf16.msra.mxu1 %v1717_v6  ;;  %v1653_v6 = vsel %vm1468_vm3, %v1651_v61, %v1652_v58 }
 0x274   :  { %4873 = vmatprep.subr.bf16.mxu1 %v1726_v13  ;;  %v1627_v13 = vmul.f32 %v6380_v14, %v1608_v25 }
 0x275   :  { %v1505_v36 = vpop.permute.xlu1 %1504  ;;  %v1507_v47 = vpop.permute.xlu0 %1506 }
 0x276   :  { %v1539_v45 = vsel %vm1533_vm4, 0.0, %v1505_v36  ;;  %v1540_v63 = vsel %vm1533_vm4, 0.0, %v1507_v47  ;;  %v1728_v36 = vpack.c.bf16 %v1653_v6, %v6232_v10  ;;  %v1656_v47 = vrot.slane %v1628_v15, 4 }
 0x277   :  { %v1558_v59 = vmul.f32 %v6363_v12, %v1539_v45  ;;  %v1559_v8 = vmul.f32 %v6363_v12, %v1540_v63  ;;  %v1654_v45 = vrot.slane %v1627_v13, 4 }
 0x279   :  { %v1718_v7 = vpack.c.bf16 %v1558_v59, %v1557_v54  ;;  %v1610_v54 = vsel %vm1605_vm5, %v1575_v37, 0.0  ;;  %v1611_v59 = vsel %vm1605_vm5, %v1577_v40, 0.0  ;;  %v1655_v37 = vsel %vm1468_vm3, %v1652_v58, %v1654_v45 }
 0x27a   :  { %v1509_v18 = vpop.permute.xlu1 %1508  ;;  %v1629_v33 = vmul.f32 %v6380_v14, %v1610_v54  ;;  %v1630_v53 = vmul.f32 %v6380_v14, %v1611_v59  ;;  %v1657_v40 = vsel %vm1468_vm3, %v1654_v45, %v1656_v47 }
 0x27b   :  { %v1541_v49 = vsel %vm1533_vm4, 0.0, %v1509_v18  ;;  %4874 = vmatpush3.bf16.msra.mxu1 %v1718_v7  ;;  %v1612_v7 = vsel %vm1605_vm5, %v1579_v21, 0.0  ;;  %v1613_v18 = vsel %vm1605_vm5, %v1581_v4, 0.0  ;;  %v1729_v15 = vpack.c.bf16 %v1657_v40, %v1655_v37  ;;  %v5518_v40 = vld [vmem:[%s8067_s6] ss:$12 sps:$4 sm:$0xff]  }
 0x27c   :  { %v1560_v23 = vmul.f32 %v6363_v12, %v1541_v49  ;;  %4875 = vmatprep.subr.bf16.mxu1 %v1727_v1  ;;  %v1511_v9 = vpop.permute.xlu0 %1510  ;;  %v1658_v6 = vrot.slane %v1629_v33, 4  ;;  %v1660_v13 = vrot.slane %v1630_v53, 4 }
 0x27d   :  { %v1542_v61 = vsel %vm1533_vm4, 0.0, %v1511_v9 }
 0x27e   :  { %v1719_v2 = vpack.c.bf16 %v1560_v23, %v1559_v8  ;;  %v1561_v1 = vmul.f32 %v6363_v12, %v1542_v61  ;;  %v1631_v8 = vmul.f32 %v6380_v14, %v1612_v7  ;;  %v6418_v23 = vmul.f32 %v6380_v14, %v1613_v18  ;;  %v5521_v7 = vld [vmem:[%s8067_s6 + $0x1c] ss:$12 sps:$4 sm:$0xff]  }
 0x27f   :  { %v1659_v45 = vsel %vm1468_vm3, %v1656_v47, %v1658_v6  ;;  %v1661_v54 = vsel %vm1468_vm3, %v1658_v6, %v1660_v13 }
 0x280   :  { %4876 = vmatpush3.bf16.msra.mxu1 %v1719_v2  ;;  %v1662_v59 = vrot.slane %v1631_v8, 4  ;;  %v1664_v61 = vrot.slane %v6418_v23, 4 }
 0x281   :  { %4877 = vmatprep.subr.bf16.mxu1 %v1728_v36 }
 0x282   :  { %v1513_v25 = vpop.permute.xlu1 %1512  ;;  %v1665_v47 = vsel %vm1468_vm3, %v1662_v59, %v1664_v61 }
 0x283   :  { %v1543_v56 = vsel %vm1533_vm4, 0.0, %v1513_v25 }
 0x284   :  { %v1562_v10 = vmul.f32 %v6363_v12, %v1543_v56  ;;  %v1515_v63 = vpop.permute.xlu0 %1514  ;;  %v1730_v56 = vpack.c.bf16 %v1661_v54, %v1659_v45 }
 0x285   :  { %v1544_v9 = vsel %vm1533_vm4, 0.0, %v1515_v63 }
 0x286   :  { %v1720_v49 = vpack.c.bf16 %v1562_v10, %v1561_v1  ;;  %v1563_v25 = vmul.f32 %v6363_v12, %v1544_v9  ;;  %v1663_v10 = vsel %vm1468_vm3, %v1660_v13, %v1662_v59 }
 0x287   :  { %v1731_v37 = vpack.c.bf16 %v1665_v47, %v1663_v10 }
 0x288   :  { %4878 = vmatpush3.bf16.msra.mxu1 %v1720_v49 }
 0x289   :  { %4879 = vmatprep.subr.bf16.mxu1 %v1729_v15  ;;  %v1519_v58 = vpop.permute.xlu0 %1518 }
 0x28a   :  { %v1546_v2 = vsel %vm1533_vm4, 0.0, %v1519_v58  ;;  %v1517_v36 = vpop.permute.xlu1 %1516 }
 0x28b   :  { %v1565_v21 = vmul.f32 %v6363_v12, %v1546_v2  ;;  %v1545_v4 = vsel %vm1533_vm4, 0.0, %v1517_v36 }
 0x28c   :  { %v1564_v33 = vmul.f32 %v6363_v12, %v1545_v4 }
 0x28d   :  { %v1689_v1 = vsel %vm1468_vm3, %v1565_v21, %v6160_v0 }
 0x28e   :  { %v1721_v53 = vpack.c.bf16 %v1564_v33, %v1563_v25  ;;  %v1722_v63 = vpack.c.bf16 %v6162_v3, %v1689_v1 }
 0x290   :  { %4880 = vmatpush3.bf16.msra.mxu1 %v1721_v53  ;;  %v5526_v53 = vld [vmem:[%s8067_s6 + $0x30] ss:$12 sps:$4 sm:$0xff]  }
 0x291   :  { %4881 = vmatprep.subr.bf16.mxu1 %v1730_v56 }
 0x294   :  { %4882 = vmatpush3.bf16.msra.mxu1 %v1722_v63 }
 0x295   :  { %4883 = vmatprep.subr.bf16.mxu1 %v1731_v37 }
 0x298   :  { %4884 = vmatpush3.bf16.msra.mxu1 %v1723_v30  ;;  %v5524_v30 = vld [vmem:[%s8067_s6 + $0x34] ss:$12 sps:$4 sm:$0xff]  }
 0x299   :  { %5223 = vmatprep.subr.bf16.mxu1 %v8073_v55 }
 0x29a   :  { %v1064_v18 = vpop.permute.xlu0 %1063 }
 0x29b   :  { %v1059_v49 = vpop.permute.xlu1 %1058  ;;  %1892 = vmatmul.mubr.bf16.vlgmr.msra.gmra.mrb[0].mxu1 %v5518_v40  ;;  %v1139_v3 = vmul.f32 %v1064_v18, %v6258_v46 }
 0x29c   :  { %1899 = vmatprep.mubr.bf16.mxu1 %v5521_v7  ;;  %v1138_v6 = vmul.f32 %v1059_v49, %v6238_v27 }
 0x29e   :  { %v1330_v13 = vpop.permute.xlu0 %1329 }
 0x29f   :  { %v1405_v15 = vadd.f32 %v1330_v13, %v1139_v3  ;;  %v1325_v8 = vpop.permute.xlu1 %1324  ;;  %v5529_v13 = vld [vmem:[%s8067_s6 + $0x48] ss:$12 sps:$4 sm:$0xff]  }
 0x2a0   :  { %v1404_v19 = vadd.f32 %v1325_v8, %v1138_v6 }
 0x2a1   :  { %v6454_v9 = vmax.f32 %v1405_v15, 0.0 }
 0x2a2   :  { %v1442_v58 = vmax.f32 %v1404_v19, 0.0  ;;  %v1074_v2 = vpop.permute.xlu0 %1073 }
 0x2a3   :  { %v2378_v46 = vrot.slane %v6454_v9, 4  ;;  %v1069_v36 = vpop.permute.xlu1 %1068  ;;  %2249 = vrot.lane.b32.xlu1 %v6454_v9, %s5631_s20  ;;  %1900 = vmatmul.mubr.bf16.gmra.mrb[4].mxu1 %v5523_v16  ;;  %v1141_v21 = vmul.f32 %v1074_v2, %v6284_v62 }
 0x2a4   :  { %v2376_v27 = vrot.slane %v1442_v58, 4  ;;  %2247 = vrot.lane.b32.xlu0 %v1442_v58, %s5631_s20  ;;  %1907 = vmatprep.mubr.bf16.mxu1 %v5524_v30  ;;  %v1140_v4 = vmul.f32 %v1069_v36, %v6267_v50 }
 0x2a6   :  { %v1340_v45 = vpop.permute.xlu0 %1339  ;;  %v6465_v54 = vsel %vm1468_vm3, %v2374_v43, %v2376_v27  ;;  %v6468_v59 = vsel %vm1468_vm3, %v2376_v27, %v2378_v46 }
 0x2a7   :  { %v1407_v25 = vadd.f32 %v1340_v45, %v1141_v21  ;;  %v1335_v33 = vpop.permute.xlu1 %1334  ;;  %v2446_v62 = vpack.c.bf16 %v6468_v59, %v6465_v54 }
 0x2a8   :  { %v1406_v56 = vadd.f32 %v1335_v33, %v1140_v4  ;;  %2312 = vrot.lane.b32.xlu0 %v1442_v58, %s5630_s3  ;;  %v5532_v33 = vld [vmem:[%s8067_s6 + $0x60] ss:$12 sps:$4 sm:$0xff]  }
 0x2a9   :  { %v6479_v43 = vmax.f32 %v1407_v25, 0.0 }
 0x2aa   :  { %v6481_v50 = vmax.f32 %v1406_v56, 0.0  ;;  %v1084_v1 = vpop.permute.xlu0 %1083 }
 0x2ab   :  { %v2382_v10 = vrot.slane %v6479_v43, 4  ;;  %v1079_v47 = vpop.permute.xlu1 %1078  ;;  %2253 = vrot.lane.b32.xlu1 %v6479_v43, %s5631_s20  ;;  %1908 = vmatmul.mubr.bf16.gmra.mrb[8].mxu1 %v5526_v53  ;;  %v1143_v37 = vmul.f32 %v1084_v1, %v6300_v11 }
 0x2ac   :  { %v2380_v63 = vrot.slane %v6481_v50, 4  ;;  %2251 = vrot.lane.b32.xlu0 %v6481_v50, %s5631_s20  ;;  %1915 = vmatprep.mubr.bf16.mxu1 %v5527_v39  ;;  %v1142_v40 = vmul.f32 %v1079_v47, %v6289_v5  ;;  %v5530_v5 = vld [vmem:[%s8067_s6 + $0x64] ss:$12 sps:$4 sm:$0xff]  }
 0x2ae   :  { %v1350_v7 = vpop.permute.xlu0 %1349  ;;  %v6492_v18 = vsel %vm1468_vm3, %v2378_v46, %v2380_v63  ;;  %v6495_v49 = vsel %vm1468_vm3, %v2380_v63, %v2382_v10 }
 0x2af   :  { %v1409_v3 = vadd.f32 %v1350_v7, %v1143_v37  ;;  %v1345_v6 = vpop.permute.xlu1 %1344  ;;  %v2447_v15 = vpack.c.bf16 %v6495_v49, %v6492_v18  ;;  %v4663_v18 = vld [vmem:[%s8070_s7 + $0x78] sm:$0xff]  ;;  %v5539_v49 = vld [vmem:[%s8067_s6 + $0x20] ss:$12 sps:$4 sm:$0xff]  }
 0x2b0   :  { %v1408_v8 = vadd.f32 %v1345_v6, %v1142_v40  ;;  %v1714_v40 = vld [vmem:[%s8067_s6 + $0x90] sm:$0x33] }
 0x2b1   :  { %v6505_v11 = vmax.f32 %v1409_v3, 0.0 }
 0x2b2   :  { %v6507_v16 = vmax.f32 %v1408_v8, 0.0  ;;  %v1094_v19 = vpop.permute.xlu0 %1093 }
 0x2b3   :  { %v2386_v30 = vrot.slane %v6505_v11, 4  ;;  %v1089_v58 = vpop.permute.xlu1 %1088  ;;  %2257 = vrot.lane.b32.xlu1 %v6505_v11, %s5631_s20  ;;  %1916 = vmatmul.mubr.bf16.gmra.mrb[12].mxu1 %v5529_v13  ;;  %v1145_v46 = vmul.f32 %v1094_v19, %v6316_v29  ;;  %v5535_v19 = vld [vmem:[%s8067_s6 + $0x78] ss:$12 sps:$4 sm:$0xff]  }
 0x2b4   :  { %v2384_v2 = vrot.slane %v6507_v16, 4  ;;  %2255 = vrot.lane.b32.xlu0 %v6507_v16, %s5631_s20  ;;  %1923 = vmatprep.mubr.bf16.mxu1 %v5530_v5  ;;  %v1144_v36 = vmul.f32 %v1089_v58, %v6305_v17  ;;  %v5533_v17 = vld [vmem:[%s8067_s6 + $0x7c] ss:$12 sps:$4 sm:$0xff]  }
 0x2b6   :  { %v1360_v27 = vpop.permute.xlu0 %1359  ;;  %v6518_v21 = vsel %vm1468_vm3, %v2382_v10, %v2384_v2  ;;  %v6521_v4 = vsel %vm1468_vm3, %v2384_v2, %v2386_v30  ;;  %v4598_v2 = vcombine.high %v1714_v40, %v1714_v40 }
 0x2b7   :  { %v1411_v45 = vadd.f32 %v1360_v27, %v1145_v46  ;;  %v1355_v25 = vpop.permute.xlu1 %1354  ;;  %v2448_v53 = vpack.c.bf16 %v6521_v4, %v6518_v21  ;;  %v4676_v21 = vld [vmem:[%s8071_s8 + $0x78] sm:$0xff]  ;;  %v4664_v4 = vld [vmem:[%s8070_s7 + $0x80] sm:$0xff] }
 0x2b8   :  { %v1410_v56 = vadd.f32 %v1355_v25, %v1144_v36 }
 0x2b9   :  { %v6531_v29 = vmax.f32 %v1411_v45, 0.0 }
 0x2ba   :  { %v6533_v39 = vmax.f32 %v1410_v56, 0.0  ;;  %v1104_v1 = vpop.permute.xlu0 %1103 }
 0x2bb   :  { %v2390_v10 = vrot.slane %v6531_v29, 4  ;;  %v1099_v47 = vpop.permute.xlu1 %1098  ;;  %2261 = vrot.lane.b32.xlu0 %v6531_v29, %s5631_s20  ;;  %1924 = vmatmul.mubr.bf16.gmra.mrb[16].mxu1 %v5532_v33  ;;  %v1147_v37 = vmul.f32 %v1104_v1, %v6332_v57 }
 0x2bc   :  { %v2388_v63 = vrot.slane %v6533_v39, 4  ;;  %2259 = vrot.lane.b32.xlu1 %v6533_v39, %s5631_s20  ;;  %1931 = vmatprep.mubr.bf16.mxu1 %v5533_v17  ;;  %v1146_v7 = vmul.f32 %v1099_v47, %v6321_v32 }
 0x2be   :  { %v1370_v3 = vpop.permute.xlu0 %1369  ;;  %v6547_v6 = vsel %vm1468_vm3, %v2386_v30, %v2388_v63  ;;  %v6550_v13 = vsel %vm1468_vm3, %v2388_v63, %v2390_v10 }
 0x2bf   :  { %v1413_v8 = vadd.f32 %v1370_v3, %v1147_v37  ;;  %v1365_v5 = vpop.permute.xlu1 %1364  ;;  %v2449_v57 = vpack.c.bf16 %v6550_v13, %v6547_v6  ;;  %v4597_v37 = vcombine.low %v1714_v40, %v1714_v40 }
 0x2c0   :  { %v1412_v58 = vadd.f32 %v1365_v5, %v1146_v7 }
 0x2c1   :  { %v6557_v46 = vmax.f32 %v1413_v8, 0.0 }
 0x2c2   :  { %v6559_v32 = vmax.f32 %v1412_v58, 0.0  ;;  %v1375_v30 = vpop.permute.xlu0 %1374 }
 0x2c3   :  { %v2394_v36 = vrot.slane %v6557_v46, 4  ;;  %v1109_v27 = vpop.permute.xlu1 %1108  ;;  %2265 = vrot.lane.b32.xlu0 %v6557_v46, %s5631_s20  ;;  %1932 = vmatmul.mubr.bf16.gmra.mrb[20].mxu1 %v5535_v19 }
 0x2c4   :  { %v2392_v45 = vrot.slane %v6559_v32, 4  ;;  %v1148_v25 = vmul.f32 %v1109_v27, %v6337_v60  ;;  %2263 = vrot.lane.b32.xlu1 %v6559_v32, %s5631_s20  ;;  %1939 = vmatprep.mubr.bf16.mxu1 %v4598_v2 }
 0x2c6   :  { %v1414_v33 = vadd.f32 %v1375_v30, %v1148_v25  ;;  %v1585_v56 = vpop.permute.xlu0 %1584  ;;  %v6569_v17 = vsel %vm1468_vm3, %v2390_v10, %v2392_v45  ;;  %v6572_v1 = vsel %vm1468_vm3, %v2392_v45, %v2394_v36 }
 0x2c7   :  { %v1615_v47 = vsel %vm1605_vm5, %v1585_v56, 0.0  ;;  %v1583_v63 = vpop.permute.xlu1 %1582  ;;  %2314 = vrot.lane.b32.xlu0 %v6454_v9, %s5630_s3  ;;  %v2450_v60 = vpack.c.bf16 %v6572_v1, %v6569_v17 }
 0x2c8   :  { %v1634_v7 = vmul.f32 %v6380_v14, %v1615_v47  ;;  %v1614_v3 = vsel %vm1605_vm5, %v1583_v63, 0.0  ;;  %2316 = vrot.lane.b32.xlu1 %v6481_v50, %s5630_s3  ;;  %v1452_v10 = vmax.f32 %v1414_v33, 0.0 }
 0x2c9   :  { %v1633_v8 = vmul.f32 %v6380_v14, %v1614_v3 }
 0x2ca   :  { %v1668_v5 = vrot.slane %v1634_v7, 4  ;;  %v1589_v19 = vpop.permute.xlu0 %1588  ;;  %v2396_v58 = vrot.slane %v1452_v10, 4 }
 0x2cb   :  { %v1666_v2 = vrot.slane %v1633_v8, 4  ;;  %v1617_v9 = vsel %vm1605_vm5, %v1589_v19, 0.0  ;;  %v1587_v40 = vpop.permute.xlu1 %1586  ;;  %2318 = vrot.lane.b32.xlu0 %v6479_v43, %s5630_s3  ;;  %1940 = vmatmul.mubr.bf16.gmra.mrb[24].mxu1 %v4597_v37 }
 0x2cc   :  { %v1636_v30 = vmul.f32 %v6380_v14, %v1617_v9  ;;  %v1616_v27 = vsel %vm1605_vm5, %v1587_v40, 0.0  ;;  %2267 = vrot.lane.b32.xlu1 %v1452_v10, %s5631_s20  ;;  %5229 = vmatprep.mubr.msk.bf16.mxu1 %vm5629_vm1, %v8073_v55  ;;  %v6593_v50 = vsel %vm1468_vm3, %v2394_v36, %v2396_v58  ;;  %v5538_v9 = vld [vmem:[%s8067_s6 + $0x8] ss:$12 sps:$4 sm:$0xff]  }
 0x2cd   :  { %v1667_v45 = vsel %vm1468_vm3, %v1664_v61, %v1666_v2  ;;  %v1669_v25 = vsel %vm1468_vm3, %v1666_v2, %v1668_v5  ;;  %v1635_v43 = vmul.f32 %v6380_v14, %v1616_v27  ;;  %v4677_v27 = vld [vmem:[%s8071_s8 + $0x80] sm:$0xff] }
 0x2ce   :  { %v1672_v33 = vrot.slane %v1636_v30, 4  ;;  %v1732_v56 = vpack.c.bf16 %v1669_v25, %v1667_v45  ;;  %v2244_v3 = vpop.permute.xlu0 %2243  ;;  %v4662_v30 = vld [vmem:[%s8070_s7 + $0x70] sm:$0xff]  ;;  %v4678_v45 = vld [vmem:[%s8071_s8 + $0x88] sm:$0xff] }
 0x2cf   :  { %v1670_v47 = vrot.slane %v1635_v43, 4  ;;  %v1591_v63 = vpop.permute.xlu1 %1590  ;;  %2322 = vrot.lane.b32.xlu0 %v6505_v11, %s5630_s3  ;;  %v4666_v25 = vld [vmem:[%s8070_s7 + $0x90] sm:$0xff]  ;;  %v4667_v43 = vld [vmem:[%s8070_s7 + $0x98] sm:$0xff] }
 0x2d0   :  { %v1618_v37 = vsel %vm1605_vm5, %v1591_v63, 0.0  ;;  %5224 = vmatpush3.bf16.msra.mxu1 %v1732_v56  ;;  %2320 = vrot.lane.b32.xlu1 %v6507_v16, %s5630_s3  ;;  %v4679_v56 = vld [vmem:[%s8071_s8 + $0x90] sm:$0xff]  ;;  %v4668_v63 = vld [vmem:[%s8070_s7 + $0xa0] sm:$0xff] }
 0x2d1   :  { %v1671_v23 = vsel %vm1468_vm3, %v1668_v5, %v1670_v47  ;;  %v1673_v61 = vsel %vm1468_vm3, %v1670_v47, %v1672_v33  ;;  %v1637_v36 = vmul.f32 %v6380_v14, %v1618_v37  ;;  %5225 = vmatprep.subr.bf16.mxu1 %v8073_v55  ;;  %v2282_v5 = vsel %vm1533_vm4, 0.0, %v2244_v3  ;;  %v4680_v47 = vld [vmem:[%s8071_s8 + $0x98] sm:$0xff]  ;;  %v4669_v37 = vld [vmem:[%s8070_s7 + $0xa8] sm:$0xff] }
 0x2d2   :  { %v1733_v7 = vpack.c.bf16 %v1673_v61, %v1671_v23  ;;  %v2295_v40 = vmul.f32 %v6363_v12, %v2282_v5  ;;  %v5542_v23 = vld [vmem:[%s8067_s6 + $0x68] ss:$12 sps:$4 sm:$0xff]   ;;  %v4681_v61 = vld [vmem:[%s8071_s8 + $0xa0] sm:$0xff]  ;;  %v4671_v3 = vld [vmem:[%s8070_s7 + $0xb8] sm:$0xff] }
 0x2d3   :  { %v1674_v8 = vrot.slane %v1637_v36, 4  ;;  %v2246_v19 = vpop.permute.xlu1 %2245  ;;  %2326 = vrot.lane.b32.xlu0 %v6531_v29, %s5630_s3  ;;  %v4682_v36 = vld [vmem:[%s8071_s8 + $0xa8] sm:$0xff] }
 0x2d4   :  { %v2283_v11 = vsel %vm1533_vm4, 0.0, %v2246_v19  ;;  %5226 = vmatpush3.bf16.msra.mxu1 %v1733_v7  ;;  %2324 = vrot.lane.b32.xlu1 %v6533_v39, %s5630_s3  ;;  %v4661_v39 = vld [vmem:[%s8070_s7 + $0x68] sm:$0xff]  ;;  %v4670_v7 = vld [vmem:[%s8070_s7 + $0xb0] sm:$0xff] }
 0x2d5   :  { %v1675_v16 = vsel %vm1468_vm3, %v1672_v33, %v1674_v8  ;;  %5227 = vmatprep.subr.bf16.mxu1 %v8073_v55  ;;  %v2296_v2 = vmul.f32 %v6363_v12, %v2283_v11  ;;  %v5541_v33 = vld [vmem:[%s8067_s6 + $0x50] ss:$12 sps:$4 sm:$0xff]   ;;  %v4673_v5 = vld [vmem:[%s8070_s7 + $0xc8] sm:$0xf] }
 0x2d6   :  { %v1734_v58 = vpack.c.bf16 %v1674_v8, %v1675_v16  ;;  %v5543_v8 = vld [vmem:[%s8067_s6 + $0x80] ss:$12 sps:$4 sm:$0xff]   ;;  %v4683_v19 = vld [vmem:[%s8071_s8 + $0xb0] sm:$0xff]  ;;  %v4684_v11 = vld [vmem:[%s8071_s8 + $0xb8] sm:$0xff] }
 0x2d7   :  { %2330 = vrot.lane.b32.xlu0 %v6557_v46, %s5630_s3  ;;  %v2439_v46 = vpack.c.bf16 %v2296_v2, %v2295_v40  ;;  %v4672_v16 = vld [vmem:[%s8070_s7 + $0xc0] sm:$0xff]  ;;  %v2309_v40 = vpop.permute.xlu0 %2308 }
 0x2d8   :  { %2328 = vrot.lane.b32.xlu1 %v6559_v32, %s5630_s3  ;;  %v1857_v29 = vsel %vm509_vm0, %v1734_v58, 0  ;;  %v4674_v32 = vld [vmem:[%s8071_s8 + $0x68] sm:$0xff]  ;;  %v5544_v58 = vld [vmem:[%s8067_s6 + $0x98] ss:$0 sps:$4 sm:$0x33]   ;;  %v4685_v2 = vld [vmem:[%s8071_s8 + $0xc0] sm:$0xff] }
 0x2d9   :  { %5228 = vmatpush3.bf16.msra.mxu1 %v1857_v29  ;;  %v5547_v29 = vld [vmem:[%s8067_s6 + $0xa0] ss:$12 sps:$4 sm:$0xff]  }
 0x2da   :  { %4937 = vmatprep.subr.bf16.mxu1 %v2447_v15  ;;  %v4675_v15 = vld [vmem:[%s8071_s8 + $0x70] sm:$0xff] }
 0x2db   :  { %2774 = vperm.xlu0 %5440, %v4661_v39   ;;  %v4686_v39 = vld [vmem:[%s8071_s8 + $0xc8] sm:$0xf] }
 0x2dc   :  { %5230 = vmatmul.mubr.msk.bf16.vlgmr.msra.gmra.mrb[28].mxu1 %vm451_vm2, %v5538_v9  ;;  %2332 = vrot.lane.b32.xlu1 %v1452_v10, %s5630_s3  ;;  %v5540_v10 = vld [vmem:[%s8067_s6 + $0x38] ss:$12 sps:$4 sm:$0xff]   ;;  %v2311_v9 = vpop.permute.xlu1 %2310 }
 0x2dd   :  { %4938 = vmatpush3.bf16.msra.mxu1 %v2439_v46  ;;  %5233 = vmatprep.mubr.msk.bf16.mxu1 %vm5629_vm1, %v8073_v55  ;;  %v2348_v17 = vsel %vm1605_vm5, %v2311_v9, 0.0 }
 0x2de   :  { %4939 = vmatprep.subr.bf16.mxu1 %v2448_v53  ;;  %v4665_v53 = vld [vmem:[%s8070_s7 + $0x88] sm:$0xff] }
 0x2df   :  { %2866 = vperm.xlu0 %5440, %v4674_v32  }
 0x2e0   :  { %2779 = vperm.xlu1 %5441, %v4662_v30  }
 0x2e3   :  { %2784 = vperm.xlu0 %5440, %v4663_v18  }
 0x2e4   :  { %5234 = vmatmul.mubr.msk.bf16.gmra.mrb[32].mxu1 %vm451_vm2, %v5539_v49  ;;  %2871 = vperm.xlu1 %5441, %v4675_v15  }
 0x2e5   :  { %5237 = vmatprep.mubr.msk.bf16.mxu1 %vm5629_vm1, %v8073_v55 }
 0x2e7   :  { %2876 = vperm.xlu0 %5440, %v4676_v21  }
 0x2e8   :  { %2789 = vperm.xlu1 %5441, %v4664_v4  }
 0x2eb   :  { %2794 = vperm.xlu0 %5440, %v4665_v53  }
 0x2ec   :  { %5238 = vmatmul.mubr.msk.bf16.gmra.mrb[36].mxu1 %vm451_vm2, %v5540_v10  ;;  %2881 = vperm.xlu1 %5441, %v4677_v27  }
 0x2ed   :  { %5241 = vmatprep.mubr.msk.bf16.mxu1 %vm5629_vm1, %v8073_v55 }
 0x2ef   :  { %2886 = vperm.xlu0 %5440, %v4678_v45  }
 0x2f0   :  { %2799 = vperm.xlu1 %5441, %v4666_v25  }
 0x2f3   :  { %2804 = vperm.xlu0 %5440, %v4667_v43  }
 0x2f4   :  { %5242 = vmatmul.mubr.msk.bf16.gmra.mrb[40].mxu1 %vm451_vm2, %v5541_v33  ;;  %2891 = vperm.xlu1 %5441, %v4679_v56   ;;  %v2347_v56 = vsel %vm1605_vm5, %v2309_v40, 0.0 }
 0x2f5   :  { %5245 = vmatprep.mubr.msk.bf16.mxu1 %vm5629_vm1, %v8073_v55 }
 0x2f7   :  { %2896 = vperm.xlu0 %5440, %v4680_v47  }
 0x2f8   :  { %2809 = vperm.xlu1 %5441, %v4668_v63  }
 0x2fb   :  { %2814 = vperm.xlu0 %5440, %v4669_v37  }
 0x2fc   :  { %5246 = vmatmul.mubr.msk.bf16.gmra.mrb[44].mxu1 %vm451_vm2, %v5542_v23  ;;  %2901 = vperm.xlu1 %5441, %v4681_v61  }
 0x2fd   :  { %5249 = vmatprep.mubr.msk.bf16.mxu1 %vm5629_vm1, %v8073_v55 }
 0x2ff   :  { %2906 = vperm.xlu0 %5440, %v4682_v36  }
 0x300   :  { %2819 = vperm.xlu1 %5441, %v4670_v7  }
 0x303   :  { %2824 = vperm.xlu0 %5440, %v4671_v3  }
 0x304   :  { %5250 = vmatmul.mubr.msk.bf16.gmra.mrb[48].mxu1 %vm451_vm2, %v5543_v8  ;;  %2911 = vperm.xlu1 %5441, %v4683_v19  }
 0x305   :  { %5253 = vmatprep.mubr.msk.bf16.mxu1 %vm5629_vm1, %v8073_v55 }
 0x307   :  { %2916 = vperm.xlu0 %5440, %v4684_v11  }
 0x308   :  { %2829 = vperm.xlu1 %5441, %v4672_v16  }
 0x30b   :  { %2834 = vperm.xlu0 %5440, %v4673_v5  }
 0x30c   :  { %2921 = vperm.xlu1 %5441, %v4685_v2   ;;  %5254 = vmatmul.mubr.msk.bf16.gmra.mrb[52].mxu1 %vm451_vm2, %v5544_v58 }
 0x30d   :  { %2614 = vmatprep.mubr.bf16.mxu1 %v5547_v29 }
 0x310   :  { %2926 = vperm.xlu1 %5441, %v4686_v39  }
 0x315   :  { %v2250_v46 = vpop.permute.xlu1 %2249 }
 0x316   :  { %v2285_v32 = vsel %vm1533_vm4, 0.0, %v2250_v46  ;;  %v2248_v30 = vpop.permute.xlu0 %2247 }
 0x317   :  { %v2298_v18 = vmul.f32 %v6363_v12, %v2285_v32  ;;  %v2284_v49 = vsel %vm1533_vm4, 0.0, %v2248_v30 }
 0x318   :  { %v2297_v15 = vmul.f32 %v6363_v12, %v2284_v49 }
 0x31a   :  { %v2440_v21 = vpack.c.bf16 %v2298_v18, %v2297_v15  ;;  %v2313_v4 = vpop.permute.xlu0 %2312 }
 0x31b   :  { %v2349_v7 = vsel %vm1605_vm5, %v2313_v4, 0.0 }
 0x31c   :  { %4940 = vmatpush3.bf16.msra.mxu1 %v2440_v21  ;;  %v2362_v8 = vmul.f32 %v6380_v14, %v2349_v7 }
 0x31d   :  { %v2254_v53 = vpop.permute.xlu1 %2253  ;;  %4941 = vmatprep.subr.bf16.mxu1 %v2449_v57  ;;  %v2360_v57 = vmul.f32 %v6380_v14, %v2347_v56 }
 0x31e   :  { %v2287_v10 = vsel %vm1533_vm4, 0.0, %v2254_v53  ;;  %v2252_v27 = vpop.permute.xlu0 %2251 }
 0x31f   :  { %v2300_v45 = vmul.f32 %v6363_v12, %v2287_v10  ;;  %v2286_v25 = vsel %vm1533_vm4, 0.0, %v2252_v27  ;;  %v2451_v36 = vpack.c.bf16 %v2360_v57, %v6593_v50  ;;  %v2361_v50 = vmul.f32 %v6380_v14, %v2348_v17 }
 0x320   :  { %v2299_v43 = vmul.f32 %v6363_v12, %v2286_v25 }
 0x321   :  { %v2452_v58 = vpack.c.bf16 %v2362_v8, %v2361_v50 }
 0x322   :  { %v2441_v33 = vpack.c.bf16 %v2300_v45, %v2299_v43 }
 0x324   :  { %4942 = vmatpush3.bf16.msra.mxu1 %v2441_v33 }
 0x325   :  { %v2258_v47 = vpop.permute.xlu1 %2257  ;;  %4943 = vmatprep.subr.bf16.mxu1 %v2450_v60 }
 0x326   :  { %v2289_v6 = vsel %vm1533_vm4, 0.0, %v2258_v47  ;;  %v2256_v13 = vpop.permute.xlu0 %2255 }
 0x327   :  { %v2302_v63 = vmul.f32 %v6363_v12, %v2289_v6  ;;  %v2288_v37 = vsel %vm1533_vm4, 0.0, %v2256_v13 }
 0x328   :  { %v2301_v23 = vmul.f32 %v6363_v12, %v2288_v37 }
 0x32a   :  { %v2442_v61 = vpack.c.bf16 %v2302_v63, %v2301_v23 }
 0x32c   :  { %4944 = vmatpush3.bf16.msra.mxu1 %v2442_v61 }
 0x32d   :  { %v2262_v3 = vpop.permute.xlu0 %2261  ;;  %4945 = vmatprep.subr.bf16.mxu1 %v2451_v36 }
 0x32e   :  { %v2291_v1 = vsel %vm1533_vm4, 0.0, %v2262_v3  ;;  %v2260_v60 = vpop.permute.xlu1 %2259  ;;  %v5548_v3 = vld [vmem:[%s8067_s6 + $0xb8] ss:$12 sps:$4 sm:$0xff]  }
 0x32f   :  { %v2304_v19 = vmul.f32 %v6363_v12, %v2291_v1  ;;  %v2290_v11 = vsel %vm1533_vm4, 0.0, %v2260_v60 }
 0x330   :  { %v2303_v16 = vmul.f32 %v6363_v12, %v2290_v11 }
 0x332   :  { %v2443_v5 = vpack.c.bf16 %v2304_v19, %v2303_v16 }
 0x334   :  { %4946 = vmatpush3.bf16.msra.mxu1 %v2443_v5 }
 0x335   :  { %v2266_v2 = vpop.permute.xlu0 %2265  ;;  %4947 = vmatprep.subr.bf16.mxu1 %v2452_v58  ;;  %v5550_v58 = vld [vmem:[%s8067_s6 + $0xb4] ss:$12 sps:$4 sm:$0xff]  }
 0x336   :  { %v2293_v29 = vsel %vm1533_vm4, 0.0, %v2266_v2  ;;  %v2264_v39 = vpop.permute.xlu1 %2263  ;;  %v5551_v2 = vld [vmem:[%s8067_s6 + $0xd0] ss:$12 sps:$4 sm:$0xff]  }
 0x337   :  { %v2306_v9 = vmul.f32 %v6363_v12, %v2293_v29  ;;  %v2292_v40 = vsel %vm1533_vm4, 0.0, %v2264_v39 }
 0x338   :  { %v2305_v46 = vmul.f32 %v6363_v12, %v2292_v40  ;;  %v5556_v40 = vld [vmem:[%s8067_s6 + $0xe4] ss:$12 sps:$4 sm:$0xff]  }
 0x339   :  { %v2315_v32 = vpop.permute.xlu0 %2314 }
 0x33a   :  { %v2444_v30 = vpack.c.bf16 %v2306_v9, %v2305_v46  ;;  %v2350_v18 = vsel %vm1605_vm5, %v2315_v32, 0.0  ;;  %v2317_v49 = vpop.permute.xlu1 %2316  ;;  %v5554_v9 = vld [vmem:[%s8067_s6 + $0xe8] ss:$12 sps:$4 sm:$0xff]   ;;  %v5557_v46 = vld [vmem:[%s8067_s6 + $0x100] ss:$12 sps:$4 sm:$0xff]  }
 0x33b   :  { %v2363_v15 = vmul.f32 %v6380_v14, %v2350_v18  ;;  %v2351_v21 = vsel %vm1605_vm5, %v2317_v49, 0.0  ;;  %v5559_v32 = vld [vmem:[%s8067_s6 + $0xfc] ss:$12 sps:$4 sm:$0xff]   ;;  %v4631_v18 = vld [vmem:[%s8067_s6 + $0x12c] sm:$0x33] }
 0x33c   :  { %v2364_v4 = vmul.f32 %v6380_v14, %v2351_v21  ;;  %4948 = vmatpush3.bf16.msra.mxu1 %v2444_v30  ;;  %v5560_v30 = vld [vmem:[%s8067_s6 + $0x118] ss:$12 sps:$4 sm:$0xff]   ;;  %v5562_v21 = vld [vmem:[%s8067_s6 + $0x114] ss:$12 sps:$4 sm:$0xff]  }
 0x33d   :  { %v2319_v53 = vpop.permute.xlu0 %2318 }
 0x33e   :  { %v2268_v10 = vpop.permute.xlu1 %2267  ;;  %v2453_v27 = vpack.c.bf16 %v2364_v4, %v2363_v15  ;;  %v2352_v43 = vsel %vm1605_vm5, %v2319_v53, 0.0 }
 0x33f   :  { %v2294_v45 = vsel %vm1533_vm4, 0.0, %v2268_v10  ;;  %v2365_v57 = vmul.f32 %v6380_v14, %v2352_v43  ;;  %v4652_v10 = vcombine.high %v4631_v18, %v4631_v18 }
 0x340   :  { %v2307_v25 = vmul.f32 %v6363_v12, %v2294_v45  ;;  %4949 = vmatprep.subr.bf16.mxu1 %v2453_v27 }
 0x341   :  { %v2323_v33 = vpop.permute.xlu0 %2322 }
 0x342   :  { %v2411_v56 = vsel %vm1468_vm3, %v2307_v25, %v2373_v41  ;;  %v2321_v47 = vpop.permute.xlu1 %2320  ;;  %v2354_v37 = vsel %vm1605_vm5, %v2323_v33, 0.0  ;;  %v4651_v33 = vcombine.low %v4631_v18, %v4631_v18  ;;  %v5570_v18 = vld [vmem:[%s8067_s6 + $0x11c] ss:$12 sps:$4 sm:$0xff]  }
 0x343   :  { %v2353_v6 = vsel %vm1605_vm5, %v2321_v47, 0.0  ;;  %v2445_v13 = vpack.c.bf16 %v6265_v52, %v2411_v56  ;;  %v2367_v34 = vmul.f32 %v6380_v14, %v2354_v37  ;;  %v5545_v52 = vld [vmem:[%s8067_s6 + $0x9c] ss:$12 sps:$4 sm:$0xff]   ;;  %v5565_v37 = vld [vmem:[%s8067_s6 + $0xa4] ss:$12 sps:$4 sm:$0xff]  }
 0x344   :  { %v2366_v63 = vmul.f32 %v6380_v14, %v2353_v6 }
 0x345   :  { %v2327_v12 = vpop.permute.xlu0 %2326  ;;  %4950 = vmatpush3.bf16.msra.mxu1 %v2445_v13 }
 0x346   :  { %v2325_v23 = vpop.permute.xlu1 %2324  ;;  %v2454_v61 = vpack.c.bf16 %v2366_v63, %v2365_v57  ;;  %v2356_v7 = vsel %vm1605_vm5, %v2327_v12, 0.0 }
 0x347   :  { %v2355_v36 = vsel %vm1605_vm5, %v2325_v23, 0.0  ;;  %v2369_v19 = vmul.f32 %v6380_v14, %v2356_v7 }
 0x348   :  { %v2368_v41 = vmul.f32 %v6380_v14, %v2355_v36  ;;  %4951 = vmatprep.subr.bf16.mxu1 %v2454_v61 }
 0x349   :  { %4952 = vmatpush3.bf16.msra.mxu1 %v2446_v62  ;;  %v2331_v1 = vpop.permute.xlu0 %2330 }
 0x34a   :  { %v2455_v17 = vpack.c.bf16 %v2368_v41, %v2367_v34  ;;  %v2329_v60 = vpop.permute.xlu1 %2328  ;;  %5257 = vmatprep.subr.bf16.mxu1 %v8073_v55  ;;  %v2358_v16 = vsel %vm1605_vm5, %v2331_v1, 0.0 }
 0x34b   :  { %v2357_v8 = vsel %vm1605_vm5, %v2329_v60, 0.0  ;;  %v2371_v50 = vmul.f32 %v6380_v14, %v2358_v16 }
 0x34c   :  { %v2370_v11 = vmul.f32 %v6380_v14, %v2357_v8  ;;  %2615 = vmatmul.mubr.bf16.vlgmr.msra.gmra.mrb[56].mxu1 %v5545_v52  ;;  %v5566_v52 = vld [vmem:[%s8067_s6 + $0xbc] ss:$12 sps:$4 sm:$0xff]  }
 0x34d   :  { %5258 = vmatpush3.bf16.msra.mxu1 %v2455_v17  ;;  %2622 = vmatprep.mubr.bf16.mxu1 %v5548_v3 }
 0x34e   :  { %v2456_v54 = vpack.c.bf16 %v2370_v11, %v2369_v19  ;;  %v2333_v59 = vpop.permute.xlu1 %2332  ;;  %5259 = vmatprep.subr.bf16.mxu1 %v8073_v55  ;;  %v5567_v19 = vld [vmem:[%s8067_s6 + $0xd4] ss:$12 sps:$4 sm:$0xff]  }
 0x34f   :  { %v2359_v62 = vsel %vm1605_vm5, %v2333_v59, 0.0 }
 0x350   :  { %v2372_v5 = vmul.f32 %v6380_v14, %v2359_v62  ;;  %v5553_v14 = vld [vmem:[%s8067_s6 + $0xcc] ss:$12 sps:$4 sm:$0xff]  }
 0x351   :  { %5260 = vmatpush3.bf16.msra.mxu1 %v2456_v54 }
 0x352   :  { %v2457_v29 = vpack.c.bf16 %v2372_v5, %v2371_v50  ;;  %5261 = vmatprep.subr.bf16.mxu1 %v8073_v55  ;;  %v5568_v5 = vld [vmem:[%s8067_s6 + $0xec] ss:$12 sps:$4 sm:$0xff]  }
 0x354   :  { %2623 = vmatmul.mubr.bf16.gmra.mrb[60].mxu1 %v5550_v58  ;;  %v2580_v39 = vsel %vm509_vm0, %v2457_v29, 0 }
 0x355   :  { %5262 = vmatpush3.bf16.msra.mxu1 %v2580_v39  ;;  %2630 = vmatprep.mubr.bf16.mxu1 %v5551_v2 }
 0x35c   :  { %2631 = vmatmul.mubr.bf16.gmra.mrb[64].mxu1 %v5553_v14 }
 0x35d   :  { %2638 = vmatprep.mubr.bf16.mxu1 %v5554_v9 }
 0x364   :  { %2639 = vmatmul.mubr.bf16.gmra.mrb[68].mxu1 %v5556_v40  ;;  %v5569_v40 = vld [vmem:[%s8067_s6 + $0x104] ss:$12 sps:$4 sm:$0xff]  }
 0x365   :  { %2646 = vmatprep.mubr.bf16.mxu1 %v5557_v46 }
 0x36c   :  { %2647 = vmatmul.mubr.bf16.gmra.mrb[72].mxu1 %v5559_v32 }
 0x36d   :  { %2654 = vmatprep.mubr.bf16.mxu1 %v5560_v30 }
 0x36e   :  { %v4885_v49 = vpop.f32.mrb[0].mxu1 }
 0x36f   :  { %v4886_v15 = vpop.f32.mrb[1].mxu1 }
 0x370   :  { %v6854_v4 = vadd.f32 %v4886_v15, %v4885_v49  ;;  %v4888_v53 = vpop.f32.mrb[2].mxu1 }
 0x371   :  { %v4889_v27 = vpop.f32.mrb[3].mxu1 }
 0x372   :  { %v6856_v45 = vadd.f32 %v4889_v27, %v4888_v53  ;;  %v5571_v53 = vld [vmem:[%s8067_s6 + $0x134] ss:$0 sps:$4 sm:$0x33]  }
 0x374   :  { %2655 = vmatmul.mubr.bf16.gmra.mrb[76].mxu1 %v5562_v21 }
 0x375   :  { %2662 = vmatprep.mubr.bf16.mxu1 %v4652_v10 }
 0x376   :  { %v4891_v25 = vpop.f32.mrb[4].mxu1 }
 0x377   :  { %v4892_v43 = vpop.f32.mrb[5].mxu1 }
 0x378   :  { %v4893_v56 = vadd.f32 %v4892_v43, %v4891_v25  ;;  %v4894_v47 = vpop.f32.mrb[6].mxu1 }
 0x379   :  { %v4895_v6 = vpop.f32.mrb[7].mxu1 }
 0x37a   :  { %v4896_v13 = vadd.f32 %v4895_v6, %v4894_v47 }
 0x37c   :  { %2663 = vmatmul.mubr.bf16.gmra.mrb[80].mxu1 %v4651_v33 }
 0x37d   :  { %5263 = vmatprep.mubr.msk.bf16.mxu1 %vm5629_vm1, %v8073_v55 }
 0x37e   :  { %v4897_v57 = vpop.f32.mrb[8].mxu1 }
 0x37f   :  { %v4898_v63 = vpop.f32.mrb[9].mxu1 }
 0x380   :  { %v4899_v12 = vadd.f32 %v4898_v63, %v4897_v57  ;;  %v4900_v23 = vpop.f32.mrb[10].mxu1 }
 0x381   :  { %v4901_v61 = vpop.f32.mrb[11].mxu1 }
 0x382   :  { %v4902_v36 = vadd.f32 %v4901_v61, %v4900_v23 }
 0x384   :  { %5264 = vmatmul.mubr.msk.bf16.vlgmr.msra.gmra.mrb[84].mxu1 %vm451_vm2, %v5565_v37 }
 0x385   :  { %5267 = vmatprep.mubr.msk.bf16.mxu1 %vm5629_vm1, %v8073_v55 }
 0x386   :  { %v4903_v34 = vpop.f32.mrb[12].mxu1 }
 0x387   :  { %v4904_v41 = vpop.f32.mrb[13].mxu1 }
 0x388   :  { %v4905_v7 = vadd.f32 %v4904_v41, %v4903_v34  ;;  %v4906_v3 = vpop.f32.mrb[14].mxu1 }
 0x389   :  { %v4907_v17 = vpop.f32.mrb[15].mxu1 }
 0x38a   :  { %v4908_v1 = vadd.f32 %v4907_v17, %v4906_v3 }
 0x38c   :  { %5268 = vmatmul.mubr.msk.bf16.gmra.mrb[88].mxu1 %vm451_vm2, %v5566_v52 }
 0x38d   :  { %5271 = vmatprep.mubr.msk.bf16.mxu1 %vm5629_vm1, %v8073_v55 }
 0x38e   :  { %v4909_v60 = vpop.f32.mrb[16].mxu1 }
 0x38f   :  { %v4910_v8 = vpop.f32.mrb[17].mxu1 }
 0x390   :  { %v4911_v11 = vadd.f32 %v4910_v8, %v4909_v60  ;;  %v4912_v16 = vpop.f32.mrb[18].mxu1 }
 0x391   :  { %v4913_v54 = vpop.f32.mrb[19].mxu1 }
 0x392   :  { %v4914_v59 = vadd.f32 %v4913_v54, %v4912_v16 }
 0x394   :  { %5272 = vmatmul.mubr.msk.bf16.gmra.mrb[92].mxu1 %vm451_vm2, %v5567_v19 }
 0x395   :  { %5275 = vmatprep.mubr.msk.bf16.mxu1 %vm5629_vm1, %v8073_v55 }
 0x396   :  { %v4915_v62 = vpop.f32.mrb[20].mxu1 }
 0x397   :  { %v4916_v50 = vpop.f32.mrb[21].mxu1 }
 0x398   :  { %v4917_v58 = vadd.f32 %v4916_v50, %v4915_v62  ;;  %v4918_v2 = vpop.f32.mrb[22].mxu1 }
 0x399   :  { %v4919_v29 = vpop.f32.mrb[23].mxu1 }
 0x39a   :  { %v4920_v39 = vadd.f32 %v4919_v29, %v4918_v2 }
 0x39c   :  { %5276 = vmatmul.mubr.msk.bf16.gmra.mrb[96].mxu1 %vm451_vm2, %v5568_v5 }
 0x39d   :  { %5279 = vmatprep.mubr.msk.bf16.mxu1 %vm5629_vm1, %v8073_v55 }
 0x39e   :  { %v4921_v14 = vpop.f32.mrb[24].mxu1 }
 0x39f   :  { %v4922_v9 = vpop.f32.mrb[25].mxu1 }
 0x3a0   :  { %v4923_v46 = vadd.f32 %v4922_v9, %v4921_v14  ;;  %v4924_v32 = vpop.f32.mrb[26].mxu1 }
 0x3a1   :  { %v4925_v30 = vpop.f32.mrb[27].mxu1 }
 0x3a4   :  { %5280 = vmatmul.mubr.msk.bf16.gmra.mrb[100].mxu1 %vm451_vm2, %v5569_v40 }
 0x3a5   :  { %5283 = vmatprep.mubr.msk.bf16.mxu1 %vm5629_vm1, %v8073_v55 }
 0x3ac   :  { %5284 = vmatmul.mubr.msk.bf16.gmra.mrb[104].mxu1 %vm451_vm2, %v5570_v18 }
 0x3ad   :  { %5287 = vmatprep.mubr.msk.bf16.mxu1 %vm5629_vm1, %v8073_v55 }
 0x3af   :  { %v1981_v49 = vpop.f32.mrb[28].mxu1 }
 0x3b0   :  { %v6897_v15 = vadd.f32 %v6854_v4, %v1981_v49  ;;  %v5231_v21 = vpop.f32.mrb[29].mxu1 }
 0x3b1   :  { %v1984_v10 = vpop.f32.mrb[30].mxu1 }
 0x3b2   :  { %v6903_v27 = vadd.f32 %v6856_v45, %v1984_v10  ;;  %v5232_v25 = vpop.f32.mrb[31].mxu1 }
 0x3b4   :  { %5288 = vmatmul.mubr.msk.bf16.gmra.mrb[108].mxu1 %vm451_vm2, %v5571_v53 }
 0x3b7   :  { %v1989_v43 = vpop.f32.mrb[32].mxu1 }
 0x3b8   :  { %v6906_v33 = vadd.f32 %v4893_v56, %v1989_v43  ;;  %v5235_v47 = vpop.f32.mrb[33].mxu1 }
 0x3b9   :  { %v1992_v6 = vpop.f32.mrb[34].mxu1 }
 0x3ba   :  { %v6908_v57 = vadd.f32 %v4896_v13, %v1992_v6  ;;  %v5236_v4 = vpop.f32.mrb[35].mxu1 }
 0x3bf   :  { %v1997_v63 = vpop.f32.mrb[36].mxu1 }
 0x3c0   :  { %v6910_v37 = vadd.f32 %v4899_v12, %v1997_v63  ;;  %v5239_v23 = vpop.f32.mrb[37].mxu1 }
 0x3c1   :  { %v2000_v61 = vpop.f32.mrb[38].mxu1 }
 0x3c2   :  { %8077 = vst [vmem:[#allocation3_spill] sm:$0xff] %v6910_v37  ;;  %v6912_v34 = vadd.f32 %v4902_v36, %v2000_v61  ;;  %v5240_v45 = vpop.f32.mrb[39].mxu1 }
 0x3c4   :  { %8078 = vst [vmem:[#allocation4_spill] sm:$0xff] %v6912_v34 }
 0x3c7   :  { %v2005_v41 = vpop.f32.mrb[40].mxu1 }
 0x3c8   :  { %v6914_v52 = vadd.f32 %v4905_v7, %v2005_v41  ;;  %v5243_v3 = vpop.f32.mrb[41].mxu1 }
 0x3c9   :  { %v2008_v17 = vpop.f32.mrb[42].mxu1 }
 0x3ca   :  { %8079 = vst [vmem:[#allocation5_spill] sm:$0xff] %v6914_v52  ;;  %v6916_v56 = vadd.f32 %v4908_v1, %v2008_v17  ;;  %v5244_v60 = vpop.f32.mrb[43].mxu1 }
 0x3cc   :  { %8080 = vst [vmem:[#allocation6_spill] sm:$0xff] %v6916_v56 }
 0x3cf   :  { %v2013_v8 = vpop.f32.mrb[44].mxu1 }
 0x3d0   :  { %v6918_v13 = vadd.f32 %v4911_v11, %v2013_v8  ;;  %v5247_v19 = vpop.f32.mrb[45].mxu1 }
 0x3d1   :  { %v2016_v16 = vpop.f32.mrb[46].mxu1  ;;  %v2775_v19 = vpop.permute.xlu0 %2774 }
 0x3d2   :  { %8081 = vst [vmem:[#allocation7_spill] sm:$0xff] %v6918_v13  ;;  %v6920_v12 = vadd.f32 %v4914_v59, %v2016_v16  ;;  %v5248_v54 = vpop.f32.mrb[47].mxu1 }
 0x3d4   :  { %8082 = vst [vmem:[#allocation8_spill] sm:$0xff] %v6920_v12 }
 0x3d7   :  { %v2021_v62 = vpop.f32.mrb[48].mxu1 }
 0x3d8   :  { %v6922_v36 = vadd.f32 %v4917_v58, %v2021_v62  ;;  %v5251_v50 = vpop.f32.mrb[49].mxu1 }
 0x3d9   :  { %v2024_v5 = vpop.f32.mrb[50].mxu1  ;;  %v2780_v50 = vpop.permute.xlu1 %2779 }
 0x3da   :  { %8083 = vst [vmem:[#allocation9_spill] sm:$0xff] %v6922_v36  ;;  %v6924_v7 = vadd.f32 %v4920_v39, %v2024_v5  ;;  %v5252_v2 = vpop.f32.mrb[51].mxu1 }
 0x3db   :  { %v2867_v2 = vpop.permute.xlu0 %2866 }
 0x3dc   :  { %8084 = vst [vmem:[#allocation10_spill] sm:$0xff] %v6924_v7 }
 0x3df   :  { %v2029_v29 = vpop.f32.mrb[52].mxu1 }
 0x3e0   :  { %v6926_v1 = vadd.f32 %v4923_v46, %v2029_v29  ;;  %v5255_v14 = vpop.f32.mrb[53].mxu1 }
 0x3e1   :  { %v2032_v9 = vpop.f32.mrb[54].mxu1 }
 0x3e2   :  { %8085 = vst [vmem:[#allocation11_spill] sm:$0xff] %v6926_v1  ;;  %v5256_v11 = vpop.f32.mrb[55].mxu1  ;;  %v2872_v9 = vpop.permute.xlu1 %2871 }
 0x41f   :  { %v4953_v40 = vpop.f32.mrb[56].mxu1 }
 0x420   :  { %v4954_v32 = vpop.f32.mrb[57].mxu1 }
 0x421   :  { %v4955_v30 = vadd.f32 %v4954_v32, %v4953_v40  ;;  %v4956_v59 = vpop.f32.mrb[58].mxu1 }
 0x422   :  { %v4957_v18 = vpop.f32.mrb[59].mxu1 }
 0x423   :  { %v4958_v49 = vadd.f32 %v4957_v18, %v4956_v59  ;;  %v2785_v18 = vpop.permute.xlu0 %2784 }
 0x427   :  { %v4959_v21 = vpop.f32.mrb[60].mxu1 }
 0x428   :  { %v4960_v58 = vpop.f32.mrb[61].mxu1 }
 0x429   :  { %v4961_v53 = vadd.f32 %v4960_v58, %v4959_v21  ;;  %v4962_v10 = vpop.f32.mrb[62].mxu1  ;;  %v2790_v21 = vpop.permute.xlu1 %2789 }
 0x42a   :  { %v4963_v25 = vpop.f32.mrb[63].mxu1 }
 0x42b   :  { %v4964_v39 = vadd.f32 %v4963_v25, %v4962_v10 }
 0x42f   :  { %v4965_v43 = vpop.f32.mrb[64].mxu1 }
 0x430   :  { %v4966_v47 = vpop.f32.mrb[65].mxu1 }
 0x431   :  { %v6928_v6 = vadd.f32 %v4966_v47, %v4965_v43  ;;  %v4968_v46 = vpop.f32.mrb[66].mxu1 }
 0x432   :  { %v4969_v4 = vpop.f32.mrb[67].mxu1 }
 0x433   :  { %v6930_v63 = vadd.f32 %v4969_v4, %v4968_v46  ;;  %v2877_v46 = vpop.permute.xlu0 %2876  ;;  %v2882_v4 = vpop.permute.xlu1 %2881 }
 0x437   :  { %v4971_v23 = vpop.f32.mrb[68].mxu1 }
 0x438   :  { %v4972_v61 = vpop.f32.mrb[69].mxu1 }
 0x439   :  { %v6932_v45 = vadd.f32 %v4972_v61, %v4971_v23  ;;  %v4974_v41 = vpop.f32.mrb[70].mxu1 }
 0x43a   :  { %v4975_v3 = vpop.f32.mrb[71].mxu1 }
 0x43b   :  { %v6934_v17 = vadd.f32 %v4975_v3, %v4974_v41  ;;  %v2795_v3 = vpop.permute.xlu0 %2794 }
 0x43f   :  { %v4977_v60 = vpop.f32.mrb[72].mxu1 }
 0x440   :  { %v4978_v8 = vpop.f32.mrb[73].mxu1 }
 0x441   :  { %v6936_v16 = vadd.f32 %v4978_v8, %v4977_v60  ;;  %v4980_v54 = vpop.f32.mrb[74].mxu1 }
 0x442   :  { %v4981_v62 = vpop.f32.mrb[75].mxu1 }
 0x443   :  { %v6938_v5 = vadd.f32 %v4981_v62, %v4980_v54 }
 0x447   :  { %v4983_v29 = vpop.f32.mrb[76].mxu1 }
 0x448   :  { %v4984_v14 = vpop.f32.mrb[77].mxu1 }
 0x449   :  { %v6940_v11 = vadd.f32 %v4984_v14, %v4983_v29  ;;  %v4986_v40 = vpop.f32.mrb[78].mxu1  ;;  %v2800_v29 = vpop.permute.xlu1 %2799 }
 0x44a   :  { %v4987_v32 = vpop.f32.mrb[79].mxu1 }
 0x44b   :  { %v6942_v59 = vadd.f32 %v4987_v32, %v4986_v40 }
 0x44f   :  { %v4989_v58 = vpop.f32.mrb[80].mxu1 }
 0x450   :  { %v4990_v10 = vpop.f32.mrb[81].mxu1 }
 0x451   :  { %v6944_v25 = vadd.f32 %v4990_v10, %v4989_v58  ;;  %v4992_v43 = vpop.f32.mrb[82].mxu1  ;;  %v2887_v58 = vpop.permute.xlu0 %2886 }
 0x452   :  { %v4993_v47 = vpop.f32.mrb[83].mxu1 }
 0x457   :  { %v2704_v23 = vpop.f32.mrb[84].mxu1 }
 0x458   :  { %v2705_v61 = vadd.f32 %v4955_v30, %v2704_v23  ;;  %v5265_v41 = vpop.f32.mrb[85].mxu1  ;;  %v2892_v30 = vpop.permute.xlu1 %2891 }
 0x459   :  { %v2707_v60 = vpop.f32.mrb[86].mxu1 }
 0x45a   :  { %v2837_v8 = vmul.f32 %v2775_v19, %v2705_v61  ;;  %v2708_v54 = vadd.f32 %v4958_v49, %v2707_v60  ;;  %v5266_v62 = vpop.f32.mrb[87].mxu1 }
 0x45c   :  { %v2929_v14 = vadd.f32 %v2867_v2, %v2837_v8  ;;  %v2838_v40 = vmul.f32 %v2780_v50, %v2708_v54 }
 0x45e   :  { %v6946_v32 = vmax.f32 %v2929_v14, 0.0  ;;  %v2930_v55 = vadd.f32 %v2872_v9, %v2838_v40 }
 0x45f   :  { %v2712_v10 = vpop.f32.mrb[88].mxu1 }
 0x460   :  { %v2943_v43 = vmax.f32 %v2930_v55, 0.0  ;;  %v2713_v47 = vadd.f32 %v4961_v53, %v2712_v10  ;;  %v5269_v1 = vpop.f32.mrb[89].mxu1  ;;  %2968 = vrot.lane.b32.xlu0 %v6946_v32, %s5631_s20  ;;  %v3098_v19 = vrot.slane %v6946_v32, 4 }
 0x461   :  { %v2715_v23 = vpop.f32.mrb[90].mxu1  ;;  %v2805_v1 = vpop.permute.xlu0 %2804 }
 0x462   :  { %v3099_v49 = vrot.slane %v2943_v43, 4  ;;  %v2839_v61 = vmul.f32 %v2785_v18, %v2713_v47  ;;  %v2716_v41 = vadd.f32 %v4964_v39, %v2715_v23  ;;  %v5270_v2 = vpop.f32.mrb[91].mxu1  ;;  %2970 = vrot.lane.b32.xlu1 %v2943_v43, %s5631_s20  ;;  %v2810_v18 = vpop.permute.xlu1 %2809 }
 0x464   :  { %v2931_v50 = vadd.f32 %v2877_v46, %v2839_v61  ;;  %v2840_v9 = vmul.f32 %v2790_v21, %v2716_v41  ;;  %3033 = vrot.lane.b32.xlu0 %v6946_v32, %s5630_s3  ;;  %v6957_v55 = vsel %vm1468_vm3, %v3098_v19, %v3099_v49 }
 0x465   :  { %v2897_v47 = vpop.permute.xlu0 %2896 }
 0x466   :  { %v2944_v53 = vmax.f32 %v2931_v50, 0.0  ;;  %v2932_v60 = vadd.f32 %v2882_v4, %v2840_v9  ;;  %3035 = vrot.lane.b32.xlu1 %v2943_v43, %s5630_s3 }
 0x467   :  { %v2720_v39 = vpop.f32.mrb[92].mxu1 }
 0x468   :  { %v3101_v8 = vrot.slane %v2944_v53, 4  ;;  %v6960_v54 = vmax.f32 %v2932_v60, 0.0  ;;  %v2721_v21 = vadd.f32 %v6928_v6, %v2720_v39  ;;  %v5273_v46 = vpop.f32.mrb[93].mxu1  ;;  %2972 = vrot.lane.b32.xlu0 %v2944_v53, %s5631_s20 }
 0x469   :  { %v2723_v62 = vpop.f32.mrb[94].mxu1 }
 0x46a   :  { %v2841_v14 = vmul.f32 %v2795_v3, %v2721_v21  ;;  %v2724_v40 = vadd.f32 %v6930_v63, %v2723_v62  ;;  %v5274_v10 = vpop.f32.mrb[95].mxu1  ;;  %2974 = vrot.lane.b32.xlu1 %v6960_v54, %s5631_s20  ;;  %v3103_v4 = vrot.slane %v6960_v54, 4  ;;  %v6969_v43 = vsel %vm1468_vm3, %v3099_v49, %v3101_v8  ;;  %v2902_v3 = vpop.permute.xlu1 %2901 }
 0x46c   :  { %v2933_v23 = vadd.f32 %v2887_v58, %v2841_v14  ;;  %v2842_v61 = vmul.f32 %v2800_v29, %v2724_v40  ;;  %3037 = vrot.lane.b32.xlu0 %v2944_v53, %s5630_s3  ;;  %v6973_v6 = vsel %vm1468_vm3, %v3101_v8, %v3103_v4  ;;  %v2815_v58 = vpop.permute.xlu0 %2814 }
 0x46d   :  { %v3171_v63 = vpack.c.bf16 %v6973_v6, %v6969_v43 }
 0x46e   :  { %v6977_v41 = vmax.f32 %v2933_v23, 0.0  ;;  %v2934_v2 = vadd.f32 %v2892_v30, %v2842_v61 }
 0x46f   :  { %v2728_v50 = vpop.f32.mrb[96].mxu1 }
 0x470   :  { %v6979_v9 = vmax.f32 %v2934_v2, 0.0  ;;  %v2729_v49 = vadd.f32 %v6932_v45, %v2728_v50  ;;  %v5277_v60 = vpop.f32.mrb[97].mxu1  ;;  %2976 = vrot.lane.b32.xlu0 %v6977_v41, %s5631_s20  ;;  %v3105_v29 = vrot.slane %v6977_v41, 4  ;;  %v2820_v45 = vpop.permute.xlu1 %2819 }
 0x471   :  { %v2731_v53 = vpop.f32.mrb[98].mxu1 }
 0x472   :  { %v2843_v39 = vmul.f32 %v2805_v1, %v2729_v49  ;;  %v2732_v8 = vadd.f32 %v6934_v17, %v2731_v53  ;;  %v5278_v21 = vpop.f32.mrb[99].mxu1  ;;  %2978 = vrot.lane.b32.xlu1 %v6979_v9, %s5631_s20  ;;  %v3106_v30 = vsel %vm1468_vm3, %v3103_v4, %v3105_v29  ;;  %v3107_v46 = vrot.slane %v6979_v9, 4  ;;  %v2907_v1 = vpop.permute.xlu0 %2906 }
 0x474   :  { %v2935_v62 = vadd.f32 %v2897_v47, %v2843_v39  ;;  %v2844_v14 = vmul.f32 %v2810_v18, %v2732_v8  ;;  %v3108_v40 = vsel %vm1468_vm3, %v3105_v29, %v3107_v46  ;;  %v2912_v18 = vpop.permute.xlu1 %2911 }
 0x475   :  { %v3172_v10 = vpack.c.bf16 %v3108_v40, %v3106_v30 }
 0x476   :  { %v6991_v23 = vmax.f32 %v2935_v62, 0.0  ;;  %v2936_v61 = vadd.f32 %v2902_v3, %v2844_v14  ;;  %v2825_v30 = vpop.permute.xlu0 %2824 }
 0x477   :  { %v2736_v2 = vpop.f32.mrb[100].mxu1  ;;  %5005 = vmatprep.subr.bf16.mxu1 %v3172_v10 }
 0x478   :  { %v6993_v17 = vmax.f32 %v2936_v61, 0.0  ;;  %v2737_v50 = vadd.f32 %v6936_v16, %v2736_v2  ;;  %v5281_v49 = vpop.f32.mrb[101].mxu1  ;;  %2980 = vrot.lane.b32.xlu0 %v6991_v23, %s5631_s20  ;;  %v3109_v4 = vrot.slane %v6991_v23, 4  ;;  %v2830_v14 = vpop.permute.xlu1 %2829 }
 0x479   :  { %v2739_v47 = vpop.f32.mrb[102].mxu1 }
 0x47a   :  { %v2845_v60 = vmul.f32 %v2815_v58, %v2737_v50  ;;  %v2740_v29 = vadd.f32 %v6938_v5, %v2739_v47  ;;  %v5282_v53 = vpop.f32.mrb[103].mxu1  ;;  %2982 = vrot.lane.b32.xlu1 %v6993_v17, %s5631_s20  ;;  %v7003_v3 = vsel %vm1468_vm3, %v3107_v46, %v3109_v4  ;;  %v3111_v16 = vrot.slane %v6993_v17, 4  ;;  %v2917_v47 = vpop.permute.xlu0 %2916 }
 0x47c   :  { %v2937_v39 = vadd.f32 %v2907_v1, %v2845_v60  ;;  %v2846_v8 = vmul.f32 %v2820_v45, %v2740_v29  ;;  %v7007_v21 = vsel %vm1468_vm3, %v3109_v4, %v3111_v16  ;;  %v2922_v53 = vpop.permute.xlu1 %2921 }
 0x47d   :  { %v3173_v58 = vpack.c.bf16 %v7007_v21, %v7003_v3 }
 0x47e   :  { %v2950_v62 = vmax.f32 %v2937_v39, 0.0  ;;  %v2938_v5 = vadd.f32 %v2912_v18, %v2846_v8 }
 0x47f   :  { %v2744_v40 = vpop.f32.mrb[104].mxu1 }
 0x480   :  { %v2951_v10 = vmax.f32 %v2938_v5, 0.0  ;;  %v2745_v61 = vadd.f32 %v6940_v11, %v2744_v40  ;;  %v5285_v46 = vpop.f32.mrb[105].mxu1  ;;  %2984 = vrot.lane.b32.xlu1 %v2950_v62, %s5631_s20  ;;  %v3113_v2 = vrot.slane %v2950_v62, 4 }
 0x481   :  { %v2747_v1 = vpop.f32.mrb[106].mxu1  ;;  %v2835_v46 = vpop.permute.xlu0 %2834 }
 0x482   :  { %v2847_v45 = vmul.f32 %v2825_v30, %v2745_v61  ;;  %v2748_v50 = vadd.f32 %v6942_v59, %v2747_v1  ;;  %v5286_v49 = vpop.f32.mrb[107].mxu1  ;;  %2986 = vrot.lane.b32.xlu0 %v2951_v10, %s5631_s20  ;;  %v7016_v4 = vsel %vm1468_vm3, %v3111_v16, %v3113_v2  ;;  %v3115_v18 = vrot.slane %v2951_v10, 4 }
 0x483   :  { %v2927_v49 = vpop.permute.xlu1 %2926 }
 0x484   :  { %v2939_v60 = vadd.f32 %v2917_v47, %v2847_v45  ;;  %v2848_v29 = vmul.f32 %v2830_v14, %v2748_v50  ;;  %v7019_v11 = vsel %vm1468_vm3, %v3113_v2, %v3115_v18 }
 0x485   :  { %v3174_v39 = vpack.c.bf16 %v7019_v11, %v7016_v4  ;;  %v7183_v11 = vld [vmem:[%s8069_s2] ss:$0 sm:$0xff] }
 0x486   :  { %v2952_v8 = vmax.f32 %v2939_v60, 0.0  ;;  %v2940_v30 = vadd.f32 %v2922_v53, %v2848_v29  ;;  %v5574_v29 = vld [vmem:[%s8067_s6 + $0x13c] ss:$12 sps:$4 sm:$0xff]  }
 0x487   :  { %v2752_v59 = vpop.f32.mrb[108].mxu1  ;;  %3339 = vmatprep.mubr.bf16.mxu1 %v5574_v29  ;;  %v4760_v29 = vld [vmem:[%s8071_s8 + $0x100] sm:$0xff] }
 0x488   :  { %v2953_v5 = vmax.f32 %v2940_v30, 0.0  ;;  %v2753_v40 = vadd.f32 %v6944_v25, %v2752_v59  ;;  %v5289_v61 = vpop.f32.mrb[109].mxu1  ;;  %2988 = vrot.lane.b32.xlu1 %v2952_v8, %s5631_s20  ;;  %v3117_v16 = vrot.slane %v2952_v8, 4  ;;  %v4742_v30 = vld [vmem:[%s8070_s7 + $0xd8] sm:$0xff]  ;;  %v4754_v59 = vld [vmem:[%s8071_s8 + $0xd0] sm:$0xff] }
 0x489   :  { %v2755_v1 = vpop.f32.mrb[110].mxu1  ;;  %v4744_v61 = vld [vmem:[%s8070_s7 + $0xe8] sm:$0xff] }
 0x48a   :  { %v2849_v14 = vmul.f32 %v2835_v46, %v2753_v40  ;;  %v5290_v45 = vpop.f32.mrb[111].mxu1  ;;  %2990 = vrot.lane.b32.xlu0 %v2953_v5, %s5631_s20  ;;  %v7027_v2 = vsel %vm1468_vm3, %v3115_v18, %v3117_v16  ;;  %v3119_v50 = vrot.slane %v2953_v5, 4  ;;  %v4743_v40 = vld [vmem:[%s8070_s7 + $0xe0] sm:$0xff]  ;;  %v4757_v46 = vld [vmem:[%s8071_s8 + $0xe8] sm:$0xff]  ;;  %v4745_v1 = vld [vmem:[%s8070_s7 + $0xf0] sm:$0xff] }
 0x48b   :  { %v4758_v45 = vld [vmem:[%s8071_s8 + $0xf0] sm:$0xff] }
 0x48c   :  { %v2941_v47 = vadd.f32 %v2927_v49, %v2849_v14  ;;  %3041 = vrot.lane.b32.xlu1 %v6977_v41, %s5630_s3  ;;  %v7032_v25 = vsel %vm1468_vm3, %v3117_v16, %v3119_v50  ;;  %v4756_v16 = vld [vmem:[%s8071_s8 + $0xe0] sm:$0xff]  ;;  %v4746_v14 = vld [vmem:[%s8070_s7 + $0xf8] sm:$0xff] }
 0x48d   :  { %v3175_v60 = vpack.c.bf16 %v7032_v25, %v7027_v2  ;;  %v4747_v49 = vld [vmem:[%s8070_s7 + $0x100] sm:$0xff] }
 0x48e   :  { %v2954_v53 = vmax.f32 %v2941_v47, 0.0  ;;  %3039 = vrot.lane.b32.xlu0 %v6960_v54, %s5630_s3  ;;  %v883_v54 = vld [vmem:[%s8065_s4] sm:$0xff]  ;;  %v4748_v47 = vld [vmem:[%s8070_s7 + $0x108] sm:$0xff] }
 0x490   :  { %2992 = vrot.lane.b32.xlu1 %v2954_v53, %s5631_s20  ;;  %v3121_v18 = vrot.slane %v2954_v53, 4 }
 0x492   :  { %3043 = vrot.lane.b32.xlu0 %v6979_v9, %s5630_s3  ;;  %v7045_v41 = vsel %vm1468_vm3, %v3119_v50, %v3121_v18  ;;  %v884_v9 = vld [vmem:[%s8065_s4 + $0x8] sm:$0xff]  ;;  %v4759_v50 = vld [vmem:[%s8071_s8 + $0xf8] sm:$0xff]  ;;  %v4749_v18 = vld [vmem:[%s8070_s7 + $0x110] sm:$0xff] }
 0x494   :  { %3045 = vrot.lane.b32.xlu1 %v6991_v23, %s5630_s3  ;;  %v885_v23 = vld [vmem:[%s8065_s4 + $0x10] sm:$0xff] }
 0x496   :  { %3047 = vrot.lane.b32.xlu0 %v6993_v17, %s5630_s3  ;;  %v886_v17 = vld [vmem:[%s8065_s4 + $0x18] sm:$0xff] }
 0x498   :  { %3049 = vrot.lane.b32.xlu1 %v2950_v62, %s5630_s3  ;;  %v887_v62 = vld [vmem:[%s8065_s4 + $0x20] sm:$0xff] }
 0x49a   :  { %3051 = vrot.lane.b32.xlu0 %v2951_v10, %s5630_s3  ;;  %v888_v10 = vld [vmem:[%s8065_s4 + $0x28] sm:$0xff] }
 0x49c   :  { %3053 = vrot.lane.b32.xlu1 %v2952_v8, %s5630_s3  ;;  %v4741_v8 = vld [vmem:[%s8070_s7 + $0xd0] sm:$0xff] }
 0x49e   :  { %3055 = vrot.lane.b32.xlu0 %v2953_v5, %s5630_s3  ;;  %v4755_v5 = vld [vmem:[%s8071_s8 + $0xd8] sm:$0xff] }
 0x4a0   :  { %3057 = vrot.lane.b32.xlu1 %v2954_v53, %s5630_s3  ;;  %v4761_v53 = vld [vmem:[%s8071_s8 + $0x108] sm:$0xff] }
 0x4a2   :  { %923 = vperm.xlu0 %5440, %v883_v54   ;;  %v4750_v54 = vld [vmem:[%s8070_s7 + $0x118] sm:$0xff] }
 0x4a4   :  { %928 = vperm.xlu1 %5441, %v884_v9   ;;  %v4762_v9 = vld [vmem:[%s8071_s8 + $0x110] sm:$0xff] }
 0x4a6   :  { %933 = vperm.xlu0 %5440, %v885_v23   ;;  %v4763_v23 = vld [vmem:[%s8071_s8 + $0x118] sm:$0xff] }
 0x4a8   :  { %938 = vperm.xlu1 %5441, %v886_v17  }
 0x4aa   :  { %943 = vperm.xlu0 %5440, %v887_v62  }
 0x4ac   :  { %948 = vperm.xlu1 %5441, %v888_v10   ;;  %v4751_v10 = vld [vmem:[%s8070_s7 + $0x120] sm:$0xff] }
 0x4ae   :  { %3499 = vperm.xlu0 %5440, %v4741_v8  }
 0x4b0   :  { %3504 = vperm.xlu1 %5441, %v4742_v30  }
 0x4b2   :  { %3591 = vperm.xlu0 %5440, %v4754_v59   ;;  %v4752_v59 = vld [vmem:[%s8070_s7 + $0x128] sm:$0xff] }
 0x4b4   :  { %3596 = vperm.xlu1 %5441, %v4755_v5   ;;  %v7145_v5 = vld [vmem:[%s8068_s1] ss:$0 sm:$0xff] }
 0x4b6   :  { %3509 = vperm.xlu0 %5440, %v4743_v40  }
 0x4b8   :  { %3514 = vperm.xlu1 %5441, %v4744_v61  }
 0x4ba   :  { %3601 = vperm.xlu0 %5440, %v4756_v16  }
 0x4bc   :  { %3606 = vperm.xlu1 %5441, %v4757_v46   ;;  %v4764_v46 = vld [vmem:[%s8071_s8 + $0x120] sm:$0xff] }
 0x4be   :  { %3519 = vperm.xlu0 %5440, %v4745_v1  }
 0x4c0   :  { %3524 = vperm.xlu1 %5441, %v4746_v14  }
 0x4c2   :  { %3611 = vperm.xlu0 %5440, %v4758_v45   ;;  %v4765_v45 = vld [vmem:[%s8071_s8 + $0x128] sm:$0xff] }
 0x4c4   :  { %3616 = vperm.xlu1 %5441, %v4759_v50  }
 0x4c6   :  { %3529 = vperm.xlu0 %5440, %v4747_v49  }
 0x4c8   :  { %3534 = vperm.xlu1 %5441, %v4748_v47   ;;  %v4753_v47 = vld [vmem:[%s8070_s7 + $0x130] sm:$0xf] }
 0x4ca   :  { %3621 = vperm.xlu0 %5440, %v4760_v29  }
 0x4cc   :  { %3626 = vperm.xlu1 %5441, %v4761_v53  }
 0x4ce   :  { %3539 = vperm.xlu0 %5440, %v4749_v18   ;;  %v4766_v18 = vld [vmem:[%s8071_s8 + $0x130] sm:$0xf] }
 0x4d0   :  { %3544 = vperm.xlu1 %5441, %v4750_v54  }
 0x4d2   :  { %3631 = vperm.xlu0 %5440, %v4762_v9   ;;  %v2969_v17 = vpop.permute.xlu0 %2968 }
 0x4d3   :  { %v3007_v62 = vsel %vm1533_vm4, 0.0, %v2969_v17 }
 0x4d4   :  { %3636 = vperm.xlu1 %5441, %v4763_v23   ;;  %v2971_v8 = vpop.permute.xlu1 %2970  ;;  %v3020_v40 = vmul.f32 %v7145_v5, %v3007_v62 }
 0x4d5   :  { %v3008_v30 = vsel %vm1533_vm4, 0.0, %v2971_v8 }
 0x4d6   :  { %v3021_v61 = vmul.f32 %v7145_v5, %v3008_v30  ;;  %3549 = vperm.xlu0 %5440, %v4751_v10   ;;  %v3034_v16 = vpop.permute.xlu0 %3033 }
 0x4d8   :  { %v3164_v1 = vpack.c.bf16 %v3021_v61, %v3020_v40  ;;  %3554 = vperm.xlu1 %5441, %v4752_v59   ;;  %v3036_v14 = vpop.permute.xlu1 %3035  ;;  %v3072_v59 = vsel %vm1605_vm5, %v3034_v16, 0.0 }
 0x4da   :  { %3641 = vperm.xlu0 %5440, %v4764_v46   ;;  %5006 = vmatpush3.bf16.msra.mxu1 %v3164_v1  ;;  %v2973_v50 = vpop.permute.xlu0 %2972 }
 0x4db   :  { %v3009_v49 = vsel %vm1533_vm4, 0.0, %v2973_v50  ;;  %5007 = vmatprep.subr.bf16.mxu1 %v3173_v58 }
 0x4dc   :  { %3646 = vperm.xlu1 %5441, %v4765_v45   ;;  %v2975_v29 = vpop.permute.xlu1 %2974  ;;  %v3022_v54 = vmul.f32 %v7145_v5, %v3009_v49  ;;  %v3073_v49 = vsel %vm1605_vm5, %v3036_v14, 0.0 }
 0x4dd   :  { %v3010_v53 = vsel %vm1533_vm4, 0.0, %v2975_v29 }
 0x4de   :  { %v3023_v9 = vmul.f32 %v7145_v5, %v3010_v53  ;;  %3559 = vperm.xlu0 %5440, %v4753_v47   ;;  %v3038_v23 = vpop.permute.xlu0 %3037 }
 0x4df   :  { %v3074_v2 = vsel %vm1605_vm5, %v3038_v23, 0.0 }
 0x4e0   :  { %v3165_v3 = vpack.c.bf16 %v3023_v9, %v3022_v54  ;;  %3651 = vperm.xlu1 %5441, %v4766_v18   ;;  %v3087_v29 = vmul.f32 %v7183_v11, %v3074_v2 }
 0x4e2   :  { %5008 = vmatpush3.bf16.msra.mxu1 %v3165_v3  ;;  %v2977_v21 = vpop.permute.xlu0 %2976 }
 0x4e3   :  { %v3011_v58 = vsel %vm1533_vm4, 0.0, %v2977_v21  ;;  %5009 = vmatprep.subr.bf16.mxu1 %v3174_v39  ;;  %v3085_v39 = vmul.f32 %v7183_v11, %v3072_v59 }
 0x4e4   :  { %v2979_v17 = vpop.permute.xlu1 %2978  ;;  %v3024_v10 = vmul.f32 %v7145_v5, %v3011_v58 }
 0x4e5   :  { %v3012_v62 = vsel %vm1533_vm4, 0.0, %v2979_v17  ;;  %v3176_v50 = vpack.c.bf16 %v3085_v39, %v7045_v41  ;;  %v3086_v41 = vmul.f32 %v7183_v11, %v3073_v49 }
 0x4e6   :  { %v3025_v8 = vmul.f32 %v7145_v5, %v3012_v62 }
 0x4e7   :  { %v3177_v23 = vpack.c.bf16 %v3087_v29, %v3086_v41 }
 0x4e8   :  { %v3166_v30 = vpack.c.bf16 %v3025_v8, %v3024_v10 }
 0x4ea   :  { %5010 = vmatpush3.bf16.msra.mxu1 %v3166_v30  ;;  %v2981_v40 = vpop.permute.xlu0 %2980 }
 0x4eb   :  { %v3013_v61 = vsel %vm1533_vm4, 0.0, %v2981_v40  ;;  %5011 = vmatprep.subr.bf16.mxu1 %v3175_v60 }
 0x4ec   :  { %v2983_v4 = vpop.permute.xlu1 %2982  ;;  %v3026_v16 = vmul.f32 %v7145_v5, %v3013_v61 }
 0x4ed   :  { %v3014_v46 = vsel %vm1533_vm4, 0.0, %v2983_v4 }
 0x4ee   :  { %v3027_v1 = vmul.f32 %v7145_v5, %v3014_v46 }
 0x4f0   :  { %v3167_v45 = vpack.c.bf16 %v3027_v1, %v3026_v16 }
 0x4f2   :  { %v2985_v25 = vpop.permute.xlu1 %2984  ;;  %5012 = vmatpush3.bf16.msra.mxu1 %v3167_v45 }
 0x4f3   :  { %v3015_v60 = vsel %vm1533_vm4, 0.0, %v2985_v25  ;;  %5013 = vmatprep.subr.bf16.mxu1 %v3176_v50 }
 0x4f4   :  { %v2987_v47 = vpop.permute.xlu0 %2986  ;;  %v3028_v18 = vmul.f32 %v7145_v5, %v3015_v60 }
 0x4f5   :  { %v3016_v53 = vsel %vm1533_vm4, 0.0, %v2987_v47 }
 0x4f6   :  { %v3029_v54 = vmul.f32 %v7145_v5, %v3016_v53 }
 0x4f8   :  { %v3168_v9 = vpack.c.bf16 %v3029_v54, %v3028_v18 }
 0x4fa   :  { %v2989_v3 = vpop.permute.xlu1 %2988  ;;  %5014 = vmatpush3.bf16.msra.mxu1 %v3168_v9 }
 0x4fb   :  { %v3017_v21 = vsel %vm1533_vm4, 0.0, %v2989_v3  ;;  %5015 = vmatprep.subr.bf16.mxu1 %v3177_v23 }
 0x4fc   :  { %v2991_v58 = vpop.permute.xlu0 %2990  ;;  %v3030_v17 = vmul.f32 %v7145_v5, %v3017_v21  ;;  %v5575_v21 = vld [vmem:[%s8067_s6 + $0x154] ss:$12 sps:$4 sm:$0xff]  }
 0x4fd   :  { %v3018_v14 = vsel %vm1533_vm4, 0.0, %v2991_v58 }
 0x4fe   :  { %v3031_v62 = vmul.f32 %v7145_v5, %v3018_v14  ;;  %v3042_v10 = vpop.permute.xlu1 %3041 }
 0x4ff   :  { %v3076_v8 = vsel %vm1605_vm5, %v3042_v10, 0.0 }
 0x500   :  { %v3169_v30 = vpack.c.bf16 %v3031_v62, %v3030_v17  ;;  %v3040_v59 = vpop.permute.xlu0 %3039  ;;  %v3089_v61 = vmul.f32 %v7183_v11, %v3076_v8  ;;  %v8086_v17 = vmov 0.0  }
 0x501   :  { %v3075_v40 = vsel %vm1605_vm5, %v3040_v59, 0.0 }
 0x502   :  { %v3088_v4 = vmul.f32 %v7183_v11, %v3075_v40  ;;  %v2993_v39 = vpop.permute.xlu1 %2992  ;;  %5016 = vmatpush3.bf16.msra.mxu1 %v3169_v30 }
 0x503   :  { %v3019_v46 = vsel %vm1533_vm4, 0.0, %v2993_v39  ;;  %v5578_v39 = vld [vmem:[%s8067_s6 + $0x16c] ss:$12 sps:$4 sm:$0xff]  }
 0x504   :  { %v3032_v16 = vmul.f32 %v7145_v5, %v3019_v46  ;;  %v3044_v1 = vpop.permute.xlu0 %3043  ;;  %v3178_v45 = vpack.c.bf16 %v3089_v61, %v3088_v4  ;;  %v5577_v4 = vld [vmem:[%s8067_s6 + $0x150] ss:$12 sps:$4 sm:$0xff]  }
 0x505   :  { %v3077_v50 = vsel %vm1605_vm5, %v3044_v1, 0.0  ;;  %v5580_v1 = vld [vmem:[%s8067_s6 + $0x168] ss:$12 sps:$4 sm:$0xff]  }
 0x506   :  { %v3136_v2 = vsel %vm1468_vm3, %v3032_v16, %v3098_v19  ;;  %v3046_v25 = vpop.permute.xlu1 %3045  ;;  %5017 = vmatprep.subr.bf16.mxu1 %v3178_v45  ;;  %v3090_v47 = vmul.f32 %v7183_v11, %v3077_v50  ;;  %v5581_v45 = vld [vmem:[%s8067_s6 + $0x184] ss:$12 sps:$4 sm:$0xff]   ;;  %v5583_v50 = vld [vmem:[%s8067_s6 + $0x180] ss:$12 sps:$4 sm:$0xff]  }
 0x507   :  { %v3078_v60 = vsel %vm1605_vm5, %v3046_v25, 0.0  ;;  %v3170_v49 = vpack.c.bf16 %v6957_v55, %v3136_v2  ;;  %v5572_v55 = vld [vmem:[%s8067_s6 + $0x138] ss:$12 sps:$4 sm:$0xff]   ;;  %v5584_v2 = vld [vmem:[%s8067_s6 + $0x19c] ss:$12 sps:$4 sm:$0xff]  }
 0x508   :  { %v3091_v29 = vmul.f32 %v7183_v11, %v3078_v60  ;;  %v3048_v53 = vpop.permute.xlu0 %3047  ;;  %v5586_v25 = vld [vmem:[%s8067_s6 + $0x198] ss:$12 sps:$4 sm:$0xff]   ;;  %v5587_v60 = vld [vmem:[%s8067_s6 + $0x1b4] ss:$12 sps:$4 sm:$0xff]  }
 0x509   :  { %v3079_v18 = vsel %vm1605_vm5, %v3048_v53, 0.0  ;;  %5018 = vmatpush3.bf16.msra.mxu1 %v3170_v49  ;;  %v4711_v49 = vld [vmem:[%s8067_s6 + $0x1c8] sm:$0x33] }
 0x50a   :  { %v3050_v54 = vpop.permute.xlu1 %3049  ;;  %v3179_v41 = vpack.c.bf16 %v3091_v29, %v3090_v47  ;;  %v3092_v19 = vmul.f32 %v7183_v11, %v3079_v18  ;;  %v5589_v47 = vld [vmem:[%s8067_s6 + $0x1b0] ss:$12 sps:$4 sm:$0xff]   ;;  %v4732_v29 = vcombine.high %v4711_v49, %v4711_v49  ;;  %v4731_v53 = vcombine.low %v4711_v49, %v4711_v49  ;;  %v5592_v18 = vld [vmem:[%s8067_s6 + $0x140] ss:$12 sps:$4 sm:$0xff]  }
 0x50b   :  { %v3080_v32 = vsel %vm1605_vm5, %v3050_v54, 0.0  ;;  %v5593_v54 = vld [vmem:[%s8067_s6 + $0x158] ss:$12 sps:$4 sm:$0xff]  }
 0x50c   :  { %v3093_v9 = vmul.f32 %v7183_v11, %v3080_v32  ;;  %v3052_v23 = vpop.permute.xlu0 %3051  ;;  %5019 = vmatprep.subr.bf16.mxu1 %v3179_v41  ;;  %v5594_v41 = vld [vmem:[%s8067_s6 + $0x170] ss:$12 sps:$4 sm:$0xff]   ;;  %v5595_v32 = vld [vmem:[%s8067_s6 + $0x188] ss:$12 sps:$4 sm:$0xff]  }
 0x50d   :  { %v3081_v3 = vsel %vm1605_vm5, %v3052_v23, 0.0  ;;  %5020 = vmatpush3.bf16.msra.mxu1 %v3171_v63  ;;  %v5598_v23 = vld [vmem:[%s8067_s6 + $0x1d0] ss:$0 sps:$4 sm:$0x33]  }
 0x50e   :  { %v3180_v58 = vpack.c.bf16 %v3093_v9, %v3092_v19  ;;  %v3054_v14 = vpop.permute.xlu1 %3053  ;;  %5291 = vmatprep.subr.bf16.mxu1 %v8086_v17  ;;  %v3094_v10 = vmul.f32 %v7183_v11, %v3081_v3  ;;  %v5596_v19 = vld [vmem:[%s8067_s6 + $0x1a0] ss:$12 sps:$4 sm:$0xff]   ;;  %v5597_v9 = vld [vmem:[%s8067_s6 + $0x1b8] ss:$12 sps:$4 sm:$0xff]  }
 0x50f   :  { %v3082_v62 = vsel %vm1605_vm5, %v3054_v14, 0.0 }
 0x510   :  { %v3095_v8 = vmul.f32 %v7183_v11, %v3082_v62  ;;  %v3056_v30 = vpop.permute.xlu0 %3055  ;;  %3340 = vmatmul.mubr.bf16.vlgmr.msra.gmra.mrb[112].mxu1 %v5572_v55 }
 0x511   :  { %v3083_v59 = vsel %vm1605_vm5, %v3056_v30, 0.0  ;;  %5292 = vmatpush3.bf16.msra.mxu1 %v3180_v58  ;;  %3347 = vmatprep.mubr.bf16.mxu1 %v5575_v21 }
 0x512   :  { %v3181_v43 = vpack.c.bf16 %v3095_v8, %v3094_v10  ;;  %v3058_v6 = vpop.permute.xlu1 %3057  ;;  %5293 = vmatprep.subr.bf16.mxu1 %v8086_v17  ;;  %v3096_v40 = vmul.f32 %v7183_v11, %v3083_v59 }
 0x513   :  { %v3084_v63 = vsel %vm1605_vm5, %v3058_v6, 0.0 }
 0x514   :  { %v3097_v61 = vmul.f32 %v7183_v11, %v3084_v63 }
 0x515   :  { %5294 = vmatpush3.bf16.msra.mxu1 %v3181_v43 }
 0x516   :  { %v3182_v46 = vpack.c.bf16 %v3097_v61, %v3096_v40  ;;  %5295 = vmatprep.subr.bf16.mxu1 %v8086_v17 }
 0x518   :  { %3348 = vmatmul.mubr.bf16.gmra.mrb[116].mxu1 %v5577_v4  ;;  %v3305_v16 = vsel %vm509_vm0, %v3182_v46, 0 }
 0x519   :  { %5296 = vmatpush3.bf16.msra.mxu1 %v3305_v16  ;;  %3355 = vmatprep.mubr.bf16.mxu1 %v5578_v39 }
 0x51a   :  { %5325 = vmatprep.subr.bf16.mxu1 %v8086_v17 }
 0x520   :  { %3356 = vmatmul.mubr.bf16.gmra.mrb[120].mxu1 %v5580_v1 }
 0x521   :  { %3363 = vmatprep.mubr.bf16.mxu1 %v5581_v45  ;;  %v7320_v63 = vpop.permute.xlu0 %923 }
 0x523   :  { %v7322_v4 = vpop.permute.xlu1 %928 }
 0x525   :  { %v7328_v45 = vpop.permute.xlu0 %933 }
 0x528   :  { %3364 = vmatmul.mubr.bf16.gmra.mrb[124].mxu1 %v5583_v50  ;;  %v7330_v50 = vpop.permute.xlu1 %938 }
 0x529   :  { %3371 = vmatprep.mubr.bf16.mxu1 %v5584_v2 }
 0x530   :  { %3372 = vmatmul.mubr.bf16.gmra.mrb[128].mxu1 %v5586_v25 }
 0x531   :  { %3379 = vmatprep.mubr.bf16.mxu1 %v5587_v60 }
 0x538   :  { %3380 = vmatmul.mubr.bf16.gmra.mrb[132].mxu1 %v5589_v47 }
 0x539   :  { %3387 = vmatprep.mubr.bf16.mxu1 %v4732_v29  ;;  %v7334_v29 = vpop.permute.xlu0 %943 }
 0x540   :  { %3388 = vmatmul.mubr.bf16.gmra.mrb[136].mxu1 %v4731_v53 }
 0x541   :  { %5297 = vmatprep.mubr.msk.bf16.mxu1 %vm5629_vm1, %v8086_v17 }
 0x548   :  { %5298 = vmatmul.mubr.msk.bf16.vlgmr.msra.gmra.mrb[140].mxu1 %vm451_vm2, %v5592_v18  ;;  %v7338_v18 = vpop.permute.xlu1 %948 }
 0x549   :  { %5301 = vmatprep.mubr.msk.bf16.mxu1 %vm5629_vm1, %v8086_v17 }
 0x550   :  { %5302 = vmatmul.mubr.msk.bf16.gmra.mrb[144].mxu1 %vm451_vm2, %v5593_v54 }
 0x551   :  { %5305 = vmatprep.mubr.msk.bf16.mxu1 %vm5629_vm1, %v8086_v17 }
 0x558   :  { %5306 = vmatmul.mubr.msk.bf16.gmra.mrb[148].mxu1 %vm451_vm2, %v5594_v41 }
 0x559   :  { %5309 = vmatprep.mubr.msk.bf16.mxu1 %vm5629_vm1, %v8086_v17 }
 0x560   :  { %5310 = vmatmul.mubr.msk.bf16.gmra.mrb[152].mxu1 %vm451_vm2, %v5595_v32  ;;  %v3500_v32 = vpop.permute.xlu0 %3499 }
 0x561   :  { %5313 = vmatprep.mubr.msk.bf16.mxu1 %vm5629_vm1, %v8086_v17 }
 0x568   :  { %5314 = vmatmul.mubr.msk.bf16.gmra.mrb[156].mxu1 %vm451_vm2, %v5596_v19 }
 0x569   :  { %5317 = vmatprep.mubr.msk.bf16.mxu1 %vm5629_vm1, %v8086_v17 }
 0x570   :  { %5318 = vmatmul.mubr.msk.bf16.gmra.mrb[160].mxu1 %vm451_vm2, %v5597_v9 }
 0x571   :  { %5321 = vmatprep.mubr.msk.bf16.mxu1 %vm5629_vm1, %v8086_v17 }
 0x578   :  { %5322 = vmatmul.mubr.msk.bf16.gmra.mrb[164].mxu1 %vm451_vm2, %v5598_v23 }
 0x579   :  { %5331 = vmatprep.mubr.msk.bf16.mxu1 %vm5629_vm1, %v8086_v17 }
 0x5e3   :  { %v5021_v55 = vpop.f32.mrb[112].mxu1 }
 0x5e4   :  { %v5022_v3 = vpop.f32.mrb[113].mxu1 }
 0x5e5   :  { %v5023_v21 = vadd.f32 %v5022_v3, %v5021_v55  ;;  %v5024_v58 = vpop.f32.mrb[114].mxu1  ;;  %v3505_v55 = vpop.permute.xlu1 %3504 }
 0x5e6   :  { %v5025_v14 = vpop.f32.mrb[115].mxu1 }
 0x5e7   :  { %v5026_v62 = vadd.f32 %v5025_v14, %v5024_v58  ;;  %v3592_v58 = vpop.permute.xlu0 %3591 }
 0x5eb   :  { %v5027_v10 = vpop.f32.mrb[116].mxu1 }
 0x5ec   :  { %v5028_v8 = vpop.f32.mrb[117].mxu1 }
 0x5ed   :  { %v7316_v30 = vadd.f32 %v5028_v8, %v5027_v10  ;;  %v5030_v59 = vpop.f32.mrb[118].mxu1  ;;  %v3597_v8 = vpop.permute.xlu1 %3596 }
 0x5ee   :  { %v5031_v43 = vpop.f32.mrb[119].mxu1 }
 0x5ef   :  { %v7318_v6 = vadd.f32 %v5031_v43, %v5030_v59 }
 0x5f3   :  { %v5033_v40 = vpop.f32.mrb[120].mxu1 }
 0x5f4   :  { %v5034_v61 = vpop.f32.mrb[121].mxu1 }
 0x5f5   :  { %v7324_v39 = vadd.f32 %v5034_v61, %v5033_v40  ;;  %v5036_v46 = vpop.f32.mrb[122].mxu1 }
 0x5f6   :  { %v5037_v16 = vpop.f32.mrb[123].mxu1 }
 0x5f7   :  { %v7326_v1 = vadd.f32 %v5037_v16, %v5036_v46  ;;  %v3510_v46 = vpop.permute.xlu0 %3509  ;;  %v3515_v16 = vpop.permute.xlu1 %3514 }
 0x5fb   :  { %v5039_v2 = vpop.f32.mrb[124].mxu1 }
 0x5fc   :  { %v5040_v25 = vpop.f32.mrb[125].mxu1 }
 0x5fd   :  { %v7332_v60 = vadd.f32 %v5040_v25, %v5039_v2  ;;  %v5042_v49 = vpop.f32.mrb[126].mxu1 }
 0x5fe   :  { %v5043_v47 = vpop.f32.mrb[127].mxu1 }
 0x5ff   :  { %v7336_v53 = vadd.f32 %v5043_v47, %v5042_v49 }
 0x603   :  { %v5045_v54 = vpop.f32.mrb[128].mxu1 }
 0x604   :  { %v5046_v41 = vpop.f32.mrb[129].mxu1 }
 0x605   :  { %v7340_v19 = vadd.f32 %v5046_v41, %v5045_v54  ;;  %v5048_v9 = vpop.f32.mrb[130].mxu1  ;;  %v3602_v41 = vpop.permute.xlu0 %3601 }
 0x606   :  { %v5049_v23 = vpop.f32.mrb[131].mxu1 }
 0x607   :  { %v7342_v3 = vadd.f32 %v5049_v23, %v5048_v9  ;;  %v3607_v9 = vpop.permute.xlu1 %3606 }
 0x609   :  { %v3520_v12 = vpop.permute.xlu0 %3519 }
 0x60b   :  { %v5051_v14 = vpop.f32.mrb[132].mxu1 }
 0x60c   :  { %v5052_v10 = vpop.f32.mrb[133].mxu1 }
 0x60d   :  { %v7344_v59 = vadd.f32 %v5052_v10, %v5051_v14  ;;  %v5054_v43 = vpop.f32.mrb[134].mxu1 }
 0x60e   :  { %v5055_v40 = vpop.f32.mrb[135].mxu1 }
 0x60f   :  { %v7346_v61 = vadd.f32 %v5055_v40, %v5054_v43  ;;  %v3525_v43 = vpop.permute.xlu1 %3524 }
 0x613   :  { %v5057_v2 = vpop.f32.mrb[136].mxu1 }
 0x614   :  { %v5058_v25 = vpop.f32.mrb[137].mxu1 }
 0x615   :  { %v7348_v49 = vadd.f32 %v5058_v25, %v5057_v2  ;;  %v5060_v47 = vpop.f32.mrb[138].mxu1  ;;  %v3612_v2 = vpop.permute.xlu0 %3611 }
 0x616   :  { %v5061_v54 = vpop.f32.mrb[139].mxu1 }
 0x61b   :  { %v3429_v23 = vpop.f32.mrb[140].mxu1 }
 0x61c   :  { %v3430_v7 = vadd.f32 %v5023_v21, %v3429_v23  ;;  %v5299_v36 = vpop.f32.mrb[141].mxu1 }
 0x61d   :  { %v3432_v14 = vpop.f32.mrb[142].mxu1  ;;  %v3617_v36 = vpop.permute.xlu1 %3616 }
 0x61e   :  { %v3562_v10 = vmul.f32 %v3500_v32, %v3430_v7  ;;  %v3433_v13 = vadd.f32 %v5026_v62, %v3432_v14  ;;  %v5300_v56 = vpop.f32.mrb[143].mxu1 }
 0x620   :  { %v3654_v40 = vadd.f32 %v3592_v58, %v3562_v10  ;;  %v3563_v52 = vmul.f32 %v3505_v55, %v3433_v13 }
 0x622   :  { %v7350_v34 = vmax.f32 %v3654_v40, 0.0  ;;  %v3655_v0 = vadd.f32 %v3597_v8, %v3563_v52  ;;  %v3535_v8 = vpop.permute.xlu1 %3534 }
 0x623   :  { %v3437_v25 = vpop.f32.mrb[144].mxu1 }
 0x624   :  { %v3668_v47 = vmax.f32 %v3655_v0, 0.0  ;;  %v3438_v54 = vadd.f32 %v7316_v30, %v3437_v25  ;;  %v5303_v37 = vpop.f32.mrb[145].mxu1  ;;  %3693 = vrot.lane.b32.xlu0 %v7350_v34, %s5631_s20  ;;  %v3823_v7 = vrot.slane %v7350_v34, 4 }
 0x625   :  { %v3440_v21 = vpop.f32.mrb[146].mxu1  ;;  %v3530_v37 = vpop.permute.xlu0 %3529 }
 0x626   :  { %v3824_v56 = vrot.slane %v3668_v47, 4  ;;  %v3564_v62 = vmul.f32 %v3510_v46, %v3438_v54  ;;  %v3441_v13 = vadd.f32 %v7318_v6, %v3440_v21  ;;  %3695 = vrot.lane.b32.xlu1 %v3668_v47, %s5631_s20  ;;  %v5304_v52 = vpop.f32.mrb[147].mxu1 }
 0x628   :  { %v3656_v32 = vadd.f32 %v3602_v41, %v3564_v62  ;;  %v3565_v55 = vmul.f32 %v3515_v16, %v3441_v13  ;;  %3758 = vrot.lane.b32.xlu0 %v7350_v34, %s5630_s3  ;;  %v7363_v0 = vsel %vm1468_vm3, %v3823_v7, %v3824_v56  ;;  %v3627_v13 = vpop.permute.xlu1 %3626  ;;  %v4834_v34 = vld [vmem:[%s8071_s8 + $0x138] sm:$0xff] }
 0x62a   :  { %v3669_v30 = vmax.f32 %v3656_v32, 0.0  ;;  %v3657_v58 = vadd.f32 %v3607_v9, %v3565_v55  ;;  %3760 = vrot.lane.b32.xlu1 %v3668_v47, %s5630_s3  ;;  %v3622_v47 = vpop.permute.xlu0 %3621 }
 0x62b   :  { %v3445_v6 = vpop.f32.mrb[148].mxu1 }
 0x62c   :  { %v3826_v46 = vrot.slane %v3669_v30, 4  ;;  %v3670_v23 = vmax.f32 %v3657_v58, 0.0  ;;  %v3446_v41 = vadd.f32 %v7324_v39, %v3445_v6  ;;  %v5307_v16 = vpop.f32.mrb[149].mxu1  ;;  %3697 = vrot.lane.b32.xlu0 %v3669_v30, %s5631_s20 }
 0x62d   :  { %v3448_v14 = vpop.f32.mrb[150].mxu1 }
 0x62e   :  { %v3566_v10 = vmul.f32 %v3520_v12, %v3446_v41  ;;  %v3449_v40 = vadd.f32 %v7326_v1, %v3448_v14  ;;  %3699 = vrot.lane.b32.xlu1 %v3670_v23, %s5631_s20  ;;  %v5308_v25 = vpop.f32.mrb[151].mxu1  ;;  %v3828_v54 = vrot.slane %v3670_v23, 4  ;;  %v7371_v9 = vsel %vm1468_vm3, %v3824_v56, %v3826_v46  ;;  %v3545_v14 = vpop.permute.xlu1 %3544 }
 0x630   :  { %v3658_v21 = vadd.f32 %v3612_v2, %v3566_v10  ;;  %v3567_v62 = vmul.f32 %v3525_v43, %v3449_v40  ;;  %3762 = vrot.lane.b32.xlu0 %v3669_v30, %s5630_s3  ;;  %v7375_v39 = vsel %vm1468_vm3, %v3826_v46, %v3828_v54  ;;  %v3540_v2 = vpop.permute.xlu0 %3539 }
 0x631   :  { %v3896_v12 = vpack.c.bf16 %v7375_v39, %v7371_v9  ;;  %v5602_v39 = vld [vmem:[%s8067_s6 + $0x1dc] ss:$12 sps:$4 sm:$0xff]  }
 0x632   :  { %v3671_v1 = vmax.f32 %v3658_v21, 0.0  ;;  %v3659_v52 = vadd.f32 %v3617_v36, %v3567_v62 }
 0x633   :  { %v3453_v32 = vpop.f32.mrb[152].mxu1 }
 0x634   :  { %v7379_v55 = vmax.f32 %v3659_v52, 0.0  ;;  %v3454_v56 = vadd.f32 %v7332_v60, %v3453_v32  ;;  %v5311_v58 = vpop.f32.mrb[153].mxu1  ;;  %3766 = vrot.lane.b32.xlu1 %v3671_v1, %s5630_s3  ;;  %3764 = vrot.lane.b32.xlu0 %v3670_v23, %s5630_s3  ;;  %v3830_v43 = vrot.slane %v3671_v1, 4 }
 0x635   :  { %v3456_v30 = vpop.f32.mrb[154].mxu1 }
 0x636   :  { %v3568_v6 = vmul.f32 %v3530_v37, %v3454_v56  ;;  %v3457_v46 = vadd.f32 %v7336_v53, %v3456_v30  ;;  %v5312_v41 = vpop.f32.mrb[155].mxu1  ;;  %v3831_v16 = vsel %vm1468_vm3, %v3828_v54, %v3830_v43  ;;  %v3832_v36 = vrot.slane %v7379_v55, 4  ;;  %v3632_v53 = vpop.permute.xlu0 %3631 }
 0x638   :  { %v3660_v10 = vadd.f32 %v3622_v47, %v3568_v6  ;;  %v3569_v40 = vmul.f32 %v3535_v8, %v3457_v46  ;;  %3703 = vrot.lane.b32.xlu1 %v7379_v55, %s5631_s20  ;;  %3701 = vrot.lane.b32.xlu0 %v3671_v1, %s5631_s20  ;;  %v3833_v60 = vsel %vm1468_vm3, %v3830_v43, %v3832_v36  ;;  %v3637_v47 = vpop.permute.xlu1 %3636 }
 0x639   :  { %v3897_v23 = vpack.c.bf16 %v3833_v60, %v3831_v16 }
 0x63a   :  { %v7391_v25 = vmax.f32 %v3660_v10, 0.0  ;;  %v3661_v37 = vadd.f32 %v3627_v13, %v3569_v40  ;;  %v3550_v46 = vpop.permute.xlu0 %3549 }
 0x63b   :  { %v3461_v21 = vpop.f32.mrb[156].mxu1  ;;  %5073 = vmatprep.subr.bf16.mxu0 %v3897_v23 }
 0x63c   :  { %v3674_v54 = vmax.f32 %v3661_v37, 0.0  ;;  %v3462_v62 = vadd.f32 %v7340_v19, %v3461_v21  ;;  %v5315_v52 = vpop.f32.mrb[157].mxu1  ;;  %3705 = vrot.lane.b32.xlu0 %v7391_v25, %s5631_s20  ;;  %v3834_v8 = vrot.slane %v7391_v25, 4  ;;  %v3555_v16 = vpop.permute.xlu1 %3554 }
 0x63d   :  { %v3464_v1 = vpop.f32.mrb[158].mxu1 }
 0x63e   :  { %v3570_v32 = vmul.f32 %v3540_v2, %v3462_v62  ;;  %v3465_v56 = vadd.f32 %v7342_v3, %v3464_v1  ;;  %3707 = vrot.lane.b32.xlu1 %v3674_v54, %s5631_s20  ;;  %v5316_v13 = vpop.f32.mrb[159].mxu1  ;;  %v7400_v58 = vsel %vm1468_vm3, %v3832_v36, %v3834_v8  ;;  %v3836_v43 = vrot.slane %v3674_v54, 4  ;;  %v3642_v52 = vpop.permute.xlu0 %3641 }
 0x640   :  { %v3662_v30 = vadd.f32 %v3632_v53, %v3570_v32  ;;  %v3571_v19 = vmul.f32 %v3545_v14, %v3465_v56  ;;  %3772 = vrot.lane.b32.xlu0 %v3674_v54, %s5630_s3  ;;  %v7404_v6 = vsel %vm1468_vm3, %v3834_v8, %v3836_v43  ;;  %v3647_v1 = vpop.permute.xlu1 %3646 }
 0x641   :  { %v3898_v2 = vpack.c.bf16 %v7404_v6, %v7400_v58  ;;  %v2131_v58 = vld [vmem:[%s8071_s8 + $0x28] sm:$0xff] }
 0x642   :  { %v3675_v41 = vmax.f32 %v3662_v30, 0.0  ;;  %v3663_v3 = vadd.f32 %v3637_v47, %v3571_v19 }
 0x643   :  { %v3469_v10 = vpop.f32.mrb[160].mxu1 }
 0x644   :  { %v3676_v40 = vmax.f32 %v3663_v3, 0.0  ;;  %v3470_v36 = vadd.f32 %v7344_v59, %v3469_v10  ;;  %v5319_v60 = vpop.f32.mrb[161].mxu1  ;;  %3709 = vrot.lane.b32.xlu1 %v3675_v41, %s5631_s20  ;;  %v3838_v14 = vrot.slane %v3675_v41, 4  ;;  %v3560_v3 = vpop.permute.xlu0 %3559 }
 0x645   :  { %v3472_v23 = vpop.f32.mrb[162].mxu1 }
 0x646   :  { %v3572_v37 = vmul.f32 %v3550_v46, %v3470_v36  ;;  %v3473_v53 = vadd.f32 %v7346_v61, %v3472_v23  ;;  %3711 = vrot.lane.b32.xlu0 %v3676_v40, %s5631_s20  ;;  %v5320_v21 = vpop.f32.mrb[163].mxu1  ;;  %v7413_v54 = vsel %vm1468_vm3, %v3836_v43, %v3838_v14  ;;  %v3840_v62 = vrot.slane %v3676_v40, 4 }
 0x648   :  { %v3664_v8 = vadd.f32 %v3642_v52, %v3572_v37  ;;  %v3573_v47 = vmul.f32 %v3555_v16, %v3473_v53  ;;  %3774 = vrot.lane.b32.xlu1 %v3675_v41, %s5630_s3  ;;  %v7417_v59 = vsel %vm1468_vm3, %v3838_v14, %v3840_v62  ;;  %v3652_v14 = vpop.permute.xlu1 %3651  ;;  %v5601_v53 = vld [vmem:[%s8067_s6 + $0x1d8] ss:$12 sps:$4 sm:$0xff]   ;;  %v889_v52 = vld [vmem:[%s8065_s4 + $0x30] sm:$0xff] }
 0x649   :  { %v3899_v32 = vpack.c.bf16 %v7417_v59, %v7413_v54  ;;  %4064 = vmatprep.mubr.bf16.mxu0 %v5601_v53  ;;  %v2037_v53 = vld [vmem:[%s8070_s7 + $0x10] sm:$0xff]  ;;  %v2135_v54 = vld [vmem:[%s8071_s8 + $0x48] sm:$0xff] }
 0x64a   :  { %v3677_v61 = vmax.f32 %v3664_v8, 0.0  ;;  %v3665_v56 = vadd.f32 %v3647_v1, %v3573_v47  ;;  %v892_v8 = vld [vmem:[%s8065_s4 + $0x48] sm:$0xff]  ;;  %v893_v47 = vld [vmem:[%s8065_s4 + $0x50] sm:$0xff]  ;;  %v894_v1 = vld [vmem:[%s8065_s4 + $0x58] sm:$0xff] }
 0x64b   :  { %v3477_v13 = vpop.f32.mrb[164].mxu1 }
 0x64c   :  { %v3678_v30 = vmax.f32 %v3665_v56, 0.0  ;;  %v3478_v43 = vadd.f32 %v7348_v49, %v3477_v13  ;;  %3713 = vrot.lane.b32.xlu1 %v3677_v61, %s5631_s20  ;;  %v5323_v19 = vpop.f32.mrb[165].mxu1  ;;  %v3842_v46 = vrot.slane %v3677_v61, 4  ;;  %v1150_v56 = vld [vmem:[%s8066_s5 + $0x8] sm:$0xff]  ;;  %v1151_v13 = vld [vmem:[%s8066_s5 + $0x10] sm:$0xff] }
 0x64d   :  { %v3480_v16 = vpop.f32.mrb[166].mxu1  ;;  %v1154_v19 = vld [vmem:[%s8066_s5 + $0x28] sm:$0xff] }
 0x64e   :  { %v3574_v41 = vmul.f32 %v3560_v3, %v3478_v43  ;;  %3715 = vrot.lane.b32.xlu0 %v3678_v30, %s5631_s20  ;;  %v5324_v10 = vpop.f32.mrb[167].mxu1  ;;  %v3844_v36 = vrot.slane %v3678_v30, 4  ;;  %v7425_v60 = vsel %vm1468_vm3, %v3840_v62, %v3842_v46  ;;  %v1153_v43 = vld [vmem:[%s8066_s5 + $0x20] sm:$0xff]  ;;  %v1156_v3 = vld [vmem:[%s8066_s5 + $0x38] sm:$0xff] }
 0x64f   :  { %v1157_v16 = vld [vmem:[%s8066_s5 + $0x40] sm:$0xff]  ;;  %v1159_v10 = vld [vmem:[%s8066_s5 + $0x50] sm:$0xff] }
 0x650   :  { %v3666_v23 = vadd.f32 %v3652_v14, %v3574_v41  ;;  %3770 = vrot.lane.b32.xlu1 %v7391_v25, %s5630_s3  ;;  %v7430_v49 = vsel %vm1468_vm3, %v3842_v46, %v3844_v36  ;;  %v1155_v46 = vld [vmem:[%s8066_s5 + $0x30] sm:$0xff]  ;;  %v1158_v41 = vld [vmem:[%s8066_s5 + $0x48] sm:$0xff]  ;;  %v2035_v14 = vld [vmem:[%s8070_s7] sm:$0xff] }
 0x651   :  { %v3900_v37 = vpack.c.bf16 %v7430_v49, %v7425_v60  ;;  %v4822_v60 = vld [vmem:[%s8070_s7 + $0x140] sm:$0xff] }
 0x652   :  { %v3679_v21 = vmax.f32 %v3666_v23, 0.0  ;;  %3768 = vrot.lane.b32.xlu0 %v7379_v55, %s5630_s3  ;;  %v890_v55 = vld [vmem:[%s8065_s4 + $0x38] sm:$0xff]  ;;  %v2036_v23 = vld [vmem:[%s8070_s7 + $0x8] sm:$0xff] }
 0x654   :  { %3717 = vrot.lane.b32.xlu1 %v3679_v21, %s5631_s20  ;;  %v3846_v62 = vrot.slane %v3679_v21, 4 }
 0x656   :  { %3776 = vrot.lane.b32.xlu0 %v3676_v40, %s5630_s3  ;;  %v7442_v25 = vsel %vm1468_vm3, %v3844_v36, %v3846_v62  ;;  %v891_v40 = vld [vmem:[%s8065_s4 + $0x40] sm:$0xff]  ;;  %v1160_v36 = vld [vmem:[%s8066_s5 + $0x58] sm:$0xff] }
 0x657   :  { %v2039_v62 = vld [vmem:[%s8070_s7 + $0x20] sm:$0xff] }
 0x658   :  { %3778 = vrot.lane.b32.xlu1 %v3677_v61, %s5630_s3  ;;  %v1149_v61 = vld [vmem:[%s8066_s5] sm:$0xff] }
 0x65a   :  { %3780 = vrot.lane.b32.xlu0 %v3678_v30, %s5630_s3  ;;  %v1152_v30 = vld [vmem:[%s8066_s5 + $0x18] sm:$0xff] }
 0x65c   :  { %3782 = vrot.lane.b32.xlu1 %v3679_v21, %s5630_s3  ;;  %v2038_v21 = vld [vmem:[%s8070_s7 + $0x18] sm:$0xff] }
 0x65e   :  { %953 = vperm.xlu0 %5440, %v889_v52   ;;  %v2040_v52 = vld [vmem:[%s8070_s7 + $0x28] sm:$0xff] }
 0x660   :  { %958 = vperm.xlu1 %5441, %v890_v55   ;;  %v2041_v55 = vld [vmem:[%s8070_s7 + $0x30] sm:$0xff] }
 0x662   :  { %963 = vperm.xlu0 %5440, %v891_v40   ;;  %v2042_v40 = vld [vmem:[%s8070_s7 + $0x38] sm:$0xff] }
 0x664   :  { %968 = vperm.xlu1 %5441, %v892_v8   ;;  %v2043_v8 = vld [vmem:[%s8070_s7 + $0x40] sm:$0xff] }
 0x666   :  { %973 = vperm.xlu0 %5440, %v893_v47   ;;  %v2044_v47 = vld [vmem:[%s8070_s7 + $0x48] sm:$0xff] }
 0x668   :  { %978 = vperm.xlu1 %5441, %v894_v1   ;;  %v2045_v1 = vld [vmem:[%s8070_s7 + $0x50] sm:$0xff] }
 0x66a   :  { %1189 = vperm.xlu0 %5440, %v1149_v61   ;;  %v2046_v61 = vld [vmem:[%s8070_s7 + $0x58] sm:$0xff] }
 0x66c   :  { %1194 = vperm.xlu1 %5441, %v1150_v56  }
 0x66e   :  { %1199 = vperm.xlu0 %5440, %v1151_v13  }
 0x670   :  { %1204 = vperm.xlu1 %5441, %v1152_v30   ;;  %v2047_v30 = vld [vmem:[%s8070_s7 + $0x60] sm:$0xf] }
 0x672   :  { %1209 = vperm.xlu0 %5440, %v1153_v43  }
 0x674   :  { %1214 = vperm.xlu1 %5441, %v1154_v19  }
 0x676   :  { %1219 = vperm.xlu0 %5440, %v1155_v46   ;;  %v2126_v46 = vld [vmem:[%s8071_s8] sm:$0xff] }
 0x678   :  { %1224 = vperm.xlu1 %5441, %v1156_v3  }
 0x67a   :  { %1229 = vperm.xlu0 %5440, %v1157_v16  }
 0x67c   :  { %1234 = vperm.xlu1 %5441, %v1158_v41  }
 0x67e   :  { %1239 = vperm.xlu0 %5440, %v1159_v10   ;;  %v2127_v10 = vld [vmem:[%s8071_s8 + $0x8] sm:$0xff] }
 0x680   :  { %1244 = vperm.xlu1 %5441, %v1160_v36  }
 0x682   :  { %2050 = vperm.xlu0 %5440, %v2035_v14  }
 0x684   :  { %2055 = vperm.xlu1 %5441, %v2036_v23   ;;  %v2128_v23 = vld [vmem:[%s8071_s8 + $0x10] sm:$0xff] }
 0x686   :  { %2060 = vperm.xlu0 %5440, %v2037_v53  }
 0x688   :  { %2065 = vperm.xlu1 %5441, %v2038_v21  }
 0x68a   :  { %2070 = vperm.xlu0 %5440, %v2039_v62   ;;  %v2129_v62 = vld [vmem:[%s8071_s8 + $0x18] sm:$0xff] }
 0x68c   :  { %2075 = vperm.xlu1 %5441, %v2040_v52  }
 0x68e   :  { %2080 = vperm.xlu0 %5440, %v2041_v55  }
 0x690   :  { %2085 = vperm.xlu1 %5441, %v2042_v40   ;;  %v2130_v40 = vld [vmem:[%s8071_s8 + $0x20] sm:$0xff] }
 0x692   :  { %2090 = vperm.xlu0 %5440, %v2043_v8  }
 0x694   :  { %2095 = vperm.xlu1 %5441, %v2044_v47  }
 0x696   :  { %2100 = vperm.xlu0 %5440, %v2045_v1   ;;  %v3694_v56 = vpop.permute.xlu0 %3693 }
 0x697   :  { %v3732_v13 = vsel %vm1533_vm4, 0.0, %v3694_v56 }
 0x698   :  { %2105 = vperm.xlu1 %5441, %v2046_v61   ;;  %v3696_v43 = vpop.permute.xlu1 %3695  ;;  %v3745_v3 = vmul.f32 %v7145_v5, %v3732_v13  ;;  %v2133_v13 = vld [vmem:[%s8071_s8 + $0x38] sm:$0xff] }
 0x699   :  { %v3733_v19 = vsel %vm1533_vm4, 0.0, %v3696_v43 }
 0x69a   :  { %v3746_v16 = vmul.f32 %v7145_v5, %v3733_v19  ;;  %2110 = vperm.xlu0 %5440, %v2047_v30   ;;  %v3759_v41 = vpop.permute.xlu0 %3758  ;;  %v2134_v30 = vld [vmem:[%s8071_s8 + $0x40] sm:$0xff] }
 0x69c   :  { %v3889_v36 = vpack.c.bf16 %v3746_v16, %v3745_v3  ;;  %2141 = vperm.xlu1 %5441, %v2126_v46   ;;  %v7550_v14 = vpop.permute.xlu1 %3760  ;;  %v2136_v16 = vld [vmem:[%s8071_s8 + $0x50] sm:$0xff] }
 0x69e   :  { %2146 = vperm.xlu0 %5440, %v2127_v10   ;;  %5074 = vmatpush3.bf16.msra.mxu0 %v3889_v36  ;;  %v3698_v53 = vpop.permute.xlu0 %3697  ;;  %v3797_v10 = vsel %vm1605_vm5, %v3759_v41, 0.0  ;;  %v2138_v41 = vld [vmem:[%s8071_s8 + $0x60] sm:$0xf] }
 0x69f   :  { %v3734_v21 = vsel %vm1533_vm4, 0.0, %v3698_v53  ;;  %5075 = vmatprep.subr.bf16.mxu0 %v3898_v2  ;;  %v2132_v2 = vld [vmem:[%s8071_s8 + $0x30] sm:$0xff] }
 0x6a0   :  { %2151 = vperm.xlu1 %5441, %v2128_v23   ;;  %v3700_v52 = vpop.permute.xlu1 %3699  ;;  %v3747_v8 = vmul.f32 %v7145_v5, %v3734_v21  ;;  %v2137_v21 = vld [vmem:[%s8071_s8 + $0x58] sm:$0xff] }
 0x6a1   :  { %v3735_v55 = vsel %vm1533_vm4, 0.0, %v3700_v52  ;;  %v3810_v52 = vmul.f32 %v7183_v11, %v3797_v10  ;;  %v4825_v10 = vld [vmem:[%s8070_s7 + $0x158] sm:$0xff] }
 0x6a2   :  { %v3748_v47 = vmul.f32 %v7145_v5, %v3735_v55  ;;  %2156 = vperm.xlu0 %5440, %v2129_v62   ;;  %v3763_v1 = vpop.permute.xlu0 %3762 }
 0x6a3   :  { %v3799_v49 = vsel %vm1605_vm5, %v3763_v1, 0.0 }
 0x6a4   :  { %v3890_v6 = vpack.c.bf16 %v3748_v47, %v3747_v8  ;;  %2161 = vperm.xlu1 %5441, %v2130_v40   ;;  %v4821_v47 = vld [vmem:[%s8070_s7 + $0x138] sm:$0xff] }
 0x6a6   :  { %v7574_v61 = vpop.permute.xlu1 %3766  ;;  %2166 = vperm.xlu0 %5440, %v2131_v58   ;;  %5076 = vmatpush3.bf16.msra.mxu0 %v3890_v6  ;;  %v7576_v56 = vpop.permute.xlu0 %3764 }
 0x6a7   :  { %5077 = vmatprep.subr.bf16.mxu0 %v3899_v32 }
 0x6a8   :  { %2171 = vperm.xlu1 %5441, %v2132_v2   ;;  %v3901_v2 = vpack.c.bf16 %v3810_v52, %v7442_v25  ;;  %v3801_v52 = vsel %vm1605_vm5, %v7574_v61, 0.0  ;;  %v5626_v61 = vld [vmem:[%s8069_s2] ss:$0 sm:$0xff] }
 0x6aa   :  { %v3704_v43 = vpop.permute.xlu1 %3703  ;;  %2176 = vperm.xlu0 %5440, %v2133_v13   ;;  %v3702_v19 = vpop.permute.xlu0 %3701  ;;  %v4823_v13 = vld [vmem:[%s8070_s7 + $0x148] sm:$0xff] }
 0x6ab   :  { %v3737_v46 = vsel %vm1533_vm4, 0.0, %v3704_v43  ;;  %v3736_v3 = vsel %vm1533_vm4, 0.0, %v3702_v19  ;;  %v3812_v43 = vmul.f32 %v7183_v11, %v3799_v49 }
 0x6ac   :  { %v3750_v59 = vmul.f32 %v7145_v5, %v3737_v46  ;;  %v3749_v32 = vmul.f32 %v7145_v5, %v3736_v3  ;;  %2181 = vperm.xlu1 %5441, %v2134_v30   ;;  %v3798_v30 = vsel %vm1605_vm5, %v7550_v14, 0.0  ;;  %v4824_v46 = vld [vmem:[%s8070_s7 + $0x150] sm:$0xff]  ;;  %v5625_v3 = vld [vmem:[%s8068_s1] ss:$0 sm:$0xff] }
 0x6ad   :  { %v3811_v14 = vmul.f32 %v7183_v11, %v3798_v30 }
 0x6ae   :  { %v3891_v36 = vpack.c.bf16 %v3750_v59, %v3749_v32  ;;  %2186 = vperm.xlu0 %5440, %v2135_v54   ;;  %v3706_v23 = vpop.permute.xlu0 %3705 }
 0x6af   :  { %v3738_v53 = vsel %vm1533_vm4, 0.0, %v3706_v23 }
 0x6b0   :  { %2191 = vperm.xlu1 %5441, %v2136_v16   ;;  %v3708_v62 = vpop.permute.xlu1 %3707  ;;  %5078 = vmatpush3.bf16.msra.mxu0 %v3891_v36  ;;  %v3751_v40 = vmul.f32 %v7145_v5, %v3738_v53 }
 0x6b1   :  { %v3739_v55 = vsel %vm1533_vm4, 0.0, %v3708_v62  ;;  %5079 = vmatprep.subr.bf16.mxu0 %v3900_v37  ;;  %v4826_v62 = vld [vmem:[%s8070_s7 + $0x160] sm:$0xff] }
 0x6b2   :  { %v3752_v8 = vmul.f32 %v7145_v5, %v3739_v55  ;;  %2196 = vperm.xlu0 %5440, %v2137_v21   ;;  %v3773_v6 = vpop.permute.xlu0 %3772  ;;  %v3902_v21 = vpack.c.bf16 %v3812_v43, %v3811_v14  ;;  %v3800_v55 = vsel %vm1605_vm5, %v7576_v56, 0.0 }
 0x6b3   :  { %v3804_v19 = vsel %vm1605_vm5, %v3773_v6, 0.0  ;;  %v3813_v56 = vmul.f32 %v5626_v61, %v3800_v55 }
 0x6b4   :  { %v3892_v58 = vpack.c.bf16 %v3752_v8, %v3751_v40  ;;  %2201 = vperm.xlu1 %5441, %v2138_v41   ;;  %v3817_v36 = vmul.f32 %v7183_v11, %v3804_v19  ;;  %v4830_v19 = vld [vmem:[%s8070_s7 + $0x180] sm:$0xff] }
 0x6b6   :  { %v3710_v37 = vpop.permute.xlu1 %3709  ;;  %4224 = vperm.xlu0 %5440, %v4821_v47   ;;  %5080 = vmatpush3.bf16.msra.mxu0 %v3892_v58  ;;  %v3814_v58 = vmul.f32 %v5626_v61, %v3801_v52 }
 0x6b7   :  { %v3740_v5 = vsel %vm1533_vm4, 0.0, %v3710_v37  ;;  %5081 = vmatprep.subr.bf16.mxu0 %v3901_v2  ;;  %v4828_v2 = vld [vmem:[%s8070_s7 + $0x170] sm:$0xff] }
 0x6b8   :  { %4229 = vperm.xlu1 %5441, %v4822_v60   ;;  %v3712_v25 = vpop.permute.xlu0 %3711  ;;  %v3753_v54 = vmul.f32 %v5625_v3, %v3740_v5  ;;  %v4829_v5 = vld [vmem:[%s8070_s7 + $0x178] sm:$0xff] }
 0x6b9   :  { %v3741_v1 = vsel %vm1533_vm4, 0.0, %v3712_v25  ;;  %v3903_v25 = vpack.c.bf16 %v3814_v58, %v3813_v56  ;;  %v4835_v58 = vld [vmem:[%s8071_s8 + $0x140] sm:$0xff] }
 0x6ba   :  { %v3754_v59 = vmul.f32 %v5625_v3, %v3741_v1  ;;  %v3775_v32 = vpop.permute.xlu1 %3774  ;;  %4234 = vperm.xlu0 %5440, %v4823_v13  }
 0x6bb   :  { %v3805_v16 = vsel %vm1605_vm5, %v3775_v32, 0.0 }
 0x6bc   :  { %v3893_v23 = vpack.c.bf16 %v3754_v59, %v3753_v54  ;;  %v3818_v53 = vmul.f32 %v7183_v11, %v3805_v16  ;;  %4239 = vperm.xlu1 %5441, %v4824_v46   ;;  %v4827_v11 = vld [vmem:[%s8070_s7 + $0x168] sm:$0xff] }
 0x6bd   :  { %v4831_v59 = vld [vmem:[%s8070_s7 + $0x188] sm:$0xff] }
 0x6be   :  { %v3905_v41 = vpack.c.bf16 %v3818_v53, %v3817_v36  ;;  %v3714_v40 = vpop.permute.xlu1 %3713  ;;  %4244 = vperm.xlu0 %5440, %v4825_v10   ;;  %5082 = vmatpush3.bf16.msra.mxu0 %v3893_v23  ;;  %v4832_v36 = vld [vmem:[%s8070_s7 + $0x190] sm:$0xff] }
 0x6bf   :  { %v3742_v8 = vsel %vm1533_vm4, 0.0, %v3714_v40  ;;  %5083 = vmatprep.subr.bf16.mxu0 %v3902_v21 }
 0x6c0   :  { %4249 = vperm.xlu1 %5441, %v4826_v62   ;;  %5326 = vmatpush3.bf16.msra.mxu1 %v3905_v41  ;;  %v3716_v47 = vpop.permute.xlu0 %3715  ;;  %v3755_v60 = vmul.f32 %v5625_v3, %v3742_v8 }
 0x6c1   :  { %v3743_v6 = vsel %vm1533_vm4, 0.0, %v3716_v47  ;;  %5327 = vmatprep.subr.bf16.mxu1 %v8086_v17 }
 0x6c2   :  { %v3756_v49 = vmul.f32 %v5625_v3, %v3743_v6  ;;  %v3771_v37 = vpop.permute.xlu1 %3770  ;;  %4254 = vperm.xlu0 %5440, %v4827_v11  }
 0x6c3   :  { %v3803_v46 = vsel %vm1605_vm5, %v3771_v37, 0.0  ;;  %v4837_v37 = vld [vmem:[%s8071_s8 + $0x150] sm:$0xff] }
 0x6c4   :  { %v3894_v13 = vpack.c.bf16 %v3756_v49, %v3755_v60  ;;  %4259 = vperm.xlu1 %5441, %v4828_v2   ;;  %v3769_v30 = vpop.permute.xlu0 %3768  ;;  %v3816_v23 = vmul.f32 %v5626_v61, %v3803_v46  ;;  %v5599_v2 = vld [vmem:[%s8067_s6 + $0x1d4] ss:$12 sps:$4 sm:$0xff]   ;;  %v4836_v60 = vld [vmem:[%s8071_s8 + $0x148] sm:$0xff]  ;;  %v4842_v46 = vld [vmem:[%s8071_s8 + $0x178] sm:$0xff] }
 0x6c5   :  { %v3802_v43 = vsel %vm1605_vm5, %v3769_v30, 0.0  ;;  %v4840_v30 = vld [vmem:[%s8071_s8 + $0x168] sm:$0xff] }
 0x6c6   :  { %v3718_v1 = vpop.permute.xlu1 %3717  ;;  %4264 = vperm.xlu0 %5440, %v4829_v5   ;;  %5084 = vmatpush3.bf16.msra.mxu0 %v3894_v13  ;;  %v3815_v32 = vmul.f32 %v5626_v61, %v3802_v43  ;;  %v4839_v5 = vld [vmem:[%s8071_s8 + $0x160] sm:$0xff]  ;;  %v5605_v13 = vld [vmem:[%s8067_s6 + $0x1ec] ss:$12 sps:$4 sm:$0xff]   ;;  %v4841_v43 = vld [vmem:[%s8071_s8 + $0x170] sm:$0xff] }
 0x6c7   :  { %v3744_v54 = vsel %vm1533_vm4, 0.0, %v3718_v1  ;;  %5085 = vmatprep.subr.bf16.mxu0 %v3903_v25  ;;  %v5607_v25 = vld [vmem:[%s8067_s6 + $0x208] ss:$12 sps:$4 sm:$0xff]  }
 0x6c8   :  { %v3757_v14 = vmul.f32 %v5625_v3, %v3744_v54  ;;  %4269 = vperm.xlu1 %5441, %v4830_v19   ;;  %v3777_v16 = vpop.permute.xlu0 %3776  ;;  %v4833_v3 = vld [vmem:[%s8070_s7 + $0x198] sm:$0xf]  ;;  %v3904_v55 = vpack.c.bf16 %v3816_v23, %v3815_v32  ;;  %v5606_v19 = vld [vmem:[%s8067_s6 + $0x1f4] ss:$12 sps:$4 sm:$0xff]   ;;  %v5609_v32 = vld [vmem:[%s8067_s6 + $0x204] ss:$12 sps:$4 sm:$0xff]  }
 0x6c9   :  { %v3806_v10 = vsel %vm1605_vm5, %v3777_v16, 0.0  ;;  %v4844_v16 = vld [vmem:[%s8071_s8 + $0x188] sm:$0xff]  ;;  %v4845_v23 = vld [vmem:[%s8071_s8 + $0x190] sm:$0xff] }
 0x6ca   :  { %v3861_v53 = vsel %vm1468_vm3, %v3757_v14, %v3823_v7  ;;  %v3779_v21 = vpop.permute.xlu1 %3778  ;;  %4274 = vperm.xlu0 %5440, %v4831_v59   ;;  %v3819_v41 = vmul.f32 %v5626_v61, %v3806_v10  ;;  %v4843_v59 = vld [vmem:[%s8071_s8 + $0x180] sm:$0xff] }
 0x6cb   :  { %v3895_v62 = vpack.c.bf16 %v7363_v0, %v3861_v53  ;;  %v3807_v52 = vsel %vm1605_vm5, %v3779_v21, 0.0  ;;  %v5611_v10 = vld [vmem:[%s8067_s6 + $0x220] ss:$12 sps:$4 sm:$0xff]  }
 0x6cc   :  { %v3820_v40 = vmul.f32 %v5626_v61, %v3807_v52  ;;  %4279 = vperm.xlu1 %5441, %v4832_v36   ;;  %v3781_v8 = vpop.permute.xlu0 %3780  ;;  %v5610_v53 = vld [vmem:[%s8067_s6 + $0x20c] ss:$12 sps:$4 sm:$0xff]   ;;  %v4779_v52 = vld [vmem:[%s8067_s6 + $0x21c] sm:$0xff] }
 0x6cd   :  { %v3808_v11 = vsel %vm1605_vm5, %v3781_v8, 0.0  ;;  %5086 = vmatpush3.bf16.msra.mxu0 %v3895_v62  ;;  %v4846_v62 = vld [vmem:[%s8071_s8 + $0x198] sm:$0xf] }
 0x6ce   :  { %v3906_v7 = vpack.c.bf16 %v3820_v40, %v3819_v41  ;;  %v3783_v0 = vpop.permute.xlu1 %3782  ;;  %4284 = vperm.xlu0 %5440, %v4833_v3   ;;  %5087 = vmatprep.subr.bf16.mxu0 %v3904_v55  ;;  %v3821_v56 = vmul.f32 %v5626_v61, %v3808_v11  ;;  %v4781_v3 = vld [vmem:[%s8067_s6 + $0x228] sm:$0xff]  ;;  %v1111_v41 = vmul.f32 %v7320_v63, %v6136_v20  ;;  %v5614_v11 = vld [vmem:[%s8067_s6 + $0x238] ss:$12 sps:$4 sm:$0xff]  }
 0x6cf   :  { %v3809_v47 = vsel %vm1605_vm5, %v3783_v0, 0.0  ;;  %v4802_v40 = vcombine.low %v4779_v52, %v4781_v3  ;;  %v1113_v20 = vmul.f32 %v7328_v45, %v6140_v24  ;;  %v1114_v24 = vmul.f32 %v7330_v50, %v6142_v26 }
 0x6d0   :  { %v3822_v6 = vmul.f32 %v5626_v61, %v3809_v47  ;;  %4316 = vperm.xlu1 %5441, %v4834_v34   ;;  %5328 = vmatpush3.bf16.msra.mxu1 %v3906_v7  ;;  %v5603_v61 = vld [vmem:[%s8067_s6 + $0x1f0] ss:$12 sps:$4 sm:$0xff]   ;;  %v1112_v34 = vmul.f32 %v7322_v4, %v6138_v22  ;;  %v4785_v22 = vld [vmem:[%s8067_s6 + $0x240] sm:$0xff] }
 0x6d1   :  { %5088 = vmatpush3.bf16.msra.mxu0 %v3896_v12  ;;  %5329 = vmatprep.subr.bf16.mxu1 %v8086_v17  ;;  %v4838_v12 = vld [vmem:[%s8071_s8 + $0x158] sm:$0xff] }
 0x6d2   :  { %v3907_v49 = vpack.c.bf16 %v3822_v6, %v3821_v56  ;;  %4321 = vperm.xlu0 %5440, %v4835_v58   ;;  %v5613_v58 = vld [vmem:[%s8067_s6 + $0x224] ss:$12 sps:$4 sm:$0xff]   ;;  %v4783_v6 = vld [vmem:[%s8067_s6 + $0x234] sm:$0xff] }
 0x6d3   :  { %v4805_v26 = vcombine.low %v4783_v6, %v4785_v22 }
 0x6d4   :  { %4326 = vperm.xlu1 %5441, %v4836_v60   ;;  %4065 = vmatmul.mubr.bf16.vlgmr.msra.gmra.mrb[76].mxu0 %v5599_v2  ;;  %v4030_v9 = vsel %vm509_vm0, %v3907_v49, 0  ;;  %v1115_v60 = vmul.f32 %v7334_v29, %v6144_v28  ;;  %v1116_v28 = vmul.f32 %v7338_v18, %v6146_v31  ;;  %v5616_v31 = vld [vmem:[%s8067_s6 + $0x23c] ss:$12 sps:$4 sm:$0xff]  }
 0x6d5   :  { %5330 = vmatpush3.bf16.msra.mxu1 %v4030_v9  ;;  %4072 = vmatprep.mubr.bf16.mxu0 %v5603_v61 }
 0x6d6   :  { %4331 = vperm.xlu0 %5440, %v4837_v37   ;;  %v5617_v37 = vld [vmem:[%s8067_s6 + $0x250] ss:$12 sps:$4 sm:$0xff]  }
 0x6d8   :  { %4336 = vperm.xlu1 %5441, %v4838_v12   ;;  %5332 = vmatmul.mubr.msk.bf16.vlgmr.msra.gmra.mrb[168].mxu1 %vm451_vm2, %v5602_v39 }
 0x6d9   :  { %5335 = vmatprep.mubr.msk.bf16.mxu1 %vm5629_vm1, %v8086_v17 }
 0x6da   :  { %4341 = vperm.xlu0 %5440, %v4839_v5  }
 0x6dc   :  { %4346 = vperm.xlu1 %5441, %v4840_v30   ;;  %4073 = vmatmul.mubr.bf16.gmra.mrb[80].mxu0 %v5605_v13  ;;  %v4787_v30 = vld [vmem:[%s8067_s6 + $0x24c] sm:$0xff] }
 0x6dd   :  { %v7737_v1 = vpop.permute.xlu0 %953  ;;  %4080 = vmatprep.mubr.bf16.mxu0 %v5607_v25 }
 0x6de   :  { %4351 = vperm.xlu0 %5440, %v4841_v43   ;;  %v1117_v12 = vmul.f32 %v7737_v1, %v6148_v35  ;;  %v4789_v35 = vld [vmem:[%s8067_s6 + $0x258] sm:$0xff]  ;;  %v4791_v1 = vld [vmem:[%s8067_s6 + $0x264] sm:$0x33] }
 0x6df   :  { %v7742_v54 = vpop.permute.xlu1 %958 }
 0x6e0   :  { %4356 = vperm.xlu1 %5441, %v4842_v46   ;;  %5336 = vmatmul.mubr.msk.bf16.gmra.mrb[172].mxu1 %vm451_vm2, %v5606_v19  ;;  %v1118_v25 = vmul.f32 %v7742_v54, %v6150_v38 }
 0x6e1   :  { %v7751_v14 = vpop.permute.xlu0 %963  ;;  %5339 = vmatprep.mubr.msk.bf16.mxu1 %vm5629_vm1, %v8086_v17 }
 0x6e2   :  { %4361 = vperm.xlu0 %5440, %v4843_v59   ;;  %v1119_v59 = vmul.f32 %v7751_v14, %v6152_v42 }
 0x6e3   :  { %v7761_v36 = vpop.permute.xlu1 %968 }
 0x6e4   :  { %4366 = vperm.xlu1 %5441, %v4844_v16   ;;  %4081 = vmatmul.mubr.bf16.gmra.mrb[84].mxu0 %v5609_v32  ;;  %v4808_v32 = vcombine.low %v4787_v30, %v4789_v35  ;;  %v8088_v30 = vld [vmem:[#allocation2_spill] sm:$0xff] }
 0x6e5   :  { %v7769_v21 = vpop.permute.xlu0 %973  ;;  %4088 = vmatprep.mubr.bf16.mxu0 %v5611_v10  ;;  %v4812_v10 = vcombine.high %v4791_v1, %v4791_v1 }
 0x6e6   :  { %4371 = vperm.xlu0 %5440, %v4845_v23   ;;  %v1120_v23 = vmul.f32 %v7761_v36, %v6154_v44  ;;  %v5619_v44 = vld [vmem:[%s8067_s6 + $0x254] ss:$12 sps:$4 sm:$0xff]  }
 0x6e7   :  { %v7780_v55 = vpop.permute.xlu1 %978 }
 0x6e8   :  { %4376 = vperm.xlu1 %5441, %v4846_v62   ;;  %5340 = vmatmul.mubr.msk.bf16.gmra.mrb[176].mxu1 %vm451_vm2, %v5610_v53  ;;  %v1121_v62 = vmul.f32 %v7769_v21, %v6156_v48 }
 0x6e9   :  { %v1190_v8 = vpop.permute.xlu0 %1189  ;;  %5343 = vmatprep.mubr.msk.bf16.mxu1 %vm5629_vm1, %v8086_v17 }
 0x6ea   :  { %v1377_v7 = vadd.f32 %v1190_v8, %v1111_v41  ;;  %v1122_v41 = vmul.f32 %v7780_v55, %v6158_v51 }
 0x6eb   :  { %v1195_v0 = vpop.permute.xlu1 %1194 }
 0x6ec   :  { %v1415_v63 = vmax.f32 %v1377_v7, 0.0  ;;  %v1378_v47 = vadd.f32 %v1195_v0, %v1112_v34  ;;  %4089 = vmatmul.mubr.bf16.gmra.mrb[88].mxu0 %v4802_v40  ;;  %v4811_v34 = vcombine.low %v4791_v1, %v4791_v1  ;;  %v5622_v0 = vld [vmem:[%s8067_s6 + $0x26c] ss:$0 sps:$4 sm:$0x33]  }
 0x6ed   :  { %v1200_v56 = vpop.permute.xlu0 %1199  ;;  %4096 = vmatprep.mubr.bf16.mxu0 %v5614_v11 }
 0x6ee   :  { %4458 = vst.msk [vmem:[%s8072_s9] sm:$0xff] %vm4457_vm6, %v1415_v63  ;;  %v1416_v4 = vmax.f32 %v1378_v47, 0.0  ;;  %v1379_v45 = vadd.f32 %v1200_v56, %v1113_v20 }
 0x6ef   :  { %v1205_v2 = vpop.permute.xlu1 %1204 }
 0x6f0   :  { %4459 = vst.msk [vmem:[%s8072_s9 + $0x8] sm:$0xff] %vm4457_vm6, %v1416_v4  ;;  %v1417_v61 = vmax.f32 %v1379_v45, 0.0  ;;  %v1380_v49 = vadd.f32 %v1205_v2, %v1114_v24  ;;  %5344 = vmatmul.mubr.msk.bf16.gmra.mrb[180].mxu1 %vm451_vm2, %v5613_v58 }
 0x6f1   :  { %v1210_v50 = vpop.permute.xlu0 %1209  ;;  %5347 = vmatprep.mubr.msk.bf16.mxu1 %vm5629_vm1, %v8086_v17 }
 0x6f2   :  { %4460 = vst.msk [vmem:[%s8072_s9 + $0x10] sm:$0xff] %vm4457_vm6, %v1417_v61  ;;  %v1418_v29 = vmax.f32 %v1380_v49, 0.0  ;;  %v1381_v9 = vadd.f32 %v1210_v50, %v1115_v60 }
 0x6f3   :  { %v1215_v39 = vpop.permute.xlu1 %1214 }
 0x6f4   :  { %4461 = vst.msk [vmem:[%s8072_s9 + $0x18] sm:$0xff] %vm4457_vm6, %v1418_v29  ;;  %v1419_v5 = vmax.f32 %v1381_v9, 0.0  ;;  %v1382_v13 = vadd.f32 %v1215_v39, %v1116_v28  ;;  %4097 = vmatmul.mubr.bf16.gmra.mrb[92].mxu0 %v4805_v26 }
 0x6f5   :  { %v1220_v18 = vpop.permute.xlu0 %1219  ;;  %4104 = vmatprep.mubr.bf16.mxu0 %v5617_v37 }
 0x6f6   :  { %4462 = vst.msk [vmem:[%s8072_s9 + $0x20] sm:$0xff] %vm4457_vm6, %v1419_v5  ;;  %v1420_v43 = vmax.f32 %v1382_v13, 0.0  ;;  %v1383_v19 = vadd.f32 %v1220_v18, %v1117_v12  ;;  %v8087_v13 = vld [vmem:[#allocation3_spill] sm:$0xff] }
 0x6f7   :  { %v1225_v46 = vpop.permute.xlu1 %1224 }
 0x6f8   :  { %4463 = vst.msk [vmem:[%s8072_s9 + $0x28] sm:$0xff] %vm4457_vm6, %v1420_v43  ;;  %v1421_v38 = vmax.f32 %v1383_v19, 0.0  ;;  %v1384_v54 = vadd.f32 %v1225_v46, %v1118_v25  ;;  %5348 = vmatmul.mubr.msk.bf16.gmra.mrb[184].mxu1 %vm451_vm2, %v5616_v31  ;;  %v8089_v43 = vld [vmem:[#allocation4_spill] sm:$0xff] }
 0x6f9   :  { %v1230_v16 = vpop.permute.xlu0 %1229  ;;  %5351 = vmatprep.mubr.msk.bf16.mxu1 %vm5629_vm1, %v8086_v17 }
 0x6fa   :  { %4464 = vst.msk [vmem:[%s8072_s9 + $0x30] sm:$0xff] %vm4457_vm6, %v1421_v38  ;;  %v1422_v42 = vmax.f32 %v1384_v54, 0.0  ;;  %v1385_v14 = vadd.f32 %v1230_v16, %v1119_v59  ;;  %v8090_v38 = vld [vmem:[#allocation5_spill] sm:$0xff] }
 0x6fb   :  { %v1235_v53 = vpop.permute.xlu1 %1234 }
 0x6fc   :  { %4465 = vst.msk [vmem:[%s8072_s9 + $0x38] sm:$0xff] %vm4457_vm6, %v1422_v42  ;;  %v1423_v52 = vmax.f32 %v1385_v14, 0.0  ;;  %v1386_v3 = vadd.f32 %v1235_v53, %v1120_v23  ;;  %4105 = vmatmul.mubr.bf16.gmra.mrb[96].mxu0 %v4808_v32  ;;  %v8091_v14 = vld [vmem:[#allocation6_spill] sm:$0xff] }
 0x6fd   :  { %v1240_v36 = vpop.permute.xlu0 %1239  ;;  %4112 = vmatprep.mubr.bf16.mxu0 %v4812_v10 }
 0x6fe   :  { %4466 = vst.msk [vmem:[%s8072_s9 + $0x40] sm:$0xff] %vm4457_vm6, %v1423_v52  ;;  %v1424_v48 = vmax.f32 %v1386_v3, 0.0  ;;  %v1387_v21 = vadd.f32 %v1240_v36, %v1121_v62 }
 0x6ff   :  { %v1245_v40 = vpop.permute.xlu1 %1244 }
 0x700   :  { %4467 = vst.msk [vmem:[%s8072_s9 + $0x48] sm:$0xff] %vm4457_vm6, %v1424_v48  ;;  %v1425_v8 = vmax.f32 %v1387_v21, 0.0  ;;  %v1388_v11 = vadd.f32 %v1245_v40, %v1122_v41  ;;  %5352 = vmatmul.mubr.msk.bf16.gmra.mrb[188].mxu1 %vm451_vm2, %v5619_v44  ;;  %v8092_v41 = vld [vmem:[#allocation7_spill] sm:$0xff] }
 0x701   :  { %v2051_v7 = vpop.permute.xlu0 %2050  ;;  %5355 = vmatprep.mubr.msk.bf16.mxu1 %vm5629_vm1, %v8086_v17 }
 0x702   :  { %4468 = vst.msk [vmem:[%s8072_s9 + $0x50] sm:$0xff] %vm4457_vm6, %v1425_v8  ;;  %v1426_v51 = vmax.f32 %v1388_v11, 0.0  ;;  %v2113_v2 = vmul.f32 %v2051_v7, %v6897_v15  ;;  %v8093_v7 = vld [vmem:[#allocation8_spill] sm:$0xff] }
 0x703   :  { %v2056_v55 = vpop.permute.xlu1 %2055 }
 0x704   :  { %4469 = vst.msk [vmem:[%s8072_s9 + $0x58] sm:$0xff] %vm4457_vm6, %v1426_v51  ;;  %4113 = vmatmul.mubr.bf16.gmra.mrb[100].mxu0 %v4811_v34  ;;  %v2114_v61 = vmul.f32 %v2056_v55, %v6903_v27 }
 0x705   :  { %v2061_v20 = vpop.permute.xlu0 %2060 }
 0x706   :  { %v2115_v50 = vmul.f32 %v2061_v20, %v6906_v33 }
 0x707   :  { %v2066_v63 = vpop.permute.xlu1 %2065 }
 0x708   :  { %5356 = vmatmul.mubr.msk.bf16.gmra.mrb[192].mxu1 %vm451_vm2, %v5622_v0  ;;  %v2116_v9 = vmul.f32 %v2066_v63, %v6908_v57 }
 0x709   :  { %v2071_v17 = vpop.permute.xlu0 %2070 }
 0x70a   :  { %v2117_v31 = vmul.f32 %v2071_v17, %v8087_v13 }
 0x70b   :  { %v2076_v47 = vpop.permute.xlu1 %2075 }
 0x70c   :  { %v2118_v19 = vmul.f32 %v2076_v47, %v8089_v43  ;;  %v8094_v47 = vld [vmem:[#allocation9_spill] sm:$0xff] }
 0x70d   :  { %v2081_v58 = vpop.permute.xlu0 %2080 }
 0x70e   :  { %v2119_v54 = vmul.f32 %v2081_v58, %v8090_v38 }
 0x70f   :  { %v2086_v56 = vpop.permute.xlu1 %2085 }
 0x710   :  { %v2120_v53 = vmul.f32 %v2086_v56, %v8091_v14 }
 0x711   :  { %v2091_v6 = vpop.permute.xlu0 %2090 }
 0x712   :  { %v2121_v48 = vmul.f32 %v2091_v6, %v8092_v41 }
 0x713   :  { %v2096_v22 = vpop.permute.xlu1 %2095 }
 0x714   :  { %v2122_v51 = vmul.f32 %v2096_v22, %v8093_v7 }
 0x715   :  { %v2101_v24 = vpop.permute.xlu0 %2100 }
 0x716   :  { %v2123_v58 = vmul.f32 %v2101_v24, %v8094_v47 }
 0x717   :  { %v7900_v4 = vpop.permute.xlu1 %2105 }
 0x719   :  { %v7902_v45 = vpop.permute.xlu0 %2110 }
 0x71b   :  { %v2142_v60 = vpop.permute.xlu1 %2141 }
 0x71c   :  { %v2204_v49 = vadd.f32 %v2142_v60, %v2113_v2 }
 0x71d   :  { %v2147_v26 = vpop.permute.xlu0 %2146 }
 0x71e   :  { %v2217_v37 = vmax.f32 %v2204_v49, 0.0  ;;  %v2205_v28 = vadd.f32 %v2147_v26, %v2114_v61  ;;  %v8095_v61 = vld [vmem:[#allocation10_spill] sm:$0xff] }
 0x71f   :  { %v2152_v29 = vpop.permute.xlu1 %2151  ;;  %v2124_v49 = vmul.f32 %v7900_v4, %v8095_v61 }
 0x720   :  { %v4418_v39 = vrot.slane %v2217_v37, 4  ;;  %v2218_v12 = vmax.f32 %v2205_v28, 0.0  ;;  %v2206_v5 = vadd.f32 %v2152_v29, %v2115_v50  ;;  %v8096_v29 = vld [vmem:[#allocation11_spill] sm:$0xff] }
 0x721   :  { %v2157_v18 = vpop.permute.xlu0 %2156 }
 0x722   :  { %v4456_v15 = vsel %vm1468_vm3, %v8088_v30, %v4418_v39  ;;  %v4419_v35 = vrot.slane %v2218_v12, 4  ;;  %v2219_v27 = vmax.f32 %v2206_v5, 0.0  ;;  %v2207_v25 = vadd.f32 %v2157_v18, %v2116_v9 }
 0x723   :  { %4470 = vst.msk [vmem:[%s8072_s9 + $0x60] sm:$0xff] %vm4457_vm6, %v4456_v15  ;;  %v2162_v33 = vpop.permute.xlu1 %2161  ;;  %v2125_v9 = vmul.f32 %v7902_v45, %v8096_v29 }
 0x724   :  { %v4420_v57 = vsel %vm1468_vm3, %v4418_v39, %v4419_v35  ;;  %v4421_v1 = vrot.slane %v2219_v27, 4  ;;  %v2220_v46 = vmax.f32 %v2207_v25, 0.0  ;;  %v2208_v59 = vadd.f32 %v2162_v33, %v2117_v31 }
 0x725   :  { %4471 = vst.msk [vmem:[%s8072_s9 + $0x68] sm:$0xff] %vm4457_vm6, %v4420_v57  ;;  %v2167_v32 = vpop.permute.xlu0 %2166 }
 0x726   :  { %v4422_v16 = vsel %vm1468_vm3, %v4419_v35, %v4421_v1  ;;  %v4423_v10 = vrot.slane %v2220_v46, 4  ;;  %v2221_v23 = vmax.f32 %v2208_v59, 0.0  ;;  %v2209_v42 = vadd.f32 %v2167_v32, %v2118_v19 }
 0x727   :  { %4472 = vst.msk [vmem:[%s8072_s9 + $0x70] sm:$0xff] %vm4457_vm6, %v4422_v16  ;;  %v2172_v62 = vpop.permute.xlu1 %2171 }
 0x728   :  { %v4424_v52 = vsel %vm1468_vm3, %v4421_v1, %v4423_v10  ;;  %v4425_v3 = vrot.slane %v2221_v23, 4  ;;  %v2222_v44 = vmax.f32 %v2209_v42, 0.0  ;;  %v2210_v36 = vadd.f32 %v2172_v62, %v2119_v54 }
 0x729   :  { %4473 = vst.msk [vmem:[%s8072_s9 + $0x78] sm:$0xff] %vm4457_vm6, %v4424_v52  ;;  %v2177_v21 = vpop.permute.xlu0 %2176 }
 0x72a   :  { %v4426_v40 = vsel %vm1468_vm3, %v4423_v10, %v4425_v3  ;;  %v4427_v8 = vrot.slane %v2222_v44, 4  ;;  %v2223_v11 = vmax.f32 %v2210_v36, 0.0  ;;  %v2211_v34 = vadd.f32 %v2177_v21, %v2120_v53 }
 0x72b   :  { %4474 = vst.msk [vmem:[%s8072_s9 + $0x80] sm:$0xff] %vm4457_vm6, %v4426_v40  ;;  %v2182_v55 = vpop.permute.xlu1 %2181 }
 0x72c   :  { %v4428_v0 = vsel %vm1468_vm3, %v4425_v3, %v4427_v8  ;;  %v4429_v20 = vrot.slane %v2223_v11, 4  ;;  %v2224_v63 = vmax.f32 %v2211_v34, 0.0  ;;  %v2212_v17 = vadd.f32 %v2182_v55, %v2121_v48 }
 0x72d   :  { %4475 = vst.msk [vmem:[%s8072_s9 + $0x88] sm:$0xff] %vm4457_vm6, %v4428_v0  ;;  %v2187_v56 = vpop.permute.xlu0 %2186 }
 0x72e   :  { %v4430_v6 = vsel %vm1468_vm3, %v4427_v8, %v4429_v20  ;;  %v4431_v22 = vrot.slane %v2224_v63, 4  ;;  %v2225_v2 = vmax.f32 %v2212_v17, 0.0  ;;  %v2213_v60 = vadd.f32 %v2187_v56, %v2122_v51 }
 0x72f   :  { %4476 = vst.msk [vmem:[%s8072_s9 + $0x90] sm:$0xff] %vm4457_vm6, %v4430_v6  ;;  %v2192_v24 = vpop.permute.xlu1 %2191 }
 0x730   :  { %v4432_v26 = vsel %vm1468_vm3, %v4429_v20, %v4431_v22  ;;  %v4433_v50 = vrot.slane %v2225_v2, 4  ;;  %v2226_v37 = vmax.f32 %v2213_v60, 0.0  ;;  %v2214_v28 = vadd.f32 %v2192_v24, %v2123_v58 }
 0x731   :  { %4477 = vst.msk [vmem:[%s8072_s9 + $0x98] sm:$0xff] %vm4457_vm6, %v4432_v26  ;;  %v2197_v4 = vpop.permute.xlu0 %2196 }
 0x732   :  { %v4434_v39 = vsel %vm1468_vm3, %v4431_v22, %v4433_v50  ;;  %v4435_v12 = vrot.slane %v2226_v37, 4  ;;  %v2227_v5 = vmax.f32 %v2214_v28, 0.0  ;;  %v2215_v13 = vadd.f32 %v2197_v4, %v2124_v49 }
 0x733   :  { %4478 = vst.msk [vmem:[%s8072_s9 + $0xa0] sm:$0xff] %vm4457_vm6, %v4434_v39  ;;  %v2202_v31 = vpop.permute.xlu1 %2201 }
 0x734   :  { %v4436_v18 = vsel %vm1468_vm3, %v4433_v50, %v4435_v12  ;;  %v4437_v45 = vrot.slane %v2227_v5, 4  ;;  %v2228_v30 = vmax.f32 %v2215_v13, 0.0  ;;  %v2216_v15 = vadd.f32 %v2202_v31, %v2125_v9 }
 0x735   :  { %4479 = vst.msk [vmem:[%s8072_s9 + $0xa8] sm:$0xff] %vm4457_vm6, %v4436_v18  ;;  %v4225_v57 = vpop.permute.xlu0 %4224 }
 0x736   :  { %v4438_v35 = vsel %vm1468_vm3, %v4435_v12, %v4437_v45  ;;  %v4439_v27 = vrot.slane %v2228_v30, 4  ;;  %v2229_v25 = vmax.f32 %v2216_v15, 0.0 }
 0x737   :  { %4480 = vst.msk [vmem:[%s8072_s9 + $0xb0] sm:$0xff] %vm4457_vm6, %v4438_v35  ;;  %v4230_v1 = vpop.permute.xlu1 %4229 }
 0x738   :  { %v4440_v43 = vsel %vm1468_vm3, %v4437_v45, %v4439_v27  ;;  %v4441_v19 = vrot.slane %v2229_v25, 4 }
 0x739   :  { %4481 = vst.msk [vmem:[%s8072_s9 + $0xb8] sm:$0xff] %vm4457_vm6, %v4440_v43  ;;  %v4235_v46 = vpop.permute.xlu0 %4234 }
 0x73a   :  { %v4442_v33 = vsel %vm1468_vm3, %v4439_v27, %v4441_v19 }
 0x73b   :  { %4482 = vst.msk [vmem:[%s8072_s9 + $0xc0] sm:$0xff] %vm4457_vm6, %v4442_v33  ;;  %v4240_v59 = vpop.permute.xlu1 %4239 }
 0x73d   :  { %v7985_v38 = vpop.permute.xlu0 %4244 }
 0x73f   :  { %v7987_v54 = vpop.permute.xlu1 %4249 }
 0x741   :  { %v7989_v32 = vpop.permute.xlu0 %4254 }
 0x743   :  { %v7991_v16 = vpop.permute.xlu1 %4259 }
 0x745   :  { %v7993_v10 = vpop.permute.xlu0 %4264 }
 0x747   :  { %v7995_v23 = vpop.permute.xlu1 %4269 }
 0x749   :  { %v7997_v42 = vpop.permute.xlu0 %4274 }
 0x74b   :  { %v7999_v62 = vpop.permute.xlu1 %4279 }
 0x74d   :  { %v8001_v36 = vpop.permute.xlu0 %4284 }
 0x74f   :  { %v4317_v51 = vpop.permute.xlu1 %4316 }
 0x751   :  { %v4322_v17 = vpop.permute.xlu0 %4321 }
 0x753   :  { %v4327_v29 = vpop.permute.xlu1 %4326 }
 0x755   :  { %v4332_v5 = vpop.permute.xlu0 %4331 }
 0x7a7   :  { %v5089_v14 = vpop.f32.mrb[76].mxu0 }
 0x7a8   :  { %v5090_v53 = vpop.f32.mrb[77].mxu0 }
 0x7a9   :  { %v5091_v52 = vadd.f32 %v5090_v53, %v5089_v14  ;;  %v5092_v3 = vpop.f32.mrb[78].mxu0 }
 0x7aa   :  { %v5093_v44 = vpop.f32.mrb[79].mxu0 }
 0x7ab   :  { %v5094_v41 = vadd.f32 %v5093_v44, %v5092_v3  ;;  %v4154_v48 = vpop.f32.mrb[168].mxu1  ;;  %v4342_v3 = vpop.permute.xlu0 %4341 }
 0x7ac   :  { %v4155_v21 = vadd.f32 %v5091_v52, %v4154_v48  ;;  %v5333_v40 = vpop.f32.mrb[169].mxu1 }
 0x7ad   :  { %v4157_v8 = vpop.f32.mrb[170].mxu1 }
 0x7ae   :  { %v4287_v11 = vmul.f32 %v4225_v57, %v4155_v21  ;;  %v4158_v34 = vadd.f32 %v5094_v41, %v4157_v8  ;;  %v5334_v7 = vpop.f32.mrb[171].mxu1 }
 0x7af   :  { %v5095_v55 = vpop.f32.mrb[80].mxu0 }
 0x7b0   :  { %v4379_v0 = vadd.f32 %v4317_v51, %v4287_v11  ;;  %v4288_v20 = vmul.f32 %v4230_v1, %v4158_v34  ;;  %v5096_v63 = vpop.f32.mrb[81].mxu0 }
 0x7b1   :  { %v5097_v47 = vadd.f32 %v5096_v63, %v5095_v55  ;;  %v5098_v58 = vpop.f32.mrb[82].mxu0 }
 0x7b2   :  { %v4392_v56 = vmax.f32 %v4379_v0, 0.0  ;;  %v4380_v6 = vadd.f32 %v4322_v17, %v4288_v20  ;;  %v5099_v22 = vpop.f32.mrb[83].mxu0 }
 0x7b3   :  { %v5100_v2 = vadd.f32 %v5099_v22, %v5098_v58  ;;  %v4162_v60 = vpop.f32.mrb[172].mxu1 }
 0x7b4   :  { %4483 = vst.msk [vmem:[%s8072_s9 + $0xc8] sm:$0xff] %vm4457_vm6, %v4392_v56  ;;  %v4393_v61 = vmax.f32 %v4380_v6, 0.0  ;;  %v4163_v49 = vadd.f32 %v5097_v47, %v4162_v60  ;;  %v5337_v24 = vpop.f32.mrb[173].mxu1  ;;  %v4352_v56 = vpop.permute.xlu0 %4351 }
 0x7b5   :  { %v4165_v26 = vpop.f32.mrb[174].mxu1 }
 0x7b6   :  { %4484 = vst.msk [vmem:[%s8072_s9 + $0xd0] sm:$0xff] %vm4457_vm6, %v4393_v61  ;;  %v4289_v50 = vmul.f32 %v4235_v46, %v4163_v49  ;;  %v4166_v37 = vadd.f32 %v5100_v2, %v4165_v26  ;;  %v5338_v28 = vpop.f32.mrb[175].mxu1  ;;  %v4337_v46 = vpop.permute.xlu1 %4336 }
 0x7b7   :  { %v5101_v9 = vpop.f32.mrb[84].mxu0 }
 0x7b8   :  { %v4381_v4 = vadd.f32 %v4327_v29, %v4289_v50  ;;  %v4290_v39 = vmul.f32 %v4240_v59, %v4166_v37  ;;  %v5102_v12 = vpop.f32.mrb[85].mxu0 }
 0x7b9   :  { %v5103_v13 = vadd.f32 %v5102_v12, %v5101_v9  ;;  %v5104_v31 = vpop.f32.mrb[86].mxu0 }
 0x7ba   :  { %v4394_v18 = vmax.f32 %v4381_v4, 0.0  ;;  %v4382_v45 = vadd.f32 %v4332_v5, %v4290_v39  ;;  %v5105_v30 = vpop.f32.mrb[87].mxu0  ;;  %v4347_v20 = vpop.permute.xlu1 %4346 }
 0x7bb   :  { %v5106_v15 = vadd.f32 %v5105_v30, %v5104_v31  ;;  %v4170_v35 = vpop.f32.mrb[176].mxu1 }
 0x7bc   :  { %4485 = vst.msk [vmem:[%s8072_s9 + $0xd8] sm:$0xff] %vm4457_vm6, %v4394_v18  ;;  %v4395_v27 = vmax.f32 %v4382_v45, 0.0  ;;  %v4171_v25 = vadd.f32 %v5103_v13, %v4170_v35  ;;  %v5341_v43 = vpop.f32.mrb[177].mxu1  ;;  %v4362_v13 = vpop.permute.xlu0 %4361 }
 0x7bd   :  { %v4173_v19 = vpop.f32.mrb[178].mxu1 }
 0x7be   :  { %4486 = vst.msk [vmem:[%s8072_s9 + $0xe0] sm:$0xff] %vm4457_vm6, %v4395_v27  ;;  %v4291_v33 = vmul.f32 %v7985_v38, %v4171_v25  ;;  %v4174_v57 = vadd.f32 %v5106_v15, %v4173_v19  ;;  %v5342_v1 = vpop.f32.mrb[179].mxu1  ;;  %v4357_v9 = vpop.permute.xlu1 %4356 }
 0x7bf   :  { %v5107_v59 = vpop.f32.mrb[88].mxu0 }
 0x7c0   :  { %v4383_v14 = vadd.f32 %v4337_v46, %v4291_v33  ;;  %v4292_v53 = vmul.f32 %v7987_v54, %v4174_v57  ;;  %v5108_v52 = vpop.f32.mrb[89].mxu0 }
 0x7c1   :  { %v5109_v44 = vadd.f32 %v5108_v52, %v5107_v59  ;;  %v5110_v41 = vpop.f32.mrb[90].mxu0  ;;  %v4372_v52 = vpop.permute.xlu0 %4371 }
 0x7c2   :  { %v4396_v48 = vmax.f32 %v4383_v14, 0.0  ;;  %v4384_v21 = vadd.f32 %v4342_v3, %v4292_v53  ;;  %v5111_v40 = vpop.f32.mrb[91].mxu0  ;;  %v4367_v1 = vpop.permute.xlu1 %4366 }
 0x7c3   :  { %v5112_v8 = vadd.f32 %v5111_v40, %v5110_v41  ;;  %v4178_v11 = vpop.f32.mrb[180].mxu1 }
 0x7c4   :  { %4487 = vst.msk [vmem:[%s8072_s9 + $0xe8] sm:$0xff] %vm4457_vm6, %v4396_v48  ;;  %v4397_v38 = vmax.f32 %v4384_v21, 0.0  ;;  %v4179_v34 = vadd.f32 %v5109_v44, %v4178_v11  ;;  %v5345_v7 = vpop.f32.mrb[181].mxu1 }
 0x7c5   :  { %v4181_v51 = vpop.f32.mrb[182].mxu1 }
 0x7c6   :  { %4488 = vst.msk [vmem:[%s8072_s9 + $0xf0] sm:$0xff] %vm4457_vm6, %v4397_v38  ;;  %v4293_v54 = vmul.f32 %v7989_v32, %v4179_v34  ;;  %v4182_v55 = vadd.f32 %v5112_v8, %v4181_v51  ;;  %v5346_v0 = vpop.f32.mrb[183].mxu1  ;;  %v4377_v7 = vpop.permute.xlu1 %4376 }
 0x7c7   :  { %v5113_v63 = vpop.f32.mrb[92].mxu0 }
 0x7c8   :  { %v4385_v17 = vadd.f32 %v4347_v20, %v4293_v54  ;;  %v4294_v47 = vmul.f32 %v7991_v16, %v4182_v55  ;;  %v5114_v58 = vpop.f32.mrb[93].mxu0 }
 0x7c9   :  { %v5115_v6 = vadd.f32 %v5114_v58, %v5113_v63  ;;  %v5116_v22 = vpop.f32.mrb[94].mxu0 }
 0x7ca   :  { %v4398_v2 = vmax.f32 %v4385_v17, 0.0  ;;  %v4386_v60 = vadd.f32 %v4352_v56, %v4294_v47  ;;  %v5117_v61 = vpop.f32.mrb[95].mxu0 }
 0x7cb   :  { %v5118_v49 = vadd.f32 %v5117_v61, %v5116_v22  ;;  %v4186_v24 = vpop.f32.mrb[184].mxu1 }
 0x7cc   :  { %4489 = vst.msk [vmem:[%s8072_s9 + $0xf8] sm:$0xff] %vm4457_vm6, %v4398_v2  ;;  %v4399_v32 = vmax.f32 %v4386_v60, 0.0  ;;  %v4187_v26 = vadd.f32 %v5115_v6, %v4186_v24  ;;  %v5349_v50 = vpop.f32.mrb[185].mxu1 }
 0x7cd   :  { %v4189_v37 = vpop.f32.mrb[186].mxu1 }
 0x7ce   :  { %4490 = vst.msk [vmem:[%s8072_s9 + $0x100] sm:$0xff] %vm4457_vm6, %v4399_v32  ;;  %v4295_v16 = vmul.f32 %v7993_v10, %v4187_v26  ;;  %v4190_v28 = vadd.f32 %v5118_v49, %v4189_v37  ;;  %v5350_v29 = vpop.f32.mrb[187].mxu1 }
 0x7cf   :  { %v5119_v4 = vpop.f32.mrb[96].mxu0 }
 0x7d0   :  { %v4387_v39 = vadd.f32 %v4357_v9, %v4295_v16  ;;  %v4296_v12 = vmul.f32 %v7995_v23, %v4190_v28  ;;  %v5120_v5 = vpop.f32.mrb[97].mxu0 }
 0x7d1   :  { %v5121_v31 = vadd.f32 %v5120_v5, %v5119_v4  ;;  %v5122_v18 = vpop.f32.mrb[98].mxu0 }
 0x7d2   :  { %v4400_v45 = vmax.f32 %v4387_v39, 0.0  ;;  %v4388_v30 = vadd.f32 %v4362_v13, %v4296_v12  ;;  %v5123_v15 = vpop.f32.mrb[99].mxu0 }
 0x7d3   :  { %v5124_v35 = vadd.f32 %v5123_v15, %v5122_v18  ;;  %v4194_v27 = vpop.f32.mrb[188].mxu1 }
 0x7d4   :  { %4491 = vst.msk [vmem:[%s8072_s9 + $0x108] sm:$0xff] %vm4457_vm6, %v4400_v45  ;;  %v4401_v10 = vmax.f32 %v4388_v30, 0.0  ;;  %v4195_v25 = vadd.f32 %v5121_v31, %v4194_v27  ;;  %v5353_v43 = vpop.f32.mrb[189].mxu1 }
 0x7d5   :  { %v4197_v19 = vpop.f32.mrb[190].mxu1 }
 0x7d6   :  { %4492 = vst.msk [vmem:[%s8072_s9 + $0x110] sm:$0xff] %vm4457_vm6, %v4401_v10  ;;  %v4297_v23 = vmul.f32 %v7997_v42, %v4195_v25  ;;  %v4198_v33 = vadd.f32 %v5124_v35, %v4197_v19  ;;  %v5354_v57 = vpop.f32.mrb[191].mxu1 }
 0x7d7   :  { %v5125_v46 = vpop.f32.mrb[100].mxu0 }
 0x7d8   :  { %v4389_v59 = vadd.f32 %v4367_v1, %v4297_v23  ;;  %v4298_v14 = vmul.f32 %v7999_v62, %v4198_v33  ;;  %v5126_v53 = vpop.f32.mrb[101].mxu0 }
 0x7d9   :  { %v5127_v3 = vadd.f32 %v5126_v53, %v5125_v46  ;;  %v5128_v44 = vpop.f32.mrb[102].mxu0 }
 0x7da   :  { %v4402_v41 = vmax.f32 %v4389_v59, 0.0  ;;  %v4390_v48 = vadd.f32 %v4372_v52, %v4298_v14  ;;  %v5129_v21 = vpop.f32.mrb[103].mxu0 }
 0x7db   :  { %v4202_v40 = vpop.f32.mrb[192].mxu1 }
 0x7dc   :  { %4493 = vst.msk [vmem:[%s8072_s9 + $0x118] sm:$0xff] %vm4457_vm6, %v4402_v41  ;;  %v4403_v42 = vmax.f32 %v4390_v48, 0.0  ;;  %v4203_v8 = vadd.f32 %v5127_v3, %v4202_v40  ;;  %v5357_v11 = vpop.f32.mrb[193].mxu1 }
 0x7dd   :  { %v4205_v38 = vpop.f32.mrb[194].mxu1 }
 0x7de   :  { %4494 = vst.msk [vmem:[%s8072_s9 + $0x120] sm:$0xff] %vm4457_vm6, %v4403_v42  ;;  %v4299_v62 = vmul.f32 %v8001_v36, %v4203_v8  ;;  %v5358_v34 = vpop.f32.mrb[195].mxu1 }
 0x7e0   :  { %v4391_v51 = vadd.f32 %v4377_v7, %v4299_v62 }
 0x7e2   :  { %v4404_v54 = vmax.f32 %v4391_v51, 0.0 }
 0x7e4   :  { %4496 = vst.msk [vmem:[%s8072_s9 + $0x128] sm:$0xf] %vm4495_vm7, %v4404_v54 }

</bundles_post_ra>
